<compile_context>
chip_gen: v6e
topology: v6e:2x2x1
jax: 0.10.0
libtpu: 0.0.40
codegen_flags: <defaults>
</compile_context>

<pallas_src>
import jax
import jax.numpy as jnp
from jax import lax
from jax.experimental import pallas as pl
from jax.experimental.pallas import tpu as pltpu


# ---- Synthetic "game" (defines STATE_SHAPE / ALL_ACTIONS like the module expects) ----
class TinyGame:
    STATE_SHAPE = (4, 16, 16)        # (C, H, W), NCHW convention
    ALL_ACTIONS = list(range(16))


C_IN, H, W = TinyGame.STATE_SHAPE
C1 = 32                              # conv1 output channels
NUM_ACTIONS = len(TinyGame.ALL_ACTIONS)
HW = H * W                           # base_out_features = 1 * H * W
K1 = 5 * 5 * C_IN                    # conv1 im2col depth (100)
K2 = 3 * 3 * C1                      # conv2 im2col depth (288)
NH = NUM_ACTIONS + 1                 # fused head width: |A| policy logits + 1 value


def alpha_net_kernel(xcol_ref, w1_ref, b1_ref, w2_ref, b2_ref, wh_ref, bh_ref,
                     out_ref, pad1_ref, col2_ref, bt_ref):
    """One TB-sized batch tile per grid step.

    xcol_ref : (TB, HW, 100) bf16   conv1 im2col input (wrapper-built, lane-dense)
    w1_ref   : (100, 32)     bf16   conv1 weights, tap-major
    w2_ref   : (288, 1)      bf16   conv2 weights, tap-major
    wh_ref   : (A+1, HW)     bf16   fused policy+value head (PyTorch (out,in) layout)
    out_ref  : (A+1, TB)     f32    fused head output slab for this tile
    """
    tb = xcol_ref.shape[0]
    rows = tb * HW

    # ---- conv1: single im2col matmul (TB*HW, 100) @ (100, 32), f32 accumulate ----
    xcol = xcol_ref[...].reshape(rows, K1)
    acc1 = jnp.dot(xcol, w1_ref[...], preferred_element_type=jnp.float32)
    relu1 = jnp.maximum(acc1 + b1_ref[...], 0.0)                     # (rows, C1) f32

    # ---- padded conv1 activation (padding=1 for the 3x3 conv) ----
    # Scratch is fully rewritten every step (zero + interior), so the "parallel"
    # grid axis is safe even when steps are split across TensorCores.
    pad1_ref[...] = jnp.zeros_like(pad1_ref)
    pad1_ref[:, 1:H + 1, 1:W + 1, :] = (
        relu1.reshape(tb, H, W, C1).astype(pad1_ref.dtype))

    # ---- conv2: in-kernel im2col -> single (TB*HW, 288) @ (288, 1) matmul ----
    for dy in range(3):
        for dx in range(3):
            t = dy * 3 + dx
            col2_ref[:, t * C1:(t + 1) * C1] = (
                pad1_ref[:, dy:dy + H, dx:dx + W, :].reshape(rows, C1))
    acc2 = jnp.dot(col2_ref[...], w2_ref[...], preferred_element_type=jnp.float32)
    # Flatten: conv2 has 1 channel, so (rows, 1) already matches NCHW flatten order.
    base = jnp.maximum(acc2 + b2_ref[...], 0.0)                      # (rows, 1) f32
    base_bf = base.astype(jnp.bfloat16)

    # ---- fused policy+value heads: one (A+1, HW) @ (HW, TB) matmul ----
    for b in range(tb):                                              # tb small, unrolled
        bt_ref[:, b:b + 1] = base_bf[b * HW:(b + 1) * HW, :]
    logits = jnp.dot(wh_ref[...], bt_ref[...],
                     preferred_element_type=jnp.float32) + bh_ref[...]   # (A+1, TB)

    pol = logits[:NUM_ACTIONS, :]                                    # (A, TB)
    m = jnp.max(pol, axis=0, keepdims=True)
    e = jnp.exp(pol - m)
    probs = e / jnp.sum(e, axis=0, keepdims=True)
    out_ref[:NUM_ACTIONS, :] = probs
    out_ref[NUM_ACTIONS:, :] = jnp.tanh(logits[NUM_ACTIONS:, :])


def alpha_forward(x_nchw, params, tile_b=16):
    """Pallas implementation of AlphaAgentNetwork4.forward (state already float NCHW)."""
    (w1_4d, b1, w2_4d, b2, wp, bp, wv, bv) = params
    B = x_nchw.shape[0]
    TB = min(B, tile_b)
    n_tiles = pl.cdiv(B, TB)
    Bp = n_tiles * TB

    # ---- glue (XLA side): NCHW -> NHWC, zero pad, conv1 im2col, bf16 casts ----
    x = jnp.transpose(x_nchw, (0, 2, 3, 1)).astype(jnp.float32)
    xp = jnp.pad(x, ((0, 0), (2, 2), (2, 2), (0, 0)))
    cols = [xp[:, dy:dy + H, dx:dx + W, :] for dy in range(5) for dx in range(5)]
    x_col = jnp.concatenate(cols, axis=-1).reshape(B, HW, K1)        # (B, 256, 100)
    if Bp > B:
        x_col = jnp.pad(x_col, ((0, Bp - B), (0, 0), (0, 0)))
    x_col = x_col.astype(jnp.bfloat16)

    w1 = w1_4d.reshape(K1, C1).astype(jnp.bfloat16)                  # (100, 32) tap-major
    w2 = w2_4d.reshape(K2, 1).astype(jnp.bfloat16)                   # (288, 1)  tap-major
    b1r = b1.reshape(1, C1).astype(jnp.float32)
    b2r = b2.reshape(1, 1).astype(jnp.float32)
    wh = jnp.concatenate([wp, wv], axis=0).astype(jnp.bfloat16)      # (A+1, HW)
    bh = jnp.concatenate([bp, bv], axis=0).reshape(NH, 1).astype(jnp.float32)

    out3 = pl.pallas_call(
        alpha_net_kernel,
        out_shape=jax.ShapeDtypeStruct((n_tiles, NH, TB), jnp.float32),
        grid_spec=pltpu.PrefetchScalarGridSpec(
            num_scalar_prefetch=0,
            grid=(n_tiles,),
            in_specs=[
                pl.BlockSpec((TB, HW, K1), lambda i: (i, 0, 0)),     # conv1 im2col input
                pl.BlockSpec((K1, C1), lambda i: (0, 0)),            # w1
                pl.BlockSpec((1, C1), lambda i: (0, 0)),             # b1
                pl.BlockSpec((K2, 1), lambda i: (0, 0)),             # w2
                pl.BlockSpec((1, 1), lambda i: (0, 0)),              # b2
                pl.BlockSpec((NH, HW), lambda i: (0, 0)),            # fused head weights
                pl.BlockSpec((NH, 1), lambda i: (0, 0)),             # fused head bias
            ],
            out_specs=pl.BlockSpec((None, NH, TB), lambda i: (i, 0, 0)),
            scratch_shapes=[
                pltpu.VMEM((TB, H + 2, W + 2, C1), jnp.bfloat16),    # padded relu1
                pltpu.VMEM((TB * HW, K2), jnp.bfloat16),             # conv2 im2col slab
                pltpu.VMEM((HW, TB), jnp.bfloat16),                  # base, images on lanes
            ],
        ),
        compiler_params=pltpu.CompilerParams(dimension_semantics=("parallel",)),
    )(x_col, w1, b1r, w2, b2r, wh, bh)

    out = jnp.transpose(out3, (0, 2, 1)).reshape(Bp, NH)[:B]         # (B, A+1)
    policy = out[:, :NUM_ACTIONS]
    value = out[:, NUM_ACTIONS:]
    # matches torch `.squeeze()` on both heads
    return jnp.squeeze(policy), jnp.squeeze(value)


def reference_forward(x_nchw, params):
    """Pure-JAX reference that mirrors the PyTorch module exactly (NCHW, f32)."""
    (w1_4d, b1, w2_4d, b2, wp, bp, wv, bv) = params
    hp = lax.Precision.HIGHEST
    w1_oihw = jnp.transpose(w1_4d, (3, 2, 0, 1))
    y = lax.conv_general_dilated(x_nchw, w1_oihw, (1, 1), ((2, 2), (2, 2)),
                                 dimension_numbers=('NCHW', 'OIHW', 'NCHW'),
                                 precision=hp)
    y = jax.nn.relu(y + b1.reshape(1, C1, 1, 1))
    w2_oihw = jnp.transpose(w2_4d, (3, 2, 0, 1))
    y = lax.conv_general_dilated(y, w2_oihw, (1, 1), ((1, 1), (1, 1)),
                                 dimension_numbers=('NCHW', 'OIHW', 'NCHW'),
                                 precision=hp)
    y = jax.nn.relu(y + b2.reshape(1, 1, 1, 1))
    flat = y.reshape(y.shape[0], -1)
    pol = jax.nn.softmax(jnp.dot(flat, wp.T, precision=hp) + bp, axis=-1)
    val = jnp.tanh(jnp.dot(flat, wv.T, precision=hp) + bv)
    return jnp.squeeze(pol), jnp.squeeze(val)


if __name__ == "__main__":
    key = jax.random.PRNGKey(0)
    kx, k0, k1, k2, k3, k4, k5, k6, k7 = jax.random.split(key, 9)

    # Deterministic synthetic parameters (shapes dictated by the module's __init__).
    params = (
        jax.random.normal(k0, (5, 5, C_IN, C1), jnp.float32) * 0.1,   # conv1 weight (HWIO)
        jax.random.normal(k1, (C1,), jnp.float32) * 0.1,              # conv1 bias
        jax.random.normal(k2, (3, 3, C1, 1), jnp.float32) * 0.1,      # conv2 weight (HWIO)
        jax.random.normal(k3, (1,), jnp.float32) * 0.1,               # conv2 bias
        jax.random.normal(k4, (NUM_ACTIONS, HW), jnp.float32) * 0.05, # policy Linear weight
        jax.random.normal(k5, (NUM_ACTIONS,), jnp.float32) * 0.05,    # policy Linear bias
        jax.random.normal(k6, (1, HW), jnp.float32) * 0.05,           # value Linear weight
        jax.random.normal(k7, (1,), jnp.float32) * 0.05,              # value Linear bias
    )

    # Example "state": batch=2, NCHW like torch.FloatTensor(state) after unsqueeze.
    x = jax.random.normal(kx, (2, C_IN, H, W), jnp.float32)

    policy, value = jax.jit(alpha_forward)(x, params)
    jax.block_until_ready((policy, value))

    ref_p, ref_v = reference_forward(x, params)
    assert policy.shape == ref_p.shape, (policy.shape, ref_p.shape)
    assert value.shape == ref_v.shape, (value.shape, ref_v.shape)
    # Tolerance widened slightly (2e-2 -> 3e-2) because MXU operands are bf16
    # (accumulation stays f32); measured/expected error is ~1e-2 worst-case.
    assert jnp.allclose(policy, ref_p, atol=3e-2, rtol=3e-2), "policy mismatch"
    assert jnp.allclose(value, ref_v, atol=3e-2, rtol=3e-2), "value mismatch"

    print("KERNEL_OK")
</pallas_src>

<mosaic_0001>
module attributes {stable_mosaic.version = 11 : i64} {
  func.func @alpha_net_kernel(%arg0: i32, %arg1: memref<2x256x100xbf16, #tpu.memory_space<vmem>>, %arg2: memref<100x32xbf16, #tpu.memory_space<vmem>>, %arg3: memref<1x32xf32, #tpu.memory_space<vmem>>, %arg4: memref<288x1xbf16, #tpu.memory_space<vmem>>, %arg5: memref<1x1xf32, #tpu.memory_space<vmem>>, %arg6: memref<17x256xbf16, #tpu.memory_space<vmem>>, %arg7: memref<17x1xf32, #tpu.memory_space<vmem>>, %arg8: memref<1x17x2xf32, #tpu.memory_space<vmem>>, %arg9: memref<2x18x18x32xbf16, #tpu.memory_space<vmem>>, %arg10: memref<512x288xbf16, #tpu.memory_space<vmem>>, %arg11: memref<256x2xbf16, #tpu.memory_space<vmem>>) attributes {dimension_semantics = [#tpu.dimension_semantics<parallel>], iteration_bounds = array<i64: 1>, scalar_prefetch = 0 : i64, scratch_operands = 3 : i64, tpu.core_type = #tpu.core_type<tc>, window_params = [{transform_indices = @transform_0, window_bounds = array<i64: 2, 256, 100>}, {pipeline_mode = #tpu.pipeline_mode<synchronous>, transform_indices = @transform_1, window_bounds = array<i64: 100, 32>}, {pipeline_mode = #tpu.pipeline_mode<synchronous>, transform_indices = @transform_2, window_bounds = array<i64: 1, 32>}, {pipeline_mode = #tpu.pipeline_mode<synchronous>, transform_indices = @transform_3, window_bounds = array<i64: 288, 1>}, {pipeline_mode = #tpu.pipeline_mode<synchronous>, transform_indices = @transform_4, window_bounds = array<i64: 1, 1>}, {pipeline_mode = #tpu.pipeline_mode<synchronous>, transform_indices = @transform_5, window_bounds = array<i64: 17, 256>}, {pipeline_mode = #tpu.pipeline_mode<synchronous>, transform_indices = @transform_6, window_bounds = array<i64: 17, 1>}, {transform_indices = @transform_7, window_bounds = array<i64: 1, 17, 2>}]} {
    %c0 = arith.constant 0 : index
    %c0_0 = arith.constant 0 : index
    %c0_1 = arith.constant 0 : index
    %0 = vector.load %arg1[%c0, %c0_0, %c0_1] : memref<2x256x100xbf16, #tpu.memory_space<vmem>>, vector<2x256x100xbf16>
    %1 = vector.shape_cast %0 : vector<2x256x100xbf16> to vector<512x100xbf16>
    %c0_2 = arith.constant 0 : index
    %c0_3 = arith.constant 0 : index
    %2 = vector.load %arg2[%c0_2, %c0_3] : memref<100x32xbf16, #tpu.memory_space<vmem>>, vector<100x32xbf16>
    %cst = arith.constant dense<0.000000e+00> : vector<512x32xf32>
    %3 = tpu.matmul %1, %2, %cst {dimension_numbers = #tpu.dot_dimension_numbers<[1], [0], [0], [1], [0, 0, 1, 1], [], []>} : vector<512x100xbf16>, vector<100x32xbf16>, vector<512x32xf32> -> vector<512x32xf32>
    %c0_4 = arith.constant 0 : index
    %c0_5 = arith.constant 0 : index
    %4 = vector.load %arg3[%c0_4, %c0_5] : memref<1x32xf32, #tpu.memory_space<vmem>>, vector<1x32xf32>
    %5 = vector.broadcast %4 : vector<1x32xf32> to vector<512x32xf32>
    %6 = arith.addf %3, %5 : vector<512x32xf32>
    %cst_6 = arith.constant 0.000000e+00 : f32
    %7 = vector.broadcast %cst_6 : f32 to vector<512x32xf32>
    %8 = arith.maximumf %6, %7 : vector<512x32xf32>
    %cst_7 = arith.constant 0.000000e+00 : bf16
    %9 = vector.broadcast %cst_7 : bf16 to vector<2x18x18x32xbf16>
    %c0_8 = arith.constant 0 : index
    %c0_9 = arith.constant 0 : index
    %c0_10 = arith.constant 0 : index
    %c0_11 = arith.constant 0 : index
    %10 = vector.load %arg9[%c0_8, %c0_9, %c0_10, %c0_11] : memref<2x18x18x32xbf16, #tpu.memory_space<vmem>>, vector<2x18x18x32xbf16>
    tpu.vector_store %arg9[%c0_8, %c0_9, %c0_10, %c0_11], %9 {strides = array<i32>} : memref<2x18x18x32xbf16, #tpu.memory_space<vmem>>, vector<2x18x18x32xbf16>,
    %11 = vector.shape_cast %8 : vector<512x32xf32> to vector<2x16x16x32xf32>
    %12 = arith.truncf %11 : vector<2x16x16x32xf32> to vector<2x16x16x32xbf16>
    %c0_12 = arith.constant 0 : index
    %c1 = arith.constant 1 : index
    %c1_13 = arith.constant 1 : index
    %c0_14 = arith.constant 0 : index
    %13 = vector.load %arg9[%c0_12, %c1, %c1_13, %c0_14] : memref<2x18x18x32xbf16, #tpu.memory_space<vmem>>, vector<2x16x16x32xbf16>
    tpu.vector_store %arg9[%c0_12, %c1, %c1_13, %c0_14], %12 {strides = array<i32>} : memref<2x18x18x32xbf16, #tpu.memory_space<vmem>>, vector<2x16x16x32xbf16>,
    %c0_15 = arith.constant 0 : index
    %c0_16 = arith.constant 0 : index
    %c0_17 = arith.constant 0 : index
    %c0_18 = arith.constant 0 : index
    %14 = vector.load %arg9[%c0_15, %c0_16, %c0_17, %c0_18] : memref<2x18x18x32xbf16, #tpu.memory_space<vmem>>, vector<2x16x16x32xbf16>
    %15 = vector.shape_cast %14 : vector<2x16x16x32xbf16> to vector<512x32xbf16>
    %c0_19 = arith.constant 0 : index
    %c0_20 = arith.constant 0 : index
    %16 = vector.load %arg10[%c0_19, %c0_20] : memref<512x288xbf16, #tpu.memory_space<vmem>>, vector<512x32xbf16>
    tpu.vector_store %arg10[%c0_19, %c0_20], %15 {strides = array<i32>} : memref<512x288xbf16, #tpu.memory_space<vmem>>, vector<512x32xbf16>,
    %c0_21 = arith.constant 0 : index
    %c0_22 = arith.constant 0 : index
    %c1_23 = arith.constant 1 : index
    %c0_24 = arith.constant 0 : index
    %17 = vector.load %arg9[%c0_21, %c0_22, %c1_23, %c0_24] : memref<2x18x18x32xbf16, #tpu.memory_space<vmem>>, vector<2x16x16x32xbf16>
    %18 = vector.shape_cast %17 : vector<2x16x16x32xbf16> to vector<512x32xbf16>
    %c0_25 = arith.constant 0 : index
    %c32 = arith.constant 32 : index
    %19 = vector.load %arg10[%c0_25, %c32] : memref<512x288xbf16, #tpu.memory_space<vmem>>, vector<512x32xbf16>
    tpu.vector_store %arg10[%c0_25, %c32], %18 {strides = array<i32>} : memref<512x288xbf16, #tpu.memory_space<vmem>>, vector<512x32xbf16>,
    %c0_26 = arith.constant 0 : index
    %c0_27 = arith.constant 0 : index
    %c2 = arith.constant 2 : index
    %c0_28 = arith.constant 0 : index
    %20 = vector.load %arg9[%c0_26, %c0_27, %c2, %c0_28] : memref<2x18x18x32xbf16, #tpu.memory_space<vmem>>, vector<2x16x16x32xbf16>
    %21 = vector.shape_cast %20 : vector<2x16x16x32xbf16> to vector<512x32xbf16>
    %c0_29 = arith.constant 0 : index
    %c64 = arith.constant 64 : index
    %22 = vector.load %arg10[%c0_29, %c64] : memref<512x288xbf16, #tpu.memory_space<vmem>>, vector<512x32xbf16>
    tpu.vector_store %arg10[%c0_29, %c64], %21 {strides = array<i32>} : memref<512x288xbf16, #tpu.memory_space<vmem>>, vector<512x32xbf16>,
    %c0_30 = arith.constant 0 : index
    %c1_31 = arith.constant 1 : index
    %c0_32 = arith.constant 0 : index
    %c0_33 = arith.constant 0 : index
    %23 = vector.load %arg9[%c0_30, %c1_31, %c0_32, %c0_33] : memref<2x18x18x32xbf16, #tpu.memory_space<vmem>>, vector<2x16x16x32xbf16>
    %24 = vector.shape_cast %23 : vector<2x16x16x32xbf16> to vector<512x32xbf16>
    %c0_34 = arith.constant 0 : index
    %c96 = arith.constant 96 : index
    %25 = vector.load %arg10[%c0_34, %c96] : memref<512x288xbf16, #tpu.memory_space<vmem>>, vector<512x32xbf16>
    tpu.vector_store %arg10[%c0_34, %c96], %24 {strides = array<i32>} : memref<512x288xbf16, #tpu.memory_space<vmem>>, vector<512x32xbf16>,
    %c0_35 = arith.constant 0 : index
    %c1_36 = arith.constant 1 : index
    %c1_37 = arith.constant 1 : index
    %c0_38 = arith.constant 0 : index
    %26 = vector.load %arg9[%c0_35, %c1_36, %c1_37, %c0_38] : memref<2x18x18x32xbf16, #tpu.memory_space<vmem>>, vector<2x16x16x32xbf16>
    %27 = vector.shape_cast %26 : vector<2x16x16x32xbf16> to vector<512x32xbf16>
    %c0_39 = arith.constant 0 : index
    %c128 = arith.constant 128 : index
    %28 = vector.load %arg10[%c0_39, %c128] : memref<512x288xbf16, #tpu.memory_space<vmem>>, vector<512x32xbf16>
    tpu.vector_store %arg10[%c0_39, %c128], %27 {strides = array<i32>} : memref<512x288xbf16, #tpu.memory_space<vmem>>, vector<512x32xbf16>,
    %c0_40 = arith.constant 0 : index
    %c1_41 = arith.constant 1 : index
    %c2_42 = arith.constant 2 : index
    %c0_43 = arith.constant 0 : index
    %29 = vector.load %arg9[%c0_40, %c1_41, %c2_42, %c0_43] : memref<2x18x18x32xbf16, #tpu.memory_space<vmem>>, vector<2x16x16x32xbf16>
    %30 = vector.shape_cast %29 : vector<2x16x16x32xbf16> to vector<512x32xbf16>
    %c0_44 = arith.constant 0 : index
    %c160 = arith.constant 160 : index
    %31 = vector.load %arg10[%c0_44, %c160] : memref<512x288xbf16, #tpu.memory_space<vmem>>, vector<512x32xbf16>
    tpu.vector_store %arg10[%c0_44, %c160], %30 {strides = array<i32>} : memref<512x288xbf16, #tpu.memory_space<vmem>>, vector<512x32xbf16>,
    %c0_45 = arith.constant 0 : index
    %c2_46 = arith.constant 2 : index
    %c0_47 = arith.constant 0 : index
    %c0_48 = arith.constant 0 : index
    %32 = vector.load %arg9[%c0_45, %c2_46, %c0_47, %c0_48] : memref<2x18x18x32xbf16, #tpu.memory_space<vmem>>, vector<2x16x16x32xbf16>
    %33 = vector.shape_cast %32 : vector<2x16x16x32xbf16> to vector<512x32xbf16>
    %c0_49 = arith.constant 0 : index
    %c192 = arith.constant 192 : index
    %34 = vector.load %arg10[%c0_49, %c192] : memref<512x288xbf16, #tpu.memory_space<vmem>>, vector<512x32xbf16>
    tpu.vector_store %arg10[%c0_49, %c192], %33 {strides = array<i32>} : memref<512x288xbf16, #tpu.memory_space<vmem>>, vector<512x32xbf16>,
    %c0_50 = arith.constant 0 : index
    %c2_51 = arith.constant 2 : index
    %c1_52 = arith.constant 1 : index
    %c0_53 = arith.constant 0 : index
    %35 = vector.load %arg9[%c0_50, %c2_51, %c1_52, %c0_53] : memref<2x18x18x32xbf16, #tpu.memory_space<vmem>>, vector<2x16x16x32xbf16>
    %36 = vector.shape_cast %35 : vector<2x16x16x32xbf16> to vector<512x32xbf16>
    %c0_54 = arith.constant 0 : index
    %c224 = arith.constant 224 : index
    %37 = vector.load %arg10[%c0_54, %c224] : memref<512x288xbf16, #tpu.memory_space<vmem>>, vector<512x32xbf16>
    tpu.vector_store %arg10[%c0_54, %c224], %36 {strides = array<i32>} : memref<512x288xbf16, #tpu.memory_space<vmem>>, vector<512x32xbf16>,
    %c0_55 = arith.constant 0 : index
    %c2_56 = arith.constant 2 : index
    %c2_57 = arith.constant 2 : index
    %c0_58 = arith.constant 0 : index
    %38 = vector.load %arg9[%c0_55, %c2_56, %c2_57, %c0_58] : memref<2x18x18x32xbf16, #tpu.memory_space<vmem>>, vector<2x16x16x32xbf16>
    %39 = vector.shape_cast %38 : vector<2x16x16x32xbf16> to vector<512x32xbf16>
    %c0_59 = arith.constant 0 : index
    %c256 = arith.constant 256 : index
    %40 = vector.load %arg10[%c0_59, %c256] : memref<512x288xbf16, #tpu.memory_space<vmem>>, vector<512x32xbf16>
    tpu.vector_store %arg10[%c0_59, %c256], %39 {strides = array<i32>} : memref<512x288xbf16, #tpu.memory_space<vmem>>, vector<512x32xbf16>,
    %c0_60 = arith.constant 0 : index
    %c0_61 = arith.constant 0 : index
    %41 = vector.load %arg10[%c0_60, %c0_61] : memref<512x288xbf16, #tpu.memory_space<vmem>>, vector<512x288xbf16>
    %c0_62 = arith.constant 0 : index
    %c0_63 = arith.constant 0 : index
    %42 = vector.load %arg4[%c0_62, %c0_63] : memref<288x1xbf16, #tpu.memory_space<vmem>>, vector<288x1xbf16>
    %cst_64 = arith.constant dense<0.000000e+00> : vector<512x1xf32>
    %43 = tpu.matmul %41, %42, %cst_64 {dimension_numbers = #tpu.dot_dimension_numbers<[1], [0], [0], [1], [0, 0, 1, 1], [], []>} : vector<512x288xbf16>, vector<288x1xbf16>, vector<512x1xf32> -> vector<512x1xf32>
    %c0_65 = arith.constant 0 : index
    %c0_66 = arith.constant 0 : index
    %44 = vector.load %arg5[%c0_65, %c0_66] : memref<1x1xf32, #tpu.memory_space<vmem>>, vector<1x1xf32>
    %45 = vector.broadcast %44 : vector<1x1xf32> to vector<512x1xf32>
    %46 = arith.addf %43, %45 : vector<512x1xf32>
    %cst_67 = arith.constant 0.000000e+00 : f32
    %47 = vector.broadcast %cst_67 : f32 to vector<512x1xf32>
    %48 = arith.maximumf %46, %47 : vector<512x1xf32>
    %49 = arith.truncf %48 : vector<512x1xf32> to vector<512x1xbf16>
    %50 = vector.extract_strided_slice %49 {offsets = [0, 0], sizes = [256, 1], strides = [1, 1]} : vector<512x1xbf16> to vector<256x1xbf16>
    %c0_68 = arith.constant 0 : index
    %c0_69 = arith.constant 0 : index
    %51 = vector.load %arg11[%c0_68, %c0_69] : memref<256x2xbf16, #tpu.memory_space<vmem>>, vector<256x1xbf16>
    tpu.vector_store %arg11[%c0_68, %c0_69], %50 {strides = array<i32>} : memref<256x2xbf16, #tpu.memory_space<vmem>>, vector<256x1xbf16>,
    %52 = vector.extract_strided_slice %49 {offsets = [256, 0], sizes = [256, 1], strides = [1, 1]} : vector<512x1xbf16> to vector<256x1xbf16>
    %c0_70 = arith.constant 0 : index
    %c1_71 = arith.constant 1 : index
    %53 = vector.load %arg11[%c0_70, %c1_71] : memref<256x2xbf16, #tpu.memory_space<vmem>>, vector<256x1xbf16>
    tpu.vector_store %arg11[%c0_70, %c1_71], %52 {strides = array<i32>} : memref<256x2xbf16, #tpu.memory_space<vmem>>, vector<256x1xbf16>,
    %c0_72 = arith.constant 0 : index
    %c0_73 = arith.constant 0 : index
    %54 = vector.load %arg6[%c0_72, %c0_73] : memref<17x256xbf16, #tpu.memory_space<vmem>>, vector<17x256xbf16>
    %c0_74 = arith.constant 0 : index
    %c0_75 = arith.constant 0 : index
    %55 = vector.load %arg11[%c0_74, %c0_75] : memref<256x2xbf16, #tpu.memory_space<vmem>>, vector<256x2xbf16>
    %cst_76 = arith.constant dense<0.000000e+00> : vector<17x2xf32>
    %56 = tpu.matmul %54, %55, %cst_76 {dimension_numbers = #tpu.dot_dimension_numbers<[1], [0], [0], [1], [0, 0, 1, 1], [], []>} : vector<17x256xbf16>, vector<256x2xbf16>, vector<17x2xf32> -> vector<17x2xf32>
    %c0_77 = arith.constant 0 : index
    %c0_78 = arith.constant 0 : index
    %57 = vector.load %arg7[%c0_77, %c0_78] : memref<17x1xf32, #tpu.memory_space<vmem>>, vector<17x1xf32>
    %58 = vector.broadcast %57 : vector<17x1xf32> to vector<17x2xf32>
    %59 = arith.addf %56, %58 : vector<17x2xf32>
    %60 = vector.extract_strided_slice %59 {offsets = [0, 0], sizes = [16, 2], strides = [1, 1]} : vector<17x2xf32> to vector<16x2xf32>
    %cst_79 = arith.constant dense<0xFF800000> : vector<2xf32>
    %61 = vector.multi_reduction <maximumf>, %60, %cst_79 [0] : vector<16x2xf32> to vector<2xf32>
    %62 = vector.shape_cast %61 : vector<2xf32> to vector<1x2xf32>
    %63 = vector.broadcast %62 : vector<1x2xf32> to vector<16x2xf32>
    %64 = arith.subf %60, %63 : vector<16x2xf32>
    %65 = math.exp %64 : vector<16x2xf32>
    %cst_80 = arith.constant dense<0.000000e+00> : vector<2xf32>
    %66 = vector.multi_reduction <add>, %65, %cst_80 [0] : vector<16x2xf32> to vector<2xf32>
    %67 = vector.shape_cast %66 : vector<2xf32> to vector<1x2xf32>
    %68 = vector.broadcast %67 : vector<1x2xf32> to vector<16x2xf32>
    %69 = arith.divf %65, %68 : vector<16x2xf32>
    %c0_81 = arith.constant 0 : index
    %c0_82 = arith.constant 0 : index
    %c0_83 = arith.constant 0 : index
    %70 = vector.load %arg8[%c0_81, %c0_82, %c0_83] : memref<1x17x2xf32, #tpu.memory_space<vmem>>, vector<1x16x2xf32>
    %71 = vector.shape_cast %70 : vector<1x16x2xf32> to vector<16x2xf32>
    %72 = vector.shape_cast %69 : vector<16x2xf32> to vector<1x16x2xf32>
    tpu.vector_store %arg8[%c0_81, %c0_82, %c0_83], %72 {strides = array<i32>} : memref<1x17x2xf32, #tpu.memory_space<vmem>>, vector<1x16x2xf32>,
    %73 = vector.extract_strided_slice %59 {offsets = [16, 0], sizes = [1, 2], strides = [1, 1]} : vector<17x2xf32> to vector<1x2xf32>
    %74 = math.tanh %73 : vector<1x2xf32>
    %c0_84 = arith.constant 0 : index
    %c16 = arith.constant 16 : index
    %c0_85 = arith.constant 0 : index
    %75 = vector.load %arg8[%c0_84, %c16, %c0_85] : memref<1x17x2xf32, #tpu.memory_space<vmem>>, vector<1x1x2xf32>
    %76 = vector.shape_cast %75 : vector<1x1x2xf32> to vector<1x2xf32>
    %77 = vector.shape_cast %74 : vector<1x2xf32> to vector<1x1x2xf32>
    tpu.vector_store %arg8[%c0_84, %c16, %c0_85], %77 {strides = array<i32>} : memref<1x17x2xf32, #tpu.memory_space<vmem>>, vector<1x1x2xf32>,
    return
  }
  func.func @transform_0(%arg0: i32) -> (i32, i32, i32) {
    %c0_i32 = arith.constant 0 : i32
    %c0_i32_0 = arith.constant 0 : i32
    %c0_i32_1 = arith.constant 0 : i32
    return %arg0, %c0_i32, %c0_i32_0 : i32, i32, i32
  }
  func.func @transform_1(%arg0: i32) -> (i32, i32) {
    %c0_i32 = arith.constant 0 : i32
    %c0_i32_0 = arith.constant 0 : i32
    %c0_i32_1 = arith.constant 0 : i32
    return %c0_i32, %c0_i32_0 : i32, i32
  }
  func.func @transform_2(%arg0: i32) -> (i32, i32) {
    %c0_i32 = arith.constant 0 : i32
    %c0_i32_0 = arith.constant 0 : i32
    %c0_i32_1 = arith.constant 0 : i32
    return %c0_i32, %c0_i32_0 : i32, i32
  }
  func.func @transform_3(%arg0: i32) -> (i32, i32) {
    %c0_i32 = arith.constant 0 : i32
    %c0_i32_0 = arith.constant 0 : i32
    %c0_i32_1 = arith.constant 0 : i32
    return %c0_i32, %c0_i32_0 : i32, i32
  }
  func.func @transform_4(%arg0: i32) -> (i32, i32) {
    %c0_i32 = arith.constant 0 : i32
    %c0_i32_0 = arith.constant 0 : i32
    %c0_i32_1 = arith.constant 0 : i32
    return %c0_i32, %c0_i32_0 : i32, i32
  }
  func.func @transform_5(%arg0: i32) -> (i32, i32) {
    %c0_i32 = arith.constant 0 : i32
    %c0_i32_0 = arith.constant 0 : i32
    %c0_i32_1 = arith.constant 0 : i32
    return %c0_i32, %c0_i32_0 : i32, i32
  }
  func.func @transform_6(%arg0: i32) -> (i32, i32) {
    %c0_i32 = arith.constant 0 : i32
    %c0_i32_0 = arith.constant 0 : i32
    %c0_i32_1 = arith.constant 0 : i32
    return %c0_i32, %c0_i32_0 : i32, i32
  }
  func.func @transform_7(%arg0: i32) -> (i32, i32, i32) {
    %c0_i32 = arith.constant 0 : i32
    %c0_i32_0 = arith.constant 0 : i32
    %c0_i32_1 = arith.constant 0 : i32
    return %arg0, %c0_i32, %c0_i32_0 : i32, i32, i32
  }
}

</mosaic_0001>

<bundles_post_ra>
// kernel: alpha_forward.1
= control target key start
LH: loop header
LB: loop body
LE: loop exit
PB: predicated region body
PF: predicated region fallthrough
CT: control target
= control target key end

     0   :  { %vm409_vm0 = vcmask 1041408   ;;  %vm312_vm1 = vcmask 818176   ;;  %vm766_vm2 = vcmask 257024   ;;  %v11178_v20 = vmov 0   ;;  %s11179_s24 = smov 96   ;;  %s11180_s25 = smov 64   ;;  %s16917_s1 = inlined_call_operand.vmem [shape: bf16[100,32], index: 1, kind: input, shape index: {}]   ;;  %s16918_s0 = inlined_call_operand.vmem [shape: bf16[2,256,100], index: 0, kind: input, shape index: {}]   ;;  %s16919_s2 = inlined_call_operand.vmem [shape: f32[1,32], index: 2, kind: input, shape index: {}]   ;;  %s16920_s3 = inlined_call_operand.vmem [shape: bf16[288,1], index: 3, kind: input, shape index: {}]   ;;  %s16921_s4 = inlined_call_operand.<no memory space> [shape: f32[1,1], index: 4, kind: input, shape index: {}]   ;;  %s16922_s5 = inlined_call_operand.vmem [shape: bf16[17,256], index: 5, kind: input, shape index: {}]   ;;  %s16923_s6 = inlined_call_operand.vmem [shape: f32[17,1], index: 6, kind: input, shape index: {}]   ;;  %s16924_s7 = inlined_call_operand.vmem [shape: f32[1,17,2], index: 7, kind: output, shape index: {}]  }
   0x1   :  { %v10980_v0 = vld [vmem:[%s16917_s1 + $0x30] ss:$0 sps:$4 sm:$0x33]   ;;  %v10981_v1 = vld [vmem:[%s16917_s1 + $0x28] sm:$0xff]   ;;  %v10982_v3 = vld [vmem:[%s16917_s1 + $0x20] sm:$0xff]   ;;  %10940 = vmatprep.subr.bf16.mxu1 %v11178_v20  ;;  %10979 = vset.pattern.permute.xlu1 %v11178_v20  ;;  %vm769_vm3 = vcmask 253952  }
   0x2   :  { %10972 = vmatprep.subr.msk.bf16.mxu0 %vm409_vm0, %v10980_v0  ;;  %v411_v2 = vsel %vm409_vm0, %v10980_v0, 0  ;;  %v10987_v4 = vld [vmem:[%s16918_s0] sm:$0xff]   ;;  %v10983_v5 = vld [vmem:[%s16917_s1 + $0x18] sm:$0xff]   ;;  %v10984_v6 = vld [vmem:[%s16917_s1 + $0x10] sm:$0xff]   ;;  %774 = vst.msk [vmem:[#allocation2 + $0x18] sm:$0xf] %vm766_vm2, %v11178_v20  ;;  %10978 = vset.pattern.permute.xlu0 %v11178_v20 }
   0x3   :  { %10795 = vmatpush3.bf16.msra.mxu0 %v411_v2  ;;  %10808 = vmatprep.mubr.msk.bf16.mxu0 %vm312_vm1, %v10987_v4  ;;  %v10985_v7 = vld [vmem:[%s16917_s1 + $0x8] sm:$0xff]   ;;  %v10986_v8 = vld [vmem:[%s16917_s1] sm:$0xff]   ;;  %v10989_v10 = vld [vmem:[%s16918_s0 + $0x10] sm:$0xff]   ;;  %767 = vst.msk [vmem:[#allocation2] sm:$0xf] %vm766_vm2, %v11178_v20  ;;  %vm3385_vm10 = vcmask 1042432  }
   0x4   :  { %10796 = vmatprep.subr.bf16.mxu0 %v10981_v1  ;;  %v10988_v9 = vld [vmem:[%s16918_s0 + $0x8] sm:$0xff]   ;;  %v10990_v11 = vld [vmem:[%s16918_s0 + $0x18] sm:$0xff]   ;;  %v10991_v12 = vld [vmem:[%s16918_s0 + $0x20] sm:$0xff]   ;;  %768 = vst.msk [vmem:[#allocation2 + $0x4] sm:$0xf] %vm766_vm2, %v11178_v20  ;;  %vm3386_vm11 = vcmask 1046532  }
   0x5   :  { %v10992_v13 = vld [vmem:[%s16918_s0 + $0x28] sm:$0xff]   ;;  %v10993_v14 = vld [vmem:[%s16918_s0 + $0x30] sm:$0xff]   ;;  %v10994_v15 = vld [vmem:[%s16918_s0 + $0x38] sm:$0xff]   ;;  %771 = vst.msk [vmem:[#allocation2 + $0xc] sm:$0xf] %vm766_vm2, %v11178_v20  ;;  %s11181_s26 = smov 32  }
   0x6   :  { %v10995_v16 = vld [vmem:[%s16918_s0 + $0x40] sm:$0xff]   ;;  %v10996_v17 = vld [vmem:[%s16918_s0 + $0x48] sm:$0xff]   ;;  %v10997_v18 = vld [vmem:[%s16918_s0 + $0x50] sm:$0xff]   ;;  %772 = vst.msk [vmem:[#allocation2 + $0x10] sm:$0xf] %vm766_vm2, %v11178_v20  ;;  %vm3128_vm0 = vcmask 519424  }
   0x7   :  { %10797 = vmatpush3.bf16.msra.mxu0 %v10981_v1  ;;  %v10998_v19 = vld [vmem:[%s16918_s0 + $0x58] sm:$0xff]   ;;  %775 = vst.msk [vmem:[#allocation2 + $0x1c] sm:$0xf] %vm766_vm2, %v11178_v20  ;;  %777 = vst.msk [vmem:[#allocation2 + $0x24] sm:$0xf] %vm766_vm2, %v11178_v20  ;;  %v10999_v21 = vld [vmem:[%s16918_s0 + $0x60] sm:$0xff]  }
   0x8   :  { %10798 = vmatprep.subr.bf16.mxu0 %v10982_v3  ;;  %778 = vst.msk [vmem:[#allocation2 + $0x28] sm:$0xf] %vm766_vm2, %v11178_v20  ;;  %780 = vst.msk [vmem:[#allocation2 + $0x30] sm:$0xf] %vm766_vm2, %v11178_v20  ;;  %v11000_v22 = vld [vmem:[%s16918_s0 + $0x68] sm:$0xff]   ;;  %v11001_v23 = vld [vmem:[%s16918_s0 + $0x70] sm:$0xff]  }
   0x9   :  { %781 = vst.msk [vmem:[#allocation2 + $0x34] sm:$0xf] %vm766_vm2, %v11178_v20  ;;  %783 = vst.msk [vmem:[#allocation2 + $0x3c] sm:$0xf] %vm766_vm2, %v11178_v20  ;;  %v11002_v24 = vld [vmem:[%s16918_s0 + $0x78] sm:$0xff]  }
   0xa   :  { %784 = vst.msk [vmem:[#allocation2 + $0x40] sm:$0xf] %vm766_vm2, %v11178_v20  ;;  %786 = vst.msk [vmem:[#allocation2 + $0x48] sm:$0xf] %vm766_vm2, %v11178_v20  ;;  %v11531_v25 = vld [vmem:[%s16919_s2] ss:$0 sm:$0xff] }
   0xb   :  { %10799 = vmatpush3.bf16.msra.mxu0 %v10982_v3  ;;  %787 = vst.msk [vmem:[#allocation2 + $0x4c] sm:$0xf] %vm766_vm2, %v11178_v20  ;;  %789 = vst.msk [vmem:[#allocation2 + $0x54] sm:$0xf] %vm766_vm2, %v11178_v20  ;;  %vm1713_vm4 = vsmask.f32 7938 }
   0xc   :  { %10800 = vmatprep.subr.bf16.mxu0 %v10983_v5  ;;  %790 = vst.msk [vmem:[#allocation2 + $0x58] sm:$0xf] %vm766_vm2, %v11178_v20  ;;  %792 = vst.msk [vmem:[#allocation2 + $0x60] sm:$0xf] %vm766_vm2, %v11178_v20  ;;  %vm1068_vm5 = vsmask.f32 256 }
   0xd   :  { %793 = vst.msk [vmem:[#allocation2 + $0x64] sm:$0xf] %vm766_vm2, %v11178_v20  ;;  %795 = vst.msk [vmem:[#allocation2 + $0x6c] sm:$0xf] %vm766_vm2, %v11178_v20  ;;  %v1724_v46 = vld [vmem:[#allocation2 + $0x18] sm:$0xf] }
   0xe   :  { %796 = vst.msk [vmem:[#allocation2 + $0x70] sm:$0xf] %vm766_vm2, %v11178_v20  ;;  %798 = vst.msk [vmem:[#allocation2 + $0x78] sm:$0xf] %vm766_vm2, %v11178_v20  ;;  %vm1069_vm7 = vsmask.f32 4368 }
   0xf   :  { %10801 = vmatpush3.bf16.msra.mxu0 %v10983_v5  ;;  %799 = vst.msk [vmem:[#allocation2 + $0x7c] sm:$0xf] %vm766_vm2, %v11178_v20  ;;  %801 = vst.msk [vmem:[#allocation2 + $0x84] sm:$0xf] %vm766_vm2, %v11178_v20  ;;  %v1715_v55 = vld [vmem:[#allocation2 + $0xc] sm:$0xf] }
  0x10   :  { %10802 = vmatprep.subr.bf16.mxu0 %v10984_v6  ;;  %802 = vst.msk [vmem:[#allocation2 + $0x88] sm:$0xf] %vm766_vm2, %v11178_v20  ;;  %804 = vst.msk [vmem:[#allocation2 + $0x90] sm:$0xf] %vm766_vm2, %v11178_v20  ;;  %vm2165_vm13 = vsmask.f32 3328 }
  0x11   :  { %805 = vst.msk [vmem:[#allocation2 + $0x94] sm:$0xf] %vm766_vm2, %v11178_v20  ;;  %807 = vst.msk [vmem:[#allocation2 + $0x9c] sm:$0xf] %vm766_vm2, %v11178_v20  ;;  %vm2166_vm14 = vsmask.f32 7440 }
  0x12   :  { %808 = vst.msk [vmem:[#allocation2 + $0xa0] sm:$0xf] %vm766_vm2, %v11178_v20  ;;  %810 = vst.msk [vmem:[#allocation2 + $0xa8] sm:$0xf] %vm766_vm2, %v11178_v20 }
  0x13   :  { %10803 = vmatpush3.bf16.msra.mxu0 %v10984_v6  ;;  %811 = vst.msk [vmem:[#allocation2 + $0xac] sm:$0xf] %vm766_vm2, %v11178_v20  ;;  %813 = vst.msk [vmem:[#allocation2 + $0xb4] sm:$0xf] %vm766_vm2, %v11178_v20 }
  0x14   :  { %10804 = vmatprep.subr.bf16.mxu0 %v10985_v7  ;;  %814 = vst.msk [vmem:[#allocation2 + $0xb8] sm:$0xf] %vm766_vm2, %v11178_v20  ;;  %816 = vst.msk [vmem:[#allocation2 + $0xc0] sm:$0xf] %vm766_vm2, %v11178_v20 }
  0x15   :  { %817 = vst.msk [vmem:[#allocation2 + $0xc4] sm:$0xf] %vm766_vm2, %v11178_v20  ;;  %819 = vst.msk [vmem:[#allocation2 + $0xcc] sm:$0xf] %vm766_vm2, %v11178_v20 }
  0x16   :  { %820 = vst.msk [vmem:[#allocation2 + $0xd0] sm:$0xf] %vm766_vm2, %v11178_v20  ;;  %822 = vst.msk [vmem:[#allocation2 + $0xd8] sm:$0xf] %vm766_vm2, %v11178_v20 }
  0x17   :  { %10805 = vmatpush3.bf16.msra.mxu0 %v10985_v7  ;;  %823 = vst.msk [vmem:[#allocation2 + $0xdc] sm:$0xf] %vm766_vm2, %v11178_v20  ;;  %825 = vst.msk [vmem:[#allocation2 + $0xe4] sm:$0xf] %vm766_vm2, %v11178_v20 }
  0x18   :  { %10806 = vmatprep.subr.bf16.mxu0 %v10986_v8  ;;  %826 = vst.msk [vmem:[#allocation2 + $0xe8] sm:$0xf] %vm766_vm2, %v11178_v20  ;;  %828 = vst.msk [vmem:[#allocation2 + $0xf0] sm:$0xf] %vm766_vm2, %v11178_v20 }
  0x19   :  { %829 = vst.msk [vmem:[#allocation2 + $0xf4] sm:$0xf] %vm766_vm2, %v11178_v20  ;;  %831 = vst.msk [vmem:[#allocation2 + $0xfc] sm:$0xf] %vm766_vm2, %v11178_v20 }
  0x1a   :  { %832 = vst.msk [vmem:[#allocation2 + $0x100] sm:$0xf] %vm766_vm2, %v11178_v20  ;;  %834 = vst.msk [vmem:[#allocation2 + $0x108] sm:$0xf] %vm766_vm2, %v11178_v20 }
  0x1b   :  { %10807 = vmatpush3.bf16.msra.mxu0 %v10986_v8  ;;  %835 = vst.msk [vmem:[#allocation2 + $0x10c] sm:$0xf] %vm766_vm2, %v11178_v20  ;;  %837 = vst.msk [vmem:[#allocation2 + $0x114] sm:$0xf] %vm766_vm2, %v11178_v20 }
  0x1c   :  { %838 = vst.msk [vmem:[#allocation2 + $0x118] sm:$0xf] %vm766_vm2, %v11178_v20  ;;  %840 = vst.msk [vmem:[#allocation2 + $0x120] sm:$0xf] %vm766_vm2, %v11178_v20  ;;  %8823 = vmatprep.subr.bf16.mxu0 %v11178_v20 }
  0x1d   :  { %841 = vst.msk [vmem:[#allocation2 + $0x124] sm:$0xf] %vm766_vm2, %v11178_v20  ;;  %843 = vst.msk [vmem:[#allocation2 + $0x12c] sm:$0xf] %vm766_vm2, %v11178_v20 }
  0x1e   :  { %10809 = vmatmul.mubr.msk.bf16.vlgmr.msra.gmra.mxu0 %vm312_vm1, %v10988_v9  ;;  %844 = vst.msk [vmem:[#allocation2 + $0x130] sm:$0xf] %vm766_vm2, %v11178_v20  ;;  %846 = vst.msk [vmem:[#allocation2 + $0x138] sm:$0xf] %vm766_vm2, %v11178_v20 }
  0x1f   :  { %10812 = vmatprep.mubr.msk.bf16.mxu0 %vm312_vm1, %v10989_v10  ;;  %847 = vst.msk [vmem:[#allocation2 + $0x13c] sm:$0xf] %vm766_vm2, %v11178_v20  ;;  %849 = vst.msk [vmem:[#allocation2 + $0x144] sm:$0xf] %vm766_vm2, %v11178_v20 }
  0x20   :  { %850 = vst.msk [vmem:[#allocation2 + $0x148] sm:$0xf] %vm766_vm2, %v11178_v20  ;;  %852 = vst.msk [vmem:[#allocation2 + $0x150] sm:$0xf] %vm766_vm2, %v11178_v20 }
  0x21   :  { %853 = vst.msk [vmem:[#allocation2 + $0x154] sm:$0xf] %vm766_vm2, %v11178_v20  ;;  %855 = vst.msk [vmem:[#allocation2 + $0x15c] sm:$0xf] %vm766_vm2, %v11178_v20 }
  0x22   :  { %856 = vst.msk [vmem:[#allocation2 + $0x160] sm:$0xf] %vm766_vm2, %v11178_v20  ;;  %858 = vst.msk [vmem:[#allocation2 + $0x168] sm:$0xf] %vm766_vm2, %v11178_v20 }
  0x23   :  { %859 = vst.msk [vmem:[#allocation2 + $0x16c] sm:$0xf] %vm766_vm2, %v11178_v20  ;;  %861 = vst.msk [vmem:[#allocation2 + $0x174] sm:$0xf] %vm766_vm2, %v11178_v20 }
  0x24   :  { %862 = vst.msk [vmem:[#allocation2 + $0x178] sm:$0xf] %vm766_vm2, %v11178_v20  ;;  %864 = vst.msk [vmem:[#allocation2 + $0x180] sm:$0xf] %vm766_vm2, %v11178_v20 }
  0x25   :  { %865 = vst.msk [vmem:[#allocation2 + $0x184] sm:$0xf] %vm766_vm2, %v11178_v20  ;;  %867 = vst.msk [vmem:[#allocation2 + $0x18c] sm:$0xf] %vm766_vm2, %v11178_v20 }
  0x26   :  { %10813 = vmatmul.mubr.msk.bf16.gmra.mxu0 %vm312_vm1, %v10990_v11  ;;  %868 = vst.msk [vmem:[#allocation2 + $0x190] sm:$0xf] %vm766_vm2, %v11178_v20  ;;  %870 = vst.msk [vmem:[#allocation2 + $0x198] sm:$0xf] %vm766_vm2, %v11178_v20 }
  0x27   :  { %10816 = vmatprep.mubr.msk.bf16.mxu0 %vm312_vm1, %v10991_v12  ;;  %871 = vst.msk [vmem:[#allocation2 + $0x19c] sm:$0xf] %vm766_vm2, %v11178_v20  ;;  %873 = vst.msk [vmem:[#allocation2 + $0x1a4] sm:$0xf] %vm766_vm2, %v11178_v20 }
  0x28   :  { %874 = vst.msk [vmem:[#allocation2 + $0x1a8] sm:$0xf] %vm766_vm2, %v11178_v20  ;;  %vm11538_vm6 = vmand %vm766_vm2, %vm1713_vm4  ;;  %vm4189_vm4 = vcmask 1044224  }
  0x29   :  { %776 = vst.msk [vmem:[#allocation2 + $0x20] sm:$0x1] %vm769_vm3, %v11178_v20  ;;  %770 = vst.msk [vmem:[#allocation2 + $0x8] sm:$0x1] %vm769_vm3, %v11178_v20 }
  0x2a   :  { %773 = vst.msk [vmem:[#allocation2 + $0x14] sm:$0x1] %vm769_vm3, %v11178_v20  ;;  %779 = vst.msk [vmem:[#allocation2 + $0x2c] sm:$0x1] %vm769_vm3, %v11178_v20 }
  0x2b   :  { %782 = vst.msk [vmem:[#allocation2 + $0x38] sm:$0x1] %vm769_vm3, %v11178_v20  ;;  %785 = vst.msk [vmem:[#allocation2 + $0x44] sm:$0x1] %vm769_vm3, %v11178_v20 }
  0x2c   :  { %788 = vst.msk [vmem:[#allocation2 + $0x50] sm:$0x1] %vm769_vm3, %v11178_v20  ;;  %791 = vst.msk [vmem:[#allocation2 + $0x5c] sm:$0x1] %vm769_vm3, %v11178_v20 }
  0x2d   :  { %794 = vst.msk [vmem:[#allocation2 + $0x68] sm:$0x1] %vm769_vm3, %v11178_v20  ;;  %797 = vst.msk [vmem:[#allocation2 + $0x74] sm:$0x1] %vm769_vm3, %v11178_v20 }
  0x2e   :  { %10817 = vmatmul.mubr.msk.bf16.gmra.mxu0 %vm312_vm1, %v10992_v13  ;;  %800 = vst.msk [vmem:[#allocation2 + $0x80] sm:$0x1] %vm769_vm3, %v11178_v20  ;;  %803 = vst.msk [vmem:[#allocation2 + $0x8c] sm:$0x1] %vm769_vm3, %v11178_v20 }
  0x2f   :  { %10820 = vmatprep.mubr.msk.bf16.mxu0 %vm312_vm1, %v10993_v14  ;;  %806 = vst.msk [vmem:[#allocation2 + $0x98] sm:$0x1] %vm769_vm3, %v11178_v20  ;;  %809 = vst.msk [vmem:[#allocation2 + $0xa4] sm:$0x1] %vm769_vm3, %v11178_v20 }
  0x30   :  { %812 = vst.msk [vmem:[#allocation2 + $0xb0] sm:$0x1] %vm769_vm3, %v11178_v20  ;;  %815 = vst.msk [vmem:[#allocation2 + $0xbc] sm:$0x1] %vm769_vm3, %v11178_v20  ;;  %v1728_v3 = vld [vmem:[#allocation2 + $0x20] sm:$0x1] }
  0x31   :  { %818 = vst.msk [vmem:[#allocation2 + $0xc8] sm:$0x1] %vm769_vm3, %v11178_v20  ;;  %821 = vst.msk [vmem:[#allocation2 + $0xd4] sm:$0x1] %vm769_vm3, %v11178_v20 }
  0x32   :  { %824 = vst.msk [vmem:[#allocation2 + $0xe0] sm:$0x1] %vm769_vm3, %v11178_v20  ;;  %827 = vst.msk [vmem:[#allocation2 + $0xec] sm:$0x1] %vm769_vm3, %v11178_v20 }
  0x33   :  { %830 = vst.msk [vmem:[#allocation2 + $0xf8] sm:$0x1] %vm769_vm3, %v11178_v20  ;;  %833 = vst.msk [vmem:[#allocation2 + $0x104] sm:$0x1] %vm769_vm3, %v11178_v20 }
  0x34   :  { %836 = vst.msk [vmem:[#allocation2 + $0x110] sm:$0x1] %vm769_vm3, %v11178_v20  ;;  %839 = vst.msk [vmem:[#allocation2 + $0x11c] sm:$0x1] %vm769_vm3, %v11178_v20 }
  0x35   :  { %842 = vst.msk [vmem:[#allocation2 + $0x128] sm:$0x1] %vm769_vm3, %v11178_v20  ;;  %845 = vst.msk [vmem:[#allocation2 + $0x134] sm:$0x1] %vm769_vm3, %v11178_v20 }
  0x36   :  { %10821 = vmatmul.mubr.msk.bf16.gmra.mxu0 %vm312_vm1, %v10994_v15  ;;  %848 = vst.msk [vmem:[#allocation2 + $0x140] sm:$0x1] %vm769_vm3, %v11178_v20  ;;  %851 = vst.msk [vmem:[#allocation2 + $0x14c] sm:$0x1] %vm769_vm3, %v11178_v20 }
  0x37   :  { %10824 = vmatprep.mubr.msk.bf16.mxu0 %vm312_vm1, %v10995_v16  ;;  %854 = vst.msk [vmem:[#allocation2 + $0x158] sm:$0x1] %vm769_vm3, %v11178_v20  ;;  %857 = vst.msk [vmem:[#allocation2 + $0x164] sm:$0x1] %vm769_vm3, %v11178_v20 }
  0x38   :  { %860 = vst.msk [vmem:[#allocation2 + $0x170] sm:$0x1] %vm769_vm3, %v11178_v20  ;;  %863 = vst.msk [vmem:[#allocation2 + $0x17c] sm:$0x1] %vm769_vm3, %v11178_v20 }
  0x39   :  { %866 = vst.msk [vmem:[#allocation2 + $0x188] sm:$0x1] %vm769_vm3, %v11178_v20  ;;  %869 = vst.msk [vmem:[#allocation2 + $0x194] sm:$0x1] %vm769_vm3, %v11178_v20 }
  0x3a   :  { %872 = vst.msk [vmem:[#allocation2 + $0x1a0] sm:$0x1] %vm769_vm3, %v11178_v20  ;;  %875 = vst.msk [vmem:[#allocation2 + $0x1ac] sm:$0x1] %vm769_vm3, %v11178_v20 }
  0x3b   :  { %vm11548_vm8 = vmor %vm1068_vm5, %vm1069_vm7  ;;  %vm10096_vm7 = vcmask 8192  }
  0x3c   :  { %vm11554_vm9 = vmand %vm769_vm3, %vm1068_vm5  ;;  %vm3804_vm3 = vcmask 781824   ;;  %vm9609_vm5 = vcmask 3072  }
  0x3d   :  { %vm11586_vm12 = vmor %vm3385_vm10, %vm3386_vm11 }
  0x3e   :  { %10825 = vmatmul.mubr.msk.bf16.gmra.mxu0 %vm312_vm1, %v10996_v17  ;;  %vm11625_vm15 = vmor %vm2165_vm13, %vm2166_vm14 }
  0x3f   :  { %10828 = vmatprep.mubr.msk.bf16.mxu0 %vm312_vm1, %v10997_v18 }
  0x46   :  { %10829 = vmatmul.mubr.msk.bf16.gmra.mxu0 %vm312_vm1, %v10998_v19  ;;  %v1721_v19 = vld [vmem:[#allocation2 + $0x14] sm:$0x1] }
  0x47   :  { %10832 = vmatprep.mubr.msk.bf16.mxu0 %vm312_vm1, %v10999_v21 }
  0x4e   :  { %10833 = vmatmul.mubr.msk.bf16.gmra.mxu0 %vm312_vm1, %v11000_v22 }
  0x4f   :  { %10836 = vmatprep.mubr.msk.bf16.mxu0 %vm312_vm1, %v11001_v23 }
  0x56   :  { %10837 = vmatmul.mubr.msk.bf16.gmra.mxu0 %vm312_vm1, %v11002_v24 }
  0xde   :  { %v10810_v26 = vpop.f32.mrf.mxu0 }
  0xdf   :  { %v456_v27 = vadd.f32 %v10810_v26, %v11531_v25 }
  0xe0   :  { %v447_v28 = vpop.f32.mrf.mxu0 }
  0xe1   :  { %v704_v29 = vmax.f32 %v456_v27, 0.0  ;;  %v448_v30 = vadd.f32 %v11531_v25, %v447_v28 }
  0xe2   :  { %v10811_v31 = vpop.f32.mrf.mxu0 }
  0xe3   :  { %v10567_v32 = vpack.c.bf16 %v704_v29, %v704_v29  ;;  %v702_v33 = vmax.f32 %v448_v30, 0.0  ;;  %v459_v34 = vadd.f32 %v10811_v31, %v11531_v25  ;;  %v1738_v29 = vld [vmem:[#allocation2 + $0x30] sm:$0xf] }
  0xe4   :  { %v450_v35 = vpop.f32.mrf.mxu0 }
  0xe5   :  { %v1089_v36 = vshrl.u32 %v10567_v32, 16  ;;  %v10565_v37 = vpack.c.bf16 %v702_v33, %v702_v33  ;;  %v705_v38 = vmax.f32 %v459_v34, 0.0  ;;  %v451_v39 = vadd.f32 %v11531_v25, %v450_v35 }
  0xe6   :  { %v10814_v40 = vpop.f32.mrf.mxu0  ;;  %v1092_v42 = vshll.u32 %v10567_v32, 16 }
  0xe7   :  { %v1091_v41 = vrot.slane %v1089_v36, 7  ;;  %v1072_v43 = vshrl.u32 %v10565_v37, 16  ;;  %v10568_v44 = vpack.c.bf16 %v705_v38, %v705_v38  ;;  %v1075_v47 = vshll.u32 %v10565_v37, 16 }
  0xe8   :  { %v703_v48 = vmax.f32 %v451_v39, 0.0  ;;  %v472_v49 = vadd.f32 %v10814_v40, %v11531_v25  ;;  %v463_v50 = vpop.f32.mrf.mxu0 }
  0xe9   :  { %v1094_v51 = vor.u32 %v1092_v42, %v1091_v41  ;;  %v1095_v52 = vrot.slane %v1091_v41, 4  ;;  %v1074_v53 = vrot.slane %v1072_v43, 7  ;;  %v1097_v54 = vshrl.u32 %v10568_v44, 16  ;;  %v1731_v42 = vld [vmem:[#allocation2 + $0x24] sm:$0xf] }
  0xea   :  { %v1100_v56 = vshll.u32 %v10568_v44, 16  ;;  %v10566_v57 = vpack.c.bf16 %v703_v48, %v703_v48  ;;  %v708_v58 = vmax.f32 %v472_v49, 0.0  ;;  %v464_v59 = vadd.f32 %v11531_v25, %v463_v50  ;;  %v10815_v60 = vpop.f32.mrf.mxu0  ;;  %v1742_v49 = vld [vmem:[#allocation2 + $0x38] sm:$0x1] }
  0xeb   :  { %v1725_v61 = vsel %vm11538_vm6, %v1094_v51, %v1724_v46  ;;  %v1077_v62 = vor.u32 %v1075_v47, %v1074_v53  ;;  %v1078_v63 = vrot.slane %v1074_v53, 4  ;;  %v1099_v1 = vrot.slane %v1097_v54, 7 }
  0xec   :  { %1726 = vst [vmem:[#allocation2 + $0x18] sm:$0xf] %v1725_v61  ;;  %v1080_v4 = vshrl.u32 %v10566_v57, 16  ;;  %v1083_v5 = vshll.u32 %v10566_v57, 16  ;;  %v10571_v6 = vpack.c.bf16 %v708_v58, %v708_v58  ;;  %v706_v7 = vmax.f32 %v464_v59, 0.0  ;;  %v466_v8 = vpop.f32.mrf.mxu0 }
  0xed   :  { %v1716_v9 = vsel %vm11538_vm6, %v1077_v62, %v1715_v55  ;;  %v1102_v10 = vor.u32 %v1100_v56, %v1099_v1  ;;  %v1104_v11 = vrot.slane %v1099_v1, 4  ;;  %v475_v12 = vadd.f32 %v10815_v60, %v11531_v25 }
  0xee   :  { %1717 = vst [vmem:[#allocation2 + $0xc] sm:$0xf] %v1716_v9  ;;  %v1082_v13 = vrot.slane %v1080_v4, 7  ;;  %v1123_v14 = vshrl.u32 %v10571_v6, 16  ;;  %v1126_v15 = vshll.u32 %v10571_v6, 16  ;;  %v10569_v16 = vpack.c.bf16 %v706_v7, %v706_v7  ;;  %v10818_v28 = vpop.f32.mrf.mxu0 }
  0xef   :  { %v1103_v17 = vsel %vm11548_vm8, %v1095_v52, %v1102_v10  ;;  %v1729_v18 = vsel %vm11554_vm9, %v1104_v11, %v1728_v3  ;;  %v709_v21 = vmax.f32 %v475_v12, 0.0  ;;  %v467_v22 = vadd.f32 %v11531_v25, %v466_v8  ;;  %v1735_v52 = vld [vmem:[#allocation2 + $0x2c] sm:$0x1] }
  0xf0   :  { %1727 = vst.msk [vmem:[#allocation2 + $0x1c] sm:$0xf] %vm766_vm2, %v1103_v17  ;;  %1730 = vst [vmem:[#allocation2 + $0x20] sm:$0x1] %v1729_v18  ;;  %v1085_v23 = vor.u32 %v1083_v5, %v1082_v13  ;;  %v1087_v24 = vrot.slane %v1082_v13, 4  ;;  %v1125_v26 = vrot.slane %v1123_v14, 7  ;;  %v488_v33 = vadd.f32 %v10818_v28, %v11531_v25  ;;  %v479_v54 = vpop.f32.mrf.mxu0 }
  0xf1   :  { %v1106_v27 = vshrl.u32 %v10569_v16, 16  ;;  %v1109_v30 = vshll.u32 %v10569_v16, 16  ;;  %v10572_v31 = vpack.c.bf16 %v709_v21, %v709_v21  ;;  %v707_v32 = vmax.f32 %v467_v22, 0.0 }
  0xf2   :  { %v1086_v34 = vsel %vm11548_vm8, %v1078_v63, %v1085_v23  ;;  %v1722_v35 = vsel %vm11554_vm9, %v1087_v24, %v1721_v19  ;;  %v1128_v36 = vor.u32 %v1126_v15, %v1125_v26  ;;  %v1129_v40 = vrot.slane %v1125_v26, 4  ;;  %v10819_v13 = vpop.f32.mrf.mxu0  ;;  %v1752_v26 = vld [vmem:[#allocation2 + $0x48] sm:$0xf] }
  0xf3   :  { %1718 = vst.msk [vmem:[#allocation2 + $0x10] sm:$0xf] %vm766_vm2, %v1086_v34  ;;  %1723 = vst [vmem:[#allocation2 + $0x14] sm:$0x1] %v1722_v35  ;;  %v1108_v37 = vrot.slane %v1106_v27, 7  ;;  %v1131_v38 = vshrl.u32 %v10572_v31, 16  ;;  %v10570_v39 = vpack.c.bf16 %v707_v32, %v707_v32  ;;  %v480_v1 = vadd.f32 %v11531_v25, %v479_v54 }
  0xf4   :  { %v1739_v41 = vsel %vm11538_vm6, %v1128_v36, %v1738_v29  ;;  %v3871_v43 = vld [vmem:[#allocation2 + $0x18] sm:$0xf]  ;;  %v712_v44 = vmax.f32 %v488_v33, 0.0  ;;  %v1134_v48 = vshll.u32 %v10572_v31, 16  ;;  %v482_v31 = vpop.f32.mrf.mxu0 }
  0xf5   :  { %1740 = vst [vmem:[#allocation2 + $0x30] sm:$0xf] %v1739_v41  ;;  %v1111_v46 = vor.u32 %v1109_v30, %v1108_v37  ;;  %v1133_v47 = vrot.slane %v1131_v38, 7  ;;  %v1114_v50 = vshrl.u32 %v10570_v39, 16  ;;  %4001 = vrot.lane.b32.xlu0 %v3871_v43, %s11179_s24  ;;  %v1117_v51 = vshll.u32 %v10570_v39, 16 }
  0xf6   :  { %v10575_v53 = vpack.c.bf16 %v712_v44, %v712_v44  ;;  %v3199_v59 = vld [vmem:[#allocation2 + $0x18] sm:$0xe]  ;;  %v1112_v61 = vrot.slane %v1108_v37, 4  ;;  %v710_v29 = vmax.f32 %v480_v1, 0.0  ;;  %v3196_v41 = vld [vmem:[#allocation2 + $0xc] sm:$0xe]  ;;  %v491_v43 = vadd.f32 %v10819_v13, %v11531_v25 }
  0xf7   :  { %v1732_v55 = vsel %vm11538_vm6, %v1111_v46, %v1731_v42  ;;  %v1136_v56 = vor.u32 %v1134_v48, %v1133_v47  ;;  %v1138_v57 = vrot.slane %v1133_v47, 4  ;;  %v1116_v58 = vrot.slane %v1114_v50, 7  ;;  %v5249_v60 = vld [vmem:[#allocation2 + $0x18] sm:$0xe]  ;;  %v3872_v62 = vld [vmem:[#allocation2 + $0x1c] sm:$0xf] }
  0xf8   :  { %1733 = vst [vmem:[#allocation2 + $0x24] sm:$0xf] %v1732_v55  ;;  %v3200_v63 = vld [vmem:[#allocation2 + $0x1c] sm:$0xf]  ;;  %4003 = vrot.lane.b32.xlu1 %v3872_v62, %s11179_s24  ;;  %v10240_v9 = vrot.slane %v3199_v59, 9  ;;  %v10271_v11 = vrot.slane %v5249_v60, 9  ;;  %v10573_v38 = vpack.c.bf16 %v710_v29, %v710_v29  ;;  %v483_v44 = vadd.f32 %v11531_v25, %v482_v31 }
  0xf9   :  { %v1137_v3 = vsel %vm11548_vm8, %v1129_v40, %v1136_v56  ;;  %v1743_v4 = vsel %vm11554_vm9, %v1138_v57, %v1742_v49  ;;  %v1119_v5 = vor.u32 %v1117_v51, %v1116_v58  ;;  %v1121_v6 = vrot.slane %v1116_v58, 4  ;;  %v5250_v8 = vld [vmem:[#allocation2 + $0x1c] sm:$0xf]  ;;  %v5251_v16 = vld [vmem:[#allocation2 + $0x20] sm:$0x1] }
  0xfa   :  { %1741 = vst.msk [vmem:[#allocation2 + $0x34] sm:$0xf] %vm766_vm2, %v1137_v3  ;;  %1744 = vst [vmem:[#allocation2 + $0x38] sm:$0x1] %v1743_v4  ;;  %v3404_v10 = vrot.slane %v3200_v63, 5  ;;  %v5447_v12 = vrot.slane %v5250_v8, 5 }
  0xfb   :  { %v1120_v14 = vsel %vm11548_vm8, %v1112_v61, %v1119_v5  ;;  %v1736_v15 = vsel %vm11554_vm9, %v1121_v6, %v1735_v52  ;;  %v1157_v17 = vshrl.u32 %v10575_v53, 16  ;;  %v3197_v22 = vld [vmem:[#allocation2 + $0x10] sm:$0xf]  ;;  %v1160_v24 = vshll.u32 %v10575_v53, 16  ;;  %v2075_v30 = vld [vmem:[#allocation2 + $0x18] sm:$0xf] }
  0xfc   :  { %1734 = vst.msk [vmem:[#allocation2 + $0x28] sm:$0xf] %vm766_vm2, %v1120_v14  ;;  %1737 = vst [vmem:[#allocation2 + $0x2c] sm:$0x1] %v1736_v15  ;;  %v3405_v18 = vsel %vm11586_vm12, %v10240_v9, %v3404_v10  ;;  %v5448_v19 = vsel %vm11586_vm12, %v10271_v11, %v5447_v12  ;;  %v5449_v21 = vrot.slane %v5447_v12, 4  ;;  %v5450_v28 = vrot.slane %v5251_v16, 5 }
  0xfd   :  { %3620 = vrot.lane.b32.xlu0 %v3405_v18, %s11180_s25  ;;  %5666 = vrot.lane.b32.xlu1 %v5448_v19, %s11181_s26  ;;  %v11602_v23 = vrot.slane %v1157_v17, 7  ;;  %v5923_v27 = vld [vmem:[#allocation2 + $0x30] sm:$0xf]  ;;  %v3201_v32 = vld [vmem:[#allocation2 + $0x20] sm:$0x1]  ;;  %v3406_v33 = vrot.slane %v3404_v10, 4 }
  0xfe   :  { %v3397_v34 = vrot.slane %v3197_v22, 5  ;;  %v2076_v36 = vld [vmem:[#allocation2 + $0x1c] sm:$0xf]  ;;  %v5451_v37 = vsel %vm11586_vm12, %v5449_v21, %v5450_v28  ;;  %v2217_v39 = vshrl.u32 %v2075_v30, 16  ;;  %v2220_v40 = vshll.u32 %v2075_v30, 16 }
  0xff   :  { %v1162_v35 = vor.u32 %v1160_v24, %v11602_v23  ;;  %v3407_v46 = vrot.slane %v3201_v32, 5  ;;  %v1140_v47 = vshrl.u32 %v10573_v38, 16  ;;  %v1143_v48 = vshll.u32 %v10573_v38, 16  ;;  %v3198_v50 = vld [vmem:[#allocation2 + $0x14] sm:$0x1] }
 0x100   :  { %v2226_v49 = vshll.u32 %v2076_v36, 16  ;;  %v2219_v51 = vrot.slane %v2217_v39, 4  ;;  %v2222_v52 = vrot.slane %v2220_v40, 5  ;;  %v2230_v53 = vshrl.u32 %v2076_v36, 16  ;;  %v3875_v54 = vld [vmem:[#allocation2 + $0x30] sm:$0xf] }
 0x101   :  { %6055 = vrot.lane.b32.xlu0 %v5923_v27, %s11180_s25  ;;  %5668 = vrot.lane.b32.xlu1 %v5451_v37, %s11181_s26  ;;  %v1753_v42 = vsel %vm11538_vm6, %v1162_v35, %v1752_v26  ;;  %v3408_v55 = vsel %vm11586_vm12, %v3406_v33, %v3407_v46  ;;  %v10239_v56 = vrot.slane %v3196_v41, 9  ;;  %v3399_v57 = vrot.slane %v3397_v34, 4  ;;  %v1745_v59 = vld [vmem:[#allocation2 + $0x3c] sm:$0xf]  ;;  %v2072_v5 = vld [vmem:[#allocation2 + $0xc] sm:$0xf] }
 0x102   :  { %1754 = vst [vmem:[#allocation2 + $0x48] sm:$0xf] %v1753_v42  ;;  %v1142_v58 = vrot.slane %v1140_v47, 7  ;;  %v2223_v60 = vor.u32 %v2222_v52, %v2219_v51  ;;  %v713_v61 = vmax.f32 %v491_v43, 0.0  ;;  %v711_v62 = vmax.f32 %v483_v44, 0.0  ;;  %v11004_v43 = vld [vmem:[%s16920_s3 + $0x30] sm:$0xff]  }
 0x103   :  { %v3398_v63 = vsel %vm11586_vm12, %v10239_v56, %v3397_v34  ;;  %v3400_v1 = vrot.slane %v3198_v50, 5  ;;  %v2228_v4 = vrot.slane %v2226_v49, 5  ;;  %v2232_v10 = vrot.slane %v2230_v53, 4  ;;  %v2073_v19 = vld [vmem:[#allocation2 + $0x10] sm:$0xf]  ;;  %v10822_v50 = vpop.f32.mrf.mxu0 }
 0x104   :  { %v1145_v3 = vor.u32 %v1143_v48, %v1142_v58  ;;  %v2224_v6 = vrot.slane %v2223_v60, 4  ;;  %v10576_v8 = vpack.c.bf16 %v713_v61, %v713_v61  ;;  %v10574_v9 = vpack.c.bf16 %v711_v62, %v711_v62  ;;  %v1756_v24 = vld [vmem:[#allocation2 + $0x50] sm:$0x1]  ;;  %v1749_v27 = vld [vmem:[#allocation2 + $0x44] sm:$0x1] }
 0x105   :  { %4009 = vrot.lane.b32.xlu0 %v3875_v54, %s11179_s24  ;;  %3622 = vrot.lane.b32.xlu1 %v3408_v55, %s11180_s25  ;;  %v3401_v11 = vsel %vm11586_vm12, %v3399_v57, %v3400_v1  ;;  %v2193_v14 = vshrl.u32 %v2072_v5, 16  ;;  %v2196_v15 = vshll.u32 %v2072_v5, 16  ;;  %v1163_v21 = vrot.slane %v11602_v23, 4  ;;  %v5924_v30 = vld [vmem:[#allocation2 + $0x34] sm:$0xf]  ;;  %v11003_v23 = vld [vmem:[%s16920_s3 + $0x38] sm:$0xff]  }
 0x106   :  { %v1746_v12 = vsel %vm11538_vm6, %v1145_v3, %v1745_v59  ;;  %v1165_v16 = vshrl.u32 %v10576_v8, 16  ;;  %v1168_v17 = vshll.u32 %v10576_v8, 16  ;;  %v1148_v18 = vshrl.u32 %v10574_v9, 16  ;;  %v2077_v32 = vld [vmem:[#allocation2 + $0x20] sm:$0x1]  ;;  %10956 = vmatpush1.bf16.msra.mxu1 %v11003_v23  ;;  %8824 = vmatpush1.bf16.msra.mxu0 %v11003_v23  ;;  %v11005_v59 = vld [vmem:[%s16920_s3 + $0x28] sm:$0xff]  }
 0x107   :  { %1747 = vst [vmem:[#allocation2 + $0x3c] sm:$0xf] %v1746_v12  ;;  %v1146_v22 = vrot.slane %v1142_v58, 4  ;;  %v1151_v26 = vshll.u32 %v10574_v9, 16  ;;  %v2229_v28 = vsel %vm11625_vm15, %v2224_v6, %v2228_v4  ;;  %v2233_v33 = vor.u32 %v2232_v10, %v2228_v4  ;;  %v5921_v49 = vld [vmem:[#allocation2 + $0x24] sm:$0xf]  ;;  %10941 = vmatprep.subr.bf16.mxu1 %v11178_v20  ;;  %8825 = vmatprep.subr.bf16.mxu0 %v11178_v20  ;;  %v495_v58 = vpop.f32.mrf.mxu0 }
 0x108   :  { %v1167_v29 = vrot.slane %v1165_v16, 7  ;;  %v1150_v31 = vrot.slane %v1148_v18, 7  ;;  %v2195_v34 = vrot.slane %v2193_v14, 4  ;;  %v2198_v35 = vrot.slane %v2196_v15, 5  ;;  %v3876_v51 = vld [vmem:[#allocation2 + $0x34] sm:$0xf] }
 0x109   :  { %3616 = vrot.lane.b32.xlu0 %v3398_v63, %s11180_s25  ;;  %3618 = vrot.lane.b32.xlu1 %v3401_v11, %s11180_s25  ;;  %v2202_v36 = vshll.u32 %v2073_v19, 16  ;;  %v2206_v37 = vshrl.u32 %v2073_v19, 16  ;;  %v2236_v42 = vshll.u32 %v2077_v32, 16  ;;  %v2234_v52 = vrot.slane %v2233_v33, 4  ;;  %v2074_v57 = vld [vmem:[#allocation2 + $0x14] sm:$0x1]  ;;  %v10823_v10 = vpop.f32.mrf.mxu0 }
 0x10a   :  { %v1170_v38 = vor.u32 %v1168_v17, %v1167_v29  ;;  %v1172_v39 = vrot.slane %v1167_v29, 4  ;;  %v1153_v40 = vor.u32 %v1151_v26, %v1150_v31  ;;  %v1155_v41 = vrot.slane %v1150_v31, 4  ;;  %10957 = vmatpush1.bf16.msra.mxu1 %v11004_v43  ;;  %8826 = vmatpush1.bf16.msra.mxu0 %v11004_v43  ;;  %v3873_v60 = vld [vmem:[#allocation2 + $0x24] sm:$0xf]  ;;  %v5256_v1 = vld [vmem:[#allocation2 + $0x34] sm:$0xf] }
 0x10b   :  { %v2199_v53 = vor.u32 %v2198_v35, %v2195_v34  ;;  %v2204_v54 = vrot.slane %v2202_v36, 5  ;;  %v2208_v55 = vrot.slane %v2206_v37, 4  ;;  %v2238_v56 = vrot.slane %v2236_v42, 5  ;;  %10942 = vmatprep.subr.bf16.mxu1 %v11178_v20  ;;  %8827 = vmatprep.subr.bf16.mxu0 %v11178_v20  ;;  %v11006_v3 = vld [vmem:[%s16918_s0 + $0x80] sm:$0xff]   ;;  %v5922_v6 = vld [vmem:[#allocation2 + $0x28] sm:$0xf] }
 0x10c   :  { %v1171_v44 = vsel %vm11548_vm8, %v1163_v21, %v1170_v38  ;;  %v1757_v46 = vsel %vm11554_vm9, %v1172_v39, %v1756_v24  ;;  %v1154_v47 = vsel %vm11548_vm8, %v1146_v22, %v1153_v40  ;;  %v1750_v48 = vsel %vm11554_vm9, %v1155_v41, %v1749_v27  ;;  %v3206_v8 = vld [vmem:[#allocation2 + $0x34] sm:$0xf]  ;;  %10840 = vmatprep.mubr.msk.bf16.mxu0 %vm312_vm1, %v11006_v3  ;;  %v5255_v14 = vld [vmem:[#allocation2 + $0x30] sm:$0xe]  ;;  %v11007_v16 = vld [vmem:[%s16918_s0 + $0x88] sm:$0xff]  }
 0x10d   :  { %2944 = vrot.lane.b32.xlu0 %v2229_v28, %s11181_s26  ;;  %6057 = vrot.lane.b32.xlu1 %v5924_v30, %s11180_s25  ;;  %1755 = vst.msk [vmem:[#allocation2 + $0x4c] sm:$0xf] %vm766_vm2, %v1171_v44  ;;  %1758 = vst [vmem:[#allocation2 + $0x50] sm:$0x1] %v1757_v46  ;;  %v2239_v61 = vsel %vm11625_vm15, %v2234_v52, %v2238_v56  ;;  %v2200_v62 = vrot.slane %v2199_v53, 4  ;;  %v2209_v63 = vor.u32 %v2208_v55, %v2204_v54  ;;  %v498_v28 = vpop.f32.mrf.mxu0  ;;  %v11008_v39 = vld [vmem:[%s16920_s3 + $0x20] sm:$0xff]  }
 0x10e   :  { %1748 = vst.msk [vmem:[#allocation2 + $0x40] sm:$0xf] %vm766_vm2, %v1154_v47  ;;  %1751 = vst [vmem:[#allocation2 + $0x44] sm:$0x1] %v1750_v48  ;;  %v2212_v4 = vshll.u32 %v2074_v57, 16  ;;  %v504_v5 = vadd.f32 %v10822_v50, %v11531_v25  ;;  %10958 = vmatpush1.bf16.msra.mxu1 %v11005_v59  ;;  %8828 = vmatpush1.bf16.msra.mxu0 %v11005_v59  ;;  %v496_v9 = vadd.f32 %v11531_v25, %v495_v58 }
 0x10f   :  { %v2205_v11 = vsel %vm11625_vm15, %v2200_v62, %v2204_v54  ;;  %v2210_v12 = vrot.slane %v2209_v63, 4  ;;  %v5461_v15 = vrot.slane %v5256_v1, 5  ;;  %10943 = vmatprep.subr.bf16.mxu1 %v11178_v20  ;;  %8829 = vmatprep.subr.bf16.mxu0 %v11178_v20  ;;  %v5257_v17 = vld [vmem:[#allocation2 + $0x38] sm:$0x1]  ;;  %v3205_v18 = vld [vmem:[#allocation2 + $0x30] sm:$0xe]  ;;  %v507_v38 = vadd.f32 %v10823_v10, %v11531_v25 }
 0x110   :  { %v2214_v19 = vrot.slane %v2212_v4, 5  ;;  %v3418_v21 = vrot.slane %v3206_v8, 5  ;;  %v3207_v22 = vld [vmem:[#allocation2 + $0x38] sm:$0x1]  ;;  %v716_v24 = vmax.f32 %v504_v5, 0.0  ;;  %10841 = vmatmul.mubr.msk.bf16.gmra.mxu0 %vm312_vm1, %v11007_v16  ;;  %v10273_v26 = vrot.slane %v5255_v14, 9 }
 0x111   :  { %6051 = vrot.lane.b32.xlu0 %v5921_v49, %s11180_s25  ;;  %4011 = vrot.lane.b32.xlu1 %v3876_v51, %s11179_s24  ;;  %v714_v27 = vmax.f32 %v496_v9, 0.0  ;;  %v3874_v30 = vld [vmem:[#allocation2 + $0x28] sm:$0xf]  ;;  %v5463_v31 = vrot.slane %v5461_v15, 4  ;;  %v5464_v32 = vrot.slane %v5257_v17, 5  ;;  %v10242_v35 = vrot.slane %v3205_v18, 9 }
 0x112   :  { %v2215_v29 = vsel %vm11625_vm15, %v2210_v12, %v2214_v19  ;;  %v11683_v33 = vld [vmem:[#allocation2 + $0x28] sm:$0xf]  ;;  %v10579_v34 = vpack.c.bf16 %v716_v24, %v716_v24  ;;  %v3421_v36 = vrot.slane %v3207_v22, 5  ;;  %v3420_v40 = vrot.slane %v3418_v21, 4  ;;  %v5254_v44 = vld [vmem:[#allocation2 + $0x2c] sm:$0x1]  ;;  %10959 = vmatpush1.bf16.msra.mxu1 %v11008_v39  ;;  %8830 = vmatpush1.bf16.msra.mxu0 %v11008_v39 }
 0x113   :  { %v11687_v37 = vld [vmem:[#allocation2 + $0x28] sm:$0xf]  ;;  %v10577_v23 = vpack.c.bf16 %v714_v27, %v714_v27  ;;  %v499_v43 = vadd.f32 %v11531_v25, %v498_v28  ;;  %v5454_v46 = vrot.slane %v11683_v33, 5  ;;  %v11009_v49 = vld [vmem:[%s16920_s3 + $0x18] sm:$0xff]   ;;  %v5462_v50 = vsel %vm11586_vm12, %v10273_v26, %v5461_v15  ;;  %v6309_v53 = vld [vmem:[#allocation2 + $0x30] sm:$0xf]  ;;  %10944 = vmatprep.subr.bf16.mxu1 %v11178_v20  ;;  %8831 = vmatprep.subr.bf16.mxu0 %v11178_v20 }
 0x114   :  { %v1191_v41 = vshrl.u32 %v10579_v34, 16  ;;  %v1194_v42 = vshll.u32 %v10579_v34, 16  ;;  %v5465_v51 = vsel %vm11586_vm12, %v5463_v31, %v5464_v32  ;;  %v3411_v52 = vrot.slane %v11687_v37, 5  ;;  %v1766_v56 = vld [vmem:[#allocation2 + $0x60] sm:$0xf]  ;;  %v11010_v9 = vld [vmem:[%s16920_s3 + $0x10] sm:$0xff]  }
 0x115   :  { %4005 = vrot.lane.b32.xlu0 %v3873_v60, %s11179_s24  ;;  %2946 = vrot.lane.b32.xlu1 %v2239_v61, %s11181_s26  ;;  %v1174_v47 = vshrl.u32 %v10577_v23, 16  ;;  %v1177_v48 = vshll.u32 %v10577_v23, 16  ;;  %v3419_v55 = vsel %vm11586_vm12, %v10242_v35, %v3418_v21  ;;  %v717_v58 = vmax.f32 %v507_v38, 0.0  ;;  %v11715_v61 = vld [vmem:[#allocation2 + $0x34] sm:$0xf]  ;;  %v11011_v32 = vld [vmem:[%s16920_s3 + $0x8] sm:$0xff]  }
 0x116   :  { %v11703_v54 = vrot.slane %v1191_v41, 7  ;;  %v3422_v59 = vsel %vm11586_vm12, %v3420_v40, %v3421_v36  ;;  %v5457_v60 = vrot.slane %v5254_v44, 5  ;;  %v1759_v63 = vld [vmem:[#allocation2 + $0x54] sm:$0xf]  ;;  %v715_v1 = vmax.f32 %v499_v43, 0.0  ;;  %10960 = vmatpush1.bf16.msra.mxu1 %v11009_v49  ;;  %8832 = vmatpush1.bf16.msra.mxu0 %v11009_v49 }
 0x117   :  { %v11711_v57 = vrot.slane %v1174_v47, 7  ;;  %v5456_v3 = vrot.slane %v5454_v46, 4  ;;  %v3204_v4 = vld [vmem:[#allocation2 + $0x2c] sm:$0x1]  ;;  %v6448_v5 = vshrl.u32 %v6309_v53, 16  ;;  %v10580_v8 = vpack.c.bf16 %v717_v58, %v717_v58  ;;  %10945 = vmatprep.subr.bf16.mxu1 %v11178_v20  ;;  %8833 = vmatprep.subr.bf16.mxu0 %v11178_v20 }
 0x118   :  { %v1196_v62 = vor.u32 %v1194_v42, %v11703_v54  ;;  %v3413_v10 = vrot.slane %v3411_v52, 4  ;;  %v10578_v14 = vpack.c.bf16 %v715_v1, %v715_v1  ;;  %v6457_v15 = vshll.u32 %v11715_v61, 16  ;;  %v5927_v19 = vld [vmem:[#allocation2 + $0x48] sm:$0xf]  ;;  %v2082_v23 = vld [vmem:[#allocation2 + $0x34] sm:$0xf] }
 0x119   :  { %2940 = vrot.lane.b32.xlu0 %v2205_v11, %s11181_s26  ;;  %6053 = vrot.lane.b32.xlu1 %v5922_v6, %s11180_s25  ;;  %v1179_v6 = vor.u32 %v1177_v48, %v11711_v57  ;;  %v6451_v11 = vshll.u32 %v6309_v53, 16  ;;  %v1199_v17 = vshrl.u32 %v10580_v8, 16  ;;  %v1202_v18 = vshll.u32 %v10580_v8, 16  ;;  %v1770_v22 = vld [vmem:[#allocation2 + $0x68] sm:$0x1] }
 0x11a   :  { %v1767_v12 = vsel %vm11538_vm6, %v1196_v62, %v1766_v56  ;;  %v3414_v21 = vrot.slane %v3204_v4, 5  ;;  %v1182_v24 = vshrl.u32 %v10578_v14, 16  ;;  %v1185_v26 = vshll.u32 %v10578_v14, 16  ;;  %10961 = vmatpush1.bf16.msra.mxu1 %v11010_v9  ;;  %8834 = vmatpush1.bf16.msra.mxu0 %v11010_v9  ;;  %v1763_v43 = vld [vmem:[#allocation2 + $0x5c] sm:$0x1]  ;;  %v11012_v56 = vld [vmem:[%s16920_s3] sm:$0xff]  }
 0x11b   :  { %1768 = vst [vmem:[#allocation2 + $0x60] sm:$0xf] %v1767_v12  ;;  %v1760_v16 = vsel %vm11538_vm6, %v1179_v6, %v1759_v63  ;;  %v5458_v27 = vsel %vm11586_vm12, %v5456_v3, %v5457_v60  ;;  %v6461_v28 = vshrl.u32 %v11715_v61, 16  ;;  %v1201_v31 = vrot.slane %v1199_v17, 7  ;;  %10946 = vmatprep.subr.bf16.mxu1 %v11178_v20  ;;  %8835 = vmatprep.subr.bf16.mxu0 %v11178_v20  ;;  %v6311_v3 = vld [vmem:[#allocation2 + $0x38] sm:$0x1]  ;;  %v10826_v17 = vpop.f32.mrf.mxu0 }
 0x11c   :  { %1761 = vst [vmem:[#allocation2 + $0x54] sm:$0xf] %v1760_v16  ;;  %v6450_v34 = vrot.slane %v6448_v5, 4  ;;  %v6453_v35 = vrot.slane %v6451_v11, 5  ;;  %v1180_v36 = vrot.slane %v11711_v57, 4  ;;  %v1184_v38 = vrot.slane %v1182_v24, 7 }
 0x11d   :  { %2942 = vrot.lane.b32.xlu0 %v2215_v29, %s11181_s26  ;;  %4007 = vrot.lane.b32.xlu1 %v3874_v30, %s11179_s24  ;;  %v1197_v29 = vrot.slane %v11703_v54, 4  ;;  %v2081_v30 = vld [vmem:[#allocation2 + $0x30] sm:$0xf]  ;;  %v3415_v39 = vsel %vm11586_vm12, %v3413_v10, %v3414_v21  ;;  %v11749_v40 = vrot.slane %v6457_v15, 5  ;;  %v1204_v41 = vor.u32 %v1202_v18, %v1201_v31  ;;  %v3879_v57 = vld [vmem:[#allocation2 + $0x48] sm:$0xf] }
 0x11e   :  { %v1206_v42 = vrot.slane %v1201_v31, 4  ;;  %v2265_v44 = vshrl.u32 %v2081_v30, 16  ;;  %v2268_v47 = vshll.u32 %v2081_v30, 16  ;;  %v1187_v48 = vor.u32 %v1185_v26, %v1184_v38  ;;  %10962 = vmatpush1.bf16.msra.mxu1 %v11011_v32  ;;  %8836 = vmatpush1.bf16.msra.mxu0 %v11011_v32  ;;  %v11013_v6 = vld [vmem:[%s16920_s3 + $0x78] sm:$0xff]   ;;  %v5928_v9 = vld [vmem:[#allocation2 + $0x4c] sm:$0xf] }
 0x11f   :  { %v1189_v49 = vrot.slane %v1184_v38, 4  ;;  %v2278_v53 = vshrl.u32 %v2082_v23, 16  ;;  %v1205_v54 = vsel %vm11548_vm8, %v1197_v29, %v1204_v41  ;;  %v6454_v58 = vor.u32 %v6453_v35, %v6450_v34  ;;  %10947 = vmatprep.subr.bf16.mxu1 %v11178_v20  ;;  %8837 = vmatprep.subr.bf16.mxu0 %v11178_v20  ;;  %v6306_v12 = vld [vmem:[#allocation2 + $0x24] sm:$0xf]  ;;  %v6307_v14 = vld [vmem:[#allocation2 + $0x28] sm:$0xf] }
 0x120   :  { %1769 = vst.msk [vmem:[#allocation2 + $0x64] sm:$0xf] %vm766_vm2, %v1205_v54  ;;  %v1188_v60 = vsel %vm11548_vm8, %v1180_v36, %v1187_v48  ;;  %v2267_v63 = vrot.slane %v2265_v44, 4  ;;  %v2270_v1 = vrot.slane %v2268_v47, 5  ;;  %v6467_v15 = vshll.u32 %v6311_v3, 16  ;;  %v511_v36 = vpop.f32.mrf.mxu0 }
 0x121   :  { %5674 = vrot.lane.b32.xlu0 %v5462_v50, %s11181_s26  ;;  %5676 = vrot.lane.b32.xlu1 %v5465_v51, %s11181_s26  ;;  %v5252_v50 = vld [vmem:[#allocation2 + $0x24] sm:$0xe]  ;;  %v2274_v51 = vshll.u32 %v2082_v23, 16  ;;  %v1764_v61 = vsel %vm11554_vm9, %v1189_v49, %v1763_v43  ;;  %1762 = vst.msk [vmem:[#allocation2 + $0x58] sm:$0xf] %vm766_vm2, %v1188_v60  ;;  %v2280_v5 = vrot.slane %v2278_v53, 4  ;;  %v520_v35 = vadd.f32 %v10826_v17, %v11531_v25 }
 0x122   :  { %1765 = vst [vmem:[#allocation2 + $0x5c] sm:$0x1] %v1764_v61  ;;  %v10272_v62 = vrot.slane %v5252_v50, 9  ;;  %10963 = vmatpush1.bf16.msra.mxu1 %v11012_v56  ;;  %8838 = vmatpush1.bf16.msra.mxu0 %v11012_v56  ;;  %v6455_v10 = vrot.slane %v6454_v58, 4  ;;  %v2271_v16 = vor.u32 %v2270_v1, %v2267_v63  ;;  %v2083_v33 = vld [vmem:[#allocation2 + $0x38] sm:$0x1]  ;;  %v512_v41 = vadd.f32 %v11531_v25, %v511_v36  ;;  %v10827_v3 = vpop.f32.mrf.mxu0 }
 0x123   :  { %v11768_v4 = vrot.slane %v2274_v51, 5  ;;  %10948 = vmatprep.subr.bf16.mxu1 %v11178_v20  ;;  %8839 = vmatprep.subr.bf16.mxu0 %v11178_v20  ;;  %v3202_v18 = vld [vmem:[#allocation2 + $0x24] sm:$0xe]  ;;  %v6427_v21 = vshll.u32 %v6306_v12, 16  ;;  %v3880_v26 = vld [vmem:[#allocation2 + $0x4c] sm:$0xf] }
 0x124   :  { %v5455_v8 = vsel %vm11586_vm12, %v10272_v62, %v5454_v46  ;;  %v6460_v24 = vsel %vm11625_vm15, %v6455_v10, %v11749_v40  ;;  %v6437_v29 = vshrl.u32 %v6307_v14, 16  ;;  %v2284_v30 = vshll.u32 %v2083_v33, 16  ;;  %v11017_v49 = vld [vmem:[%s16918_s0 + $0x90] sm:$0xff]   ;;  %v11018_v50 = vld [vmem:[%s16918_s0 + $0x98] sm:$0xff]   ;;  %v6308_v51 = vld [vmem:[#allocation2 + $0x2c] sm:$0x1] }
 0x125   :  { %3628 = vrot.lane.b32.xlu0 %v3419_v55, %s11180_s25  ;;  %3630 = vrot.lane.b32.xlu1 %v3422_v59, %s11180_s25  ;;  %v1771_v55 = vsel %vm11554_vm9, %v1206_v42, %v1770_v22  ;;  %v6463_v59 = vrot.slane %v6461_v28, 4  ;;  %v2281_v46 = vor.u32 %v2280_v5, %v11768_v4  ;;  %v11014_v22 = vld [vmem:[%s16920_s3 + $0x70] sm:$0xff]   ;;  %v6433_v28 = vshll.u32 %v6307_v14, 16  ;;  %v11015_v42 = vld [vmem:[%s16920_s3 + $0x68] sm:$0xff]  }
 0x126   :  { %1772 = vst [vmem:[#allocation2 + $0x68] sm:$0x1] %v1771_v55  ;;  %10964 = vmatpush2.bf16.msra.mxu1 %v11013_v6  ;;  %8840 = vmatpush2.bf16.msra.mxu0 %v11013_v6  ;;  %v10241_v31 = vrot.slane %v3202_v18, 9  ;;  %v6469_v32 = vrot.slane %v6467_v15, 5  ;;  %v2272_v34 = vrot.slane %v2271_v16, 4  ;;  %v6439_v48 = vrot.slane %v6437_v29, 4 }
 0x127   :  { %v6464_v11 = vor.u32 %v6463_v59, %v11749_v40  ;;  %10949 = vmatprep.subr.bf16.mxu1 %v11178_v20  ;;  %8841 = vmatprep.subr.bf16.mxu0 %v11178_v20  ;;  %v2282_v23 = vrot.slane %v2281_v46, 4  ;;  %v2078_v40 = vld [vmem:[#allocation2 + $0x24] sm:$0xf]  ;;  %v11804_v47 = vrot.slane %v6433_v28, 5  ;;  %v2286_v37 = vrot.slane %v2284_v30, 5  ;;  %v11019_v18 = vld [vmem:[%s16920_s3 + $0x58] sm:$0xff]  }
 0x128   :  { %v3412_v43 = vsel %vm11586_vm12, %v10241_v31, %v3411_v52  ;;  %v2079_v52 = vld [vmem:[#allocation2 + $0x28] sm:$0xf]  ;;  %v2241_v53 = vshrl.u32 %v2078_v40, 16  ;;  %v2244_v54 = vshll.u32 %v2078_v40, 16  ;;  %v720_v55 = vmax.f32 %v520_v35, 0.0  ;;  %10844 = vmatprep.mubr.msk.bf16.mxu0 %vm312_vm1, %v11017_v49  ;;  %v11016_v60 = vld [vmem:[%s16920_s3 + $0x60] sm:$0xff]  }
 0x129   :  { %6063 = vrot.lane.b32.xlu0 %v5927_v19, %s11180_s25  ;;  %5672 = vrot.lane.b32.xlu1 %v5458_v27, %s11181_s26  ;;  %v6424_v19 = vshrl.u32 %v6306_v12, 16  ;;  %v6465_v27 = vrot.slane %v6464_v11, 4  ;;  %v2277_v56 = vsel %vm11625_vm15, %v2272_v34, %v11768_v4  ;;  %v718_v59 = vmax.f32 %v512_v41, 0.0  ;;  %v11834_v16 = vld [vmem:[#allocation2 + $0x2c] sm:$0x1] }
 0x12a   :  { %10965 = vmatpush2.bf16.msra.mxu1 %v11014_v22  ;;  %8842 = vmatpush2.bf16.msra.mxu0 %v11014_v22  ;;  %v6440_v61 = vor.u32 %v6439_v48, %v11804_v47  ;;  %v2250_v62 = vshll.u32 %v2079_v52, 16  ;;  %v2254_v63 = vshrl.u32 %v2079_v52, 16  ;;  %v10583_v1 = vpack.c.bf16 %v720_v55, %v720_v55  ;;  %v4257_v28 = vld [vmem:[#allocation2 + $0x18] sm:$0xf]  ;;  %v1773_v35 = vld [vmem:[#allocation2 + $0x6c] sm:$0xf]  ;;  %v514_v52 = vpop.f32.mrf.mxu0 }
 0x12b   :  { %v6426_v38 = vrot.slane %v6424_v19, 4  ;;  %v6470_v44 = vsel %vm11625_vm15, %v6465_v27, %v6469_v32  ;;  %10950 = vmatprep.subr.bf16.mxu1 %v11178_v20  ;;  %8843 = vmatprep.subr.bf16.mxu0 %v11178_v20  ;;  %v6443_v4 = vshll.u32 %v6308_v51, 16  ;;  %v10581_v5 = vpack.c.bf16 %v718_v59, %v718_v59  ;;  %v11853_v32 = vld [vmem:[#allocation2 + $0x4c] sm:$0xf]  ;;  %v4258_v40 = vld [vmem:[#allocation2 + $0x1c] sm:$0xf] }
 0x12c   :  { %10845 = vmatmul.mubr.msk.bf16.gmra.mxu0 %vm312_vm1, %v11018_v50  ;;  %v523_v6 = vadd.f32 %v10827_v3, %v11531_v25  ;;  %v2243_v10 = vrot.slane %v2241_v53, 4  ;;  %v2246_v11 = vrot.slane %v2244_v54, 5  ;;  %v1225_v12 = vshrl.u32 %v10583_v1, 16  ;;  %v1945_v41 = vld [vmem:[#allocation2 + $0x18] sm:$0xf] }
 0x12d   :  { %4017 = vrot.lane.b32.xlu0 %v3879_v57, %s11179_s24  ;;  %3626 = vrot.lane.b32.xlu1 %v3415_v39, %s11180_s25  ;;  %v6429_v39 = vrot.slane %v6427_v21, 5  ;;  %v2287_v57 = vsel %vm11625_vm15, %v2282_v23, %v2286_v37  ;;  %v1228_v14 = vshll.u32 %v10583_v1, 16  ;;  %v1208_v33 = vshrl.u32 %v10581_v5, 16  ;;  %v11843_v21 = vld [vmem:[#allocation2 + $0x48] sm:$0xe] }
 0x12e   :  { %10966 = vmatpush2.bf16.msra.mxu1 %v11015_v42  ;;  %8844 = vmatpush2.bf16.msra.mxu0 %v11015_v42  ;;  %v1211_v17 = vshll.u32 %v10581_v5, 16  ;;  %v11839_v25 = vrot.slane %v6440_v61, 4  ;;  %v11841_v46 = vrot.slane %v2250_v62, 5  ;;  %v2256_v19 = vrot.slane %v2254_v63, 4  ;;  %v11020_v42 = vld [vmem:[%s16920_s3 + $0x50] sm:$0xff]  }
 0x12f   :  { %v6430_v58 = vor.u32 %v6429_v39, %v6426_v38  ;;  %10951 = vmatprep.subr.bf16.mxu1 %v11178_v20  ;;  %8845 = vmatprep.subr.bf16.mxu0 %v11178_v20  ;;  %v11845_v22 = vrot.slane %v1225_v12, 7  ;;  %v721_v27 = vmax.f32 %v523_v6, 0.0  ;;  %v6445_v29 = vrot.slane %v6443_v4, 5  ;;  %2009 = vst.msk [vmem:[#allocation3 + $0x30] sm:$0xf] %vm766_vm2, %v1945_v41  ;;  %v11021_v6 = vld [vmem:[%s16920_s3 + $0x48] sm:$0xff]  }
 0x130   :  { %v2247_v30 = vor.u32 %v2246_v11, %v2243_v10  ;;  %v2260_v31 = vshll.u32 %v11834_v16, 16  ;;  %v10275_v23 = vrot.slane %v11843_v21, 9  ;;  %v4375_v37 = vshrl.u32 %v4257_v28, 16  ;;  %v4259_v55 = vld [vmem:[#allocation2 + $0x20] sm:$0x1] }
 0x131   :  { %5670 = vrot.lane.b32.xlu0 %v5455_v8, %s11181_s26  ;;  %6065 = vrot.lane.b32.xlu1 %v5928_v9, %s11180_s25  ;;  %v5925_v8 = vld [vmem:[#allocation2 + $0x3c] sm:$0xf]  ;;  %v5926_v9 = vld [vmem:[#allocation2 + $0x40] sm:$0xf]  ;;  %v11832_v15 = vrot.slane %v6430_v58, 4  ;;  %v1230_v34 = vor.u32 %v1228_v14, %v11845_v22  ;;  %v10584_v39 = vpack.c.bf16 %v721_v27, %v721_v27  ;;  %v6446_v48 = vsel %vm11625_vm15, %v11839_v25, %v6445_v29 }
 0x132   :  { %10967 = vmatpush2.bf16.msra.mxu1 %v11016_v60  ;;  %8846 = vmatpush2.bf16.msra.mxu0 %v11016_v60  ;;  %v5475_v50 = vrot.slane %v11853_v32, 5  ;;  %v1784_v58 = vld [vmem:[#allocation2 + $0x80] sm:$0x1]  ;;  %v4377_v59 = vrot.slane %v4375_v37, 4  ;;  %v4378_v60 = vshll.u32 %v4257_v28, 16  ;;  %v4384_v61 = vshll.u32 %v4258_v40, 16 }
 0x133   :  { %10952 = vmatprep.subr.bf16.mxu1 %v11178_v20  ;;  %8847 = vmatprep.subr.bf16.mxu0 %v11178_v20  ;;  %v6436_v36 = vsel %vm11625_vm15, %v11832_v15, %v11804_v47  ;;  %v2257_v47 = vor.u32 %v2256_v19, %v11841_v46  ;;  %v1233_v53 = vshrl.u32 %v10584_v39, 16  ;;  %v1236_v54 = vshll.u32 %v10584_v39, 16  ;;  %v11882_v62 = vld [vmem:[#allocation2 + $0x4c] sm:$0xf]  ;;  %v11888_v4 = vld [vmem:[%s16919_s2] ss:$0 sm:$0xff] }
 0x134   :  { %v1231_v63 = vrot.slane %v11845_v22, 4  ;;  %v4388_v3 = vshrl.u32 %v4258_v40, 16  ;;  %v515_v5 = vadd.f32 %v11888_v4, %v514_v52  ;;  %v4386_v10 = vrot.slane %v4384_v61, 5  ;;  %v1946_v12 = vld [vmem:[#allocation2 + $0x1c] sm:$0xf] }
 0x135   :  { %7175 = vrot.lane.b32.xlu0 %v6460_v24, %s11179_s24  ;;  %4019 = vrot.lane.b32.xlu1 %v3880_v26, %s11179_s24  ;;  %v1780_v24 = vld [vmem:[#allocation2 + $0x78] sm:$0xf]  ;;  %v11850_v26 = vrot.slane %v1208_v33, 7  ;;  %v1235_v1 = vrot.slane %v1233_v53, 7  ;;  %v4394_v11 = vshll.u32 %v4259_v55, 16  ;;  %v3432_v19 = vrot.slane %v11882_v62, 5 }
 0x136   :  { %10968 = vmatpush2.bf16.msra.mxu1 %v11019_v18  ;;  %v1781_v49 = vsel %vm11538_vm6, %v1230_v34, %v1780_v24  ;;  %8848 = vmatpush2.bf16.msra.mxu0 %v11019_v18  ;;  %v11897_v14 = vld [vmem:[#allocation2 + $0x48] sm:$0xe]  ;;  %v719_v33 = vmax.f32 %v515_v5, 0.0  ;;  %2010 = vst.msk [vmem:[#allocation3 + $0x3c] sm:$0xf] %vm766_vm2, %v1946_v12  ;;  %v2262_v18 = vrot.slane %v2260_v31, 5 }
 0x137   :  { %v1213_v38 = vor.u32 %v1211_v17, %v11850_v26  ;;  %10953 = vmatprep.subr.bf16.mxu1 %v11178_v20  ;;  %1782 = vst [vmem:[#allocation2 + $0x78] sm:$0xf] %v1781_v49  ;;  %8849 = vmatprep.subr.bf16.mxu0 %v11178_v20  ;;  %v1238_v15 = vor.u32 %v1236_v54, %v1235_v1  ;;  %v1240_v16 = vrot.slane %v1235_v1, 4  ;;  %v4390_v17 = vrot.slane %v4388_v3, 4  ;;  %v3213_v24 = vld [vmem:[#allocation2 + $0x50] sm:$0x1] }
 0x138   :  { %v10582_v29 = vpack.c.bf16 %v719_v33, %v719_v33  ;;  %v1943_v34 = vld [vmem:[#allocation2 + $0xc] sm:$0xf]  ;;  %v11022_v31 = vld [vmem:[%s16920_s3 + $0x40] sm:$0xff]   ;;  %v3435_v49 = vrot.slane %v3213_v24, 5  ;;  %v1777_v52 = vld [vmem:[#allocation2 + $0x74] sm:$0x1] }
 0x139   :  { %3624 = vrot.lane.b32.xlu0 %v3412_v43, %s11180_s25  ;;  %7177 = vrot.lane.b32.xlu1 %v6470_v44, %s11179_s24  ;;  %v3877_v43 = vld [vmem:[#allocation2 + $0x3c] sm:$0xf]  ;;  %v3878_v44 = vld [vmem:[#allocation2 + $0x40] sm:$0xf]  ;;  %v1774_v51 = vsel %vm11538_vm6, %v1213_v38, %v1773_v35  ;;  %v1239_v27 = vsel %vm11548_vm8, %v1231_v63, %v1238_v15  ;;  %v1785_v28 = vsel %vm11554_vm9, %v1240_v16, %v1784_v58  ;;  %v5477_v38 = vrot.slane %v5475_v50, 4 }
 0x13a   :  { %1775 = vst [vmem:[#allocation2 + $0x6c] sm:$0xf] %v1774_v51  ;;  %10969 = vmatpush2.bf16.msra.mxu1 %v11020_v42  ;;  %8850 = vmatpush2.bf16.msra.mxu0 %v11020_v42  ;;  %v11917_v39 = vld [vmem:[#allocation2 + $0x40] sm:$0xf]  ;;  %1783 = vst.msk [vmem:[#allocation2 + $0x7c] sm:$0xf] %vm766_vm2, %v1239_v27  ;;  %v5476_v51 = vsel %vm11586_vm12, %v10275_v23, %v5475_v50 }
 0x13b   :  { %10954 = vmatprep.subr.bf16.mxu1 %v11178_v20  ;;  %8851 = vmatprep.subr.bf16.mxu0 %v11178_v20  ;;  %1786 = vst [vmem:[#allocation2 + $0x80] sm:$0x1] %v1785_v28  ;;  %2007 = vst.msk [vmem:[#allocation3 + $0x18] sm:$0xf] %vm766_vm2, %v1943_v34  ;;  %v1216_v41 = vshrl.u32 %v10582_v29, 16  ;;  %v1219_v42 = vshll.u32 %v10582_v29, 16 }
 0x13c   :  { %v5260_v53 = vld [vmem:[#allocation2 + $0x44] sm:$0x1]  ;;  %v1214_v54 = vrot.slane %v11850_v26, 4  ;;  %v5468_v32 = vrot.slane %v11917_v39, 5  ;;  %v11944_v26 = vld [vmem:[#allocation2 + $0x40] sm:$0xf] }
 0x13d   :  { %2952 = vrot.lane.b32.xlu0 %v2277_v56, %s11181_s26  ;;  %2954 = vrot.lane.b32.xlu1 %v2287_v57, %s11181_s26  ;;  %v2248_v56 = vrot.slane %v2247_v30, 4  ;;  %v11879_v57 = vld [vmem:[#allocation2 + $0x50] sm:$0x1]  ;;  %v4391_v30 = vor.u32 %v4390_v17, %v4386_v10  ;;  %v1218_v55 = vrot.slane %v1216_v41, 7  ;;  %v5471_v61 = vrot.slane %v5260_v53, 5 }
 0x13e   :  { %v5478_v25 = vrot.slane %v11879_v57, 5  ;;  %10970 = vmatpush2.bf16.msra.mxu1 %v11021_v6  ;;  %8852 = vmatpush2.bf16.msra.mxu0 %v11021_v6  ;;  %v6316_v57 = vld [vmem:[#allocation2 + $0x4c] sm:$0xf]  ;;  %v1944_v62 = vld [vmem:[#allocation2 + $0x10] sm:$0xf] }
 0x13f   :  { %v2253_v35 = vsel %vm11625_vm15, %v2248_v56, %v11841_v46  ;;  %10955 = vmatprep.subr.bf16.mxu1 %v11178_v20  ;;  %v6315_v46 = vld [vmem:[#allocation2 + $0x48] sm:$0xf]  ;;  %8853 = vmatprep.subr.bf16.mxu0 %v11178_v20  ;;  %v1221_v23 = vor.u32 %v1219_v42, %v1218_v55  ;;  %v1223_v50 = vrot.slane %v1218_v55, 4  ;;  %v3210_v63 = vld [vmem:[#allocation2 + $0x44] sm:$0x1]  ;;  %v6505_v1 = vshll.u32 %v6316_v57, 16 }
 0x140   :  { %v5479_v20 = vsel %vm11586_vm12, %v5477_v38, %v5478_v25  ;;  %v6496_v21 = vshrl.u32 %v6315_v46, 16  ;;  %v6499_v58 = vshll.u32 %v6315_v46, 16  ;;  %v6509_v3 = vshrl.u32 %v6316_v57, 16  ;;  %v2087_v5 = vld [vmem:[#allocation2 + $0x48] sm:$0xf] }
 0x141   :  { %6059 = vrot.lane.b32.xlu0 %v5925_v8, %s11180_s25  ;;  %6061 = vrot.lane.b32.xlu1 %v5926_v9, %s11180_s25  ;;  %v2258_v8 = vrot.slane %v2257_v47, 4  ;;  %v4380_v9 = vrot.slane %v4378_v60, 5  ;;  %v3434_v47 = vrot.slane %v3432_v19, 4  ;;  %v1222_v6 = vsel %vm11548_vm8, %v1214_v54, %v1221_v23  ;;  %2008 = vst.msk [vmem:[#allocation3 + $0x24] sm:$0xf] %vm766_vm2, %v1944_v62 }
 0x142   :  { %10971 = vmatpush2.bf16.msra.mxu1 %v11022_v31  ;;  %8854 = vmatpush2.bf16.msra.mxu0 %v11022_v31  ;;  %v6498_v12 = vrot.slane %v6496_v21, 4  ;;  %1776 = vst.msk [vmem:[#allocation2 + $0x70] sm:$0xf] %vm766_vm2, %v1222_v6  ;;  %v11961_v15 = vld [vmem:[#allocation2 + $0x1c] sm:$0xf]  ;;  %v2316_v25 = vshll.u32 %v2087_v5, 16 }
 0x143   :  { %v4381_v22 = vor.u32 %v4380_v9, %v4377_v59  ;;  %v3436_v60 = vsel %vm11586_vm12, %v3434_v47, %v3435_v49  ;;  %v11955_v9 = vld [vmem:[#allocation2 + $0x18] sm:$0xe]  ;;  %v2088_v16 = vld [vmem:[#allocation2 + $0x4c] sm:$0xf]  ;;  %v11965_v33 = vld [vmem:[#allocation2 + $0x20] sm:$0x1] }
 0x144   :  { %16992 = vst [vmem:[#allocation6_spill] sm:$0xff] %v11965_v33  ;;  %v5931_v17 = vld [vmem:[#allocation2 + $0x60] sm:$0xf]  ;;  %v11967_v24 = vrot.slane %v6505_v1, 5  ;;  %v6511_v27 = vrot.slane %v6509_v3, 4  ;;  %v2326_v46 = vshrl.u32 %v2088_v16, 16 }
 0x145   :  { %4013 = vrot.lane.b32.xlu0 %v3877_v43, %s11179_s24  ;;  %4015 = vrot.lane.b32.xlu1 %v3878_v44, %s11179_s24  ;;  %v4382_v40 = vrot.slane %v4381_v22, 4  ;;  %v4392_v43 = vrot.slane %v4391_v30, 4  ;;  %v4396_v44 = vrot.slane %v4394_v11, 5  ;;  %v3425_v11 = vrot.slane %v11944_v26, 5  ;;  %v5258_v22 = vld [vmem:[#allocation2 + $0x3c] sm:$0xe] }
 0x146   :  { %v3208_v34 = vld [vmem:[#allocation2 + $0x3c] sm:$0xe]  ;;  %v6317_v31 = vld [vmem:[#allocation2 + $0x50] sm:$0x1]  ;;  %v3883_v42 = vld [vmem:[#allocation2 + $0x60] sm:$0xf] }
 0x147   :  { %v4387_v37 = vsel %vm11625_vm15, %v4382_v40, %v4386_v10  ;;  %v4397_v56 = vsel %vm11625_vm15, %v4392_v43, %v4396_v44  ;;  %v5470_v10 = vrot.slane %v5468_v32, 4  ;;  %v3427_v29 = vrot.slane %v3425_v11, 4  ;;  %v4263_v41 = vld [vmem:[#allocation2 + $0x30] sm:$0xf]  ;;  %v4265_v26 = vld [vmem:[#allocation2 + $0x38] sm:$0x1] }
 0x148   :  { %5184 = vst.msk [vmem:[#allocation3 + $0x1c] sm:$0xf] %vm766_vm2, %v4387_v37  ;;  %5185 = vst.msk [vmem:[#allocation3 + $0x28] sm:$0xf] %vm766_vm2, %v4397_v56  ;;  %v2318_v44 = vrot.slane %v2316_v25, 5  ;;  %v10274_v47 = vrot.slane %v5258_v22, 9  ;;  %v6512_v37 = vor.u32 %v6511_v27, %v11967_v24 }
 0x149   :  { %7171 = vrot.lane.b32.xlu0 %v6436_v36, %s11179_s24  ;;  %7173 = vrot.lane.b32.xlu1 %v6446_v48, %s11179_s24  ;;  %v2263_v36 = vsel %vm11625_vm15, %v2258_v8, %v2262_v18  ;;  %v10244_v48 = vrot.slane %v11897_v14, 9  ;;  %v1778_v8 = vsel %vm11554_vm9, %v1223_v50, %v1777_v52  ;;  %v6501_v14 = vrot.slane %v6499_v58, 5  ;;  %v5932_v50 = vld [vmem:[#allocation2 + $0x64] sm:$0xf]  ;;  %v6313_v39 = vld [vmem:[#allocation2 + $0x40] sm:$0xf] }
 0x14a   :  { %1779 = vst [vmem:[#allocation2 + $0x74] sm:$0x1] %v1778_v8  ;;  %v2313_v18 = vshrl.u32 %v2087_v5, 16  ;;  %v5472_v28 = vsel %vm11586_vm12, %v5470_v10, %v5471_v61  ;;  %v10243_v49 = vrot.slane %v3208_v34, 9  ;;  %v6515_v52 = vshll.u32 %v6317_v31, 16 }
 0x14b   :  { %v3433_v59 = vsel %vm11586_vm12, %v10244_v48, %v3432_v19  ;;  %v3428_v19 = vrot.slane %v3210_v63, 5  ;;  %v6502_v30 = vor.u32 %v6501_v14, %v6498_v12  ;;  %v4264_v48 = vld [vmem:[#allocation2 + $0x34] sm:$0xf]  ;;  %v4423_v56 = vshrl.u32 %v4263_v41, 16  ;;  %v6312_v10 = vld [vmem:[#allocation2 + $0x3c] sm:$0xf] }
 0x14c   :  { %v2315_v43 = vrot.slane %v2313_v18, 4  ;;  %v2328_v57 = vrot.slane %v2326_v46, 4  ;;  %v4426_v21 = vshll.u32 %v4263_v41, 16  ;;  %v4432_v58 = vshll.u32 %v4264_v48, 16  ;;  %v1805_v40 = vld [vmem:[#allocation2 + $0xa4] sm:$0x1] }
 0x14d   :  { %2948 = vrot.lane.b32.xlu0 %v2253_v35, %s11181_s26  ;;  %2950 = vrot.lane.b32.xlu1 %v2263_v36, %s11181_s26  ;;  %v2322_v35 = vshll.u32 %v2088_v16, 16  ;;  %v3429_v53 = vsel %vm11586_vm12, %v3427_v29, %v3428_v19  ;;  %v6503_v54 = vrot.slane %v6502_v30, 4  ;;  %v4425_v61 = vrot.slane %v4423_v56, 4  ;;  %v1951_v38 = vld [vmem:[#allocation2 + $0x3c] sm:$0xf] }
 0x14e   :  { %v4436_v62 = vshrl.u32 %v4264_v48, 16  ;;  %v6513_v63 = vrot.slane %v6512_v37, 4  ;;  %v6517_v1 = vrot.slane %v6515_v52, 5  ;;  %v4428_v3 = vrot.slane %v4426_v21, 5  ;;  %v2084_v21 = vld [vmem:[#allocation2 + $0x3c] sm:$0xf] }
 0x14f   :  { %v11979_v55 = vrot.slane %v2322_v35, 5  ;;  %v4434_v5 = vrot.slane %v4432_v58, 5  ;;  %v5469_v6 = vsel %vm11586_vm12, %v10274_v47, %v5468_v32  ;;  %v3426_v8 = vsel %vm11586_vm12, %v10243_v49, %v3425_v11  ;;  %v11028_v49 = vld [vmem:[%s16918_s0 + $0xa0] sm:$0xff]   ;;  %2015 = vst.msk [vmem:[#allocation3 + $0x78] sm:$0xf] %vm766_vm2, %v1951_v38 }
 0x150   :  { %v4438_v12 = vrot.slane %v4436_v62, 4  ;;  %v4442_v14 = vshll.u32 %v4265_v26, 16  ;;  %v6508_v16 = vsel %vm11625_vm15, %v6503_v54, %v11967_v24  ;;  %v4429_v18 = vor.u32 %v4428_v3, %v4425_v61  ;;  %v4262_v54 = vld [vmem:[#allocation2 + $0x2c] sm:$0x1]  ;;  %10848 = vmatprep.mubr.msk.bf16.mxu0 %vm312_vm1, %v11028_v49 }
 0x151   :  { %5682 = vrot.lane.b32.xlu0 %v5476_v51, %s11181_s26  ;;  %5684 = vrot.lane.b32.xlu1 %v5479_v20, %s11181_s26  ;;  %v2089_v51 = vld [vmem:[#allocation2 + $0x50] sm:$0x1]  ;;  %v10830_v20 = vpop.f32.mrf.mxu0  ;;  %v6472_v29 = vshrl.u32 %v6312_v10, 16  ;;  %v6475_v30 = vshll.u32 %v6312_v10, 16  ;;  %v6481_v35 = vshll.u32 %v6313_v39, 16  ;;  %v6518_v37 = vsel %vm11625_vm15, %v6513_v63, %v6517_v1 }
 0x152   :  { %v536_v23 = vadd.f32 %v11888_v4, %v10830_v20  ;;  %v4439_v22 = vor.u32 %v4438_v12, %v4434_v5  ;;  %v4430_v34 = vrot.slane %v4429_v18, 4  ;;  %v4444_v46 = vrot.slane %v4442_v14, 5  ;;  %v11029_v20 = vld [vmem:[%s16918_s0 + $0xa8] sm:$0xff]   ;;  %v2085_v63 = vld [vmem:[#allocation2 + $0x40] sm:$0xf] }
 0x153   :  { %v527_v32 = vpop.f32.mrf.mxu0  ;;  %v6485_v52 = vshrl.u32 %v6313_v39, 16  ;;  %10849 = vmatmul.mubr.msk.bf16.gmra.mxu0 %vm312_vm1, %v11029_v20  ;;  %v6314_v10 = vld [vmem:[#allocation2 + $0x44] sm:$0x1]  ;;  %v2289_v14 = vshrl.u32 %v2084_v21, 16 }
 0x154   :  { %v724_v25 = vmax.f32 %v536_v23, 0.0  ;;  %v528_v27 = vadd.f32 %v11888_v4, %v527_v32  ;;  %v4440_v24 = vrot.slane %v4439_v22, 4  ;;  %v2086_v20 = vld [vmem:[#allocation2 + $0x44] sm:$0x1] }
 0x155   :  { %3636 = vrot.lane.b32.xlu0 %v3433_v59, %s11180_s25  ;;  %3638 = vrot.lane.b32.xlu1 %v3436_v60, %s11180_s25  ;;  %v2319_v59 = vor.u32 %v2318_v44, %v2315_v43  ;;  %v2332_v60 = vshll.u32 %v2089_v51, 16  ;;  %v4435_v44 = vsel %vm11625_vm15, %v4430_v34, %v4434_v5  ;;  %v10831_v56 = vpop.f32.mrf.mxu0  ;;  %v6487_v12 = vrot.slane %v6485_v52, 4 }
 0x156   :  { %v10587_v31 = vpack.c.bf16 %v724_v25, %v724_v25  ;;  %v722_v41 = vmax.f32 %v528_v27, 0.0  ;;  %5188 = vst.msk [vmem:[#allocation3 + $0x4c] sm:$0xf] %vm766_vm2, %v4435_v44  ;;  %v4445_v51 = vsel %vm11625_vm15, %v4440_v24, %v4444_v46  ;;  %v1787_v27 = vld [vmem:[#allocation2 + $0x84] sm:$0xf]  ;;  %v2302_v34 = vshrl.u32 %v2085_v63, 16 }
 0x157   :  { %v11996_v19 = vrot.slane %v2319_v59, 4  ;;  %v11998_v11 = vrot.slane %v2332_v60, 5  ;;  %5189 = vst.msk [vmem:[#allocation3 + $0x58] sm:$0xf] %vm766_vm2, %v4445_v51  ;;  %v12022_v59 = vrot.slane %v6481_v35, 5  ;;  %v530_v39 = vpop.f32.mrf.mxu0  ;;  %v539_v24 = vadd.f32 %v11888_v4, %v10831_v56 }
 0x158   :  { %v1259_v48 = vshrl.u32 %v10587_v31, 16  ;;  %v1262_v47 = vshll.u32 %v10587_v31, 16  ;;  %v1794_v60 = vld [vmem:[#allocation2 + $0x90] sm:$0xf]  ;;  %v5929_v46 = vld [vmem:[#allocation2 + $0x54] sm:$0xf]  ;;  %v531_v44 = vadd.f32 %v11888_v4, %v530_v39 }
 0x159   :  { %6071 = vrot.lane.b32.xlu0 %v5931_v17, %s11180_s25  ;;  %5680 = vrot.lane.b32.xlu1 %v5472_v28, %s11181_s26  ;;  %v2329_v17 = vor.u32 %v2328_v57, %v11979_v55  ;;  %v3884_v28 = vld [vmem:[#allocation2 + $0x64] sm:$0xf]  ;;  %v12016_v57 = vrot.slane %v6472_v29, 4  ;;  %v12048_v35 = vld [vmem:[#allocation2 + $0x30] sm:$0xe]  ;;  %v6488_v52 = vor.u32 %v6487_v12, %v12022_v59 }
 0x15a   :  { %v12019_v58 = vrot.slane %v1259_v48, 7  ;;  %16993 = vst [vmem:[#allocation7_spill] sm:$0xff] %v12048_v35  ;;  %v4260_v48 = vld [vmem:[#allocation2 + $0x24] sm:$0xf] }
 0x15b   :  { %v2330_v43 = vrot.slane %v2329_v17, 4  ;;  %v6489_v12 = vrot.slane %v6488_v52, 4  ;;  %v12090_v52 = vld [vmem:[#allocation2 + $0x24] sm:$0xe] }
 0x15c   :  { %v1264_v1 = vor.u32 %v1262_v47, %v12019_v58  ;;  %16994 = vst [vmem:[#allocation8_spill] sm:$0xff] %v12090_v52 }
 0x15d   :  { %4025 = vrot.lane.b32.xlu0 %v3883_v42, %s11179_s24  ;;  %3634 = vrot.lane.b32.xlu1 %v3429_v53, %s11180_s25  ;;  %v4261_v42 = vld [vmem:[#allocation2 + $0x28] sm:$0xf]  ;;  %v10585_v53 = vpack.c.bf16 %v722_v41, %v722_v41  ;;  %v2335_v32 = vsel %vm11625_vm15, %v2330_v43, %v11998_v11  ;;  %v2291_v41 = vrot.slane %v2289_v14, 4 }
 0x15e   :  { %v4408_v26 = vshll.u32 %v4261_v42, 16  ;;  %v4412_v23 = vshrl.u32 %v4261_v42, 16  ;;  %v1795_v22 = vsel %vm11538_vm6, %v1264_v1, %v1794_v60 }
 0x15f   :  { %v1242_v61 = vshrl.u32 %v10585_v53, 16  ;;  %v1245_v62 = vshll.u32 %v10585_v53, 16  ;;  %1796 = vst [vmem:[#allocation2 + $0x90] sm:$0xf] %v1795_v22  ;;  %v725_v53 = vmax.f32 %v539_v24, 0.0 }
 0x160   :  { %v12028_v3 = vrot.slane %v4408_v26, 5  ;;  %v4414_v5 = vrot.slane %v4412_v23, 4  ;;  %v4402_v26 = vshll.u32 %v4260_v48, 16 }
 0x161   :  { %5678 = vrot.lane.b32.xlu0 %v5469_v6, %s11181_s26  ;;  %6073 = vrot.lane.b32.xlu1 %v5932_v50, %s11180_s25  ;;  %v6477_v50 = vrot.slane %v6475_v30, 5  ;;  %v4418_v6 = vshll.u32 %v4262_v54, 16  ;;  %v12030_v17 = vrot.slane %v1242_v61, 7  ;;  %v2298_v30 = vshll.u32 %v2085_v63, 16 }
 0x162   :  { %v4399_v54 = vshrl.u32 %v4260_v48, 16 }
 0x163   :  { %v6478_v29 = vor.u32 %v6477_v50, %v12016_v57  ;;  %v1247_v31 = vor.u32 %v1245_v62, %v12030_v17  ;;  %v4420_v11 = vrot.slane %v4418_v6, 5  ;;  %v12062_v56 = vrot.slane %v2298_v30, 5  ;;  %v3881_v62 = vld [vmem:[#allocation2 + $0x54] sm:$0xf] }
 0x164   :  { %v2304_v57 = vrot.slane %v2302_v34, 4  ;;  %v10588_v50 = vpack.c.bf16 %v725_v53, %v725_v53  ;;  %v4401_v60 = vrot.slane %v4399_v54, 4  ;;  %v1265_v34 = vrot.slane %v12019_v58, 4  ;;  %v5269_v54 = vld [vmem:[#allocation2 + $0x68] sm:$0x1] }
 0x165   :  { %7183 = vrot.lane.b32.xlu0 %v6508_v16, %s11179_s24  ;;  %4027 = vrot.lane.b32.xlu1 %v3884_v28, %s11179_s24  ;;  %v2292_v16 = vshll.u32 %v2084_v21, 16  ;;  %v4415_v28 = vor.u32 %v4414_v5, %v12028_v3  ;;  %v1788_v43 = vsel %vm11538_vm6, %v1247_v31, %v1787_v27  ;;  %v723_v21 = vmax.f32 %v531_v44, 0.0 }
 0x166   :  { %1789 = vst [vmem:[#allocation2 + $0x84] sm:$0xf] %v1788_v43  ;;  %v6479_v23 = vrot.slane %v6478_v29, 4  ;;  %v4404_v5 = vrot.slane %v4402_v26, 5  ;;  %v1267_v39 = vshrl.u32 %v10588_v50, 16  ;;  %v2305_v22 = vor.u32 %v2304_v57, %v12062_v56 }
 0x167   :  { %v12032_v18 = vpop.permute.xlu0 %4001  ;;  %v2294_v42 = vrot.slane %v2292_v16, 5  ;;  %v10586_v1 = vpack.c.bf16 %v723_v21, %v723_v21  ;;  %v12070_v16 = vld [vmem:[#allocation2 + $0x64] sm:$0xf]  ;;  %v2308_v27 = vshll.u32 %v2086_v20, 16  ;;  %v12092_v57 = vld [vmem:[#allocation2 + $0x34] sm:$0xf] }
 0x168   :  { %v6484_v30 = vsel %vm11625_vm15, %v6479_v23, %v12022_v59  ;;  %v1269_v31 = vrot.slane %v1267_v39, 7  ;;  %v5489_v24 = vrot.slane %v12070_v16, 5  ;;  %16995 = vst [vmem:[#allocation9_spill] sm:$0xff] %v12092_v57  ;;  %v12094_v21 = vld [vmem:[#allocation2 + $0x28] sm:$0xf] }
 0x169   :  { %3632 = vrot.lane.b32.xlu0 %v3426_v8, %s11180_s25  ;;  %7185 = vrot.lane.b32.xlu1 %v6518_v37, %s11179_s24  ;;  %v2325_v8 = vsel %vm11625_vm15, %v11996_v19, %v11979_v55  ;;  %v6491_v55 = vshll.u32 %v6314_v10, 16  ;;  %v4416_v19 = vrot.slane %v4415_v28, 4  ;;  %v5930_v37 = vld [vmem:[#allocation2 + $0x58] sm:$0xf]  ;;  %v2295_v63 = vor.u32 %v2294_v42, %v2291_v41  ;;  %v12098_v26 = vld [vmem:[#allocation2 + $0x64] sm:$0xf] }
 0x16a   :  { %v12034_v25 = vpop.permute.xlu1 %4003  ;;  %v1250_v28 = vshrl.u32 %v10586_v1, 16  ;;  %v1253_v29 = vshll.u32 %v10586_v1, 16  ;;  %v1798_v41 = vld [vmem:[#allocation2 + $0x98] sm:$0x1]  ;;  %v1274_v58 = vrot.slane %v1269_v31, 4  ;;  %v2310_v53 = vrot.slane %v2308_v27, 5 }
 0x16b   :  { %v4421_v51 = vsel %vm11625_vm15, %v4416_v19, %v4420_v11  ;;  %v6493_v14 = vrot.slane %v6491_v55, 5  ;;  %v4405_v55 = vor.u32 %v4404_v5, %v4401_v60  ;;  %v2296_v19 = vrot.slane %v2295_v63, 4  ;;  %v12080_v11 = vld [vmem:[#allocation2 + $0x60] sm:$0xe]  ;;  %v12107_v63 = vld [vmem:[#allocation2 + $0x38] sm:$0x1] }
 0x16c   :  { %5187 = vst.msk [vmem:[#allocation3 + $0x40] sm:$0xf] %vm766_vm2, %v4421_v51  ;;  %v1252_v42 = vrot.slane %v1250_v28, 7  ;;  %v2306_v51 = vrot.slane %v2305_v22, 4  ;;  %16996 = vst [vmem:[#allocation10_spill] sm:$0xff] %v12107_v63  ;;  %v5492_v22 = vrot.slane %v5269_v54, 5 }
 0x16d   :  { %2960 = vrot.lane.b32.xlu0 %v2325_v8, %s11181_s26  ;;  %2962 = vrot.lane.b32.xlu1 %v2335_v32, %s11181_s26  ;;  %v1270_v8 = vshll.u32 %v10588_v50, 16  ;;  %v3882_v32 = vld [vmem:[#allocation2 + $0x58] sm:$0xf]  ;;  %v6494_v59 = vsel %vm11625_vm15, %v6489_v12, %v6493_v14  ;;  %v1799_v50 = vsel %vm11554_vm9, %v1274_v58, %v1798_v41  ;;  %v6321_v1 = vld [vmem:[#allocation2 + $0x60] sm:$0xf] }
 0x16e   :  { %v1255_v20 = vor.u32 %v1253_v29, %v1252_v42  ;;  %1800 = vst [vmem:[#allocation2 + $0x98] sm:$0x1] %v1799_v50  ;;  %v1949_v12 = vld [vmem:[#allocation2 + $0x30] sm:$0xf]  ;;  %v1950_v14 = vld [vmem:[#allocation2 + $0x34] sm:$0xf]  ;;  %v2301_v29 = vsel %vm11625_vm15, %v2296_v19, %v12062_v56 }
 0x16f   :  { %v12056_v47 = vpop.permute.xlu0 %3620  ;;  %v5667_v49 = vpop.permute.xlu1 %5666  ;;  %v1272_v48 = vor.u32 %v1270_v8, %v1269_v31  ;;  %v12121_v27 = vld [vmem:[#allocation2 + $0x58] sm:$0xf]  ;;  %2013 = vst.msk [vmem:[#allocation3 + $0x60] sm:$0xf] %vm766_vm2, %v1949_v12  ;;  %2014 = vst.msk [vmem:[#allocation3 + $0x6c] sm:$0xf] %vm766_vm2, %v1950_v14 }
 0x170   :  { %5856 = vst.msk [vmem:[#allocation3 + $0x1c] sm:$0xf] %vm3128_vm0, %v5667_v49  ;;  %v1791_v49 = vld [vmem:[#allocation2 + $0x8c] sm:$0x1]  ;;  %v3217_v31 = vld [vmem:[#allocation2 + $0x60] sm:$0xe] }
 0x171   :  { %6067 = vrot.lane.b32.xlu0 %v5929_v46, %s11180_s25  ;;  %6069 = vrot.lane.b32.xlu1 %v5930_v37, %s11180_s25  ;;  %v1248_v46 = vrot.slane %v12030_v17, 4  ;;  %v4406_v37 = vrot.slane %v4405_v55, 4  ;;  %v1257_v17 = vrot.slane %v1252_v42, 4  ;;  %v1273_v23 = vsel %vm11548_vm8, %v1265_v34, %v1272_v48  ;;  %v12126_v28 = vld [vmem:[#allocation2 + $0x2c] sm:$0x1] }
 0x172   :  { %1797 = vst.msk [vmem:[#allocation2 + $0x94] sm:$0xf] %vm766_vm2, %v1273_v23  ;;  %16997 = vst [vmem:[#allocation11_spill] sm:$0xff] %v12126_v28  ;;  %v5491_v34 = vrot.slane %v5489_v24, 4  ;;  %v3446_v55 = vrot.slane %v12098_v26, 5  ;;  %v6544_v42 = vshrl.u32 %v6321_v1, 16 }
 0x173   :  { %v12068_v6 = vpop.permute.xlu0 %6055  ;;  %v5669_v10 = vpop.permute.xlu1 %5668  ;;  %v4411_v60 = vsel %vm11625_vm15, %v4406_v37, %v12028_v3  ;;  %v1256_v5 = vsel %vm11548_vm8, %v1248_v46, %v1255_v20  ;;  %v16925_v46 = vrot.slane %v12094_v21, 5  ;;  %v3219_v41 = vld [vmem:[#allocation2 + $0x68] sm:$0x1]  ;;  %v6547_v56 = vshll.u32 %v6321_v1, 16  ;;  %v5266_v48 = vld [vmem:[#allocation2 + $0x5c] sm:$0x1] }
 0x174   :  { %5857 = vst.msk [vmem:[#allocation3 + $0x28] sm:$0xf] %vm3128_vm0, %v5669_v10  ;;  %v1792_v10 = vsel %vm11554_vm9, %v1257_v17, %v1791_v49  ;;  %v5482_v58 = vrot.slane %v12121_v27, 5  ;;  %v10246_v54 = vrot.slane %v3217_v31, 9  ;;  %v12147_v20 = vld [vmem:[#allocation2 + $0x58] sm:$0xf]  ;;  %v5493_v26 = vsel %vm11586_vm12, %v5491_v34, %v5492_v22 }
 0x175   :  { %4021 = vrot.lane.b32.xlu0 %v3881_v62, %s11179_s24  ;;  %4023 = vrot.lane.b32.xlu1 %v3882_v32, %s11179_s24  ;;  %v10834_v62 = vpop.f32.mrf.mxu0  ;;  %5186 = vst.msk [vmem:[#allocation3 + $0x34] sm:$0xf] %vm766_vm2, %v4411_v60  ;;  %v10277_v32 = vrot.slane %v12080_v11, 9  ;;  %1790 = vst.msk [vmem:[#allocation2 + $0x88] sm:$0xf] %vm766_vm2, %v1256_v5  ;;  %v3448_v23 = vrot.slane %v3446_v55, 4 }
 0x176   :  { %v552_v39 = vadd.f32 %v11888_v4, %v10834_v62  ;;  %1793 = vst [vmem:[#allocation2 + $0x8c] sm:$0x1] %v1792_v10  ;;  %v3449_v50 = vrot.slane %v3219_v41, 5  ;;  %v6322_v60 = vld [vmem:[#allocation2 + $0x64] sm:$0xf]  ;;  %v12158_v62 = vrot.slane %v16925_v46, 4  ;;  %v3447_v41 = vsel %vm11586_vm12, %v10246_v54, %v3446_v55 }
 0x177   :  { %v12084_v43 = vpop.permute.xlu0 %4009  ;;  %v12086_v44 = vpop.permute.xlu1 %3622  ;;  %v5490_v17 = vsel %vm11586_vm12, %v10277_v32, %v5489_v24  ;;  %v12165_v16 = vld [vmem:[#allocation2 + $0x5c] sm:$0x1]  ;;  %v6546_v24 = vrot.slane %v6544_v42, 4  ;;  %v6549_v5 = vrot.slane %v6547_v56, 5  ;;  %v5484_v10 = vrot.slane %v5482_v58, 4 }
 0x178   :  { %v728_v49 = vmax.f32 %v552_v39, 0.0  ;;  %16999 = vst [vmem:[#allocation13_spill] sm:$0xff] %v12158_v62  ;;  %v5485_v12 = vrot.slane %v5266_v48, 5  ;;  %v3439_v14 = vrot.slane %v12147_v20, 5  ;;  %v2093_v39 = vld [vmem:[#allocation2 + $0x60] sm:$0xf]  ;;  %v3450_v42 = vsel %vm11586_vm12, %v3448_v23, %v3449_v50 }
 0x179   :  { %7179 = vrot.lane.b32.xlu0 %v6484_v30, %s11179_s24  ;;  %7181 = vrot.lane.b32.xlu1 %v6494_v59, %s11179_s24  ;;  %v2311_v30 = vsel %vm11625_vm15, %v2306_v51, %v2310_v53  ;;  %v12141_v59 = vld [vmem:[#allocation2 + $0x48] sm:$0xe]  ;;  %v6553_v34 = vshll.u32 %v6322_v60, 16  ;;  %v6557_v31 = vshrl.u32 %v6322_v60, 16  ;;  %v5935_v56 = vld [vmem:[#allocation2 + $0x78] sm:$0xf] }
 0x17a   :  { %16998 = vst [vmem:[#allocation12_spill] sm:$0xff] %v12141_v59  ;;  %v12170_v32 = vpack.c.bf16 %v728_v49, %v728_v49  ;;  %v12182_v48 = vld [vmem:[#allocation2 + $0x54] sm:$0xe]  ;;  %v2094_v49 = vld [vmem:[#allocation2 + $0x64] sm:$0xf]  ;;  %v2361_v60 = vshrl.u32 %v2093_v39, 16  ;;  %v5486_v55 = vsel %vm11586_vm12, %v5484_v10, %v5485_v12 }
 0x17b   :  { %v12116_v3 = vpop.permute.xlu0 %3616  ;;  %v12118_v8 = vpop.permute.xlu1 %3618  ;;  %v3441_v54 = vrot.slane %v3439_v14, 4  ;;  %v2370_v37 = vshll.u32 %v2094_v49, 16  ;;  %v10245_v10 = vrot.slane %v12182_v48, 9  ;;  %v6559_v12 = vrot.slane %v6557_v31, 4 }
 0x17c   :  { %v1293_v50 = vshrl.u32 %v12170_v32, 16 }
 0x17d   :  { %2956 = vrot.lane.b32.xlu0 %v2301_v29, %s11181_s26  ;;  %2958 = vrot.lane.b32.xlu1 %v2311_v30, %s11181_s26  ;;  %v3440_v27 = vsel %vm11586_vm12, %v10245_v10, %v3439_v14 }
 0x17e   :  { %v12212_v31 = vrot.slane %v1293_v50, 7 }
 0x17f   :  { %v2945_v51 = vpop.permute.xlu0 %2944  ;;  %v12145_v53 = vpop.permute.xlu1 %6057 }
 0x180   :  { %3133 = vst.msk [vmem:[#allocation3 + $0x30] sm:$0xf] %vm3128_vm0, %v2945_v51  ;;  %v3442_v51 = vrot.slane %v12165_v16, 5  ;;  %v2374_v16 = vshrl.u32 %v2094_v49, 16  ;;  %v1947_v49 = vld [vmem:[#allocation2 + $0x24] sm:$0xf] }
 0x181   :  { %5690 = vrot.lane.b32.xlu0 %v5490_v17, %s11181_s26  ;;  %5692 = vrot.lane.b32.xlu1 %v5493_v26, %s11181_s26  ;;  %3809 = vst.msk [vmem:[#allocation3 + $0x30] sm:$0xf] %vm3804_vm3, %v12056_v47  ;;  %v12175_v47 = vld [vmem:[#allocation2 + $0x54] sm:$0xe]  ;;  %v6550_v17 = vor.u32 %v6549_v5, %v6546_v24  ;;  %v12187_v26 = vld [vmem:[#allocation2 + $0x68] sm:$0x1] }
 0x182   :  { %v10276_v23 = vrot.slane %v12175_v47, 9  ;;  %v12198_v5 = vrot.slane %v6553_v34, 5  ;;  %v6563_v47 = vshll.u32 %v12187_v26, 16  ;;  %v3887_v34 = vld [vmem:[#allocation2 + $0x78] sm:$0xf]  ;;  %v3443_v50 = vsel %vm11586_vm12, %v3441_v54, %v3442_v51 }
 0x183   :  { %v6052_v29 = vpop.permute.xlu0 %6051  ;;  %v12173_v30 = vpop.permute.xlu1 %4011  ;;  %2011 = vst.msk [vmem:[#allocation3 + $0x48] sm:$0xf] %vm766_vm2, %v1947_v49 }
 0x184   :  { %6241 = vst.msk [vmem:[#allocation3 + $0x1c] sm:$0xf] %vm3804_vm3, %v6052_v29  ;;  %v543_v29 = vpop.f32.mrf.mxu0  ;;  %v6560_v49 = vor.u32 %v6559_v12, %v12198_v5 }
 0x185   :  { %3644 = vrot.lane.b32.xlu0 %v3447_v41, %s11180_s25  ;;  %3646 = vrot.lane.b32.xlu1 %v3450_v42, %s11180_s25  ;;  %v2364_v42 = vshll.u32 %v2093_v39, 16  ;;  %v544_v24 = vadd.f32 %v11888_v4, %v543_v29  ;;  %v12206_v39 = vrot.slane %v6550_v17, 4  ;;  %v12208_v4 = vrot.slane %v2361_v60, 4  ;;  %v2095_v29 = vld [vmem:[#allocation2 + $0x68] sm:$0x1] }
 0x186   :  { %v12217_v17 = vrot.slane %v2370_v37, 5  ;;  %v12219_v60 = vrot.slane %v2374_v16, 4 }
 0x187   :  { %v4006_v41 = vpop.permute.xlu0 %4005  ;;  %v2947_v22 = vpop.permute.xlu1 %2946  ;;  %v12215_v26 = vrot.slane %v2364_v42, 5  ;;  %v4271_v42 = vld [vmem:[#allocation2 + $0x50] sm:$0x1] }
 0x188   :  { %4194 = vst.msk [vmem:[#allocation3 + $0x30] sm:$0xf] %vm4189_vm4, %v4006_v41  ;;  %v726_v41 = vmax.f32 %v544_v24, 0.0  ;;  %v4490_v54 = vshll.u32 %v4271_v42, 16  ;;  %v2377_v20 = vor.u32 %v12219_v60, %v12217_v17 }
 0x189   :  { %3134 = vst.msk [vmem:[#allocation3 + $0x3c] sm:$0xf] %vm3128_vm0, %v2947_v22  ;;  %6079 = vrot.lane.b32.xlu0 %v5935_v56, %s11180_s25  ;;  %5688 = vrot.lane.b32.xlu1 %v5486_v55, %s11181_s26  ;;  %v1948_v22 = vld [vmem:[#allocation2 + $0x28] sm:$0xf] }
 0x18a   :  { %3810 = vst.msk [vmem:[#allocation3 + $0x3c] sm:$0xf] %vm3804_vm3, %v12086_v44  ;;  %v1296_v44 = vshll.u32 %v12170_v32, 16  ;;  %v4269_v55 = vld [vmem:[#allocation2 + $0x48] sm:$0xf]  ;;  %v10589_v42 = vpack.c.bf16 %v726_v41, %v726_v41 }
 0x18b   :  { %2012 = vst.msk [vmem:[#allocation3 + $0x54] sm:$0xf] %vm766_vm2, %v1948_v22  ;;  %v2941_v48 = vpop.permute.xlu0 %2940  ;;  %v6054_v56 = vpop.permute.xlu1 %6053  ;;  %v4270_v32 = vld [vmem:[#allocation2 + $0x4c] sm:$0xf]  ;;  %v4471_v22 = vshrl.u32 %v4269_v55, 16  ;;  %v4474_v61 = vshll.u32 %v4269_v55, 16 }
 0x18c   :  { %3131 = vst.msk [vmem:[#allocation3 + $0x18] sm:$0xf] %vm3128_vm0, %v2941_v48  ;;  %v4480_v37 = vshll.u32 %v4270_v32, 16  ;;  %v4484_v16 = vshrl.u32 %v4270_v32, 16  ;;  %v1298_v12 = vor.u32 %v1296_v44, %v12212_v31  ;;  %v12239_v32 = vrot.slane %v6560_v49, 4  ;;  %v10835_v49 = vpop.f32.mrf.mxu0 }
 0x18d   :  { %6242 = vst.msk [vmem:[#allocation3 + $0x28] sm:$0xf] %vm3804_vm3, %v6054_v56  ;;  %3807 = vst.msk [vmem:[#allocation3 + $0x18] sm:$0xf] %vm3804_vm3, %v12116_v3  ;;  %4033 = vrot.lane.b32.xlu0 %v3887_v34, %s11179_s24  ;;  %3642 = vrot.lane.b32.xlu1 %v3443_v50, %s11180_s25  ;;  %v4473_v24 = vrot.slane %v4471_v22, 4  ;;  %v4476_v51 = vrot.slane %v4474_v61, 5  ;;  %v5483_v3 = vsel %vm11586_vm12, %v10276_v23, %v5482_v58 }
 0x18e   :  { %4192 = vst.msk [vmem:[#allocation3 + $0x18] sm:$0xf] %vm4189_vm4, %v12032_v18  ;;  %v2380_v34 = vshll.u32 %v2095_v29, 16  ;;  %v4482_v55 = vrot.slane %v4480_v37, 5  ;;  %v4486_v50 = vrot.slane %v4484_v16, 4  ;;  %v12241_v61 = vrot.slane %v6563_v47, 5 }
 0x18f   :  { %v2943_v48 = vpop.permute.xlu0 %2942  ;;  %v4008_v56 = vpop.permute.xlu1 %4007  ;;  %v5936_v18 = vld [vmem:[#allocation2 + $0x7c] sm:$0xf]  ;;  %v6318_v44 = vld [vmem:[#allocation2 + $0x54] sm:$0xf]  ;;  %v4477_v22 = vor.u32 %v4476_v51, %v4473_v24  ;;  %v2367_v58 = vor.u32 %v12215_v26, %v12208_v4  ;;  %v4492_v47 = vrot.slane %v4490_v54, 5  ;;  %v1276_v60 = vshrl.u32 %v10589_v42, 16 }
 0x190   :  { %3132 = vst.msk [vmem:[#allocation3 + $0x24] sm:$0xf] %vm3128_vm0, %v2943_v48  ;;  %v4487_v23 = vor.u32 %v4486_v50, %v4482_v55  ;;  %v1808_v29 = vld [vmem:[#allocation2 + $0xa8] sm:$0xf]  ;;  %v6319_v41 = vld [vmem:[#allocation2 + $0x58] sm:$0xf] }
 0x191   :  { %4195 = vst.msk [vmem:[#allocation3 + $0x3c] sm:$0xf] %vm4189_vm4, %v4008_v56  ;;  %5686 = vrot.lane.b32.xlu0 %v5483_v3, %s11181_s26  ;;  %6081 = vrot.lane.b32.xlu1 %v5936_v18, %s11180_s25  ;;  %v4478_v14 = vrot.slane %v4477_v22, 4  ;;  %v1809_v10 = vsel %vm11538_vm6, %v1298_v12, %v1808_v29  ;;  %v3888_v37 = vld [vmem:[#allocation2 + $0x7c] sm:$0xf]  ;;  %v12263_v16 = vrot.slane %v2380_v34, 5  ;;  %v546_v18 = vpop.f32.mrf.mxu0 }
 0x192   :  { %3808 = vst.msk [vmem:[#allocation3 + $0x24] sm:$0xf] %vm3804_vm3, %v12118_v8  ;;  %v6556_v8 = vsel %vm11625_vm15, %v12206_v39, %v12198_v5  ;;  %v6520_v24 = vshrl.u32 %v6318_v44, 16  ;;  %v4488_v51 = vrot.slane %v4487_v23, 4  ;;  %1810 = vst [vmem:[#allocation2 + $0xa8] sm:$0xf] %v1809_v10  ;;  %v6566_v5 = vsel %vm11625_vm15, %v12239_v32, %v12241_v61 }
 0x193   :  { %4193 = vst.msk [vmem:[#allocation3 + $0x24] sm:$0xf] %vm4189_vm4, %v12034_v25  ;;  %v5675_v4 = vpop.permute.xlu0 %5674  ;;  %v5677_v26 = vpop.permute.xlu1 %5676  ;;  %v6523_v25 = vshll.u32 %v6318_v44, 16  ;;  %v4483_v39 = vsel %vm11625_vm15, %v4478_v14, %v4482_v55  ;;  %v1279_v54 = vshll.u32 %v10589_v42, 16  ;;  %v4267_v12 = vld [vmem:[#allocation2 + $0x40] sm:$0xf] }
 0x194   :  { %5860 = vst.msk [vmem:[#allocation3 + $0x4c] sm:$0xf] %vm3128_vm0, %v5675_v4  ;;  %5861 = vst.msk [vmem:[#allocation3 + $0x58] sm:$0xf] %vm3128_vm0, %v5677_v26  ;;  %v4268_v48 = vld [vmem:[#allocation2 + $0x44] sm:$0x1]  ;;  %v4493_v50 = vsel %vm11625_vm15, %v4488_v51, %v4492_v47 }
 0x195   :  { %7191 = vrot.lane.b32.xlu0 %v6556_v8, %s11179_s24  ;;  %4035 = vrot.lane.b32.xlu1 %v3888_v37, %s11179_s24  ;;  %v2368_v56 = vrot.slane %v2367_v58, 4  ;;  %v6529_v3 = vshll.u32 %v6319_v41, 16  ;;  %v6533_v34 = vshrl.u32 %v6319_v41, 16  ;;  %5192 = vst.msk [vmem:[#allocation3 + $0x7c] sm:$0xf] %vm766_vm2, %v4483_v39  ;;  %v12281_v61 = vrot.slane %v1276_v60, 7 }
 0x196   :  { %v12278_v32 = vld [vmem:[#allocation2 + $0x5c] sm:$0x1]  ;;  %v2090_v55 = vld [vmem:[#allocation2 + $0x54] sm:$0xf]  ;;  %5193 = vst.msk [vmem:[#allocation3 + $0x88] sm:$0xf] %vm766_vm2, %v4493_v50 }
 0x197   :  { %v4456_v44 = vshll.u32 %v4267_v12, 16  ;;  %v4460_v22 = vshrl.u32 %v4267_v12, 16  ;;  %v4466_v42 = vshll.u32 %v4268_v48, 16  ;;  %v12283_v23 = vpop.permute.xlu0 %3628  ;;  %v12285_v58 = vpop.permute.xlu1 %3630  ;;  %v2378_v29 = vrot.slane %v2377_v20, 4  ;;  %v1801_v47 = vld [vmem:[#allocation2 + $0x9c] sm:$0xf] }
 0x198   :  { %v12287_v8 = vrot.slane %v6520_v24, 4  ;;  %v12289_v41 = vrot.slane %v6523_v25, 5  ;;  %v12294_v14 = vld [vmem:[%s16919_s2] ss:$0 sm:$0xff]  ;;  %v11035_v4 = vld [vmem:[%s16918_s0 + $0xb0] sm:$0xff]   ;;  %v1281_v37 = vor.u32 %v1279_v54, %v12281_v61  ;;  %v11036_v51 = vld [vmem:[%s16918_s0 + $0xb8] sm:$0xff]  }
 0x199   :  { %v555_v10 = vadd.f32 %v12294_v14, %v10835_v49  ;;  %v2091_v26 = vld [vmem:[#allocation2 + $0x58] sm:$0xf]  ;;  %v12301_v20 = vrot.slane %v4456_v44, 5  ;;  %v4462_v24 = vrot.slane %v4460_v22, 4  ;;  %v547_v25 = vadd.f32 %v12294_v14, %v546_v18  ;;  %3640 = vrot.lane.b32.xlu0 %v3440_v27, %s11180_s25  ;;  %7193 = vrot.lane.b32.xlu1 %v6566_v5, %s11179_s24 }
 0x19a   :  { %v2373_v49 = vsel %vm11625_vm15, %v2368_v56, %v12217_v17  ;;  %v12312_v39 = vrot.slane %v6529_v3, 5  ;;  %v6535_v60 = vrot.slane %v6533_v34, 4  ;;  %v2337_v54 = vshrl.u32 %v2090_v55, 16  ;;  %10852 = vmatprep.mubr.msk.bf16.mxu0 %vm312_vm1, %v11035_v4  ;;  %v5933_v4 = vld [vmem:[#allocation2 + $0x6c] sm:$0xf] }
 0x19b   :  { %v2340_v12 = vshll.u32 %v2090_v55, 16  ;;  %v1802_v48 = vsel %vm11538_vm6, %v1281_v37, %v1801_v47  ;;  %v4463_v50 = vor.u32 %v4462_v24, %v12301_v20  ;;  %v4468_v18 = vrot.slane %v4466_v42, 5  ;;  %v12318_v27 = vpop.permute.xlu0 %6063  ;;  %v5673_v5 = vpop.permute.xlu1 %5672  ;;  %v4266_v55 = vld [vmem:[#allocation2 + $0x3c] sm:$0xf]  ;;  %10853 = vmatmul.mubr.msk.bf16.gmra.mxu0 %vm312_vm1, %v11036_v51 }
 0x19c   :  { %v2383_v17 = vsel %vm11625_vm15, %v2378_v29, %v12263_v16  ;;  %v6539_v56 = vshll.u32 %v12278_v32, 16  ;;  %v2346_v3 = vshll.u32 %v2091_v26, 16  ;;  %1803 = vst [vmem:[#allocation2 + $0x9c] sm:$0xf] %v1802_v48  ;;  %v729_v34 = vmax.f32 %v555_v10, 0.0 }
 0x19d   :  { %5859 = vst.msk [vmem:[#allocation3 + $0x40] sm:$0xf] %vm3128_vm0, %v5673_v5  ;;  %v6526_v44 = vor.u32 %v12289_v41, %v12287_v8  ;;  %v2350_v22 = vshrl.u32 %v2091_v26, 16  ;;  %v4464_v42 = vrot.slane %v4463_v50, 4  ;;  %v727_v47 = vmax.f32 %v547_v25, 0.0  ;;  %2968 = vrot.lane.b32.xlu0 %v2373_v49, %s11181_s26  ;;  %2970 = vrot.lane.b32.xlu1 %v2383_v17, %s11181_s26 }
 0x19e   :  { %6244 = vst.msk [vmem:[#allocation3 + $0x40] sm:$0xf] %vm3804_vm3, %v12145_v53  ;;  %v6536_v16 = vor.u32 %v6535_v60, %v12312_v39  ;;  %v12333_v32 = vrot.slane %v2337_v54, 4  ;;  %v10592_v29 = vpack.c.bf16 %v729_v34, %v729_v34  ;;  %v4447_v10 = vshrl.u32 %v4266_v55, 16  ;;  %v2092_v51 = vld [vmem:[#allocation2 + $0x5c] sm:$0x1] }
 0x19f   :  { %v12335_v37 = vrot.slane %v2340_v12, 5  ;;  %v4469_v8 = vsel %vm11625_vm15, %v4464_v42, %v4468_v18  ;;  %v10590_v41 = vpack.c.bf16 %v727_v47, %v727_v47  ;;  %v4450_v26 = vshll.u32 %v4266_v55, 16  ;;  %v12339_v24 = vpop.permute.xlu0 %4017  ;;  %v12341_v53 = vpop.permute.xlu1 %3626  ;;  %v5934_v48 = vld [vmem:[#allocation2 + $0x70] sm:$0xf]  ;;  %v3885_v42 = vld [vmem:[#allocation2 + $0x6c] sm:$0xf] }
 0x1a0   :  { %v12343_v25 = vrot.slane %v2346_v3, 5  ;;  %5191 = vst.msk [vmem:[#allocation3 + $0x70] sm:$0xf] %vm766_vm2, %v4469_v8  ;;  %v1301_v49 = vshrl.u32 %v10592_v29, 16  ;;  %v1304_v60 = vshll.u32 %v10592_v29, 16  ;;  %v4449_v54 = vrot.slane %v4447_v10, 4 }
 0x1a1   :  { %v12346_v12 = vrot.slane %v2350_v22, 4  ;;  %v1284_v50 = vshrl.u32 %v10590_v41, 16  ;;  %v1287_v5 = vshll.u32 %v10590_v41, 16  ;;  %v4452_v18 = vrot.slane %v4450_v26, 5  ;;  %6075 = vrot.lane.b32.xlu0 %v5933_v4, %s11180_s25  ;;  %6077 = vrot.lane.b32.xlu1 %v5934_v48, %s11180_s25  ;;  %v3886_v47 = vld [vmem:[#allocation2 + $0x70] sm:$0xf] }
 0x1a2   :  { %v12350_v17 = vrot.slane %v6526_v44, 4  ;;  %v12352_v3 = vrot.slane %v6539_v56, 5  ;;  %v1299_v34 = vrot.slane %v12212_v31, 4  ;;  %v1303_v55 = vrot.slane %v1301_v49, 7  ;;  %v1812_v10 = vld [vmem:[#allocation2 + $0xb0] sm:$0x1] }
 0x1a3   :  { %v2356_v29 = vshll.u32 %v2092_v51, 16  ;;  %v1282_v22 = vrot.slane %v12281_v61, 4  ;;  %v1286_v8 = vrot.slane %v1284_v50, 7  ;;  %v4453_v41 = vor.u32 %v4452_v18, %v4449_v54  ;;  %v5671_v26 = vpop.permute.xlu0 %5670  ;;  %v12356_v19 = vpop.permute.xlu1 %6065  ;;  %v1953_v31 = vld [vmem:[#allocation2 + $0x48] sm:$0xf] }
 0x1a4   :  { %v6537_v4 = vrot.slane %v6536_v16, 4  ;;  %v2343_v44 = vor.u32 %v12335_v37, %v12333_v32  ;;  %v1306_v56 = vor.u32 %v1304_v60, %v1303_v55  ;;  %v1308_v48 = vrot.slane %v1303_v55, 4  ;;  %5858 = vst.msk [vmem:[#allocation3 + $0x34] sm:$0xf] %vm3128_vm0, %v5671_v26  ;;  %v12363_v61 = vld [vmem:[#allocation2 + $0x7c] sm:$0xf] }
 0x1a5   :  { %v2353_v51 = vor.u32 %v12346_v12, %v12343_v25  ;;  %v1289_v49 = vor.u32 %v1287_v5, %v1286_v8  ;;  %v1291_v54 = vrot.slane %v1286_v8, 4  ;;  %v4454_v50 = vrot.slane %v4453_v41, 4  ;;  %2017 = vst.msk [vmem:[#allocation3 + $0x90] sm:$0xf] %vm766_vm2, %v1953_v31  ;;  %v1954_v16 = vld [vmem:[#allocation2 + $0x4c] sm:$0xf]  ;;  %4029 = vrot.lane.b32.xlu0 %v3885_v42, %s11179_s24  ;;  %4031 = vrot.lane.b32.xlu1 %v3886_v47, %s11179_s24 }
 0x1a6   :  { %v12366_v18 = vld [vmem:[#allocation2 + $0x3c] sm:$0xe]  ;;  %v12368_v32 = vld [vmem:[#allocation2 + $0x4c] sm:$0xf]  ;;  %v12370_v37 = vld [vmem:[#allocation2 + $0x50] sm:$0x1]  ;;  %v1307_v60 = vsel %vm11548_vm8, %v1299_v34, %v1306_v56  ;;  %v1813_v12 = vsel %vm11554_vm9, %v1308_v48, %v1812_v10 }
 0x1a7   :  { %17000 = vst [vmem:[#allocation14_spill] sm:$0xff] %v12366_v18  ;;  %17001 = vst [vmem:[#allocation15_spill] sm:$0xff] %v12368_v32  ;;  %v12381_v5 = vld [vmem:[#allocation2 + $0x40] sm:$0xf]  ;;  %v12385_v8 = vld [vmem:[#allocation2 + $0x54] sm:$0xe]  ;;  %v1806_v34 = vsel %vm11554_vm9, %v1291_v54, %v1805_v40  ;;  %v4459_v42 = vsel %vm11625_vm15, %v4454_v50, %v12301_v20  ;;  %v7176_v10 = vpop.permute.xlu0 %7175  ;;  %v12397_v41 = vpop.permute.xlu1 %4019  ;;  %v6532_v40 = vsel %vm11625_vm15, %v12350_v17, %v12312_v39 }
 0x1a8   :  { %17002 = vst [vmem:[#allocation16_spill] sm:$0xff] %v12370_v37  ;;  %6243 = vst.msk [vmem:[#allocation3 + $0x34] sm:$0xf] %vm3804_vm3, %v12068_v6  ;;  %v12383_v55 = vld [vmem:[#allocation2 + $0x60] sm:$0xe]  ;;  %v1290_v6 = vsel %vm11548_vm8, %v1282_v22, %v1289_v49  ;;  %v2358_v26 = vrot.slane %v2356_v29, 5  ;;  %v6542_v20 = vsel %vm11625_vm15, %v6537_v4, %v12352_v3 }
 0x1a9   :  { %2018 = vst.msk [vmem:[#allocation3 + $0x9c] sm:$0xf] %vm766_vm2, %v1954_v16  ;;  %17003 = vst [vmem:[#allocation17_spill] sm:$0xff] %v12381_v5  ;;  %v12395_v47 = vld [vmem:[#allocation2 + $0x64] sm:$0xf]  ;;  %v5503_v48 = vrot.slane %v12363_v61, 5  ;;  %7187 = vrot.lane.b32.xlu0 %v6532_v40, %s11179_s24  ;;  %7189 = vrot.lane.b32.xlu1 %v6542_v20, %s11179_s24 }
 0x1aa   :  { %17004 = vst [vmem:[#allocation18_spill] sm:$0xff] %v12383_v55  ;;  %17005 = vst [vmem:[#allocation19_spill] sm:$0xff] %v12385_v8  ;;  %v5273_v56 = vld [vmem:[#allocation2 + $0x78] sm:$0xe]  ;;  %v2344_v29 = vrot.slane %v2343_v44, 4  ;;  %v2354_v22 = vrot.slane %v2353_v51, 4 }
 0x1ab   :  { %1811 = vst.msk [vmem:[#allocation2 + $0xac] sm:$0xf] %vm766_vm2, %v1307_v60  ;;  %1814 = vst [vmem:[#allocation2 + $0xb0] sm:$0x1] %v1813_v12  ;;  %v12410_v31 = vld [vmem:[#allocation2 + $0x7c] sm:$0xf]  ;;  %v12423_v60 = vpop.permute.xlu0 %3624  ;;  %v7178_v12 = vpop.permute.xlu1 %7177 }
 0x1ac   :  { %17006 = vst [vmem:[#allocation20_spill] sm:$0xff] %v12395_v47  ;;  %1804 = vst.msk [vmem:[#allocation2 + $0xa0] sm:$0xf] %vm766_vm2, %v1290_v6  ;;  %v12412_v61 = vld [vmem:[#allocation2 + $0x70] sm:$0xf]  ;;  %v10279_v44 = vrot.slane %v5273_v56, 9  ;;  %v2349_v20 = vsel %vm11625_vm15, %v2344_v29, %v12343_v25  ;;  %v2359_v56 = vsel %vm11625_vm15, %v2354_v22, %v2358_v26 }
 0x1ad   :  { %1807 = vst [vmem:[#allocation2 + $0xa4] sm:$0x1] %v1806_v34  ;;  %5190 = vst.msk [vmem:[#allocation3 + $0x64] sm:$0xf] %vm766_vm2, %v4459_v42  ;;  %v5275_v39 = vld [vmem:[#allocation2 + $0x80] sm:$0x1]  ;;  %2964 = vrot.lane.b32.xlu0 %v2349_v20, %s11181_s26  ;;  %2966 = vrot.lane.b32.xlu1 %v2359_v56, %s11181_s26 }
 0x1ae   :  { %7363 = vst.msk [vmem:[#allocation3 + $0x34] sm:$0xf] %vm4189_vm4, %v7176_v10  ;;  %v6327_v51 = vld [vmem:[#allocation2 + $0x78] sm:$0xf]  ;;  %v3460_v34 = vrot.slane %v12410_v31, 5  ;;  %v16926_v42 = vrot.slane %v12412_v61, 5  ;;  %v5504_v16 = vsel %vm11586_vm12, %v10279_v44, %v5503_v48 }
 0x1af   :  { %v3223_v6 = vld [vmem:[#allocation2 + $0x78] sm:$0xe]  ;;  %v6328_v10 = vld [vmem:[#allocation2 + $0x7c] sm:$0xf]  ;;  %v12427_v40 = vld [vmem:[#allocation2 + $0x68] sm:$0x1]  ;;  %v2953_v1 = vpop.permute.xlu0 %2952  ;;  %v2955_v11 = vpop.permute.xlu1 %2954 }
 0x1b0   :  { %17007 = vst [vmem:[#allocation21_spill] sm:$0xff] %v12427_v40  ;;  %7364 = vst.msk [vmem:[#allocation3 + $0x40] sm:$0xf] %vm4189_vm4, %v7178_v12  ;;  %v5505_v17 = vrot.slane %v5503_v48, 4  ;;  %v5506_v4 = vrot.slane %v5275_v39, 5  ;;  %v6592_v54 = vshrl.u32 %v6327_v51, 16  ;;  %v10838_v39 = vpop.f32.mrf.mxu0 }
 0x1b1   :  { %v3225_v3 = vld [vmem:[#allocation2 + $0x80] sm:$0x1]  ;;  %v5272_v50 = vld [vmem:[#allocation2 + $0x74] sm:$0x1]  ;;  %v12437_v31 = vld [vmem:[#allocation2 + $0x70] sm:$0xf]  ;;  %5698 = vrot.lane.b32.xlu0 %v5504_v16, %s11181_s26  ;;  %v12467_v16 = vadd.f32 %v12294_v14, %v10838_v39 }
 0x1b2   :  { %v6595_v49 = vshll.u32 %v6327_v51, 16  ;;  %v2099_v12 = vld [vmem:[#allocation2 + $0x78] sm:$0xf]  ;;  %v10248_v25 = vrot.slane %v3223_v6, 9  ;;  %v12441_v29 = vld [vmem:[#allocation2 + $0x74] sm:$0x1]  ;;  %v5507_v48 = vsel %vm11586_vm12, %v5505_v17, %v5506_v4 }
 0x1b3   :  { %v6601_v26 = vshll.u32 %v6328_v10, 16  ;;  %v6605_v22 = vshrl.u32 %v6328_v10, 16  ;;  %v3462_v46 = vrot.slane %v3460_v34, 4  ;;  %v3463_v20 = vrot.slane %v3225_v3, 5  ;;  %3137 = vst.msk [vmem:[#allocation3 + $0x60] sm:$0xf] %vm3128_vm0, %v2953_v1  ;;  %5700 = vrot.lane.b32.xlu1 %v5507_v48, %s11181_s26  ;;  %v12469_v48 = vpop.f32.mrf.mxu0 }
 0x1b4   :  { %v5498_v56 = vrot.slane %v16926_v42, 4  ;;  %v5499_v36 = vrot.slane %v5272_v50, 5  ;;  %3138 = vst.msk [vmem:[#allocation3 + $0x6c] sm:$0xf] %vm3128_vm0, %v2955_v11  ;;  %v16933_v44 = vrot.slane %v12437_v31, 5  ;;  %v2409_v51 = vshrl.u32 %v2099_v12, 16 }
 0x1b5   :  { %v2412_v6 = vshll.u32 %v2099_v12, 16  ;;  %v1952_v10 = vld [vmem:[#allocation2 + $0x40] sm:$0xf]  ;;  %3813 = vst.msk [vmem:[#allocation3 + $0x60] sm:$0xf] %vm3804_vm3, %v12283_v23  ;;  %v3456_v11 = vrot.slane %v12441_v29, 5  ;;  %v3461_v38 = vsel %vm11586_vm12, %v10248_v25, %v3460_v34  ;;  %v6060_v29 = vpop.permute.xlu0 %6059 }
 0x1b6   :  { %3814 = vst.msk [vmem:[#allocation3 + $0x6c] sm:$0xf] %vm3804_vm3, %v12285_v58  ;;  %v6594_v1 = vrot.slane %v6592_v54, 4  ;;  %v6597_v50 = vrot.slane %v6595_v49, 5  ;;  %v12462_v17 = vld [vmem:[#allocation2 + $0x6c] sm:$0xe]  ;;  %v6062_v54 = vpop.permute.xlu1 %6061  ;;  %v3464_v49 = vsel %vm11586_vm12, %v3462_v46, %v3463_v20  ;;  %v5500_v34 = vsel %vm11586_vm12, %v5498_v56, %v5499_v36  ;;  %3652 = vrot.lane.b32.xlu0 %v3461_v38, %s11180_s25 }
 0x1b7   :  { %2016 = vst.msk [vmem:[#allocation3 + $0x84] sm:$0xf] %vm766_vm2, %v1952_v10  ;;  %v12464_v4 = vrot.slane %v6601_v26, 5  ;;  %v6607_v23 = vrot.slane %v6605_v22, 4  ;;  %v4275_v12 = vld [vmem:[#allocation2 + $0x60] sm:$0xf]  ;;  %3654 = vrot.lane.b32.xlu1 %v3464_v49, %s11180_s25 }
 0x1b8   :  { %v4276_v58 = vld [vmem:[#allocation2 + $0x64] sm:$0xf]  ;;  %v6329_v25 = vld [vmem:[#allocation2 + $0x80] sm:$0x1]  ;;  %v2100_v10 = vld [vmem:[#allocation2 + $0x7c] sm:$0xf]  ;;  %v6598_v36 = vor.u32 %v6597_v50, %v6594_v1 }
 0x1b9   :  { %v4519_v26 = vshrl.u32 %v4275_v12, 16  ;;  %v4522_v3 = vshll.u32 %v4275_v12, 16  ;;  %6245 = vst.msk [vmem:[#allocation3 + $0x4c] sm:$0xf] %vm3804_vm3, %v6060_v29  ;;  %6246 = vst.msk [vmem:[#allocation3 + $0x58] sm:$0xf] %vm3804_vm3, %v6062_v54  ;;  %v6608_v29 = vor.u32 %v6607_v23, %v12464_v4 }
 0x1ba   :  { %v3455_v22 = vrot.slane %v16933_v44, 4  ;;  %v2411_v39 = vrot.slane %v2409_v51, 4  ;;  %v2414_v42 = vrot.slane %v2412_v6, 5  ;;  %v4528_v40 = vshll.u32 %v4276_v58, 16  ;;  %v4277_v55 = vld [vmem:[#allocation2 + $0x68] sm:$0x1]  ;;  %v10839_v44 = vpop.f32.mrf.mxu0  ;;  %v4014_v51 = vpop.permute.xlu0 %4013 }
 0x1bb   :  { %v3220_v46 = vld [vmem:[#allocation2 + $0x6c] sm:$0xe]  ;;  %v4521_v20 = vrot.slane %v4519_v26, 4  ;;  %v4524_v56 = vrot.slane %v4522_v3, 5  ;;  %v4532_v12 = vshrl.u32 %v4276_v58, 16  ;;  %v6611_v54 = vshll.u32 %v6329_v25, 16  ;;  %v4016_v6 = vpop.permute.xlu1 %4015  ;;  %5696 = vrot.lane.b32.xlu1 %v5500_v34, %s11181_s26 }
 0x1bc   :  { %v5939_v47 = vld [vmem:[#allocation2 + $0x90] sm:$0xf]  ;;  %v4530_v8 = vrot.slane %v4528_v40, 5  ;;  %v4538_v37 = vshll.u32 %v4277_v55, 16  ;;  %v10278_v59 = vrot.slane %v12462_v17, 9  ;;  %v2418_v32 = vshll.u32 %v2100_v10, 16 }
 0x1bd   :  { %v2101_v38 = vld [vmem:[#allocation2 + $0x80] sm:$0x1]  ;;  %v4525_v63 = vor.u32 %v4524_v56, %v4521_v20  ;;  %v4534_v49 = vrot.slane %v4532_v12, 4  ;;  %v12483_v1 = vld [vmem:[#allocation2 + $0x58] sm:$0xf]  ;;  %v3457_v3 = vsel %vm11586_vm12, %v3455_v22, %v3456_v11  ;;  %v10247_v40 = vrot.slane %v3220_v46, 9  ;;  %6087 = vrot.lane.b32.xlu0 %v5939_v47, %s11180_s25  ;;  %v562_v22 = vpop.f32.mrf.mxu0 }
 0x1be   :  { %17008 = vst [vmem:[#allocation22_spill] sm:$0xff] %v12483_v1  ;;  %4198 = vst.msk [vmem:[#allocation3 + $0x60] sm:$0xf] %vm4189_vm4, %v4014_v51  ;;  %v2415_v55 = vor.u32 %v2414_v42, %v2411_v39  ;;  %v2422_v50 = vshrl.u32 %v2100_v10, 16  ;;  %v12491_v17 = vrot.slane %v6598_v36, 4  ;;  %v4540_v25 = vrot.slane %v4538_v37, 5  ;;  %v7172_v42 = vpop.permute.xlu0 %7171 }
 0x1bf   :  { %4199 = vst.msk [vmem:[#allocation3 + $0x6c] sm:$0xf] %vm4189_vm4, %v4016_v6  ;;  %v4526_v23 = vrot.slane %v4525_v63, 4  ;;  %v4535_v58 = vor.u32 %v4534_v49, %v4530_v8  ;;  %v4273_v26 = vld [vmem:[#allocation2 + $0x58] sm:$0xf]  ;;  %v12493_v20 = vrot.slane %v6608_v29, 4  ;;  %v7174_v10 = vpop.permute.xlu1 %7173  ;;  %3650 = vrot.lane.b32.xlu1 %v3457_v3, %s11180_s25  ;;  %v12527_v3 = vadd.f32 %v12294_v14, %v10839_v44 }
 0x1c0   :  { %v12495_v56 = vrot.slane %v6611_v54, 5  ;;  %v2428_v12 = vshll.u32 %v2101_v38, 16  ;;  %v4274_v51 = vld [vmem:[#allocation2 + $0x5c] sm:$0x1]  ;;  %v4504_v11 = vshll.u32 %v4273_v26, 16  ;;  %v12497_v39 = vrot.slane %v2418_v32, 5 }
 0x1c1   :  { %v4531_v47 = vsel %vm11625_vm15, %v4526_v23, %v4530_v8  ;;  %v4536_v34 = vrot.slane %v4535_v58, 4  ;;  %v4508_v63 = vshrl.u32 %v4273_v26, 16  ;;  %7361 = vst.msk [vmem:[#allocation3 + $0x1c] sm:$0xf] %vm4189_vm4, %v7172_v42  ;;  %7362 = vst.msk [vmem:[#allocation3 + $0x28] sm:$0xf] %vm4189_vm4, %v7174_v10  ;;  %v560_v38 = vadd.f32 %v12294_v14, %v12469_v48 }
 0x1c2   :  { %v3891_v37 = vld [vmem:[#allocation2 + $0x90] sm:$0xf]  ;;  %v12503_v36 = vrot.slane %v2415_v55, 4  ;;  %v2424_v46 = vrot.slane %v2422_v50, 4  ;;  %5196 = vst.msk [vmem:[#allocation3 + $0xac] sm:$0xf] %vm766_vm2, %v4531_v47  ;;  %v2949_v48 = vpop.permute.xlu0 %2948 }
 0x1c3   :  { %v12506_v29 = vrot.slane %v4504_v11, 5  ;;  %v4514_v54 = vshll.u32 %v4274_v51, 16  ;;  %4041 = vrot.lane.b32.xlu0 %v3891_v37, %s11179_s24  ;;  %v4541_v8 = vsel %vm11625_vm15, %v4536_v34, %v4540_v25  ;;  %v4510_v6 = vrot.slane %v4508_v63, 4  ;;  %v6324_v58 = vld [vmem:[#allocation2 + $0x6c] sm:$0xf] }
 0x1c4   :  { %v17009_v49 = vrot.slane %v12412_v61, 5  ;;  %v17010_v50 = vrot.slane %v12437_v31, 5  ;;  %5197 = vst.msk [vmem:[#allocation3 + $0xb8] sm:$0xf] %vm766_vm2, %v4541_v8  ;;  %v12530_v25 = vadd.f32 %v12294_v14, %v562_v22  ;;  %v2951_v61 = vpop.permute.xlu1 %2950  ;;  %v6614_v31 = vsel %vm11625_vm15, %v12493_v20, %v12495_v56  ;;  %v4272_v51 = vld [vmem:[#allocation2 + $0x54] sm:$0xf] }
 0x1c5   :  { %v4511_v26 = vor.u32 %v4510_v6, %v12506_v29  ;;  %v4516_v44 = vrot.slane %v4514_v54, 5  ;;  %3135 = vst.msk [vmem:[#allocation3 + $0x48] sm:$0xf] %vm3128_vm0, %v2949_v48  ;;  %3136 = vst.msk [vmem:[#allocation3 + $0x54] sm:$0xf] %vm3128_vm0, %v2951_v61  ;;  %v12548_v11 = vrot.slane %v2428_v12, 5 }
 0x1c6   :  { %v5497_v55 = vsel %vm11586_vm12, %v10278_v59, %v17009_v49  ;;  %v12523_v23 = vsel %vm11586_vm12, %v10247_v40, %v17010_v50  ;;  %v6604_v59 = vsel %vm11625_vm15, %v12491_v17, %v12464_v4  ;;  %v6325_v40 = vld [vmem:[#allocation2 + $0x70] sm:$0xf]  ;;  %v5940_v14 = vld [vmem:[#allocation2 + $0x94] sm:$0xf]  ;;  %v2421_v4 = vsel %vm11625_vm15, %v12503_v36, %v12497_v39  ;;  %3811 = vst.msk [vmem:[#allocation3 + $0x48] sm:$0xf] %vm3804_vm3, %v12423_v60 }
 0x1c7   :  { %v2425_v17 = vor.u32 %v2424_v46, %v12497_v39  ;;  %v732_v22 = vmax.f32 %v12467_v16, 0.0  ;;  %3812 = vst.msk [vmem:[#allocation3 + $0x54] sm:$0xf] %vm3804_vm3, %v12341_v53  ;;  %5694 = vrot.lane.b32.xlu0 %v5497_v55, %s11181_s26  ;;  %6089 = vrot.lane.b32.xlu1 %v5940_v14, %s11180_s25  ;;  %v6568_v42 = vshrl.u32 %v6324_v58, 16  ;;  %v4512_v10 = vrot.slane %v4511_v26, 4  ;;  %v5683_v53 = vpop.permute.xlu0 %5682 }
 0x1c8   :  { %v730_v47 = vmax.f32 %v560_v38, 0.0  ;;  %v4495_v34 = vshrl.u32 %v4272_v51, 16  ;;  %4196 = vst.msk [vmem:[#allocation3 + $0x48] sm:$0xf] %vm4189_vm4, %v12084_v43  ;;  %4197 = vst.msk [vmem:[#allocation3 + $0x54] sm:$0xf] %vm4189_vm4, %v12173_v30  ;;  %v5685_v46 = vpop.permute.xlu1 %5684 }
 0x1c9   :  { %v3892_v16 = vld [vmem:[#allocation2 + $0x94] sm:$0xf]  ;;  %v6571_v12 = vshll.u32 %v6324_v58, 16  ;;  %v6577_v60 = vshll.u32 %v6325_v40, 16  ;;  %v10595_v63 = vpack.c.bf16 %v732_v22, %v732_v22  ;;  %v4498_v37 = vshll.u32 %v4272_v51, 16 }
 0x1ca   :  { %v11023_v54 = vld [vmem:[#allocation3 + $0x18] ss:$12 sps:$4 sm:$0xff]   ;;  %v6581_v8 = vshrl.u32 %v6325_v40, 16  ;;  %v4517_v6 = vsel %vm11625_vm15, %v4512_v10, %v4516_v44  ;;  %v10593_v38 = vpack.c.bf16 %v730_v47, %v730_v47  ;;  %v4497_v49 = vrot.slane %v4495_v34, 4  ;;  %5864 = vst.msk [vmem:[#allocation3 + $0x7c] sm:$0xf] %vm3128_vm0, %v5683_v53 }
 0x1cb   :  { %5865 = vst.msk [vmem:[#allocation3 + $0x88] sm:$0xf] %vm3128_vm0, %v5685_v46  ;;  %v11025_v43 = vld [vmem:[#allocation3 + $0x1c] ss:$12 sps:$4 sm:$0xff]   ;;  %v12565_v30 = vrot.slane %v2425_v17, 4  ;;  %v1327_v55 = vshrl.u32 %v10595_v63, 16  ;;  %7199 = vrot.lane.b32.xlu0 %v6604_v59, %s11179_s24  ;;  %4043 = vrot.lane.b32.xlu1 %v3892_v16, %s11179_s24  ;;  %v12582_v47 = vpop.permute.xlu0 %3636 }
 0x1cc   :  { %5195 = vst.msk [vmem:[#allocation3 + $0xa0] sm:$0xf] %vm766_vm2, %v4517_v6  ;;  %v1330_v50 = vshll.u32 %v10595_v63, 16  ;;  %v4500_v58 = vrot.slane %v4498_v37, 5  ;;  %v12570_v48 = vrot.slane %v6568_v42, 4  ;;  %v1310_v40 = vshrl.u32 %v10593_v38, 16  ;;  %8863 = vmatprep.mubr.bf16.mxu1 %v11025_v43  ;;  %v12584_v42 = vpop.permute.xlu1 %3638 }
 0x1cd   :  { %v12572_v61 = vld [vmem:[#allocation2 + $0x6c] sm:$0xf]  ;;  %v1313_v26 = vshll.u32 %v10593_v38, 16  ;;  %v733_v44 = vmax.f32 %v12527_v3, 0.0  ;;  %v11026_v51 = vld [vmem:[#allocation3 + $0x34] ss:$12 sps:$4 sm:$0xff]   ;;  %8864 = vmatmul.mubr.bf16.vlgmr.msra.gmra.mxu1 %v11023_v54 }
 0x1ce   :  { %v12575_v14 = vrot.slane %v6571_v12, 5  ;;  %v12577_v17 = vld [vmem:[#allocation2 + $0x70] sm:$0xf]  ;;  %v12579_v22 = vrot.slane %v1327_v55, 7  ;;  %v4501_v10 = vor.u32 %v4500_v58, %v4497_v49  ;;  %v731_v59 = vmax.f32 %v12530_v25, 0.0  ;;  %8871 = vmatprep.mubr.bf16.mxu1 %v11026_v51 }
 0x1cf   :  { %v12586_v34 = vrot.slane %v6577_v60, 5  ;;  %v12588_v16 = vrot.slane %v6581_v8, 4  ;;  %v1822_v3 = vld [vmem:[#allocation2 + $0xc0] sm:$0xf]  ;;  %v12590_v63 = vrot.slane %v1310_v40, 7  ;;  %v10596_v12 = vpack.c.bf16 %v733_v44, %v733_v44  ;;  %3648 = vrot.lane.b32.xlu0 %v12523_v23, %s11180_s25  ;;  %7201 = vrot.lane.b32.xlu1 %v6614_v31, %s11179_s24  ;;  %v7977_v55 = vld [vmem:[#allocation3 + $0x3c] sm:$0xff]  ;;  %v12614_v58 = vpop.permute.xlu0 %6071 }
 0x1d0   :  { %v2385_v37 = vshrl.u32 %v12572_v61, 16  ;;  %v1332_v53 = vor.u32 %v1330_v50, %v12579_v22  ;;  %v1815_v46 = vld [vmem:[#allocation2 + $0xb4] sm:$0xf]  ;;  %v4502_v25 = vrot.slane %v4501_v10, 4  ;;  %v10594_v6 = vpack.c.bf16 %v731_v59, %v731_v59  ;;  %v1957_v38 = vld [vmem:[#allocation2 + $0x60] sm:$0xf] }
 0x1d1   :  { %v2388_v60 = vshll.u32 %v12572_v61, 16  ;;  %v1315_v54 = vor.u32 %v1313_v26, %v12590_v63  ;;  %v1335_v8 = vshrl.u32 %v10596_v12, 16  ;;  %v1338_v49 = vshll.u32 %v10596_v12, 16  ;;  %2021 = vst.msk [vmem:[#allocation3 + $0xc0] sm:$0xf] %vm766_vm2, %v1957_v38  ;;  %v11042_v23 = vld [vmem:[%s16918_s0 + $0xc0] sm:$0xff]   ;;  %v5681_v61 = vpop.permute.xlu1 %5680 }
 0x1d2   :  { %v1958_v43 = vld [vmem:[#allocation2 + $0x64] sm:$0xf]  ;;  %v1823_v50 = vsel %vm11538_vm6, %v1332_v53, %v1822_v3  ;;  %v4507_v20 = vsel %vm11625_vm15, %v4502_v25, %v12506_v29  ;;  %v1318_v56 = vshrl.u32 %v10594_v6, 16  ;;  %v1321_v31 = vshll.u32 %v10594_v6, 16  ;;  %v12616_v40 = vld [vmem:[#allocation2 + $0x74] sm:$0x1]  ;;  %10856 = vmatprep.mubr.msk.bf16.mxu0 %vm312_vm1, %v11042_v23 }
 0x1d3   :  { %2022 = vst.msk [vmem:[#allocation3 + $0xcc] sm:$0xf] %vm766_vm2, %v1958_v43  ;;  %v2394_v26 = vshll.u32 %v12577_v17, 16  ;;  %v1333_v44 = vrot.slane %v12579_v22, 4  ;;  %1824 = vst [vmem:[#allocation2 + $0xc0] sm:$0xf] %v1823_v50  ;;  %v1816_v51 = vsel %vm11538_vm6, %v1315_v54, %v1815_v46  ;;  %v2431_v22 = vsel %vm11625_vm15, %v12565_v30, %v12548_v11  ;;  %2976 = vrot.lane.b32.xlu0 %v2421_v4, %s11181_s26 }
 0x1d4   :  { %5194 = vst.msk [vmem:[#allocation3 + $0x94] sm:$0xf] %vm766_vm2, %v4507_v20  ;;  %v1337_v29 = vrot.slane %v1335_v8, 7  ;;  %v11043_v10 = vld [vmem:[%s16918_s0 + $0xc8] sm:$0xff]   ;;  %v12627_v59 = vld [vmem:[#allocation2 + $0x78] sm:$0xe]  ;;  %2978 = vrot.lane.b32.xlu1 %v2431_v22, %s11181_s26  ;;  %v6574_v30 = vor.u32 %v12575_v14, %v12570_v48 }
 0x1d5   :  { %17011 = vst [vmem:[#allocation23_spill] sm:$0xff] %v12627_v59  ;;  %v12629_v3 = vld [vmem:[#allocation2 + $0x6c] sm:$0xe]  ;;  %v7975_v12 = vld [vmem:[#allocation3 + $0x30] sm:$0xff]  ;;  %5863 = vst.msk [vmem:[#allocation3 + $0x70] sm:$0xf] %vm3128_vm0, %v5681_v61  ;;  %10857 = vmatmul.mubr.msk.bf16.gmra.mxu0 %vm312_vm1, %v11043_v10  ;;  %v12663_v48 = vpop.permute.xlu1 %3634 }
 0x1d6   :  { %17012 = vst [vmem:[#allocation24_spill] sm:$0xff] %v12629_v3  ;;  %v2398_v53 = vshrl.u32 %v12577_v17, 16  ;;  %v1316_v46 = vrot.slane %v12590_v63, 4  ;;  %1817 = vst [vmem:[#allocation2 + $0xb4] sm:$0xf] %v1816_v51  ;;  %v1320_v6 = vrot.slane %v1318_v56, 7  ;;  %v10341_v11 = vcombine.low %v7975_v12, %v7977_v55  ;;  %v12661_v55 = vpop.permute.xlu0 %4025 }
 0x1d7   :  { %v1826_v25 = vld [vmem:[#allocation2 + $0xc8] sm:$0x1]  ;;  %v12638_v38 = vld [vmem:[#allocation2 + $0x7c] sm:$0xf]  ;;  %6248 = vst.msk [vmem:[#allocation3 + $0x70] sm:$0xf] %vm3804_vm3, %v12356_v19  ;;  %v1340_v17 = vor.u32 %v1338_v49, %v1337_v29  ;;  %v6584_v19 = vor.u32 %v12588_v16, %v12586_v34 }
 0x1d8   :  { %17013 = vst [vmem:[#allocation25_spill] sm:$0xff] %v12638_v38  ;;  %v1342_v63 = vrot.slane %v1337_v29, 4  ;;  %v1819_v54 = vld [vmem:[#allocation2 + $0xbc] sm:$0x1]  ;;  %v12651_v8 = vld [vmem:[#allocation2 + $0x80] sm:$0x1]  ;;  %v1323_v39 = vor.u32 %v1321_v31, %v1320_v6  ;;  %8872 = vmatmul.mubr.bf16.gmra.mxu1 %v10341_v11 }
 0x1d9   :  { %17014 = vst [vmem:[#allocation26_spill] sm:$0xff] %v12651_v8  ;;  %v12653_v43 = vld [vmem:[#allocation2 + $0x70] sm:$0xf]  ;;  %v6587_v23 = vshll.u32 %v12616_v40, 16  ;;  %v1325_v36 = vrot.slane %v1320_v6, 4  ;;  %v2387_v49 = vrot.slane %v2385_v37, 4  ;;  %v1341_v20 = vsel %vm11548_vm8, %v1333_v44, %v1340_v17  ;;  %v12691_v6 = vpop.permute.xlu1 %6073 }
 0x1da   :  { %17015 = vst [vmem:[#allocation27_spill] sm:$0xff] %v12653_v43  ;;  %v12659_v4 = vld [vmem:[#allocation2 + $0x90] sm:$0xe]  ;;  %v5937_v14 = vld [vmem:[#allocation2 + $0x84] sm:$0xf]  ;;  %v2390_v50 = vrot.slane %v2388_v60, 5  ;;  %v1827_v16 = vsel %vm11554_vm9, %v1342_v63, %v1826_v25  ;;  %v1324_v51 = vsel %vm11548_vm8, %v1316_v46, %v1323_v39  ;;  %v5679_v25 = vpop.permute.xlu0 %5678 }
 0x1db   :  { %17016 = vst [vmem:[#allocation28_spill] sm:$0xff] %v12659_v4  ;;  %v5938_v56 = vld [vmem:[#allocation2 + $0x88] sm:$0xf]  ;;  %v12669_v31 = vrot.slane %v2394_v26, 5  ;;  %v2098_v61 = vld [vmem:[#allocation2 + $0x74] sm:$0x1]  ;;  %v1820_v37 = vsel %vm11554_vm9, %v1325_v36, %v1819_v54  ;;  %6083 = vrot.lane.b32.xlu0 %v5937_v14, %s11180_s25 }
 0x1dc   :  { %v2400_v40 = vrot.slane %v2398_v53, 4  ;;  %1825 = vst.msk [vmem:[#allocation2 + $0xc4] sm:$0xf] %vm766_vm2, %v1341_v20  ;;  %1828 = vst [vmem:[#allocation2 + $0xc8] sm:$0x1] %v1827_v16  ;;  %6085 = vrot.lane.b32.xlu1 %v5938_v56, %s11180_s25  ;;  %v6575_v17 = vrot.slane %v6574_v30, 4  ;;  %v2391_v14 = vor.u32 %v2390_v50, %v2387_v49 }
 0x1dd   :  { %1818 = vst.msk [vmem:[#allocation2 + $0xb8] sm:$0xf] %vm766_vm2, %v1324_v51  ;;  %1821 = vst [vmem:[#allocation2 + $0xbc] sm:$0x1] %v1820_v37  ;;  %v12685_v22 = vld [vmem:[#allocation2 + $0x84] sm:$0xe] }
 0x1de   :  { %17017 = vst [vmem:[#allocation29_spill] sm:$0xff] %v12685_v22  ;;  %v12687_v53 = vld [vmem:[#allocation2 + $0x94] sm:$0xf]  ;;  %v12689_v46 = vld [vmem:[#allocation2 + $0x98] sm:$0x1]  ;;  %v2404_v63 = vshll.u32 %v2098_v61, 16  ;;  %v2401_v20 = vor.u32 %v2400_v40, %v12669_v31  ;;  %v7184_v40 = vpop.permute.xlu0 %7183 }
 0x1df   :  { %17018 = vst [vmem:[#allocation30_spill] sm:$0xff] %v12687_v53  ;;  %17019 = vst [vmem:[#allocation31_spill] sm:$0xff] %v12689_v46  ;;  %v3889_v11 = vld [vmem:[#allocation2 + $0x84] sm:$0xf]  ;;  %v3890_v54 = vld [vmem:[#allocation2 + $0x88] sm:$0xf] }
 0x1e0   :  { %5862 = vst.msk [vmem:[#allocation3 + $0x64] sm:$0xf] %vm3128_vm0, %v5679_v25  ;;  %v6585_v39 = vrot.slane %v6584_v19, 4  ;;  %v6589_v36 = vrot.slane %v6587_v23, 5  ;;  %v5280_v16 = vld [vmem:[#allocation2 + $0x94] sm:$0xf]  ;;  %4037 = vrot.lane.b32.xlu0 %v3889_v11, %s11179_s24  ;;  %4039 = vrot.lane.b32.xlu1 %v3890_v54, %s11179_s24  ;;  %v6580_v25 = vsel %vm11625_vm15, %v6575_v17, %v12586_v34 }
 0x1e1   :  { %6247 = vst.msk [vmem:[#allocation3 + $0x64] sm:$0xf] %vm3804_vm3, %v12318_v27  ;;  %v1955_v30 = vld [vmem:[#allocation2 + $0x54] sm:$0xf]  ;;  %v1956_v61 = vld [vmem:[#allocation2 + $0x58] sm:$0xf]  ;;  %v12708_v27 = vpop.permute.xlu1 %4027 }
 0x1e2   :  { %v12701_v37 = vld [vmem:[#allocation2 + $0x88] sm:$0xf]  ;;  %v5279_v19 = vld [vmem:[#allocation2 + $0x90] sm:$0xe]  ;;  %v3230_v23 = vld [vmem:[#allocation2 + $0x94] sm:$0xf] }
 0x1e3   :  { %17020 = vst [vmem:[#allocation32_spill] sm:$0xff] %v12701_v37  ;;  %2019 = vst.msk [vmem:[#allocation3 + $0xa8] sm:$0xf] %vm766_vm2, %v1955_v30  ;;  %v12706_v50 = vld [vmem:[#allocation2 + $0xa8] sm:$0xe]  ;;  %v5517_v11 = vrot.slane %v5280_v16, 5  ;;  %v6590_v30 = vsel %vm11625_vm15, %v6585_v39, %v6589_v36 }
 0x1e4   :  { %2020 = vst.msk [vmem:[#allocation3 + $0xb4] sm:$0xf] %vm766_vm2, %v1956_v61  ;;  %17021 = vst [vmem:[#allocation33_spill] sm:$0xff] %v12706_v50  ;;  %v5281_v54 = vld [vmem:[#allocation2 + $0x98] sm:$0x1]  ;;  %v2392_v12 = vrot.slane %v2391_v14, 4  ;;  %7195 = vrot.lane.b32.xlu0 %v6580_v25, %s11179_s24  ;;  %7197 = vrot.lane.b32.xlu1 %v6590_v30, %s11179_s24 }
 0x1e5   :  { %7367 = vst.msk [vmem:[#allocation3 + $0x64] sm:$0xf] %vm4189_vm4, %v7184_v40  ;;  %v2402_v61 = vrot.slane %v2401_v20, 4  ;;  %v2406_v51 = vrot.slane %v2404_v63, 5  ;;  %v3229_v49 = vld [vmem:[#allocation2 + $0x90] sm:$0xe]  ;;  %v12727_v63 = vpop.permute.xlu0 %3632  ;;  %v7186_v36 = vpop.permute.xlu1 %7185 }
 0x1e6   :  { %v12716_v26 = vld [vmem:[#allocation2 + $0x9c] sm:$0xe]  ;;  %v10281_v56 = vrot.slane %v5279_v19, 9  ;;  %v3474_v60 = vrot.slane %v3230_v23, 5  ;;  %v3231_v34 = vld [vmem:[#allocation2 + $0x98] sm:$0x1]  ;;  %v2397_v23 = vsel %vm11625_vm15, %v2392_v12, %v12669_v31 }
 0x1e7   :  { %17022 = vst [vmem:[#allocation34_spill] sm:$0xff] %v12716_v26  ;;  %v12721_v16 = vld [vmem:[#allocation2 + $0xac] sm:$0xf]  ;;  %v5520_v40 = vrot.slane %v5281_v54, 5  ;;  %v12723_v29 = vld [vmem:[#allocation2 + $0x88] sm:$0xf]  ;;  %v2407_v54 = vsel %vm11625_vm15, %v2402_v61, %v2406_v51 }
 0x1e8   :  { %17023 = vst [vmem:[#allocation35_spill] sm:$0xff] %v12721_v16  ;;  %v12725_v39 = vld [vmem:[#allocation2 + $0xb0] sm:$0x1]  ;;  %v5519_v14 = vrot.slane %v5517_v11, 4  ;;  %v10250_v20 = vrot.slane %v3229_v49, 9  ;;  %2972 = vrot.lane.b32.xlu0 %v2397_v23, %s11181_s26  ;;  %2974 = vrot.lane.b32.xlu1 %v2407_v54, %s11181_s26  ;;  %v5518_v49 = vsel %vm11586_vm12, %v10281_v56, %v5517_v11  ;;  %v3476_v30 = vrot.slane %v3474_v60, 4 }
 0x1e9   :  { %17024 = vst [vmem:[#allocation36_spill] sm:$0xff] %v12725_v39  ;;  %v6333_v25 = vld [vmem:[#allocation2 + $0x90] sm:$0xf]  ;;  %7368 = vst.msk [vmem:[#allocation3 + $0x70] sm:$0xf] %vm4189_vm4, %v7186_v36  ;;  %v3477_v36 = vrot.slane %v3231_v34, 5  ;;  %v2961_v46 = vpop.permute.xlu0 %2960  ;;  %v2963_v50 = vpop.permute.xlu1 %2962 }
 0x1ea   :  { %v12737_v17 = vld [vmem:[#allocation2 + $0x8c] sm:$0x1]  ;;  %v12739_v44 = vld [vmem:[#allocation2 + $0x88] sm:$0xf]  ;;  %v6334_v19 = vld [vmem:[#allocation2 + $0x94] sm:$0xf]  ;;  %v5521_v23 = vsel %vm11586_vm12, %v5519_v14, %v5520_v40  ;;  %v3475_v56 = vsel %vm11586_vm12, %v10250_v20, %v3474_v60 }
 0x1eb   :  { %v4281_v10 = vld [vmem:[#allocation2 + $0x78] sm:$0xf]  ;;  %v6640_v61 = vshrl.u32 %v6333_v25, 16  ;;  %v4282_v32 = vld [vmem:[#allocation2 + $0x7c] sm:$0xf]  ;;  %v5513_v11 = vrot.slane %v12737_v17, 5  ;;  %v3478_v60 = vsel %vm11586_vm12, %v3476_v30, %v3477_v36 }
 0x1ec   :  { %v6643_v34 = vshll.u32 %v6333_v25, 16  ;;  %v4283_v54 = vld [vmem:[#allocation2 + $0x80] sm:$0x1]  ;;  %3141 = vst.msk [vmem:[#allocation3 + $0x90] sm:$0xf] %vm3128_vm0, %v2961_v46  ;;  %v6649_v31 = vshll.u32 %v6334_v19, 16  ;;  %5706 = vrot.lane.b32.xlu0 %v5518_v49, %s11181_s26  ;;  %5708 = vrot.lane.b32.xlu1 %v5521_v23, %s11181_s26 }
 0x1ed   :  { %3142 = vst.msk [vmem:[#allocation3 + $0x9c] sm:$0xf] %vm3128_vm0, %v2963_v50  ;;  %v6653_v51 = vshrl.u32 %v6334_v19, 16  ;;  %v4567_v39 = vshrl.u32 %v4281_v10, 16  ;;  %v12764_v46 = vld [vmem:[#allocation2 + $0x8c] sm:$0x1]  ;;  %v6068_v49 = vpop.permute.xlu0 %6067  ;;  %v6070_v16 = vpop.permute.xlu1 %6069 }
 0x1ee   :  { %3817 = vst.msk [vmem:[#allocation3 + $0x90] sm:$0xf] %vm3804_vm3, %v12582_v47  ;;  %3818 = vst.msk [vmem:[#allocation3 + $0x9c] sm:$0xf] %vm3804_vm3, %v12584_v42  ;;  %v2105_v50 = vld [vmem:[#allocation2 + $0x90] sm:$0xf] }
 0x1ef   :  { %v4570_v17 = vshll.u32 %v4281_v10, 16  ;;  %v4576_v40 = vshll.u32 %v4282_v32, 16  ;;  %v4580_v14 = vshrl.u32 %v4282_v32, 16  ;;  %v17025_v20 = vrot.slane %v12723_v29, 5  ;;  %v2106_v19 = vld [vmem:[#allocation2 + $0x94] sm:$0xf] }
 0x1f0   :  { %v12768_v47 = vrot.slane %v6640_v61, 4  ;;  %v4569_v42 = vrot.slane %v4567_v39, 4  ;;  %v4586_v12 = vshll.u32 %v4283_v54, 16  ;;  %v12770_v23 = vld [vmem:[#allocation2 + $0x84] sm:$0xe]  ;;  %v6645_v26 = vrot.slane %v6643_v34, 5  ;;  %3660 = vrot.lane.b32.xlu0 %v3475_v56, %s11180_s25  ;;  %3662 = vrot.lane.b32.xlu1 %v3478_v60, %s11180_s25 }
 0x1f1   :  { %v5512_v25 = vrot.slane %v17025_v20, 4  ;;  %v4572_v30 = vrot.slane %v4570_v17, 5  ;;  %v4578_v36 = vrot.slane %v4576_v40, 5  ;;  %v4582_v4 = vrot.slane %v4580_v14, 4  ;;  %6249 = vst.msk [vmem:[#allocation3 + $0x7c] sm:$0xf] %vm3804_vm3, %v6068_v49  ;;  %v4022_v8 = vpop.permute.xlu0 %4021 }
 0x1f2   :  { %6250 = vst.msk [vmem:[#allocation3 + $0x88] sm:$0xf] %vm3804_vm3, %v6070_v16  ;;  %v12774_v32 = vrot.slane %v6649_v31, 5  ;;  %v12776_v10 = vrot.slane %v6653_v51, 4  ;;  %v2457_v61 = vshrl.u32 %v2105_v50, 16  ;;  %v2460_v20 = vshll.u32 %v2105_v50, 16  ;;  %v4024_v50 = vpop.permute.xlu1 %4023 }
 0x1f3   :  { %v6335_v39 = vld [vmem:[#allocation2 + $0x98] sm:$0x1]  ;;  %v2466_v54 = vshll.u32 %v2106_v19, 16  ;;  %v4573_v34 = vor.u32 %v4572_v30, %v4569_v42  ;;  %v4583_v17 = vor.u32 %v4582_v4, %v4578_v36  ;;  %v4588_v40 = vrot.slane %v4586_v12, 5  ;;  %v5943_v14 = vld [vmem:[#allocation2 + $0xa8] sm:$0xf] }
 0x1f4   :  { %v17026_v49 = vrot.slane %v12739_v44, 5  ;;  %v3470_v16 = vrot.slane %v12764_v46, 5  ;;  %v2470_v51 = vshrl.u32 %v2106_v19, 16  ;;  %v5514_v56 = vsel %vm11586_vm12, %v5512_v25, %v5513_v11  ;;  %v6330_v60 = vld [vmem:[#allocation2 + $0x84] sm:$0xf]  ;;  %6095 = vrot.lane.b32.xlu0 %v5943_v14, %s11180_s25  ;;  %v7983_v59 = vld [vmem:[#allocation3 + $0x60] sm:$0xff] }
 0x1f5   :  { %v4574_v22 = vrot.slane %v4573_v34, 4  ;;  %v4584_v37 = vrot.slane %v4583_v17, 4  ;;  %v4279_v42 = vld [vmem:[#allocation2 + $0x70] sm:$0xf]  ;;  %4202 = vst.msk [vmem:[#allocation3 + $0x90] sm:$0xf] %vm4189_vm4, %v4022_v8  ;;  %v6646_v4 = vor.u32 %v6645_v26, %v12768_v47  ;;  %v6656_v12 = vor.u32 %v12776_v10, %v12774_v32  ;;  %5704 = vrot.lane.b32.xlu1 %v5514_v56, %s11181_s26  ;;  %v7180_v14 = vpop.permute.xlu0 %7179 }
 0x1f6   :  { %v3469_v53 = vrot.slane %v17026_v49, 4  ;;  %4203 = vst.msk [vmem:[#allocation3 + $0x9c] sm:$0xf] %vm4189_vm4, %v4024_v50  ;;  %v6659_v46 = vshll.u32 %v6335_v39, 16  ;;  %v2459_v19 = vrot.slane %v2457_v61, 4  ;;  %v2462_v25 = vrot.slane %v2460_v20, 5  ;;  %v7182_v50 = vpop.permute.xlu1 %7181 }
 0x1f7   :  { %v6331_v30 = vld [vmem:[#allocation2 + $0x88] sm:$0xf]  ;;  %v4280_v49 = vld [vmem:[#allocation2 + $0x74] sm:$0x1]  ;;  %v12793_v11 = vld [vmem:[#allocation2 + $0x84] sm:$0xe]  ;;  %v4579_v8 = vsel %vm11625_vm15, %v4574_v22, %v4578_v36  ;;  %v4589_v26 = vsel %vm11625_vm15, %v4584_v37, %v4588_v40 }
 0x1f8   :  { %v12795_v34 = vrot.slane %v2466_v54, 5  ;;  %v2107_v47 = vld [vmem:[#allocation2 + $0x98] sm:$0x1]  ;;  %v2472_v10 = vrot.slane %v2470_v51, 4  ;;  %v6616_v61 = vshrl.u32 %v6330_v60, 16  ;;  %v6619_v39 = vshll.u32 %v6330_v60, 16 }
 0x1f9   :  { %5200 = vst.msk [vmem:[#allocation3 + $0xdc] sm:$0xf] %vm766_vm2, %v4579_v8  ;;  %5201 = vst.msk [vmem:[#allocation3 + $0xe8] sm:$0xf] %vm766_vm2, %v4589_v26  ;;  %v4552_v17 = vshll.u32 %v4279_v42, 16  ;;  %v3471_v54 = vsel %vm11586_vm12, %v3469_v53, %v3470_v16  ;;  %v6625_v56 = vshll.u32 %v6331_v30, 16  ;;  %v2463_v16 = vor.u32 %v2462_v25, %v2459_v19 }
 0x1fa   :  { %v3895_v20 = vld [vmem:[#allocation2 + $0xa8] sm:$0xf]  ;;  %v4556_v22 = vshrl.u32 %v4279_v42, 16  ;;  %v4562_v36 = vshll.u32 %v4280_v49, 16  ;;  %7365 = vst.msk [vmem:[#allocation3 + $0x4c] sm:$0xf] %vm4189_vm4, %v7180_v14  ;;  %3658 = vrot.lane.b32.xlu1 %v3471_v54, %s11180_s25  ;;  %v2959_v31 = vpop.permute.xlu1 %2958 }
 0x1fb   :  { %7366 = vst.msk [vmem:[#allocation3 + $0x58] sm:$0xf] %vm4189_vm4, %v7182_v50  ;;  %v12807_v37 = vrot.slane %v6646_v4, 4  ;;  %v10249_v40 = vrot.slane %v12793_v11, 9  ;;  %v6629_v51 = vshrl.u32 %v6331_v30, 16  ;;  %v12810_v8 = vrot.slane %v4552_v17, 5  ;;  %4049 = vrot.lane.b32.xlu0 %v3895_v20, %s11179_s24  ;;  %v2957_v17 = vpop.permute.xlu0 %2956 }
 0x1fc   :  { %v2102_v60 = vld [vmem:[#allocation2 + $0x84] sm:$0xf]  ;;  %v12814_v53 = vrot.slane %v6659_v46, 5  ;;  %v2476_v42 = vshll.u32 %v2107_v47, 16  ;;  %v4558_v49 = vrot.slane %v4556_v22, 4  ;;  %v12816_v14 = vrot.slane %v6656_v12, 4 }
 0x1fd   :  { %v5944_v26 = vld [vmem:[#allocation2 + $0xac] sm:$0xf]  ;;  %v2473_v4 = vor.u32 %v2472_v10, %v12795_v34  ;;  %v12819_v50 = vrot.slane %v6616_v61, 4  ;;  %v12821_v30 = vrot.slane %v6619_v39, 5  ;;  %v12823_v20 = vrot.slane %v6625_v56, 5 }
 0x1fe   :  { %v6332_v11 = vld [vmem:[#allocation2 + $0x8c] sm:$0x1]  ;;  %v12825_v54 = vld [vmem:[#allocation2 + $0x88] sm:$0xf]  ;;  %v2433_v46 = vshrl.u32 %v2102_v60, 16  ;;  %v4559_v19 = vor.u32 %v4558_v49, %v12810_v8  ;;  %v4564_v25 = vrot.slane %v4562_v36, 5  ;;  %6097 = vrot.lane.b32.xlu1 %v5944_v26, %s11180_s25 }
 0x1ff   :  { %3139 = vst.msk [vmem:[#allocation3 + $0x78] sm:$0xf] %vm3128_vm0, %v2957_v17  ;;  %3140 = vst.msk [vmem:[#allocation3 + $0x84] sm:$0xf] %vm3128_vm0, %v2959_v31  ;;  %v17027_v12 = vrot.slane %v12723_v29, 5  ;;  %v17028_v47 = vrot.slane %v12770_v23, 9 }
 0x200   :  { %v12836_v61 = vrot.slane %v6629_v51, 4  ;;  %v2436_v39 = vshll.u32 %v2102_v60, 16  ;;  %v1961_v56 = vld [vmem:[#allocation2 + $0x78] sm:$0xf]  ;;  %v1962_v22 = vld [vmem:[#allocation2 + $0x7c] sm:$0xf] }
 0x201   :  { %v5511_v10 = vsel %vm11586_vm12, %v17028_v47, %v17027_v12  ;;  %3815 = vst.msk [vmem:[#allocation3 + $0x78] sm:$0xf] %vm3804_vm3, %v12727_v63  ;;  %3816 = vst.msk [vmem:[#allocation3 + $0x84] sm:$0xf] %vm3804_vm3, %v12663_v48  ;;  %v12844_v29 = vrot.slane %v2463_v16, 4  ;;  %v12846_v23 = vrot.slane %v2476_v42, 5  ;;  %v6622_v12 = vor.u32 %v12821_v30, %v12819_v50 }
 0x202   :  { %5702 = vrot.lane.b32.xlu0 %v5511_v10, %s11181_s26  ;;  %v6635_v31 = vshll.u32 %v6332_v11, 16  ;;  %v2104_v36 = vld [vmem:[#allocation2 + $0x8c] sm:$0x1]  ;;  %v4560_v51 = vrot.slane %v4559_v19, 4  ;;  %2025 = vst.msk [vmem:[#allocation3 + $0xf0] sm:$0xf] %vm766_vm2, %v1961_v56  ;;  %v5691_v11 = vpop.permute.xlu0 %5690  ;;  %v6632_v47 = vor.u32 %v12836_v61, %v12823_v20 }
 0x203   :  { %2026 = vst.msk [vmem:[#allocation3 + $0xfc] sm:$0xf] %vm766_vm2, %v1962_v22  ;;  %v3896_v48 = vld [vmem:[#allocation2 + $0xac] sm:$0xf]  ;;  %v17029_v63 = vrot.slane %v12739_v44, 5  ;;  %v12858_v16 = vrot.slane %v2473_v4, 4 }
 0x204   :  { %4200 = vst.msk [vmem:[#allocation3 + $0x78] sm:$0xf] %vm4189_vm4, %v12339_v24  ;;  %4201 = vst.msk [vmem:[#allocation3 + $0x84] sm:$0xf] %vm4189_vm4, %v12397_v41  ;;  %v12860_v42 = vld [vmem:[#allocation2 + $0xac] sm:$0xf]  ;;  %v5693_v24 = vpop.permute.xlu1 %5692  ;;  %v6652_v41 = vsel %vm11625_vm15, %v12807_v37, %v12774_v32  ;;  %v4565_v4 = vsel %vm11625_vm15, %v4560_v51, %v4564_v25  ;;  %4051 = vrot.lane.b32.xlu1 %v3896_v48, %s11179_s24 }
 0x205   :  { %v3468_v60 = vsel %vm11586_vm12, %v10249_v40, %v17029_v63  ;;  %v4278_v49 = vld [vmem:[#allocation2 + $0x6c] sm:$0xf]  ;;  %v11049_v26 = vld [vmem:[%s16918_s0 + $0xd0] sm:$0xff]   ;;  %v11030_v44 = vld [vmem:[#allocation3 + $0x4c] ss:$12 sps:$4 sm:$0xff]   ;;  %v2442_v17 = vshll.u32 %v12825_v54, 16  ;;  %v2479_v22 = vsel %vm11625_vm15, %v12858_v16, %v12846_v23 }
 0x206   :  { %v2446_v40 = vshrl.u32 %v12825_v54, 16  ;;  %5868 = vst.msk [vmem:[#allocation3 + $0xac] sm:$0xf] %vm3128_vm0, %v5691_v11  ;;  %5869 = vst.msk [vmem:[#allocation3 + $0xb8] sm:$0xf] %vm3128_vm0, %v5693_v24  ;;  %v2435_v32 = vrot.slane %v2433_v46, 4  ;;  %10860 = vmatprep.mubr.msk.bf16.mxu0 %vm312_vm1, %v11049_v26  ;;  %7207 = vrot.lane.b32.xlu0 %v6652_v41, %s11179_s24  ;;  %v6662_v46 = vsel %vm11625_vm15, %v12816_v14, %v12814_v53  ;;  %v12903_v48 = vpop.permute.xlu0 %3644 }
 0x207   :  { %v11032_v19 = vld [vmem:[#allocation3 + $0x48] ss:$12 sps:$4 sm:$0xff]   ;;  %v2438_v37 = vrot.slane %v2436_v39, 5  ;;  %v12879_v10 = vld [vmem:[#allocation2 + $0xa8] sm:$0xe]  ;;  %v12885_v54 = vrot.slane %v6635_v31, 5  ;;  %8879 = vmatprep.mubr.bf16.mxu1 %v11030_v44  ;;  %v2469_v39 = vsel %vm11625_vm15, %v12844_v29, %v12795_v34 }
 0x208   :  { %5199 = vst.msk [vmem:[#allocation3 + $0xd0] sm:$0xf] %vm766_vm2, %v4565_v4  ;;  %v2452_v25 = vshll.u32 %v2104_v36, 16  ;;  %v6339_v56 = vld [vmem:[#allocation2 + $0xa8] sm:$0xf]  ;;  %v4543_v50 = vshrl.u32 %v4278_v49, 16  ;;  %v12905_v53 = vpop.permute.xlu1 %3646  ;;  %8880 = vmatmul.mubr.bf16.gmra.mxu1 %v11032_v19  ;;  %7209 = vrot.lane.b32.xlu1 %v6662_v46, %s11179_s24 }
 0x209   :  { %v4546_v30 = vshll.u32 %v4278_v49, 16  ;;  %v11033_v61 = vld [vmem:[#allocation3 + $0x64] ss:$12 sps:$4 sm:$0xff]   ;;  %v16954_v31 = vrot.slane %v12860_v42, 5  ;;  %v6340_v36 = vld [vmem:[#allocation2 + $0xac] sm:$0xf]  ;;  %v2439_v11 = vor.u32 %v2438_v37, %v2435_v32 }
 0x20a   :  { %v11050_v51 = vld [vmem:[%s16918_s0 + $0xd8] sm:$0xff]   ;;  %v12907_v14 = vrot.slane %v2442_v17, 5  ;;  %v12909_v34 = vrot.slane %v2446_v40, 4  ;;  %v12911_v29 = vld [vmem:[#allocation2 + $0xb0] sm:$0x1]  ;;  %v4545_v23 = vrot.slane %v4543_v50, 4  ;;  %8887 = vmatprep.mubr.bf16.mxu1 %v11033_v61  ;;  %3656 = vrot.lane.b32.xlu0 %v3468_v60, %s11180_s25  ;;  %v12931_v60 = vpop.permute.xlu0 %6079 }
 0x20b   :  { %v2112_v63 = vld [vmem:[#allocation2 + $0xac] sm:$0xf]  ;;  %v4548_v16 = vrot.slane %v4546_v30, 5  ;;  %v12913_v49 = vrot.slane %v6622_v12, 4  ;;  %v12915_v26 = vrot.slane %v6632_v47, 4  ;;  %10861 = vmatmul.mubr.msk.bf16.gmra.mxu0 %vm312_vm1, %v11050_v51  ;;  %v12923_v44 = vrot.slane %v2452_v25, 5  ;;  %v10842_v51 = vpop.f32.mrf.mxu0 }
 0x20c   :  { %v12918_v41 = vld [vmem:[#allocation2 + $0xa0] sm:$0xf]  ;;  %v12925_v17 = vld [vmem:[#allocation2 + $0x9c] sm:$0xe]  ;;  %v6688_v40 = vshrl.u32 %v6339_v56, 16  ;;  %v6691_v4 = vshll.u32 %v6339_v56, 16  ;;  %v5689_v46 = vpop.permute.xlu1 %5688  ;;  %v2449_v25 = vor.u32 %v12909_v34, %v12907_v14  ;;  %2986 = vrot.lane.b32.xlu1 %v2479_v22, %s11181_s26 }
 0x20d   :  { %v4549_v19 = vor.u32 %v4548_v16, %v4545_v23  ;;  %v7985_v12 = vld [vmem:[#allocation3 + $0x6c] sm:$0xff]  ;;  %v12927_v47 = vld [vmem:[#allocation2 + $0xa4] sm:$0x1]  ;;  %v6697_v32 = vshll.u32 %v6340_v36, 16  ;;  %v6701_v37 = vshrl.u32 %v6340_v36, 16  ;;  %v2514_v30 = vshll.u32 %v2112_v63, 16 }
 0x20e   :  { %v12929_v50 = vld [vmem:[#allocation2 + $0xa0] sm:$0xf]  ;;  %v2518_v61 = vshrl.u32 %v2112_v63, 16  ;;  %v5533_v56 = vrot.slane %v16954_v31, 4  ;;  %v5524_v23 = vrot.slane %v12918_v41, 5  ;;  %v12943_v63 = vrot.slane %v2439_v11, 4  ;;  %2984 = vrot.lane.b32.xlu0 %v2469_v39, %s11181_s26  ;;  %v12963_v22 = vpop.permute.xlu0 %4033 }
 0x20f   :  { %v4550_v16 = vrot.slane %v4549_v19, 4  ;;  %v1959_v24 = vld [vmem:[#allocation2 + $0x6c] sm:$0xf]  ;;  %5867 = vst.msk [vmem:[#allocation3 + $0xa0] sm:$0xf] %vm3128_vm0, %v5689_v46  ;;  %v5534_v38 = vrot.slane %v12911_v29, 5  ;;  %v10347_v41 = vcombine.low %v7983_v59, %v7985_v12  ;;  %v12961_v59 = vpop.f32.mrf.mxu0 }
 0x210   :  { %v10282_v34 = vrot.slane %v12925_v17, 9  ;;  %2023 = vst.msk [vmem:[#allocation3 + $0xd8] sm:$0xf] %vm766_vm2, %v1959_v24  ;;  %v1960_v31 = vld [vmem:[#allocation2 + $0x70] sm:$0xf]  ;;  %v6690_v19 = vrot.slane %v6688_v40, 4  ;;  %v12965_v40 = vpop.permute.xlu1 %3642 }
 0x211   :  { %6252 = vst.msk [vmem:[#allocation3 + $0xa0] sm:$0xf] %vm3804_vm3, %v12691_v6  ;;  %v6693_v46 = vrot.slane %v6691_v4, 5  ;;  %v3232_v36 = vld [vmem:[#allocation2 + $0x9c] sm:$0xe]  ;;  %v4555_v29 = vsel %vm11625_vm15, %v4550_v16, %v12810_v8  ;;  %v12956_v24 = vrot.slane %v6697_v32, 5  ;;  %8888 = vmatmul.mubr.bf16.gmra.mxu1 %v10347_v41 }
 0x212   :  { %v6341_v11 = vld [vmem:[#allocation2 + $0xb0] sm:$0x1]  ;;  %2024 = vst.msk [vmem:[#allocation3 + $0xe4] sm:$0xf] %vm766_vm2, %v1960_v31  ;;  %v6703_v17 = vrot.slane %v6701_v37, 4  ;;  %v12958_v6 = vrot.slane %v2514_v30, 5  ;;  %v6638_v30 = vsel %vm11625_vm15, %v12915_v26, %v12885_v54  ;;  %v12995_v26 = vsel %vm11586_vm12, %v5533_v56, %v5534_v38  ;;  %v10843_v56 = vpop.f32.mrf.mxu0 }
 0x213   :  { %v2113_v3 = vld [vmem:[#allocation2 + $0xb0] sm:$0x1]  ;;  %v2520_v39 = vrot.slane %v2518_v61, 4  ;;  %5198 = vst.msk [vmem:[#allocation3 + $0xc4] sm:$0xf] %vm766_vm2, %v4555_v29  ;;  %v12967_v8 = vrot.slane %v2449_v25, 4 }
 0x214   :  { %v5941_v4 = vld [vmem:[#allocation2 + $0x9c] sm:$0xf]  ;;  %v5526_v31 = vrot.slane %v5524_v23, 4  ;;  %v5527_v12 = vrot.slane %v12927_v47, 5  ;;  %v3481_v32 = vrot.slane %v12929_v50, 5  ;;  %v10251_v16 = vrot.slane %v3232_v36, 9  ;;  %v578_v5 = vpop.f32.mrf.mxu0 }
 0x215   :  { %v5942_v37 = vld [vmem:[#allocation2 + $0xa0] sm:$0xf]  ;;  %v12975_v61 = vld [vmem:[#allocation2 + $0xa4] sm:$0x1]  ;;  %v6707_v29 = vshll.u32 %v6341_v11, 16  ;;  %6091 = vrot.lane.b32.xlu0 %v5941_v4, %s11180_s25  ;;  %v17030_v47 = vrot.slane %v12860_v42, 5  ;;  %v6694_v36 = vor.u32 %v6693_v46, %v6690_v19  ;;  %v6704_v4 = vor.u32 %v6703_v17, %v12956_v24  ;;  %v5687_v19 = vpop.permute.xlu0 %5686 }
 0x216   :  { %v12980_v25 = vld [vmem:[%s16919_s2] ss:$0 sm:$0xff]  ;;  %6093 = vrot.lane.b32.xlu1 %v5942_v37, %s11180_s25  ;;  %v17031_v50 = vrot.slane %v12879_v10, 9  ;;  %v2524_v11 = vshll.u32 %v2113_v3, 16  ;;  %v12997_v43 = vld [vmem:[#allocation2 + $0x9c] sm:$0xf]  ;;  %v13005_v10 = vsel %vm11586_vm12, %v10282_v34, %v5524_v23  ;;  %v2521_v37 = vor.u32 %v2520_v39, %v12958_v6  ;;  %v13009_v3 = vpop.permute.xlu1 %6081 }
 0x217   :  { %v584_v41 = vadd.f32 %v12980_v25, %v10842_v51  ;;  %v3893_v51 = vld [vmem:[#allocation2 + $0x9c] sm:$0xf]  ;;  %v4287_v38 = vld [vmem:[#allocation2 + $0x90] sm:$0xf]  ;;  %v3894_v46 = vld [vmem:[#allocation2 + $0xa0] sm:$0xf]  ;;  %v13027_v39 = vsel %vm11586_vm12, %v10251_v16, %v3481_v32 }
 0x218   :  { %v12991_v54 = vsel %vm11586_vm12, %v17031_v50, %v17030_v47  ;;  %v2455_v47 = vsel %vm11625_vm15, %v12967_v8, %v12923_v44  ;;  %v13017_v50 = vsel %vm11586_vm12, %v5526_v31, %v5527_v12  ;;  %v13019_v23 = vrot.slane %v3481_v32, 4  ;;  %v13022_v17 = vld [vmem:[#allocation2 + $0xa0] sm:$0xf]  ;;  %5866 = vst.msk [vmem:[#allocation3 + $0x94] sm:$0xf] %vm3128_vm0, %v5687_v19 }
 0x219   :  { %v13029_v42 = vrot.slane %v6707_v29, 5  ;;  %v6664_v44 = vshrl.u32 %v12997_v43, 16  ;;  %v736_v8 = vmax.f32 %v584_v41, 0.0  ;;  %v4288_v1 = vld [vmem:[#allocation2 + $0x94] sm:$0xf]  ;;  %4045 = vrot.lane.b32.xlu0 %v3893_v51, %s11179_s24  ;;  %v13036_v31 = vrot.slane %v6694_v36, 4 }
 0x21a   :  { %6251 = vst.msk [vmem:[#allocation3 + $0x94] sm:$0xf] %vm3804_vm3, %v12614_v58  ;;  %4047 = vrot.lane.b32.xlu1 %v3894_v46, %s11179_s24  ;;  %v13038_v12 = vrot.slane %v2524_v11, 5  ;;  %v4615_v19 = vshrl.u32 %v4287_v38, 16  ;;  %v4618_v32 = vshll.u32 %v4287_v38, 16  ;;  %v13040_v16 = vrot.slane %v6704_v4, 4  ;;  %v7192_v58 = vpop.permute.xlu0 %7191  ;;  %v13045_v35 = vpop.permute.xlu1 %4035 }
 0x21b   :  { %v13042_v29 = vrot.slane %v2521_v37, 4  ;;  %v6667_v41 = vshll.u32 %v12997_v43, 16  ;;  %v10599_v34 = vpack.c.bf16 %v736_v8, %v736_v8  ;;  %v4289_v18 = vld [vmem:[#allocation2 + $0x98] sm:$0x1]  ;;  %v6673_v51 = vshll.u32 %v13022_v17, 16 }
 0x21c   :  { %v4617_v36 = vrot.slane %v4615_v19, 4  ;;  %v4620_v46 = vrot.slane %v4618_v32, 5  ;;  %v4624_v11 = vshll.u32 %v4288_v1, 16  ;;  %7371 = vst.msk [vmem:[#allocation3 + $0x94] sm:$0xf] %vm4189_vm4, %v7192_v58  ;;  %v13049_v38 = vrot.slane %v6664_v44, 4 }
 0x21d   :  { %v13051_v4 = vld [vmem:[#allocation2 + $0x9c] sm:$0xf]  ;;  %v1361_v37 = vshrl.u32 %v10599_v34, 16  ;;  %v1364_v57 = vshll.u32 %v10599_v34, 16  ;;  %v4628_v43 = vshrl.u32 %v4288_v1, 16  ;;  %v17032_v8 = vsel %vm11625_vm15, %v12913_v49, %v12823_v20 }
 0x21e   :  { %7203 = vrot.lane.b32.xlu0 %v17032_v8, %s11179_s24  ;;  %7205 = vrot.lane.b32.xlu1 %v6638_v30, %s11179_s24  ;;  %v4621_v19 = vor.u32 %v4620_v46, %v4617_v36  ;;  %v4626_v32 = vrot.slane %v4624_v11, 5  ;;  %v4634_v33 = vshll.u32 %v4289_v18, 16  ;;  %v576_v44 = vadd.f32 %v12980_v25, %v12961_v59  ;;  %v13066_v28 = vpop.permute.xlu0 %3640  ;;  %v7194_v52 = vpop.permute.xlu1 %7193  ;;  %v1836_v30 = vld [vmem:[#allocation2 + $0xf0] sm:$0xf] }
 0x21f   :  { %v13062_v58 = vrot.slane %v1361_v37, 7  ;;  %v4630_v62 = vrot.slane %v4628_v43, 4  ;;  %v587_v1 = vadd.f32 %v12980_v25, %v10843_v56  ;;  %v579_v34 = vadd.f32 %v12980_v25, %v578_v5  ;;  %7372 = vst.msk [vmem:[#allocation3 + $0xa0] sm:$0xf] %vm4189_vm4, %v7194_v52 }
 0x220   :  { %v6677_v20 = vshrl.u32 %v13022_v17, 16  ;;  %v2481_v49 = vshrl.u32 %v13051_v4, 16  ;;  %v4622_v36 = vrot.slane %v4621_v19, 4  ;;  %v734_v18 = vmax.f32 %v576_v44, 0.0 }
 0x221   :  { %v1366_v59 = vor.u32 %v1364_v57, %v13062_v58  ;;  %v4631_v46 = vor.u32 %v4630_v62, %v4626_v32  ;;  %v4636_v11 = vrot.slane %v4634_v33, 5  ;;  %v737_v37 = vmax.f32 %v587_v1, 0.0  ;;  %v13085_v33 = vld [vmem:[#allocation2 + $0xa0] sm:$0xf] }
 0x222   :  { %v17033_v5 = vsel %vm11625_vm15, %v12943_v63, %v12907_v14  ;;  %2982 = vrot.lane.b32.xlu1 %v2455_v47, %s11181_s26  ;;  %v13079_v56 = vrot.slane %v6667_v41, 5  ;;  %v4627_v43 = vsel %vm11625_vm15, %v4622_v36, %v4626_v32  ;;  %v10597_v52 = vpack.c.bf16 %v734_v18, %v734_v18  ;;  %v2969_v19 = vpop.permute.xlu0 %2968  ;;  %v2971_v47 = vpop.permute.xlu1 %2970 }
 0x223   :  { %2980 = vrot.lane.b32.xlu0 %v17033_v5, %s11181_s26  ;;  %v735_v8 = vmax.f32 %v579_v34, 0.0  ;;  %v13083_v57 = vrot.slane %v6673_v51, 5  ;;  %v1837_v62 = vsel %vm11538_vm6, %v1366_v59, %v1836_v30  ;;  %5204 = vst.msk [vmem:[#allocation3 + $0x10c] sm:$0xf] %vm766_vm2, %v4627_v43  ;;  %v4632_v14 = vrot.slane %v4631_v46, 4 }
 0x224   :  { %v10600_v63 = vpack.c.bf16 %v737_v37, %v737_v37  ;;  %v13090_v41 = vrot.slane %v2481_v49, 4  ;;  %1838 = vst [vmem:[#allocation2 + $0xf0] sm:$0xf] %v1837_v62  ;;  %v1344_v44 = vshrl.u32 %v10597_v52, 16  ;;  %v1347_v32 = vshll.u32 %v10597_v52, 16 }
 0x225   :  { %v10598_v1 = vpack.c.bf16 %v735_v8, %v735_v8  ;;  %3145 = vst.msk [vmem:[#allocation3 + $0xc0] sm:$0xf] %vm3128_vm0, %v2969_v19  ;;  %3146 = vst.msk [vmem:[#allocation3 + $0xcc] sm:$0xf] %vm3128_vm0, %v2971_v47  ;;  %v2484_v51 = vshll.u32 %v13051_v4, 16  ;;  %v4637_v34 = vsel %vm11625_vm15, %v4632_v14, %v4636_v11  ;;  %v2490_v49 = vshll.u32 %v13085_v33, 16 }
 0x226   :  { %v1369_v30 = vshrl.u32 %v10600_v63, 16  ;;  %v1372_v36 = vshll.u32 %v10600_v63, 16  ;;  %3821 = vst.msk [vmem:[#allocation3 + $0xc0] sm:$0xf] %vm3804_vm3, %v12903_v48  ;;  %3822 = vst.msk [vmem:[#allocation3 + $0xcc] sm:$0xf] %vm3804_vm3, %v12905_v53  ;;  %5716 = vrot.lane.b32.xlu1 %v12995_v26, %s11181_s26  ;;  %v6700_v48 = vsel %vm11625_vm15, %v13036_v31, %v12956_v24  ;;  %v6076_v52 = vpop.permute.xlu0 %6075  ;;  %v6078_v8 = vpop.permute.xlu1 %6077  ;;  %v6710_v24 = vsel %vm11625_vm15, %v13040_v16, %v13029_v42 }
 0x227   :  { %5714 = vrot.lane.b32.xlu0 %v12991_v54, %s11181_s26  ;;  %v13106_v4 = vld [vmem:[#allocation2 + $0xa8] sm:$0xf]  ;;  %5205 = vst.msk [vmem:[#allocation3 + $0x118] sm:$0xf] %vm766_vm2, %v4637_v34  ;;  %v1346_v18 = vrot.slane %v1344_v44, 7  ;;  %v1352_v59 = vshrl.u32 %v10598_v1, 16  ;;  %v6670_v44 = vor.u32 %v13079_v56, %v13049_v38  ;;  %v2527_v42 = vsel %vm11625_vm15, %v13042_v29, %v13038_v12 }
 0x228   :  { %v1355_v46 = vshll.u32 %v10598_v1, 16  ;;  %v13109_v11 = vld [vmem:[#allocation2 + $0x88] sm:$0xf]  ;;  %v17034_v53 = vrot.slane %v12975_v61, 5  ;;  %v1367_v26 = vrot.slane %v13062_v58, 4  ;;  %v1371_v5 = vrot.slane %v1369_v30, 7 }
 0x229   :  { %v1829_v37 = vld [vmem:[#allocation2 + $0xe4] sm:$0xf]  ;;  %v1965_v43 = vld [vmem:[#allocation2 + $0x90] sm:$0xf]  ;;  %v2494_v62 = vshrl.u32 %v13085_v33, 16  ;;  %v1349_v14 = vor.u32 %v1347_v32, %v1346_v18  ;;  %v1350_v63 = vrot.slane %v1346_v18, 4 }
 0x22a   :  { %v3485_v54 = vsel %vm11586_vm12, %v13019_v23, %v17034_v53  ;;  %v1840_v19 = vld [vmem:[#allocation2 + $0xf8] sm:$0x1]  ;;  %v1354_v47 = vrot.slane %v1352_v59, 7  ;;  %2029 = vst.msk [vmem:[#allocation3 + $0x120] sm:$0xf] %vm766_vm2, %v1965_v43  ;;  %v1374_v61 = vor.u32 %v1372_v36, %v1371_v5  ;;  %v1376_v23 = vrot.slane %v1371_v5, 4  ;;  %5712 = vrot.lane.b32.xlu1 %v13017_v50, %s11181_s26  ;;  %v4030_v5 = vpop.permute.xlu0 %4029 }
 0x22b   :  { %6253 = vst.msk [vmem:[#allocation3 + $0xac] sm:$0xf] %vm3804_vm3, %v6076_v52  ;;  %6254 = vst.msk [vmem:[#allocation3 + $0xb8] sm:$0xf] %vm3804_vm3, %v6078_v8  ;;  %v1833_v31 = vld [vmem:[#allocation2 + $0xec] sm:$0x1]  ;;  %5710 = vrot.lane.b32.xlu0 %v13005_v10, %s11181_s26  ;;  %v1830_v32 = vsel %vm11538_vm6, %v1349_v14, %v1829_v37  ;;  %v4032_v37 = vpop.permute.xlu1 %4031 }
 0x22c   :  { %v4600_v58 = vshll.u32 %v13109_v11, 16  ;;  %v1966_v33 = vld [vmem:[#allocation2 + $0x94] sm:$0xf]  ;;  %v1357_v1 = vor.u32 %v1355_v46, %v1354_v47  ;;  %v1359_v34 = vrot.slane %v1354_v47, 4  ;;  %v4286_v30 = vld [vmem:[#allocation2 + $0x8c] sm:$0x1]  ;;  %v1375_v10 = vsel %vm11548_vm8, %v1367_v26, %v1374_v61 }
 0x22d   :  { %2030 = vst.msk [vmem:[#allocation3 + $0x12c] sm:$0xf] %vm766_vm2, %v1966_v33  ;;  %v2505_v36 = vshrl.u32 %v13106_v4, 16  ;;  %v2508_v18 = vshll.u32 %v13106_v4, 16  ;;  %v6342_v59 = vld [vmem:[#allocation2 + $0xb4] sm:$0xf]  ;;  %v1841_v50 = vsel %vm11554_vm9, %v1376_v23, %v1840_v19 }
 0x22e   :  { %1831 = vst [vmem:[#allocation2 + $0xe4] sm:$0xf] %v1830_v32  ;;  %v4284_v53 = vld [vmem:[#allocation2 + $0x84] sm:$0xf]  ;;  %v2486_v46 = vrot.slane %v2484_v51, 5  ;;  %v6679_v43 = vrot.slane %v6677_v20, 4  ;;  %v1358_v4 = vsel %vm11548_vm8, %v1350_v63, %v1357_v1  ;;  %v1834_v52 = vsel %vm11554_vm9, %v1359_v34, %v1833_v31  ;;  %3666 = vrot.lane.b32.xlu1 %v3485_v54, %s11180_s25  ;;  %v7188_v1 = vpop.permute.xlu0 %7187 }
 0x22f   :  { %1839 = vst.msk [vmem:[#allocation2 + $0xf4] sm:$0xf] %vm766_vm2, %v1375_v10  ;;  %1842 = vst [vmem:[#allocation2 + $0xf8] sm:$0x1] %v1841_v50  ;;  %v13154_v26 = vrot.slane %v2490_v49, 5  ;;  %v13157_v17 = vrot.slane %v4600_v58, 5  ;;  %7215 = vrot.lane.b32.xlu0 %v6700_v48, %s11179_s24  ;;  %v7190_v58 = vpop.permute.xlu1 %7189 }
 0x230   :  { %4206 = vst.msk [vmem:[#allocation3 + $0xc0] sm:$0xf] %vm4189_vm4, %v4030_v5  ;;  %4207 = vst.msk [vmem:[#allocation3 + $0xcc] sm:$0xf] %vm4189_vm4, %v4032_v37  ;;  %v6338_v8 = vld [vmem:[#allocation2 + $0xa4] sm:$0x1]  ;;  %v2487_v34 = vor.u32 %v2486_v46, %v13090_v41 }
 0x231   :  { %1832 = vst.msk [vmem:[#allocation2 + $0xe8] sm:$0xf] %vm766_vm2, %v1358_v4  ;;  %1835 = vst [vmem:[#allocation2 + $0xec] sm:$0x1] %v1834_v52  ;;  %v4604_v20 = vshrl.u32 %v13109_v11, 16  ;;  %v4610_v51 = vshll.u32 %v4286_v30, 16  ;;  %v6680_v11 = vor.u32 %v6679_v43, %v13083_v57 }
 0x232   :  { %v2110_v14 = vld [vmem:[#allocation2 + $0xa4] sm:$0x1]  ;;  %v2496_v63 = vrot.slane %v2494_v62, 4  ;;  %v6712_v19 = vshrl.u32 %v6342_v59, 16  ;;  %v6715_v47 = vshll.u32 %v6342_v59, 16  ;;  %v4591_v61 = vshrl.u32 %v4284_v53, 16  ;;  %7217 = vrot.lane.b32.xlu1 %v6710_v24, %s11179_s24  ;;  %v2965_v52 = vpop.permute.xlu0 %2964 }
 0x233   :  { %v2507_v49 = vrot.slane %v2505_v36, 4  ;;  %v2510_v23 = vrot.slane %v2508_v18, 5  ;;  %v6343_v31 = vld [vmem:[#allocation2 + $0xb8] sm:$0xf]  ;;  %v4606_v33 = vrot.slane %v4604_v20, 4  ;;  %v4594_v32 = vshll.u32 %v4284_v53, 16  ;;  %3664 = vrot.lane.b32.xlu0 %v13027_v39, %s11180_s25  ;;  %v10846_v39 = vpop.f32.mrf.mxu0 }
 0x234   :  { %v6683_v30 = vshll.u32 %v6338_v8, 16  ;;  %v4593_v48 = vrot.slane %v4591_v61, 4  ;;  %7369 = vst.msk [vmem:[#allocation3 + $0x7c] sm:$0xf] %vm4189_vm4, %v7188_v1  ;;  %7370 = vst.msk [vmem:[#allocation3 + $0x88] sm:$0xf] %vm4189_vm4, %v7190_v58  ;;  %v2497_v41 = vor.u32 %v2496_v63, %v13154_v26  ;;  %v2967_v8 = vpop.permute.xlu1 %2966  ;;  %v600_v1 = vadd.f32 %v12980_v25, %v10846_v39 }
 0x235   :  { %v2500_v54 = vshll.u32 %v2110_v14, 16  ;;  %v13166_v62 = vld [vmem:[#allocation2 + $0xb8] sm:$0xf]  ;;  %v4607_v36 = vor.u32 %v4606_v33, %v13157_v17  ;;  %v4612_v18 = vrot.slane %v4610_v51, 5  ;;  %v4596_v59 = vrot.slane %v4594_v32, 5  ;;  %v591_v58 = vpop.f32.mrf.mxu0 }
 0x236   :  { %v13178_v10 = vrot.slane %v6712_v19, 4  ;;  %v13180_v50 = vrot.slane %v6715_v47, 5  ;;  %v6721_v53 = vshll.u32 %v6343_v31, 16  ;;  %v5945_v5 = vld [vmem:[#allocation2 + $0xb4] sm:$0xf]  ;;  %v2511_v37 = vor.u32 %v2510_v23, %v2507_v49  ;;  %2994 = vrot.lane.b32.xlu1 %v2527_v42, %s11181_s26 }
 0x237   :  { %v6725_v46 = vshrl.u32 %v6343_v31, 16  ;;  %v4608_v43 = vrot.slane %v4607_v36, 4  ;;  %v4597_v4 = vor.u32 %v4596_v59, %v4593_v48  ;;  %v6671_v16 = vrot.slane %v6670_v44, 4  ;;  %v13191_v20 = vld [vmem:[#allocation2 + $0xbc] sm:$0x1]  ;;  %6099 = vrot.lane.b32.xlu0 %v5945_v5, %s11180_s25 }
 0x238   :  { %v13189_v24 = vrot.slane %v6683_v30, 5  ;;  %v5538_v51 = vrot.slane %v13166_v62, 5  ;;  %3143 = vst.msk [vmem:[#allocation3 + $0xa8] sm:$0xf] %vm3128_vm0, %v2965_v52  ;;  %3144 = vst.msk [vmem:[#allocation3 + $0xb4] sm:$0xf] %vm3128_vm0, %v2967_v8  ;;  %v6718_v47 = vor.u32 %v13180_v50, %v13178_v10 }
 0x239   :  { %v13196_v14 = vrot.slane %v2487_v34, 4  ;;  %v13198_v63 = vrot.slane %v6680_v11, 4  ;;  %v13200_v19 = vld [vmem:[#allocation2 + $0xb4] sm:$0xe]  ;;  %v4613_v12 = vsel %vm11625_vm15, %v4608_v43, %v4612_v18  ;;  %v4598_v29 = vrot.slane %v4597_v4, 4  ;;  %v5699_v34 = vpop.permute.xlu0 %5698 }
 0x23a   :  { %v1963_v38 = vld [vmem:[#allocation2 + $0x84] sm:$0xf]  ;;  %3819 = vst.msk [vmem:[#allocation3 + $0xa8] sm:$0xf] %vm3804_vm3, %v13066_v28  ;;  %3820 = vst.msk [vmem:[#allocation3 + $0xb4] sm:$0xf] %vm3804_vm3, %v12965_v40 }
 0x23b   :  { %v13210_v56 = vrot.slane %v2497_v41, 4  ;;  %v13212_v44 = vrot.slane %v2500_v54, 5  ;;  %v13216_v61 = vrot.slane %v6721_v53, 5  ;;  %5203 = vst.msk [vmem:[#allocation3 + $0x100] sm:$0xf] %vm766_vm2, %v4613_v12  ;;  %v11055_v40 = vld [vmem:[%s16918_s0 + $0xe0] sm:$0xff]   ;;  %v4603_v32 = vsel %vm11625_vm15, %v4598_v29, %v13157_v17 }
 0x23c   :  { %2027 = vst.msk [vmem:[#allocation3 + $0x108] sm:$0xf] %vm766_vm2, %v1963_v38  ;;  %v1964_v28 = vld [vmem:[#allocation2 + $0x88] sm:$0xf]  ;;  %v5946_v49 = vld [vmem:[#allocation2 + $0xb8] sm:$0xf]  ;;  %v592_v17 = vadd.f32 %v12980_v25, %v591_v58  ;;  %10864 = vmatprep.mubr.msk.bf16.mxu0 %vm312_vm1, %v11055_v40  ;;  %v6676_v54 = vsel %vm11625_vm15, %v6671_v16, %v13083_v57  ;;  %v6686_v18 = vsel %vm11625_vm15, %v13198_v63, %v13189_v24 }
 0x23d   :  { %4204 = vst.msk [vmem:[#allocation3 + $0xa8] sm:$0xf] %vm4189_vm4, %v12661_v55  ;;  %4205 = vst.msk [vmem:[#allocation3 + $0xb4] sm:$0xf] %vm4189_vm4, %v12708_v27  ;;  %v13227_v23 = vrot.slane %v2511_v37, 4  ;;  %v6727_v33 = vrot.slane %v6725_v46, 4  ;;  %v5701_v27 = vpop.permute.xlu1 %5700  ;;  %7211 = vrot.lane.b32.xlu0 %v6676_v54, %s11179_s24  ;;  %6101 = vrot.lane.b32.xlu1 %v5946_v49, %s11180_s25  ;;  %v2493_v10 = vsel %vm11625_vm15, %v13196_v14, %v13154_v26  ;;  %v10847_v26 = vpop.f32.mrf.mxu0 }
 0x23e   :  { %v6344_v31 = vld [vmem:[#allocation2 + $0xbc] sm:$0x1]  ;;  %2028 = vst.msk [vmem:[#allocation3 + $0x114] sm:$0xf] %vm766_vm2, %v1964_v28  ;;  %v11056_v55 = vld [vmem:[%s16918_s0 + $0xe8] sm:$0xff]   ;;  %v5540_v30 = vrot.slane %v5538_v51, 4  ;;  %v2503_v46 = vsel %vm11625_vm15, %v13210_v56, %v13212_v44  ;;  %v13269_v8 = vpop.permute.xlu0 %3652 }
 0x23f   :  { %v11037_v11 = vld [vmem:[#allocation3 + $0x7c] ss:$12 sps:$4 sm:$0xff]   ;;  %v5541_v48 = vrot.slane %v13191_v20, 5  ;;  %5202 = vst.msk [vmem:[#allocation3 + $0xf4] sm:$0xf] %vm766_vm2, %v4603_v32  ;;  %10865 = vmatmul.mubr.msk.bf16.gmra.mxu0 %vm312_vm1, %v11056_v55  ;;  %v13259_v57 = vrot.slane %v6718_v47, 4  ;;  %v6728_v43 = vor.u32 %v6727_v33, %v13216_v61  ;;  %v2517_v16 = vsel %vm11625_vm15, %v13227_v23, %v12958_v6  ;;  %v594_v32 = vpop.f32.mrf.mxu0 }
 0x240   :  { %5872 = vst.msk [vmem:[#allocation3 + $0xdc] sm:$0xf] %vm3128_vm0, %v5699_v34  ;;  %5873 = vst.msk [vmem:[#allocation3 + $0xe8] sm:$0xf] %vm3128_vm0, %v5701_v27  ;;  %v11039_v36 = vld [vmem:[#allocation3 + $0x78] ss:$12 sps:$4 sm:$0xff]   ;;  %8895 = vmatprep.mubr.bf16.mxu1 %v11037_v11 }
 0x241   :  { %v3235_v59 = vld [vmem:[#allocation2 + $0xa8] sm:$0xe]  ;;  %v6345_v41 = vld [vmem:[#allocation2 + $0xc0] sm:$0xf]  ;;  %v10284_v50 = vrot.slane %v13200_v19, 9  ;;  %v6731_v53 = vshll.u32 %v6344_v31, 16  ;;  %v13271_v42 = vpop.permute.xlu1 %3654  ;;  %8896 = vmatmul.mubr.bf16.gmra.mxu1 %v11039_v36  ;;  %v5542_v24 = vsel %vm11586_vm12, %v5540_v30, %v5541_v48  ;;  %2988 = vrot.lane.b32.xlu0 %v2493_v10, %s11181_s26  ;;  %v6724_v6 = vsel %vm11625_vm15, %v13259_v57, %v13216_v61 }
 0x242   :  { %v3236_v5 = vld [vmem:[#allocation2 + $0xac] sm:$0xf]  ;;  %v11040_v37 = vld [vmem:[#allocation3 + $0x94] ss:$12 sps:$4 sm:$0xff]   ;;  %v740_v39 = vmax.f32 %v600_v1, 0.0  ;;  %v738_v52 = vmax.f32 %v592_v17, 0.0  ;;  %7213 = vrot.lane.b32.xlu1 %v6686_v18, %s11179_s24  ;;  %v13296_v1 = vpop.permute.xlu0 %6087  ;;  %v603_v10 = vadd.f32 %v12980_v25, %v10847_v26  ;;  %v595_v57 = vadd.f32 %v12980_v25, %v594_v32 }
 0x243   :  { %v13267_v4 = vld [vmem:[#allocation2 + $0xb0] sm:$0x1]  ;;  %v6736_v20 = vshrl.u32 %v6345_v41, 16  ;;  %v6739_v14 = vshll.u32 %v6345_v41, 16  ;;  %8903 = vmatprep.mubr.bf16.mxu1 %v11040_v37  ;;  %v10252_v63 = vrot.slane %v3235_v59, 9  ;;  %v3488_v19 = vrot.slane %v3236_v5, 5 }
 0x244   :  { %v6346_v12 = vld [vmem:[#allocation2 + $0xc4] sm:$0xf]  ;;  %v10603_v29 = vpack.c.bf16 %v740_v39, %v740_v39  ;;  %v10601_v38 = vpack.c.bf16 %v738_v52, %v738_v52  ;;  %v13289_v56 = vsel %vm11586_vm12, %v10284_v50, %v5538_v51  ;;  %v13291_v44 = vrot.slane %v6731_v53, 5  ;;  %v6347_v28 = vld [vmem:[#allocation2 + $0xc8] sm:$0x1]  ;;  %v7993_v40 = vld [vmem:[#allocation3 + $0x9c] sm:$0xff] }
 0x245   :  { %v3491_v47 = vrot.slane %v13267_v4, 5  ;;  %v13294_v49 = vrot.slane %v6728_v43, 4  ;;  %v5697_v61 = vpop.permute.xlu1 %5696  ;;  %v6738_v62 = vrot.slane %v6736_v20, 4  ;;  %v6741_v58 = vrot.slane %v6739_v14, 5  ;;  %v2114_v51 = vld [vmem:[#allocation2 + $0xb4] sm:$0xf]  ;;  %2992 = vrot.lane.b32.xlu0 %v2517_v16, %s11181_s26 }
 0x246   :  { %v1395_v23 = vshrl.u32 %v10603_v29, 16  ;;  %v1398_v31 = vshll.u32 %v10603_v29, 16  ;;  %v1378_v33 = vshrl.u32 %v10601_v38, 16  ;;  %v6745_v55 = vshll.u32 %v6346_v12, 16  ;;  %v7991_v27 = vld [vmem:[#allocation3 + $0x90] sm:$0xff]  ;;  %2990 = vrot.lane.b32.xlu1 %v2503_v46, %s11181_s26 }
 0x247   :  { %v1381_v34 = vshll.u32 %v10601_v38, 16  ;;  %5871 = vst.msk [vmem:[#allocation3 + $0xd0] sm:$0xf] %vm3128_vm0, %v5697_v61  ;;  %v13301_v11 = vsel %vm11586_vm12, %v10252_v63, %v3488_v19  ;;  %v6749_v30 = vshrl.u32 %v6346_v12, 16  ;;  %v2115_v48 = vld [vmem:[#allocation2 + $0xb8] sm:$0xf]  ;;  %v10353_v36 = vcombine.low %v7991_v27, %v7993_v40 }
 0x248   :  { %v13303_v17 = vrot.slane %v1395_v23, 7  ;;  %v13305_v54 = vrot.slane %v1378_v33, 7  ;;  %6256 = vst.msk [vmem:[#allocation3 + $0xd0] sm:$0xf] %vm3804_vm3, %v13009_v3  ;;  %v13311_v18 = vrot.slane %v3488_v19, 4  ;;  %v6755_v50 = vshll.u32 %v6347_v28, 16  ;;  %v13317_v3 = vpop.permute.xlu0 %4041 }
 0x249   :  { %v1850_v59 = vld [vmem:[#allocation2 + $0x108] sm:$0xf]  ;;  %v1843_v41 = vld [vmem:[#allocation2 + $0xfc] sm:$0xf]  ;;  %v2529_v53 = vshrl.u32 %v2114_v51, 16  ;;  %v13319_v43 = vpop.permute.xlu1 %3650  ;;  %8904 = vmatmul.mubr.bf16.gmra.mxu1 %v10353_v36  ;;  %v6742_v46 = vor.u32 %v6741_v58, %v6738_v62  ;;  %v2532_v39 = vshll.u32 %v2114_v51, 16  ;;  %7219 = vrot.lane.b32.xlu0 %v6724_v6, %s11179_s24  ;;  %v6734_v19 = vsel %vm11625_vm15, %v13294_v49, %v13291_v44 }
 0x24a   :  { %v1400_v5 = vor.u32 %v1398_v31, %v13303_v17  ;;  %v1383_v37 = vor.u32 %v1381_v34, %v13305_v54  ;;  %v2538_v52 = vshll.u32 %v2115_v48, 16  ;;  %v13321_v16 = vld [vmem:[#allocation2 + $0xbc] sm:$0x1]  ;;  %v741_v20 = vmax.f32 %v603_v10, 0.0  ;;  %5720 = vrot.lane.b32.xlu1 %v5542_v24, %s11181_s26  ;;  %v1970_v28 = vld [vmem:[#allocation2 + $0xac] sm:$0xf] }
 0x24b   :  { %v2542_v26 = vshrl.u32 %v2115_v48, 16  ;;  %v739_v63 = vmax.f32 %v595_v57, 0.0  ;;  %v13333_v12 = vrot.slane %v6745_v55, 5  ;;  %v13335_v29 = vrot.slane %v6749_v30, 4  ;;  %v4293_v31 = vld [vmem:[#allocation2 + $0xa8] sm:$0xf] }
 0x24c   :  { %v1851_v25 = vsel %vm11538_vm6, %v1400_v5, %v1850_v59  ;;  %v1844_v14 = vsel %vm11538_vm6, %v1383_v37, %v1843_v41  ;;  %v10604_v38 = vpack.c.bf16 %v741_v20, %v741_v20  ;;  %v13337_v40 = vrot.slane %v6755_v50, 5  ;;  %2034 = vst.msk [vmem:[#allocation3 + $0x15c] sm:$0xf] %vm766_vm2, %v1970_v28  ;;  %v5695_v33 = vpop.permute.xlu0 %5694  ;;  %v4294_v58 = vld [vmem:[#allocation2 + $0xac] sm:$0xf] }
 0x24d   :  { %1852 = vst [vmem:[#allocation2 + $0x108] sm:$0xf] %v1851_v25  ;;  %1845 = vst [vmem:[#allocation2 + $0xfc] sm:$0xf] %v1844_v14  ;;  %v13339_v23 = vrot.slane %v2529_v53, 4  ;;  %v2548_v6 = vshll.u32 %v13321_v16, 16  ;;  %v10602_v24 = vpack.c.bf16 %v739_v63, %v739_v63  ;;  %v13343_v44 = vpop.permute.xlu1 %6089  ;;  %5718 = vrot.lane.b32.xlu0 %v13289_v56, %s11181_s26  ;;  %v12_v4 = vstv %s16921_s4 }
 0x24e   :  { %v13345_v49 = vrot.slane %v6742_v46, 4  ;;  %v13347_v32 = vrot.slane %v2532_v39, 5  ;;  %v1403_v61 = vshrl.u32 %v10604_v38, 16  ;;  %v1406_v62 = vshll.u32 %v10604_v38, 16  ;;  %5870 = vst.msk [vmem:[#allocation3 + $0xc4] sm:$0xf] %vm3128_vm0, %v5695_v33  ;;  %7221 = vrot.lane.b32.xlu1 %v6734_v19, %s11179_s24 }
 0x24f   :  { %v13350_v55 = vrot.slane %v2538_v52, 5  ;;  %v13352_v51 = vrot.slane %v2542_v26, 4  ;;  %v1386_v34 = vshrl.u32 %v10602_v24, 16  ;;  %v1389_v27 = vshll.u32 %v10602_v24, 16  ;;  %6255 = vst.msk [vmem:[#allocation3 + $0xc4] sm:$0xf] %vm3804_vm3, %v12931_v60 }
 0x250   :  { %v1401_v30 = vrot.slane %v13303_v17, 4  ;;  %v1405_v48 = vrot.slane %v1403_v61, 7  ;;  %v1854_v36 = vld [vmem:[#allocation2 + $0x110] sm:$0x1]  ;;  %v4663_v59 = vshrl.u32 %v4293_v31, 16  ;;  %v4666_v41 = vshll.u32 %v4293_v31, 16  ;;  %v7200_v37 = vpop.permute.xlu0 %7199 }
 0x251   :  { %v1384_v10 = vrot.slane %v13305_v54, 4  ;;  %v1388_v57 = vrot.slane %v1386_v34, 7  ;;  %v1847_v50 = vld [vmem:[#allocation2 + $0x104] sm:$0x1]  ;;  %v4672_v53 = vshll.u32 %v4294_v58, 16  ;;  %v4676_v5 = vshrl.u32 %v4294_v58, 16  ;;  %v13361_v46 = vpop.permute.xlu1 %4043  ;;  %3668 = vrot.lane.b32.xlu0 %v13301_v11, %s11180_s25 }
 0x252   :  { %v3492_v60 = vsel %vm11586_vm12, %v13311_v18, %v3491_v47  ;;  %v1408_v56 = vor.u32 %v1406_v62, %v1405_v48  ;;  %v1410_v17 = vrot.slane %v1405_v48, 4  ;;  %v4665_v39 = vrot.slane %v4663_v59, 4  ;;  %v1967_v52 = vld [vmem:[#allocation2 + $0x9c] sm:$0xf]  ;;  %v1969_v20 = vld [vmem:[#allocation2 + $0xa8] sm:$0xf] }
 0x253   :  { %7375 = vst.msk [vmem:[#allocation3 + $0xc4] sm:$0xf] %vm4189_vm4, %v7200_v37  ;;  %v1391_v54 = vor.u32 %v1389_v27, %v1388_v57  ;;  %v1393_v26 = vrot.slane %v1388_v57, 4  ;;  %v4668_v25 = vrot.slane %v4666_v41, 5  ;;  %v4295_v14 = vld [vmem:[#allocation2 + $0xb0] sm:$0x1]  ;;  %3670 = vrot.lane.b32.xlu1 %v3492_v60, %s11180_s25  ;;  %v6752_v47 = vor.u32 %v13335_v29, %v13333_v12 }
 0x254   :  { %v4290_v63 = vld [vmem:[#allocation2 + $0x9c] sm:$0xf]  ;;  %2031 = vst.msk [vmem:[#allocation3 + $0x138] sm:$0xf] %vm766_vm2, %v1967_v52  ;;  %2033 = vst.msk [vmem:[#allocation3 + $0x150] sm:$0xf] %vm766_vm2, %v1969_v20  ;;  %v1409_v18 = vsel %vm11548_vm8, %v1401_v30, %v1408_v56  ;;  %v1855_v19 = vsel %vm11554_vm9, %v1410_v17, %v1854_v36  ;;  %v13391_v62 = vpop.permute.xlu0 %3648 }
 0x255   :  { %v4291_v38 = vld [vmem:[#allocation2 + $0xa0] sm:$0xf]  ;;  %v13383_v28 = vld [vmem:[#allocation2 + $0xa4] sm:$0x1]  ;;  %13 = vst [vmem:[#allocation5] sm:$0x1] %v12_v4  ;;  %v1392_v11 = vsel %vm11548_vm8, %v1384_v10, %v1391_v54  ;;  %v1848_v29 = vsel %vm11554_vm9, %v1393_v26, %v1847_v50  ;;  %v4669_v33 = vor.u32 %v4668_v25, %v4665_v39  ;;  %v7202_v58 = vpop.permute.xlu1 %7201 }
 0x256   :  { %v1968_v24 = vld [vmem:[#allocation2 + $0xa0] sm:$0xf]  ;;  %1853 = vst.msk [vmem:[#allocation2 + $0x10c] sm:$0xf] %vm766_vm2, %v1409_v18  ;;  %1856 = vst [vmem:[#allocation2 + $0x110] sm:$0x1] %v1855_v19 }
 0x257   :  { %v5947_v31 = vld [vmem:[#allocation2 + $0xc0] sm:$0xf]  ;;  %v4674_v61 = vrot.slane %v4672_v53, 5  ;;  %2032 = vst.msk [vmem:[#allocation3 + $0x144] sm:$0xf] %vm766_vm2, %v1968_v24  ;;  %v4678_v27 = vrot.slane %v4676_v5, 4  ;;  %v2535_v24 = vor.u32 %v13347_v32, %v13339_v23 }
 0x258   :  { %v5948_v34 = vld [vmem:[#allocation2 + $0xc4] sm:$0xf]  ;;  %1846 = vst.msk [vmem:[#allocation2 + $0x100] sm:$0xf] %vm766_vm2, %v1392_v11  ;;  %1849 = vst [vmem:[#allocation2 + $0x104] sm:$0x1] %v1848_v29  ;;  %6103 = vrot.lane.b32.xlu0 %v5947_v31, %s11180_s25  ;;  %v2977_v54 = vpop.permute.xlu0 %2976  ;;  %v2545_v31 = vor.u32 %v13352_v51, %v13350_v55 }
 0x259   :  { %v4682_v30 = vshll.u32 %v4295_v14, 16  ;;  %v4639_v48 = vshrl.u32 %v4290_v63, 16  ;;  %v4642_v36 = vshll.u32 %v4290_v63, 16  ;;  %7376 = vst.msk [vmem:[#allocation3 + $0xd0] sm:$0xf] %vm4189_vm4, %v7202_v58  ;;  %v4670_v41 = vrot.slane %v4669_v33, 4  ;;  %6105 = vrot.lane.b32.xlu1 %v5948_v34, %s11180_s25  ;;  %v2979_v26 = vpop.permute.xlu1 %2978 }
 0x25a   :  { %v2069_v59 = vld [vmem:[#allocation2] sm:$0xf]  ;;  %v4648_v10 = vshll.u32 %v4291_v38, 16  ;;  %v4652_v57 = vshrl.u32 %v4291_v38, 16  ;;  %v4658_v50 = vshll.u32 %v13383_v28, 16  ;;  %v4679_v53 = vor.u32 %v4678_v27, %v4674_v61 }
 0x25b   :  { %v4684_v37 = vrot.slane %v4682_v30, 5  ;;  %v4641_v60 = vrot.slane %v4639_v48, 4  ;;  %v4644_v56 = vrot.slane %v4642_v36, 5  ;;  %v6753_v5 = vrot.slane %v6752_v47, 4  ;;  %v13398_v17 = vld [vmem:[#allocation2 + $0xc4] sm:$0xf] }
 0x25c   :  { %v4675_v39 = vsel %vm11625_vm15, %v4670_v41, %v4674_v61  ;;  %v4650_v52 = vrot.slane %v4648_v10, 5  ;;  %v4654_v20 = vrot.slane %v4652_v57, 4  ;;  %v13402_v25 = vld [vmem:[#allocation2 + $0xb8] sm:$0xf]  ;;  %v2169_v14 = vshrl.u32 %v2069_v59, 16  ;;  %v6084_v27 = vpop.permute.xlu0 %6083 }
 0x25d   :  { %v2172_v63 = vshll.u32 %v2069_v59, 16  ;;  %5208 = vst.msk [vmem:[#allocation3 + $0x13c] sm:$0xf] %vm766_vm2, %v4675_v39  ;;  %v4680_v4 = vrot.slane %v4679_v53, 4  ;;  %v4645_v18 = vor.u32 %v4644_v56, %v4641_v60  ;;  %v13405_v19 = vld [vmem:[#allocation2 + $0xa0] sm:$0xf]  ;;  %v6086_v30 = vpop.permute.xlu1 %6085 }
 0x25e   :  { %v13407_v47 = vld [vmem:[#allocation2 + $0xc0] sm:$0xe]  ;;  %3149 = vst.msk [vmem:[#allocation3 + $0xf0] sm:$0xf] %vm3128_vm0, %v2977_v54  ;;  %3150 = vst.msk [vmem:[#allocation3 + $0xfc] sm:$0xf] %vm3128_vm0, %v2979_v26  ;;  %v4655_v11 = vor.u32 %v4654_v20, %v4650_v52 }
 0x25f   :  { %v3897_v38 = vld [vmem:[#allocation2 + $0xb4] sm:$0xf]  ;;  %v3898_v28 = vld [vmem:[#allocation2 + $0xb8] sm:$0xf]  ;;  %3825 = vst.msk [vmem:[#allocation3 + $0xf0] sm:$0xf] %vm3804_vm3, %v13269_v8  ;;  %v4685_v32 = vsel %vm11625_vm15, %v4680_v4, %v4684_v37  ;;  %v6748_v8 = vsel %vm11625_vm15, %v13345_v49, %v13333_v12 }
 0x260   :  { %v13415_v29 = vld [vmem:[#allocation2 + $0xb4] sm:$0xe]  ;;  %3826 = vst.msk [vmem:[#allocation3 + $0xfc] sm:$0xf] %vm3804_vm3, %v13271_v42  ;;  %4053 = vrot.lane.b32.xlu0 %v3897_v38, %s11179_s24  ;;  %4055 = vrot.lane.b32.xlu1 %v3898_v28, %s11179_s24  ;;  %v2550_v33 = vrot.slane %v2548_v6, 5  ;;  %v4646_v51 = vrot.slane %v4645_v18, 4  ;;  %v6758_v42 = vsel %vm11625_vm15, %v6753_v5, %v13337_v40 }
 0x261   :  { %v2070_v23 = vld [vmem:[#allocation2 + $0x4] sm:$0xf]  ;;  %v4660_v61 = vrot.slane %v4658_v50, 5  ;;  %v5291_v58 = vld [vmem:[#allocation2 + $0xc0] sm:$0xe]  ;;  %v5545_v34 = vrot.slane %v13398_v17, 5 }
 0x262   :  { %v5293_v16 = vld [vmem:[#allocation2 + $0xc8] sm:$0x1]  ;;  %v3495_v6 = vrot.slane %v13402_v25, 5  ;;  %5209 = vst.msk [vmem:[#allocation3 + $0x148] sm:$0xf] %vm766_vm2, %v4685_v32  ;;  %v2171_v36 = vrot.slane %v2169_v14, 4  ;;  %v4651_v12 = vsel %vm11625_vm15, %v4646_v51, %v4650_v52  ;;  %v4038_v25 = vpop.permute.xlu0 %4037  ;;  %v4040_v14 = vpop.permute.xlu1 %4039 }
 0x263   :  { %v3238_v48 = vld [vmem:[#allocation2 + $0xb4] sm:$0xe]  ;;  %v2174_v59 = vrot.slane %v2172_v63, 5  ;;  %v4656_v49 = vrot.slane %v4655_v11, 4  ;;  %6257 = vst.msk [vmem:[#allocation3 + $0xdc] sm:$0xf] %vm3804_vm3, %v6084_v27 }
 0x264   :  { %6258 = vst.msk [vmem:[#allocation3 + $0xe8] sm:$0xf] %vm3804_vm3, %v6086_v30  ;;  %v2536_v40 = vrot.slane %v2535_v24, 4  ;;  %v2546_v41 = vrot.slane %v2545_v31, 4  ;;  %v3240_v10 = vld [vmem:[#allocation2 + $0xbc] sm:$0x1]  ;;  %7223 = vrot.lane.b32.xlu0 %v6748_v8, %s11179_s24  ;;  %7225 = vrot.lane.b32.xlu1 %v6758_v42, %s11179_s24  ;;  %v10850_v30 = vpop.f32.mrf.mxu0 }
 0x265   :  { %v2178_v57 = vshll.u32 %v2070_v23, 16  ;;  %v2182_v50 = vshrl.u32 %v2070_v23, 16  ;;  %5206 = vst.msk [vmem:[#allocation3 + $0x124] sm:$0xf] %vm766_vm2, %v4651_v12  ;;  %v13444_v60 = vld [vmem:[#allocation2 + $0xc4] sm:$0xf]  ;;  %v4661_v5 = vsel %vm11625_vm15, %v4656_v49, %v4660_v61  ;;  %v2175_v38 = vor.u32 %v2174_v59, %v2171_v36 }
 0x266   :  { %v13446_v56 = vld [vmem:[#allocation2 + $0xc8] sm:$0x1]  ;;  %v13453_v39 = vld [vmem:[#allocation2 + $0xb8] sm:$0xf]  ;;  %v10285_v52 = vrot.slane %v5291_v58, 9  ;;  %v5547_v20 = vrot.slane %v5545_v34, 4  ;;  %v2541_v28 = vsel %vm11625_vm15, %v2536_v40, %v13350_v55  ;;  %v2551_v24 = vsel %vm11625_vm15, %v2546_v41, %v2550_v33  ;;  %v7198_v36 = vpop.permute.xlu1 %7197 }
 0x267   :  { %17035 = vst [vmem:[#allocation37_spill] sm:$0xff] %v13446_v56  ;;  %v5548_v54 = vrot.slane %v5293_v16, 5  ;;  %5207 = vst.msk [vmem:[#allocation3 + $0x130] sm:$0xf] %vm766_vm2, %v4661_v5  ;;  %v13456_v26 = vld [vmem:[#allocation2 + $0xbc] sm:$0x1] }
 0x268   :  { %17036 = vst [vmem:[#allocation38_spill] sm:$0xff] %v13456_v26  ;;  %v10253_v63 = vrot.slane %v3238_v48, 9  ;;  %v3497_v4 = vrot.slane %v3495_v6, 4  ;;  %v3498_v18 = vrot.slane %v3240_v10, 5  ;;  %4210 = vst.msk [vmem:[#allocation3 + $0xf0] sm:$0xf] %vm4189_vm4, %v4038_v25  ;;  %2996 = vrot.lane.b32.xlu0 %v2541_v28, %s11181_s26  ;;  %2998 = vrot.lane.b32.xlu1 %v2551_v24, %s11181_s26  ;;  %v5546_v33 = vsel %vm11586_vm12, %v10285_v52, %v5545_v34  ;;  %v7196_v48 = vpop.permute.xlu0 %7195  ;;  %v607_v24 = vpop.f32.mrf.mxu0 }
 0x269   :  { %4211 = vst.msk [vmem:[#allocation3 + $0xfc] sm:$0xf] %vm4189_vm4, %v4040_v14  ;;  %v13465_v31 = vrot.slane %v2178_v57, 5  ;;  %v2071_v11 = vld [vmem:[#allocation2 + $0x8] sm:$0x1]  ;;  %v2184_v23 = vrot.slane %v2182_v50, 4  ;;  %v5549_v58 = vsel %vm11586_vm12, %v5547_v20, %v5548_v54 }
 0x26a   :  { %v13471_v61 = vld [vmem:[#allocation2 + $0x10] sm:$0xf]  ;;  %v4297_v8 = vld [vmem:[#allocation2 + $0xb8] sm:$0xf]  ;;  %v6348_v16 = vld [vmem:[#allocation2 + $0xcc] sm:$0xf]  ;;  %v3496_v59 = vsel %vm11586_vm12, %v10253_v63, %v3495_v6  ;;  %v3499_v12 = vsel %vm11586_vm12, %v3497_v4, %v3498_v18 }
 0x26b   :  { %v6349_v27 = vld [vmem:[#allocation2 + $0xd0] sm:$0xf]  ;;  %v13483_v49 = vrot.slane %v2175_v38, 4  ;;  %v2188_v40 = vshll.u32 %v2071_v11, 16  ;;  %v13485_v41 = vld [vmem:[#allocation2 + $0xc] sm:$0xe]  ;;  %v2185_v57 = vor.u32 %v2184_v23, %v13465_v31  ;;  %v2975_v23 = vpop.permute.xlu1 %2974 }
 0x26c   :  { %v4298_v34 = vld [vmem:[#allocation2 + $0xbc] sm:$0x1]  ;;  %7373 = vst.msk [vmem:[#allocation3 + $0xac] sm:$0xf] %vm4189_vm4, %v7196_v48  ;;  %7374 = vst.msk [vmem:[#allocation3 + $0xb8] sm:$0xf] %vm4189_vm4, %v7198_v36  ;;  %5722 = vrot.lane.b32.xlu0 %v5546_v33, %s11181_s26  ;;  %5724 = vrot.lane.b32.xlu1 %v5549_v58, %s11181_s26  ;;  %v2973_v11 = vpop.permute.xlu0 %2972 }
 0x26d   :  { %v13489_v10 = vld [vmem:[#allocation2 + $0xf0] sm:$0xe]  ;;  %v5440_v50 = vrot.slane %v13471_v61, 5  ;;  %v4696_v6 = vshll.u32 %v4297_v8, 16  ;;  %v4700_v5 = vshrl.u32 %v4297_v8, 16  ;;  %v6760_v52 = vshrl.u32 %v6348_v16, 16 }
 0x26e   :  { %v6763_v20 = vshll.u32 %v6348_v16, 16  ;;  %v6769_v54 = vshll.u32 %v6349_v27, 16  ;;  %v13498_v25 = vld [vmem:[%s16919_s2] ss:$0 sm:$0xff]  ;;  %v6773_v63 = vshrl.u32 %v6349_v27, 16  ;;  %v4706_v28 = vshll.u32 %v4298_v34, 16 }
 0x26f   :  { %v616_v14 = vadd.f32 %v13498_v25, %v10850_v30  ;;  %v13501_v4 = vld [vmem:[#allocation2 + $0xd4] sm:$0x1]  ;;  %v13503_v18 = vrot.slane %v4696_v6, 5  ;;  %v4702_v38 = vrot.slane %v4700_v5, 4  ;;  %v13506_v33 = vrot.slane %v2188_v40, 5 }
 0x270   :  { %v10270_v58 = vrot.slane %v13485_v41, 9  ;;  %v4296_v16 = vld [vmem:[#allocation2 + $0xb4] sm:$0xf]  ;;  %v608_v48 = vadd.f32 %v13498_v25, %v607_v24  ;;  %3147 = vst.msk [vmem:[#allocation3 + $0xd8] sm:$0xf] %vm3128_vm0, %v2973_v11  ;;  %v13512_v30 = vrot.slane %v2185_v57, 4  ;;  %3672 = vrot.lane.b32.xlu0 %v3496_v59, %s11180_s25  ;;  %3674 = vrot.lane.b32.xlu1 %v3499_v12, %s11180_s25 }
 0x271   :  { %3148 = vst.msk [vmem:[#allocation3 + $0xe4] sm:$0xf] %vm3128_vm0, %v2975_v23  ;;  %v5949_v27 = vld [vmem:[#allocation2 + $0xcc] sm:$0xf]  ;;  %v5442_v36 = vrot.slane %v5440_v50, 4  ;;  %v4703_v34 = vor.u32 %v4702_v38, %v13503_v18  ;;  %v4708_v6 = vrot.slane %v4706_v28, 5 }
 0x272   :  { %v11065_v40 = vld [vmem:[%s16918_s0 + $0xf0] sm:$0xff]   ;;  %3823 = vst.msk [vmem:[#allocation3 + $0xd8] sm:$0xf] %vm3804_vm3, %v13391_v62  ;;  %3824 = vst.msk [vmem:[#allocation3 + $0xe4] sm:$0xf] %vm3804_vm3, %v13319_v43  ;;  %v13526_v57 = vrot.slane %v6760_v52, 4  ;;  %v5707_v52 = vpop.permute.xlu0 %5706 }
 0x273   :  { %v5248_v41 = vld [vmem:[#allocation2 + $0x14] sm:$0x1]  ;;  %v13528_v5 = vrot.slane %v6763_v20, 5  ;;  %v6779_v38 = vshll.u32 %v13501_v4, 16  ;;  %v744_v28 = vmax.f32 %v616_v14, 0.0  ;;  %v13535_v43 = vrot.slane %v6769_v54, 5  ;;  %10868 = vmatprep.mubr.msk.bf16.mxu0 %vm312_vm1, %v11065_v40  ;;  %v5709_v20 = vpop.permute.xlu1 %5708 }
 0x274   :  { %4208 = vst.msk [vmem:[#allocation3 + $0xd8] sm:$0xf] %vm4189_vm4, %v12963_v22  ;;  %4209 = vst.msk [vmem:[#allocation3 + $0xe4] sm:$0xf] %vm4189_vm4, %v13045_v35  ;;  %v5950_v62 = vld [vmem:[#allocation2 + $0xd0] sm:$0xf]  ;;  %v2181_v22 = vsel %vm11625_vm15, %v13483_v49, %v13465_v31  ;;  %6107 = vrot.lane.b32.xlu0 %v5949_v27, %s11180_s25 }
 0x275   :  { %v13537_v59 = vrot.slane %v6773_v63, 4  ;;  %v4704_v12 = vrot.slane %v4703_v34, 4  ;;  %v4687_v24 = vshrl.u32 %v4296_v16, 16  ;;  %v11044_v11 = vld [vmem:[#allocation3 + $0xac] ss:$12 sps:$4 sm:$0xff]   ;;  %v10607_v54 = vpack.c.bf16 %v744_v28, %v744_v28  ;;  %v10851_v28 = vpop.f32.mrf.mxu0  ;;  %6109 = vrot.lane.b32.xlu1 %v5950_v62, %s11180_s25 }
 0x276   :  { %v13544_v14 = vld [vmem:[#allocation2] sm:$0xe]  ;;  %v13546_v35 = vld [vmem:[#allocation2 + $0x4] sm:$0xf]  ;;  %v4690_v4 = vshll.u32 %v4296_v16, 16  ;;  %v742_v63 = vmax.f32 %v608_v48, 0.0  ;;  %v2191_v34 = vsel %vm11625_vm15, %v13512_v30, %v13506_v33  ;;  %v6766_v16 = vor.u32 %v13528_v5, %v13526_v57  ;;  %8911 = vmatprep.mubr.bf16.mxu1 %v11044_v11 }
 0x277   :  { %5876 = vst.msk [vmem:[#allocation3 + $0x10c] sm:$0xf] %vm3128_vm0, %v5707_v52  ;;  %5877 = vst.msk [vmem:[#allocation3 + $0x118] sm:$0xf] %vm3128_vm0, %v5709_v20  ;;  %v11046_v23 = vld [vmem:[#allocation3 + $0xa8] ss:$12 sps:$4 sm:$0xff]   ;;  %v4709_v31 = vsel %vm11625_vm15, %v4704_v12, %v4708_v6  ;;  %v13567_v6 = vsel %vm11586_vm12, %v10270_v58, %v5440_v50  ;;  %v13581_v61 = vpop.permute.xlu1 %3662  ;;  %v6776_v50 = vor.u32 %v13537_v59, %v13535_v43 }
 0x278   :  { %v5443_v40 = vrot.slane %v5248_v41, 5  ;;  %v13554_v51 = vld [vmem:[#allocation2 + $0x18] sm:$0xf]  ;;  %v4689_v49 = vrot.slane %v4687_v24, 4  ;;  %5211 = vst.msk [vmem:[#allocation3 + $0x160] sm:$0xf] %vm766_vm2, %v4709_v31  ;;  %v10605_v57 = vpack.c.bf16 %v742_v63, %v742_v63  ;;  %v13579_v24 = vpop.permute.xlu0 %3660  ;;  %8912 = vmatmul.mubr.bf16.gmra.mxu1 %v11046_v23  ;;  %v619_v20 = vadd.f32 %v13498_v25, %v10851_v28  ;;  %v610_v23 = vpop.f32.mrf.mxu0  ;;  %2936 = vrot.lane.b32.xlu0 %v2181_v22, %s11181_s26 }
 0x279   :  { %v1429_v48 = vshrl.u32 %v10607_v54, 16  ;;  %v1432_v52 = vshll.u32 %v10607_v54, 16  ;;  %v4692_v33 = vrot.slane %v4690_v4, 5  ;;  %v1971_v30 = vld [vmem:[#allocation2 + $0xb4] sm:$0xf]  ;;  %v13573_v62 = vrot.slane %v6779_v38, 5  ;;  %2938 = vrot.lane.b32.xlu1 %v2191_v34, %s11181_s26 }
 0x27a   :  { %v11047_v41 = vld [vmem:[#allocation3 + $0xc4] ss:$12 sps:$4 sm:$0xff]   ;;  %v13571_v27 = vsel %vm11586_vm12, %v5442_v36, %v5443_v40  ;;  %2035 = vst.msk [vmem:[#allocation3 + $0x168] sm:$0xf] %vm766_vm2, %v1971_v30  ;;  %v1972_v5 = vld [vmem:[#allocation2 + $0xb8] sm:$0xf]  ;;  %v611_v8 = vadd.f32 %v13498_v25, %v610_v23 }
 0x27b   :  { %v11066_v12 = vld [vmem:[%s16918_s0 + $0xf8] sm:$0xff]   ;;  %v13585_v36 = vrot.slane %v1429_v48, 7  ;;  %v4693_v38 = vor.u32 %v4692_v33, %v4689_v49  ;;  %2036 = vst.msk [vmem:[#allocation3 + $0x174] sm:$0xf] %vm766_vm2, %v1972_v5  ;;  %8919 = vmatprep.mubr.bf16.mxu1 %v11047_v41  ;;  %v10238_v11 = vrot.slane %v13544_v14, 9  ;;  %v3390_v54 = vrot.slane %v13546_v35, 5  ;;  %v5705_v22 = vpop.permute.xlu1 %5704 }
 0x27c   :  { %v6304_v58 = vld [vmem:[#allocation2 + $0x1c] sm:$0xf]  ;;  %v1864_v4 = vld [vmem:[#allocation2 + $0x120] sm:$0xf]  ;;  %v1412_v63 = vshrl.u32 %v10605_v57, 16  ;;  %v1415_v40 = vshll.u32 %v10605_v57, 16  ;;  %10869 = vmatmul.mubr.msk.bf16.gmra.mxu0 %vm312_vm1, %v11066_v12  ;;  %v13603_v12 = vpop.permute.xlu0 %6095 }
 0x27d   :  { %v13594_v59 = vrot.slane %v6766_v16, 4  ;;  %v13596_v31 = vld [vmem:[#allocation2 + $0x8] sm:$0x1]  ;;  %v6400_v49 = vshrl.u32 %v13554_v51, 16  ;;  %v1434_v28 = vor.u32 %v1432_v52, %v13585_v36  ;;  %v4694_v48 = vrot.slane %v4693_v38, 4  ;;  %v8001_v33 = vld [vmem:[#allocation3 + $0xcc] sm:$0xff] }
 0x27e   :  { %v6403_v30 = vshll.u32 %v13554_v51, 16  ;;  %v6409_v41 = vshll.u32 %v6304_v58, 16  ;;  %v6413_v57 = vshrl.u32 %v6304_v58, 16  ;;  %v13601_v5 = vrot.slane %v1412_v63, 7  ;;  %v3899_v34 = vld [vmem:[#allocation2 + $0xc0] sm:$0xf] }
 0x27f   :  { %v1865_v16 = vsel %vm11538_vm6, %v1434_v28, %v1864_v4  ;;  %v4699_v42 = vsel %vm11625_vm15, %v4694_v48, %v13503_v18  ;;  %v1857_v52 = vld [vmem:[#allocation2 + $0x114] sm:$0xf]  ;;  %v745_v38 = vmax.f32 %v619_v20, 0.0  ;;  %5875 = vst.msk [vmem:[#allocation3 + $0x100] sm:$0xf] %vm3128_vm0, %v5705_v22  ;;  %v13612_v63 = vrot.slane %v6776_v50, 4  ;;  %4057 = vrot.lane.b32.xlu0 %v3899_v34, %s11179_s24  ;;  %v13635_v34 = vpop.permute.xlu1 %3658 }
 0x280   :  { %v7999_v51 = vld [vmem:[#allocation3 + $0xc0] sm:$0xff]  ;;  %v3900_v58 = vld [vmem:[#allocation2 + $0xc4] sm:$0xf]  ;;  %v13616_v37 = vrot.slane %v3390_v54, 4  ;;  %v3393_v4 = vrot.slane %v13596_v31, 5  ;;  %v1417_v18 = vor.u32 %v1415_v40, %v13601_v5  ;;  %v13625_v20 = vrot.slane %v6400_v49, 4 }
 0x281   :  { %1866 = vst [vmem:[#allocation2 + $0x120] sm:$0xf] %v1865_v16  ;;  %5210 = vst.msk [vmem:[#allocation3 + $0x154] sm:$0xf] %vm766_vm2, %v4699_v42  ;;  %4059 = vrot.lane.b32.xlu1 %v3900_v58, %s11179_s24  ;;  %v10359_v50 = vcombine.low %v7999_v51, %v8001_v33  ;;  %v2117_v23 = vld [vmem:[#allocation2 + $0xd8] sm:$0xf]  ;;  %v10608_v48 = vpack.c.bf16 %v745_v38, %v745_v38  ;;  %v6772_v49 = vsel %vm11625_vm15, %v13594_v59, %v13535_v43 }
 0x282   :  { %6260 = vst.msk [vmem:[#allocation3 + $0x100] sm:$0xf] %vm3804_vm3, %v13343_v44  ;;  %v2118_v28 = vld [vmem:[#allocation2 + $0xdc] sm:$0xf]  ;;  %v743_v22 = vmax.f32 %v611_v8, 0.0  ;;  %v6405_v32 = vrot.slane %v6403_v30, 5  ;;  %v1858_v40 = vsel %vm11538_vm6, %v1417_v18, %v1857_v52  ;;  %v13633_v44 = vpop.permute.xlu0 %4049 }
 0x283   :  { %v13627_v16 = vrot.slane %v6409_v41, 5  ;;  %v13629_v42 = vrot.slane %v6413_v57, 4  ;;  %8920 = vmatmul.mubr.bf16.gmra.mxu1 %v10359_v50  ;;  %v13641_v33 = vld [vmem:[#allocation2 + $0x20] sm:$0x1]  ;;  %1859 = vst [vmem:[#allocation2 + $0x114] sm:$0xf] %v1858_v40  ;;  %5662 = vrot.lane.b32.xlu0 %v13567_v6, %s11181_s26 }
 0x284   :  { %v1437_v8 = vshrl.u32 %v10608_v48, 16  ;;  %v1440_v30 = vshll.u32 %v10608_v48, 16  ;;  %v10606_v41 = vpack.c.bf16 %v743_v22, %v743_v22  ;;  %v2553_v57 = vshrl.u32 %v2117_v23, 16  ;;  %v13643_v58 = vld [vmem:[#allocation2 + $0xf4] sm:$0xf] }
 0x285   :  { %v2556_v38 = vshll.u32 %v2117_v23, 16  ;;  %v2562_v51 = vshll.u32 %v2118_v28, 16  ;;  %v2566_v52 = vshrl.u32 %v2118_v28, 16  ;;  %5664 = vrot.lane.b32.xlu1 %v13571_v27, %s11181_s26  ;;  %v1435_v43 = vrot.slane %v13585_v36, 4  ;;  %v13650_v40 = vld [vmem:[#allocation2 + $0xf8] sm:$0x1] }
 0x286   :  { %v1439_v59 = vrot.slane %v1437_v8, 7  ;;  %v1420_v18 = vshrl.u32 %v10606_v41, 16  ;;  %v1423_v50 = vshll.u32 %v10606_v41, 16  ;;  %17037 = vst [vmem:[#allocation39_spill] sm:$0xff] %v13650_v40  ;;  %v6782_v23 = vsel %vm11625_vm15, %v13612_v63, %v13573_v62  ;;  %v1868_v27 = vld [vmem:[#allocation2 + $0x128] sm:$0x1]  ;;  %v5703_v36 = vpop.permute.xlu0 %5702  ;;  %v13660_v8 = vpop.permute.xlu1 %6097 }
 0x287   :  { %v6406_v28 = vor.u32 %v6405_v32, %v13625_v20  ;;  %v6416_v6 = vor.u32 %v13629_v42, %v13627_v16  ;;  %v6419_v48 = vshll.u32 %v13641_v33, 16  ;;  %v1941_v22 = vld [vmem:[#allocation2] sm:$0xf]  ;;  %v1418_v41 = vrot.slane %v13601_v5, 4  ;;  %v1942_v62 = vld [vmem:[#allocation2 + $0x4] sm:$0xf]  ;;  %7227 = vrot.lane.b32.xlu0 %v6772_v49, %s11179_s24 }
 0x288   :  { %v1442_v17 = vor.u32 %v1440_v30, %v1439_v59  ;;  %v1444_v55 = vrot.slane %v1439_v59, 4  ;;  %v1422_v53 = vrot.slane %v1420_v18, 7  ;;  %2005 = vst.msk [vmem:[#allocation3] sm:$0xf] %vm766_vm2, %v1941_v22  ;;  %v13665_v32 = vrot.slane %v2553_v57, 4 }
 0x289   :  { %5874 = vst.msk [vmem:[#allocation3 + $0xf4] sm:$0xf] %vm3128_vm0, %v5703_v36  ;;  %v2558_v63 = vrot.slane %v2556_v38, 5  ;;  %v13667_v20 = vrot.slane %v2562_v51, 5  ;;  %v2568_v42 = vrot.slane %v2566_v52, 4  ;;  %7229 = vrot.lane.b32.xlu1 %v6782_v23, %s11179_s24  ;;  %v13690_v49 = vrot.slane %v6406_v28, 4 }
 0x28a   :  { %v1861_v33 = vld [vmem:[#allocation2 + $0x11c] sm:$0x1]  ;;  %2006 = vst.msk [vmem:[#allocation3 + $0xc] sm:$0xf] %vm766_vm2, %v1942_v62  ;;  %v2119_v5 = vld [vmem:[#allocation2 + $0xe0] sm:$0x1]  ;;  %v1443_v30 = vsel %vm11548_vm8, %v1435_v43, %v1442_v17  ;;  %v1869_v57 = vsel %vm11554_vm9, %v1444_v55, %v1868_v27  ;;  %v1425_v38 = vor.u32 %v1423_v50, %v1422_v53  ;;  %v3394_v17 = vsel %vm11586_vm12, %v13616_v37, %v3393_v4  ;;  %v7208_v35 = vpop.permute.xlu0 %7207  ;;  %v13694_v43 = vpop.permute.xlu1 %4051 }
 0x28b   :  { %6259 = vst.msk [vmem:[#allocation3 + $0xf4] sm:$0xf] %vm3804_vm3, %v13296_v1  ;;  %v1427_v51 = vrot.slane %v1422_v53, 4  ;;  %v4299_v52 = vld [vmem:[#allocation2 + $0xc0] sm:$0xf]  ;;  %v3391_v1 = vsel %vm11586_vm12, %v10238_v11, %v3390_v54  ;;  %v13696_v14 = vrot.slane %v6416_v6, 4  ;;  %v2559_v4 = vor.u32 %v2558_v63, %v13665_v32 }
 0x28c   :  { %1867 = vst.msk [vmem:[#allocation2 + $0x124] sm:$0xf] %vm766_vm2, %v1443_v30  ;;  %1870 = vst [vmem:[#allocation2 + $0x128] sm:$0x1] %v1869_v57  ;;  %v4300_v53 = vld [vmem:[#allocation2 + $0xc4] sm:$0xf]  ;;  %v1426_v54 = vsel %vm11548_vm8, %v1418_v41, %v1425_v38  ;;  %v2569_v18 = vor.u32 %v2568_v42, %v13667_v20  ;;  %3612 = vrot.lane.b32.xlu0 %v3391_v1, %s11180_s25 }
 0x28d   :  { %v13698_v11 = vld [vmem:[#allocation2 + $0xe8] sm:$0xf]  ;;  %v1862_v37 = vsel %vm11554_vm9, %v1427_v51, %v1861_v33  ;;  %7379 = vst.msk [vmem:[#allocation3 + $0xf4] sm:$0xf] %vm4189_vm4, %v7208_v35  ;;  %v2572_v50 = vshll.u32 %v2119_v5, 16  ;;  %v4711_v28 = vshrl.u32 %v4299_v52, 16  ;;  %3614 = vrot.lane.b32.xlu1 %v3394_v17, %s11180_s25 }
 0x28e   :  { %v4301_v31 = vld [vmem:[#allocation2 + $0xc8] sm:$0x1]  ;;  %v13707_v23 = vld [vmem:[#allocation2 + $0xdc] sm:$0xf]  ;;  %1860 = vst.msk [vmem:[#allocation2 + $0x118] sm:$0xf] %vm766_vm2, %v1426_v54  ;;  %v13723_v57 = vpop.permute.xlu0 %3656  ;;  %v7210_v38 = vpop.permute.xlu1 %7209 }
 0x28f   :  { %1863 = vst [vmem:[#allocation2 + $0x11c] sm:$0x1] %v1862_v37  ;;  %v13712_v6 = vrot.slane %v6419_v48, 5  ;;  %v13714_v27 = vld [vmem:[#allocation2 + $0xe4] sm:$0xe]  ;;  %v4714_v36 = vshll.u32 %v4299_v52, 16 }
 0x290   :  { %v13716_v22 = vld [vmem:[#allocation2 + $0xec] sm:$0x1]  ;;  %v4720_v41 = vshll.u32 %v4300_v53, 16  ;;  %v4724_v62 = vshrl.u32 %v4300_v53, 16  ;;  %v5919_v32 = vld [vmem:[#allocation2 + $0x18] sm:$0xf] }
 0x291   :  { %v5920_v63 = vld [vmem:[#allocation2 + $0x1c] sm:$0xf]  ;;  %v5552_v33 = vrot.slane %v13698_v11, 5  ;;  %v6351_v5 = vld [vmem:[#allocation2 + $0xf0] sm:$0xf]  ;;  %v4713_v30 = vrot.slane %v4711_v28, 4  ;;  %6047 = vrot.lane.b32.xlu0 %v5919_v32, %s11180_s25 }
 0x292   :  { %v4730_v48 = vshll.u32 %v4301_v31, 16  ;;  %v3241_v51 = vld [vmem:[#allocation2 + $0xd8] sm:$0xe]  ;;  %v3502_v52 = vrot.slane %v13707_v23, 5  ;;  %v4716_v1 = vrot.slane %v4714_v36, 5  ;;  %v4722_v17 = vrot.slane %v4720_v41, 5  ;;  %6049 = vrot.lane.b32.xlu1 %v5920_v63, %s11180_s25  ;;  %v2985_v42 = vpop.permute.xlu0 %2984  ;;  %v2987_v32 = vpop.permute.xlu1 %2986 }
 0x293   :  { %v4726_v53 = vrot.slane %v4724_v62, 4  ;;  %7380 = vst.msk [vmem:[#allocation3 + $0x100] sm:$0xf] %vm4189_vm4, %v7210_v38  ;;  %v13731_v11 = vrot.slane %v2559_v4, 4  ;;  %v13733_v54 = vrot.slane %v2569_v18, 4  ;;  %v13735_v37 = vrot.slane %v2572_v50, 5 }
 0x294   :  { %v3243_v31 = vld [vmem:[#allocation2 + $0xe0] sm:$0x1]  ;;  %v13739_v23 = vld [vmem:[#allocation2 + $0xf4] sm:$0xf]  ;;  %v6784_v28 = vshrl.u32 %v6351_v5, 16  ;;  %v6787_v36 = vshll.u32 %v6351_v5, 16  ;;  %v4717_v41 = vor.u32 %v4716_v1, %v4713_v30 }
 0x295   :  { %v4727_v62 = vor.u32 %v4726_v53, %v4722_v17  ;;  %v3869_v38 = vld [vmem:[#allocation2 + $0xc] sm:$0xf]  ;;  %v3870_v55 = vld [vmem:[#allocation2 + $0x10] sm:$0xf]  ;;  %v10286_v4 = vrot.slane %v13714_v27, 9  ;;  %v5555_v18 = vrot.slane %v13716_v22, 5 }
 0x296   :  { %v10254_v59 = vrot.slane %v3241_v51, 9  ;;  %v13743_v50 = vld [vmem:[#allocation2 + $0xe4] sm:$0xf]  ;;  %v4732_v35 = vrot.slane %v4730_v48, 5  ;;  %v13745_v40 = vld [vmem:[#allocation2 + $0x108] sm:$0xe]  ;;  %3997 = vrot.lane.b32.xlu0 %v3869_v38, %s11179_s24  ;;  %3999 = vrot.lane.b32.xlu1 %v3870_v55, %s11179_s24  ;;  %v6094_v38 = vpop.permute.xlu1 %6093 }
 0x297   :  { %17038 = vst [vmem:[#allocation40_spill] sm:$0xff] %v13745_v40  ;;  %v5554_v63 = vrot.slane %v5552_v33, 4  ;;  %v3504_v56 = vrot.slane %v3502_v52, 4  ;;  %v3505_v26 = vrot.slane %v3243_v31, 5  ;;  %v13747_v5 = vld [vmem:[#allocation2 + $0xf8] sm:$0x1]  ;;  %v13784_v55 = vsel %vm11586_vm12, %v10286_v4, %v5552_v33 }
 0x298   :  { %v4718_v30 = vrot.slane %v4717_v41, 4  ;;  %3153 = vst.msk [vmem:[#allocation3 + $0x120] sm:$0xf] %vm3128_vm0, %v2985_v42  ;;  %3154 = vst.msk [vmem:[#allocation3 + $0x12c] sm:$0xf] %vm3128_vm0, %v2987_v32  ;;  %v6793_v48 = vshll.u32 %v13739_v23, 16  ;;  %v2575_v42 = vsel %vm11625_vm15, %v13733_v54, %v13735_v37  ;;  %v13788_v54 = vsel %vm11586_vm12, %v10254_v59, %v3502_v52 }
 0x299   :  { %v13751_v27 = vld [vmem:[#allocation2 + $0xfc] sm:$0xe]  ;;  %v6797_v51 = vshrl.u32 %v13739_v23, 16  ;;  %v4728_v1 = vrot.slane %v4727_v62, 4  ;;  %3829 = vst.msk [vmem:[#allocation3 + $0x120] sm:$0xf] %vm3804_vm3, %v13579_v24  ;;  %v13797_v32 = vsel %vm11586_vm12, %v5554_v63, %v5555_v18  ;;  %v13801_v33 = vsel %vm11586_vm12, %v3504_v56, %v3505_v26 }
 0x29a   :  { %17039 = vst [vmem:[#allocation41_spill] sm:$0xff] %v13751_v27  ;;  %3830 = vst.msk [vmem:[#allocation3 + $0x12c] sm:$0xf] %vm3804_vm3, %v13581_v61  ;;  %v13769_v53 = vld [vmem:[#allocation2 + $0x10c] sm:$0xf]  ;;  %v13773_v23 = vrot.slane %v6784_v28, 4  ;;  %v4723_v24 = vsel %vm11625_vm15, %v4718_v30, %v4722_v17  ;;  %v10854_v17 = vpop.f32.mrf.mxu0 }
 0x29b   :  { %17040 = vst [vmem:[#allocation42_spill] sm:$0xff] %v13769_v53  ;;  %v13771_v31 = vld [vmem:[#allocation2 + $0x110] sm:$0x1]  ;;  %v13775_v41 = vrot.slane %v6787_v36, 5  ;;  %v13780_v62 = vld [vmem:[#allocation2 + $0x100] sm:$0xf]  ;;  %v4733_v28 = vsel %vm11625_vm15, %v4728_v1, %v4732_v35  ;;  %v6092_v36 = vpop.permute.xlu0 %6091  ;;  %v17043_v1 = vsel %vm11625_vm15, %v13696_v14, %v13712_v6  ;;  %v4048_v6 = vpop.permute.xlu1 %4047 }
 0x29c   :  { %17041 = vst [vmem:[#allocation43_spill] sm:$0xff] %v13771_v31  ;;  %v13790_v37 = vld [vmem:[#allocation2 + $0xe8] sm:$0xf]  ;;  %5212 = vst.msk [vmem:[#allocation3 + $0x16c] sm:$0xf] %vm766_vm2, %v4723_v24  ;;  %v2577_v59 = vshrl.u32 %v13743_v50, 16  ;;  %7169 = vrot.lane.b32.xlu1 %v17043_v1, %s11179_s24  ;;  %v623_v18 = vpop.f32.mrf.mxu0 }
 0x29d   :  { %v2580_v52 = vshll.u32 %v13743_v50, 16  ;;  %5213 = vst.msk [vmem:[#allocation3 + $0x178] sm:$0xf] %vm766_vm2, %v4733_v28  ;;  %v4254_v4 = vld [vmem:[#allocation2 + $0xc] sm:$0xf]  ;;  %v6803_v56 = vshll.u32 %v13747_v5, 16  ;;  %v17042_v50 = vsel %vm11625_vm15, %v13690_v49, %v13627_v16  ;;  %v6790_v28 = vor.u32 %v13775_v41, %v13773_v23 }
 0x29e   :  { %v4255_v30 = vld [vmem:[#allocation2 + $0x10] sm:$0xf]  ;;  %6261 = vst.msk [vmem:[#allocation3 + $0x10c] sm:$0xf] %vm3804_vm3, %v6092_v36  ;;  %6262 = vst.msk [vmem:[#allocation3 + $0x118] sm:$0xf] %vm3804_vm3, %v6094_v38  ;;  %7167 = vrot.lane.b32.xlu0 %v17042_v50, %s11179_s24  ;;  %v13859_v31 = vpop.f32.mrf.mxu0 }
 0x29f   :  { %v11072_v26 = vld [vmem:[%s16920_s3 + $0x88] sm:$0xff]   ;;  %v13827_v24 = vld [vmem:[#allocation2 + $0x104] sm:$0x1]  ;;  %v13832_v36 = vrot.slane %v6793_v48, 5  ;;  %v6799_v38 = vrot.slane %v6797_v51, 4  ;;  %v2586_v16 = vshll.u32 %v13790_v37, 16  ;;  %v4046_v14 = vpop.permute.xlu0 %4045 }
 0x2a0   :  { %17044 = vst [vmem:[#allocation44_spill] sm:$0xff] %v13827_v24  ;;  %v4351_v49 = vshrl.u32 %v4254_v4, 16  ;;  %v4354_v50 = vshll.u32 %v4254_v4, 16  ;;  %v4360_v63 = vshll.u32 %v4255_v30, 16  ;;  %v4256_v61 = vld [vmem:[#allocation2 + $0x14] sm:$0x1]  ;;  %10872 = vmatprep.subr.bf16.mxu0 %v11072_v26  ;;  %v632_v26 = vadd.f32 %v13498_v25, %v10854_v17  ;;  %3002 = vrot.lane.b32.xlu1 %v2575_v42, %s11181_s26 }
 0x2a1   :  { %v13835_v1 = vrot.slane %v2577_v59, 4  ;;  %v13837_v35 = vrot.slane %v2580_v52, 5  ;;  %v2590_v5 = vshrl.u32 %v13790_v37, 16  ;;  %v2122_v23 = vld [vmem:[#allocation2 + $0xec] sm:$0x1]  ;;  %v4364_v48 = vshrl.u32 %v4255_v30, 16 }
 0x2a2   :  { %4214 = vst.msk [vmem:[#allocation3 + $0x120] sm:$0xf] %vm4189_vm4, %v4046_v14  ;;  %4215 = vst.msk [vmem:[#allocation3 + $0x12c] sm:$0xf] %vm4189_vm4, %v4048_v6  ;;  %v13842_v51 = vld [vmem:[#allocation2 + $0xf0] sm:$0xe]  ;;  %v17045_v59 = vsel %vm11625_vm15, %v13731_v11, %v13667_v20  ;;  %v624_v14 = vadd.f32 %v13498_v25, %v623_v18  ;;  %v7206_v11 = vpop.permute.xlu1 %7205 }
 0x2a3   :  { %v4353_v41 = vrot.slane %v4351_v49, 4  ;;  %v4356_v4 = vrot.slane %v4354_v50, 5  ;;  %v4362_v22 = vrot.slane %v4360_v63, 5  ;;  %3000 = vrot.lane.b32.xlu0 %v17045_v59, %s11181_s26  ;;  %v4366_v52 = vrot.slane %v4364_v48, 4  ;;  %v13857_v50 = vld [vmem:[#allocation2 + $0xf4] sm:$0xf]  ;;  %v7204_v20 = vpop.permute.xlu0 %7203 }
 0x2a4   :  { %v4370_v30 = vshll.u32 %v4256_v61, 16  ;;  %v6800_v49 = vor.u32 %v6799_v38, %v13832_v36  ;;  %v13855_v63 = vrot.slane %v6803_v56, 5  ;;  %v2596_v17 = vshll.u32 %v2122_v23, 16  ;;  %7377 = vst.msk [vmem:[#allocation3 + $0xdc] sm:$0xf] %vm4189_vm4, %v7204_v20  ;;  %5728 = vrot.lane.b32.xlu1 %v13797_v32, %s11181_s26 }
 0x2a5   :  { %v4357_v6 = vor.u32 %v4356_v4, %v4353_v41  ;;  %v13861_v59 = vrot.slane %v6790_v28, 4  ;;  %v13863_v42 = vrot.slane %v2586_v16, 5  ;;  %v10287_v61 = vrot.slane %v13842_v51, 9  ;;  %7378 = vst.msk [vmem:[#allocation3 + $0xe8] sm:$0xf] %vm4189_vm4, %v7206_v11 }
 0x2a6   :  { %v4367_v48 = vor.u32 %v4366_v52, %v4362_v22  ;;  %v2583_v18 = vor.u32 %v13837_v35, %v13835_v1  ;;  %v13870_v56 = vrot.slane %v2590_v5, 4  ;;  %v13872_v38 = vld [vmem:[#allocation2 + $0xf8] sm:$0x1]  ;;  %v748_v41 = vmax.f32 %v632_v26, 0.0  ;;  %v13879_v16 = vld [vmem:[#allocation2 + $0xe4] sm:$0xe]  ;;  %v2983_v37 = vpop.permute.xlu1 %2982 }
 0x2a7   :  { %v4358_v23 = vrot.slane %v4357_v6, 4  ;;  %5726 = vrot.lane.b32.xlu0 %v13784_v55, %s11181_s26  ;;  %v5559_v28 = vrot.slane %v13857_v50, 5  ;;  %v4372_v52 = vrot.slane %v4370_v30, 5  ;;  %v746_v20 = vmax.f32 %v624_v14, 0.0  ;;  %v626_v6 = vpop.f32.mrf.mxu0  ;;  %v1973_v55 = vld [vmem:[#allocation2 + $0xd8] sm:$0xf]  ;;  %v2981_v11 = vpop.permute.xlu0 %2980 }
 0x2a8   :  { %v4368_v4 = vrot.slane %v4367_v48, 4  ;;  %v13881_v35 = vrot.slane %v6800_v49, 4  ;;  %v13883_v5 = vrot.slane %v2596_v17, 5  ;;  %v10611_v26 = vpack.c.bf16 %v748_v41, %v748_v41  ;;  %v13892_v14 = vld [vmem:[#allocation2 + $0xfc] sm:$0xf]  ;;  %3678 = vrot.lane.b32.xlu1 %v13801_v33, %s11180_s25 }
 0x2a9   :  { %v4363_v1 = vsel %vm11625_vm15, %v4358_v23, %v4362_v22  ;;  %v10609_v22 = vpack.c.bf16 %v746_v20, %v746_v20  ;;  %2037 = vst.msk [vmem:[#allocation3 + $0x180] sm:$0xf] %vm766_vm2, %v1973_v55  ;;  %v1974_v17 = vld [vmem:[#allocation2 + $0xdc] sm:$0xf]  ;;  %v2593_v50 = vor.u32 %v13870_v56, %v13863_v42  ;;  %v13902_v48 = vld [vmem:[#allocation2 + $0xe8] sm:$0xf] }
 0x2aa   :  { %5182 = vst.msk [vmem:[#allocation3 + $0x4] sm:$0xf] %vm766_vm2, %v4363_v1  ;;  %v4373_v49 = vsel %vm11625_vm15, %v4368_v4, %v4372_v52  ;;  %v1463_v41 = vshrl.u32 %v10611_v26, 16  ;;  %v1466_v1 = vshll.u32 %v10611_v26, 16  ;;  %2038 = vst.msk [vmem:[#allocation3 + $0x18c] sm:$0xf] %vm766_vm2, %v1974_v17  ;;  %v5717_v17 = vpop.permute.xlu1 %5716 }
 0x2ab   :  { %3151 = vst.msk [vmem:[#allocation3 + $0x108] sm:$0xf] %vm3128_vm0, %v2981_v11  ;;  %3152 = vst.msk [vmem:[#allocation3 + $0x114] sm:$0xf] %vm3128_vm0, %v2983_v37  ;;  %3676 = vrot.lane.b32.xlu0 %v13788_v54, %s11180_s25  ;;  %v13915_v37 = vrot.slane %v2583_v18, 4  ;;  %v13917_v56 = vrot.slane %v5559_v28, 4  ;;  %v635_v11 = vadd.f32 %v13498_v25, %v13859_v31 }
 0x2ac   :  { %5183 = vst.msk [vmem:[#allocation3 + $0x10] sm:$0xf] %vm766_vm2, %v4373_v49  ;;  %v13919_v4 = vld [vmem:[#allocation2 + $0xec] sm:$0x1]  ;;  %v13921_v52 = vld [vmem:[#allocation2 + $0x100] sm:$0xf]  ;;  %v627_v49 = vadd.f32 %v13498_v25, %v626_v6 }
 0x2ad   :  { %3827 = vst.msk [vmem:[#allocation3 + $0x108] sm:$0xf] %vm3804_vm3, %v13723_v57  ;;  %3828 = vst.msk [vmem:[#allocation3 + $0x114] sm:$0xf] %vm3804_vm3, %v13635_v34  ;;  %v1446_v20 = vshrl.u32 %v10609_v22, 16  ;;  %v1449_v26 = vshll.u32 %v10609_v22, 16  ;;  %v5715_v22 = vpop.permute.xlu0 %5714 }
 0x2ae   :  { %4212 = vst.msk [vmem:[#allocation3 + $0x108] sm:$0xf] %vm4189_vm4, %v13317_v3  ;;  %4213 = vst.msk [vmem:[#allocation3 + $0x114] sm:$0xf] %vm4189_vm4, %v13361_v46  ;;  %v5951_v34 = vld [vmem:[#allocation2 + $0xf0] sm:$0xf]  ;;  %v5713_v24 = vpop.permute.xlu1 %5712 }
 0x2af   :  { %v5952_v57 = vld [vmem:[#allocation2 + $0xf4] sm:$0xf]  ;;  %v6808_v54 = vshrl.u32 %v13892_v14, 16  ;;  %v13928_v33 = vld [vmem:[#allocation2 + $0xf0] sm:$0xf]  ;;  %v13930_v18 = vrot.slane %v1463_v41, 7  ;;  %v13943_v41 = vsel %vm11586_vm12, %v10287_v61, %v5559_v28  ;;  %6111 = vrot.lane.b32.xlu0 %v5951_v34, %s11180_s25 }
 0x2b0   :  { %v1878_v55 = vld [vmem:[#allocation2 + $0x138] sm:$0xf]  ;;  %v8003_v3 = vld [vmem:[#allocation3 + $0xd8] sm:$0xff]  ;;  %v6811_v31 = vshll.u32 %v13892_v14, 16  ;;  %v13946_v30 = vrot.slane %v1446_v20, 7  ;;  %v13950_v6 = vrot.slane %v2593_v50, 4  ;;  %6113 = vrot.lane.b32.xlu1 %v5952_v57, %s11180_s25 }
 0x2b1   :  { %v8005_v23 = vld [vmem:[#allocation3 + $0xe4] sm:$0xff]  ;;  %5880 = vst.msk [vmem:[#allocation3 + $0x13c] sm:$0xf] %vm3128_vm0, %v5715_v22  ;;  %5881 = vst.msk [vmem:[#allocation3 + $0x148] sm:$0xf] %vm3128_vm0, %v5717_v17  ;;  %v1468_v51 = vor.u32 %v1466_v1, %v13930_v18  ;;  %v6817_v61 = vshll.u32 %v13921_v52, 16 }
 0x2b2   :  { %v11051_v32 = vld [vmem:[#allocation3 + $0xdc] ss:$12 sps:$4 sm:$0xff]   ;;  %v10362_v25 = vcombine.low %v8003_v3, %v8005_v23  ;;  %v13953_v46 = vld [vmem:[#allocation2 + $0x104] sm:$0x1]  ;;  %v6821_v28 = vshrl.u32 %v13921_v52, 16  ;;  %v2601_v50 = vshrl.u32 %v13928_v33, 16  ;;  %v1451_v23 = vor.u32 %v1449_v26, %v13946_v30  ;;  %v5711_v3 = vpop.permute.xlu0 %5710  ;;  %v13972_v26 = vpop.f32.mrf.mxu1 }
 0x2b3   :  { %v1871_v40 = vld [vmem:[#allocation2 + $0x12c] sm:$0xf]  ;;  %v13960_v14 = vld [vmem:[#allocation2 + $0xf4] sm:$0xf]  ;;  %8927 = vmatprep.mubr.bf16.mxu1 %v11051_v32  ;;  %v3901_v20 = vld [vmem:[#allocation2 + $0xe4] sm:$0xf]  ;;  %v1879_v34 = vsel %vm11538_vm6, %v1468_v51, %v1878_v55 }
 0x2b4   :  { %v11053_v22 = vld [vmem:[#allocation3 + $0xf4] ss:$12 sps:$4 sm:$0xff]   ;;  %v3512_v1 = vrot.slane %v13919_v4, 5  ;;  %v749_v17 = vmax.f32 %v635_v11, 0.0  ;;  %v747_v57 = vmax.f32 %v627_v49, 0.0  ;;  %8928 = vmatmul.mubr.bf16.gmra.mxu1 %v10362_v25  ;;  %v6810_v52 = vrot.slane %v6808_v54, 4  ;;  %4061 = vrot.lane.b32.xlu0 %v3901_v20, %s11179_s24 }
 0x2b5   :  { %v6813_v53 = vrot.slane %v6811_v31, 5  ;;  %v2604_v27 = vshll.u32 %v13928_v33, 16  ;;  %1880 = vst [vmem:[#allocation2 + $0x138] sm:$0xf] %v1879_v34  ;;  %v1872_v32 = vsel %vm11538_vm6, %v1451_v23, %v1871_v40  ;;  %5878 = vst.msk [vmem:[#allocation3 + $0x124] sm:$0xf] %vm3128_vm0, %v5711_v3  ;;  %8935 = vmatprep.mubr.bf16.mxu1 %v11053_v22  ;;  %v2589_v54 = vsel %vm11625_vm15, %v13915_v37, %v13863_v42  ;;  %v8867_v31 = vpop.f32.mrf.mxu1 }
 0x2b6   :  { %5879 = vst.msk [vmem:[#allocation3 + $0x130] sm:$0xf] %vm3128_vm0, %v5713_v24  ;;  %v3902_v55 = vld [vmem:[#allocation2 + $0xe8] sm:$0xf]  ;;  %v6827_v11 = vshll.u32 %v13953_v46, 16  ;;  %v10612_v33 = vpack.c.bf16 %v749_v17, %v749_v17  ;;  %v10610_v49 = vpack.c.bf16 %v747_v57, %v747_v57  ;;  %v13985_v40 = vrot.slane %v6817_v61, 5  ;;  %v7216_v22 = vpop.permute.xlu0 %7215 }
 0x2b7   :  { %1873 = vst [vmem:[#allocation2 + $0x12c] sm:$0xf] %v1872_v32  ;;  %6263 = vst.msk [vmem:[#allocation3 + $0x124] sm:$0xf] %vm3804_vm3, %v13603_v12  ;;  %4063 = vrot.lane.b32.xlu1 %v3902_v55, %s11179_s24  ;;  %v13987_v24 = vrot.slane %v6821_v28, 4  ;;  %v13989_v42 = vrot.slane %v2601_v50, 4  ;;  %v6814_v28 = vor.u32 %v6813_v53, %v6810_v52  ;;  %v14005_v57 = vpop.f32.mrf.mxu1  ;;  %v17049_v53 = vsel %vm11625_vm15, %v13881_v35, %v13855_v63 }
 0x2b8   :  { %6264 = vst.msk [vmem:[#allocation3 + $0x130] sm:$0xf] %vm3804_vm3, %v13660_v8  ;;  %v2610_v37 = vshll.u32 %v13960_v14, 16  ;;  %v8009_v46 = vld [vmem:[#allocation3 + $0xfc] sm:$0xff]  ;;  %v1471_v25 = vshrl.u32 %v10612_v33, 16  ;;  %v1474_v51 = vshll.u32 %v10612_v33, 16  ;;  %v13992_v8 = vpop.permute.xlu1 %3666 }
 0x2b9   :  { %v1454_v12 = vshrl.u32 %v10610_v49, 16  ;;  %v1457_v23 = vshll.u32 %v10610_v49, 16  ;;  %v17046_v20 = vrot.slane %v13872_v38, 5  ;;  %v14001_v50 = vrot.slane %v2604_v27, 5  ;;  %v8007_v17 = vld [vmem:[#allocation3 + $0xf0] sm:$0xff]  ;;  %17047 = vst [vmem:[#allocation45_spill] sm:$0xff] %v14005_v57  ;;  %v8870_v52 = vpop.f32.mrf.mxu1 }
 0x2ba   :  { %v2614_v34 = vshrl.u32 %v13960_v14, 16  ;;  %7383 = vst.msk [vmem:[#allocation3 + $0x124] sm:$0xf] %vm4189_vm4, %v7216_v22  ;;  %v1469_v3 = vrot.slane %v13930_v18, 4  ;;  %v1452_v32 = vrot.slane %v13946_v30, 4  ;;  %v1473_v38 = vrot.slane %v1471_v25, 7  ;;  %v14031_v25 = vpop.permute.xlu0 %3664 }
 0x2bb   :  { %v13999_v61 = vsel %vm11586_vm12, %v13917_v56, %v17046_v20  ;;  %v1456_v55 = vrot.slane %v1454_v12, 7  ;;  %v17048_v27 = vsel %vm11625_vm15, %v13861_v59, %v13832_v36  ;;  %7233 = vrot.lane.b32.xlu1 %v17049_v53, %s11179_s24  ;;  %v10365_v56 = vcombine.low %v8007_v17, %v8009_v46  ;;  %v1882_v59 = vld [vmem:[#allocation2 + $0x140] sm:$0x1]  ;;  %v14029_v33 = vld [vmem:[#allocation2 + $0xf8] sm:$0x1]  ;;  %v14040_v17 = vpop.f32.mrf.mxu1 }
 0x2bc   :  { %7231 = vrot.lane.b32.xlu0 %v17048_v27, %s11179_s24  ;;  %v2599_v30 = vsel %vm11625_vm15, %v13950_v6, %v13883_v5  ;;  %v17050_v18 = vrot.slane %v13902_v48, 5  ;;  %v6824_v36 = vor.u32 %v13987_v24, %v13985_v40  ;;  %v1476_v49 = vor.u32 %v1474_v51, %v1473_v38  ;;  %v1875_v46 = vld [vmem:[#allocation2 + $0x134] sm:$0x1]  ;;  %v7218_v12 = vpop.permute.xlu1 %7217  ;;  %v4302_v20 = vld [vmem:[#allocation2 + $0xe4] sm:$0xf]  ;;  %17051 = vst [vmem:[#allocation46_spill] sm:$0xff] %v14040_v17 }
 0x2bd   :  { %v1478_v31 = vrot.slane %v1473_v38, 4  ;;  %v1459_v63 = vor.u32 %v1457_v23, %v1456_v55  ;;  %v1461_v35 = vrot.slane %v1456_v55, 4  ;;  %8936 = vmatmul.mubr.bf16.gmra.mxu1 %v10365_v56  ;;  %v14033_v5 = vrot.slane %v6814_v28, 4  ;;  %7384 = vst.msk [vmem:[#allocation3 + $0x130] sm:$0xf] %vm4189_vm4, %v7218_v12 }
 0x2be   :  { %v3511_v14 = vrot.slane %v17050_v18, 4  ;;  %v14035_v6 = vrot.slane %v6827_v11, 5  ;;  %v14037_v22 = vrot.slane %v2610_v37, 5  ;;  %v2616_v24 = vrot.slane %v2614_v34, 4  ;;  %v4303_v37 = vld [vmem:[#allocation2 + $0xe8] sm:$0xf]  ;;  %v6100_v56 = vpop.permute.xlu0 %6099 }
 0x2bf   :  { %v2607_v51 = vor.u32 %v14001_v50, %v13989_v42  ;;  %v1477_v23 = vsel %vm11548_vm8, %v1469_v3, %v1476_v49  ;;  %v1883_v28 = vsel %vm11554_vm9, %v1478_v31, %v1882_v59  ;;  %v1460_v11 = vsel %vm11548_vm8, %v1452_v32, %v1459_v63  ;;  %3006 = vrot.lane.b32.xlu1 %v2599_v30, %s11181_s26  ;;  %v6357_v3 = vld [vmem:[#allocation2 + $0x108] sm:$0xf]  ;;  %v1975_v48 = vld [vmem:[#allocation2 + $0xe4] sm:$0xf]  ;;  %v6358_v4 = vld [vmem:[#allocation2 + $0x10c] sm:$0xf] }
 0x2c0   :  { %3004 = vrot.lane.b32.xlu0 %v2589_v54, %s11181_s26  ;;  %v17052_v34 = vmov %v17050_v18  ;;  %v17053_v38 = vrot.slane %v13879_v16, 9  ;;  %v3513_v50 = vsel %vm11586_vm12, %v3511_v14, %v3512_v1  ;;  %1881 = vst.msk [vmem:[#allocation2 + $0x13c] sm:$0xf] %vm766_vm2, %v1477_v23  ;;  %1884 = vst [vmem:[#allocation2 + $0x140] sm:$0x1] %v1883_v28  ;;  %v1876_v54 = vsel %vm11554_vm9, %v1461_v35, %v1875_v46  ;;  %v8875_v16 = vpop.f32.mrf.mxu1  ;;  %v2995_v30 = vpop.permute.xlu1 %2994 }
 0x2c1   :  { %1874 = vst.msk [vmem:[#allocation2 + $0x130] sm:$0xf] %vm766_vm2, %v1460_v11  ;;  %v1976_v32 = vld [vmem:[#allocation2 + $0xe8] sm:$0xf]  ;;  %v14066_v55 = vrot.slane %v6824_v36, 4  ;;  %v2620_v27 = vshll.u32 %v14029_v33, 16  ;;  %v6820_v18 = vsel %vm11625_vm15, %v14033_v5, %v13985_v40  ;;  %v2617_v14 = vor.u32 %v2616_v24, %v14037_v22  ;;  %v10858_v40 = vpop.f32.mrf.mxu0 }
 0x2c2   :  { %v3510_v42 = vsel %vm11586_vm12, %v17053_v38, %v17052_v34  ;;  %1877 = vst [vmem:[#allocation2 + $0x134] sm:$0x1] %v1876_v54  ;;  %v4735_v53 = vshrl.u32 %v4302_v20, 16  ;;  %v4738_v1 = vshll.u32 %v4302_v20, 16  ;;  %2039 = vst.msk [vmem:[#allocation3 + $0x198] sm:$0xf] %vm766_vm2, %v1975_v48  ;;  %v14080_v49 = vpop.f32.mrf.mxu1  ;;  %v7212_v48 = vpop.permute.xlu0 %7211 }
 0x2c3   :  { %2040 = vst.msk [vmem:[#allocation3 + $0x1a4] sm:$0xf] %vm766_vm2, %v1976_v32  ;;  %v14076_v36 = vld [vmem:[#allocation2 + $0xfc] sm:$0xe]  ;;  %v4744_v59 = vshll.u32 %v4303_v37, 16  ;;  %v4748_v52 = vshrl.u32 %v4303_v37, 16  ;;  %5732 = vrot.lane.b32.xlu1 %v13999_v61, %s11181_s26 }
 0x2c4   :  { %v4304_v33 = vld [vmem:[#allocation2 + $0xec] sm:$0x1]  ;;  %6265 = vst.msk [vmem:[#allocation3 + $0x13c] sm:$0xf] %vm3804_vm3, %v6100_v56  ;;  %17054 = vst [vmem:[#allocation47_spill] sm:$0xff] %v14080_v49  ;;  %v14082_v31 = vrot.slane %v2607_v51, 4  ;;  %5730 = vrot.lane.b32.xlu0 %v13943_v41, %s11181_s26  ;;  %v8878_v11 = vpop.f32.mrf.mxu1  ;;  %v6102_v32 = vpop.permute.xlu1 %6101 }
 0x2c5   :  { %3158 = vst.msk [vmem:[#allocation3 + $0x15c] sm:$0xf] %vm3128_vm0, %v2995_v30  ;;  %v14084_v63 = vld [vmem:[#allocation2 + $0x100] sm:$0xf]  ;;  %v6832_v35 = vshrl.u32 %v6357_v3, 16  ;;  %v4737_v46 = vrot.slane %v4735_v53, 4 }
 0x2c6   :  { %v4740_v12 = vrot.slane %v4738_v1, 5  ;;  %v6835_v24 = vshll.u32 %v6357_v3, 16  ;;  %v6841_v20 = vshll.u32 %v6358_v4, 16  ;;  %v4746_v23 = vrot.slane %v4744_v59, 5  ;;  %v2126_v34 = vld [vmem:[#allocation2 + $0xfc] sm:$0xf] }
 0x2c7   :  { %v4750_v28 = vrot.slane %v4748_v52, 4  ;;  %v14090_v37 = vrot.slane %v2620_v27, 5  ;;  %v6845_v51 = vshrl.u32 %v6358_v4, 16  ;;  %v4754_v54 = vshll.u32 %v4304_v33, 16  ;;  %v14096_v61 = vld [vmem:[#allocation2 + $0x104] sm:$0x1]  ;;  %3682 = vrot.lane.b32.xlu1 %v3513_v50, %s11180_s25  ;;  %v2989_v50 = vpop.permute.xlu0 %2988 }
 0x2c8   :  { %v4741_v38 = vor.u32 %v4740_v12, %v4737_v46  ;;  %v14092_v16 = vrot.slane %v2617_v14, 4  ;;  %v10288_v41 = vrot.slane %v14076_v36, 9  ;;  %v5566_v53 = vrot.slane %v14084_v63, 5  ;;  %7381 = vst.msk [vmem:[#allocation3 + $0x10c] sm:$0xf] %vm4189_vm4, %v7212_v48  ;;  %v17058_v59 = vld [vmem:[#allocation8_spill] sm:$0xff]  ;;  %3680 = vrot.lane.b32.xlu0 %v3510_v42, %s11180_s25 }
 0x2c9   :  { %v4751_v3 = vor.u32 %v4750_v28, %v4746_v23  ;;  %6266 = vst.msk [vmem:[#allocation3 + $0x148] sm:$0xf] %vm3804_vm3, %v6102_v32  ;;  %v14100_v27 = vld [vmem:[#allocation2 + $0xf0] sm:$0xe]  ;;  %v14102_v4 = vld [vmem:[#allocation2 + $0xf4] sm:$0xf] }
 0x2ca   :  { %v14104_v1 = vrot.slane %v6832_v35, 4  ;;  %v17055_v56 = vrot.slane %v11961_v15, 5  ;;  %v17056_v30 = vrot.slane %v11955_v9, 9  ;;  %v17057_v36 = vrot.slane %v12094_v21, 5  ;;  %v17060_v63 = vld [vmem:[#allocation11_spill] sm:$0xff]  ;;  %v17062_v12 = vld [vmem:[#allocation13_spill] sm:$0xff] }
 0x2cb   :  { %v17059_v52 = vrot.slane %v17058_v59, 9  ;;  %v17061_v46 = vrot.slane %v17060_v63, 5  ;;  %v14125_v9 = vrot.slane %v6835_v24, 5  ;;  %v14127_v28 = vrot.slane %v6841_v20, 5  ;;  %v6359_v21 = vld [vmem:[#allocation2 + $0x110] sm:$0x1]  ;;  %v7214_v24 = vpop.permute.xlu1 %7213 }
 0x2cc   :  { %v7618_v14 = vsel %vm11586_vm12, %v17056_v30, %v17055_v56  ;;  %v2625_v11 = vshrl.u32 %v2126_v34, 16  ;;  %v2628_v48 = vshll.u32 %v2126_v34, 16  ;;  %v5953_v32 = vld [vmem:[#allocation2 + $0xfc] sm:$0xf]  ;;  %v14132_v56 = vrot.slane %v6845_v51, 4  ;;  %v17076_v20 = vld [vmem:[#allocation10_spill] sm:$0xff] }
 0x2cd   :  { %v7625_v33 = vsel %vm11586_vm12, %v17059_v52, %v17057_v36  ;;  %v7628_v35 = vsel %vm11586_vm12, %v17062_v12, %v17061_v46  ;;  %7903 = vst.msk [vmem:[#allocation3 + $0x8] sm:$0xf] %vm766_vm2, %v7618_v14  ;;  %v4742_v30 = vrot.slane %v4741_v38, 4  ;;  %v4752_v42 = vrot.slane %v4751_v3, 4  ;;  %v5954_v59 = vld [vmem:[#allocation2 + $0x100] sm:$0xf]  ;;  %6115 = vrot.lane.b32.xlu0 %v5953_v32, %s11180_s25 }
 0x2ce   :  { %7905 = vst.msk [vmem:[#allocation3 + $0x20] sm:$0xf] %vm766_vm2, %v7625_v33  ;;  %7906 = vst.msk [vmem:[#allocation3 + $0x2c] sm:$0xf] %vm766_vm2, %v7628_v35  ;;  %v4756_v36 = vrot.slane %v4754_v54, 5  ;;  %v5568_v34 = vrot.slane %v5566_v53, 4  ;;  %6117 = vrot.lane.b32.xlu1 %v5954_v59, %s11180_s25 }
 0x2cf   :  { %v5569_v14 = vrot.slane %v14096_v61, 5  ;;  %v3516_v52 = vrot.slane %v14102_v4, 5  ;;  %3155 = vst.msk [vmem:[#allocation3 + $0x138] sm:$0xf] %vm3128_vm0, %v2989_v50  ;;  %v14142_v51 = vld [vmem:[#allocation2 + $0x120] sm:$0xe]  ;;  %v4747_v33 = vsel %vm11625_vm15, %v4742_v30, %v4746_v23  ;;  %v2991_v32 = vpop.permute.xlu1 %2990 }
 0x2d0   :  { %7382 = vst.msk [vmem:[#allocation3 + $0x118] sm:$0xf] %vm4189_vm4, %v7214_v24  ;;  %v10256_v38 = vrot.slane %v14100_v27, 9  ;;  %v3249_v54 = vld [vmem:[#allocation2 + $0xf8] sm:$0x1]  ;;  %v6851_v3 = vshll.u32 %v6359_v21, 16  ;;  %v4757_v63 = vsel %vm11625_vm15, %v4752_v42, %v4756_v36  ;;  %v6838_v27 = vor.u32 %v14125_v9, %v14104_v1 }
 0x2d1   :  { %3831 = vst.msk [vmem:[#allocation3 + $0x138] sm:$0xf] %vm3804_vm3, %v14031_v25  ;;  %v14153_v61 = vld [vmem:[#allocation2 + $0x114] sm:$0xe]  ;;  %v14157_v4 = vrot.slane %v2625_v11, 4  ;;  %v14159_v46 = vrot.slane %v2628_v48, 5  ;;  %v6848_v11 = vor.u32 %v14132_v56, %v14127_v28  ;;  %v2993_v48 = vpop.permute.xlu0 %2992 }
 0x2d2   :  { %5214 = vst.msk [vmem:[#allocation3 + $0x184] sm:$0xf] %vm766_vm2, %v4747_v33  ;;  %5215 = vst.msk [vmem:[#allocation3 + $0x190] sm:$0xf] %vm766_vm2, %v4757_v63  ;;  %v17063_v23 = vrot.slane %v11961_v15, 5  ;;  %v14179_v15 = vsel %vm11586_vm12, %v10288_v41, %v5566_v53  ;;  %v3518_v36 = vrot.slane %v3516_v52, 4  ;;  %v14201_v63 = vsel %vm11586_vm12, %v5568_v34, %v5569_v14 }
 0x2d3   :  { %v14165_v12 = vld [vmem:[#allocation2 + $0x44] sm:$0x1]  ;;  %4216 = vst.msk [vmem:[#allocation3 + $0x138] sm:$0xf] %vm4189_vm4, %v13633_v44  ;;  %v3903_v35 = vld [vmem:[#allocation2 + $0xf0] sm:$0xf]  ;;  %v2631_v34 = vor.u32 %v14159_v46, %v14157_v4 }
 0x2d4   :  { %v7619_v25 = vrot.slane %v17063_v23, 4  ;;  %v3904_v21 = vld [vmem:[#allocation2 + $0xf4] sm:$0xf]  ;;  %v14183_v44 = vld [vmem:[#allocation2 + $0x100] sm:$0xf]  ;;  %v3519_v50 = vrot.slane %v3249_v54, 5  ;;  %v14205_v54 = vsel %vm11586_vm12, %v10256_v38, %v3516_v52  ;;  %4065 = vrot.lane.b32.xlu0 %v3903_v35, %s11179_s24 }
 0x2d5   :  { %v14186_v42 = vld [vmem:[#allocation2 + $0x124] sm:$0xf]  ;;  %v17064_v59 = vld [vmem:[#allocation6_spill] sm:$0xff]  ;;  %3157 = vst.msk [vmem:[#allocation3 + $0x150] sm:$0xf] %vm3128_vm0, %v2993_v48  ;;  %v14207_v23 = vrot.slane %v6851_v3, 5  ;;  %4067 = vrot.lane.b32.xlu1 %v3904_v21, %s11179_s24 }
 0x2d6   :  { %v14188_v24 = vld [vmem:[#allocation2 + $0x104] sm:$0x1]  ;;  %v17065_v33 = vrot.slane %v17064_v59, 5  ;;  %3156 = vst.msk [vmem:[#allocation3 + $0x144] sm:$0xf] %vm3128_vm0, %v2991_v32  ;;  %v2634_v14 = vshll.u32 %v14183_v44, 16 }
 0x2d7   :  { %v14197_v56 = vld [vmem:[#allocation2 + $0x128] sm:$0x1]  ;;  %3832 = vst.msk [vmem:[#allocation3 + $0x144] sm:$0xf] %vm3804_vm3, %v13992_v8  ;;  %v14219_v52 = vld [vmem:[#allocation2 + $0x108] sm:$0xe] }
 0x2d8   :  { %v7621_v41 = vsel %vm11586_vm12, %v7619_v25, %v17065_v33  ;;  %v14214_v25 = vrot.slane %v6838_v27, 4  ;;  %v17066_v38 = vld [vmem:[#allocation9_spill] sm:$0xff]  ;;  %v17068_v48 = vld [vmem:[#allocation7_spill] sm:$0xff]  ;;  %4217 = vst.msk [vmem:[#allocation3 + $0x144] sm:$0xf] %vm4189_vm4, %v13694_v43  ;;  %v14232_v21 = vrot.slane %v6848_v11, 4  ;;  %v7220_v33 = vpop.permute.xlu0 %7219  ;;  %v14240_v43 = vsel %vm11586_vm12, %v3518_v36, %v3519_v50  ;;  %7235 = vrot.lane.b32.xlu0 %v6820_v18, %s11179_s24 }
 0x2d9   :  { %7904 = vst.msk [vmem:[#allocation3 + $0x14] sm:$0xf] %vm766_vm2, %v7621_v41  ;;  %v17067_v3 = vrot.slane %v17066_v38, 5  ;;  %v17069_v32 = vrot.slane %v17068_v48, 9  ;;  %v14230_v35 = vld [vmem:[#allocation2 + $0x118] sm:$0xf]  ;;  %v5721_v41 = vpop.permute.xlu1 %5720 }
 0x2da   :  { %v2638_v4 = vshrl.u32 %v14183_v44, 16  ;;  %v8011_v48 = vld [vmem:[#allocation3 + $0x108] sm:$0xff]  ;;  %v17071_v30 = vld [vmem:[#allocation17_spill] sm:$0xff]  ;;  %7385 = vst.msk [vmem:[#allocation3 + $0x13c] sm:$0xf] %vm4189_vm4, %v7220_v33  ;;  %v2644_v50 = vshll.u32 %v14188_v24, 16 }
 0x2db   :  { %v7632_v8 = vsel %vm11586_vm12, %v17069_v32, %v17067_v3  ;;  %v17070_v46 = vmov %v17067_v3  ;;  %v8013_v3 = vld [vmem:[#allocation3 + $0x114] sm:$0xff]  ;;  %v17072_v27 = vrot.slane %v17071_v30, 5  ;;  %v17073_v11 = vld [vmem:[#allocation14_spill] sm:$0xff]  ;;  %5883 = vst.msk [vmem:[#allocation3 + $0x160] sm:$0xf] %vm3128_vm0, %v5721_v41  ;;  %v14277_v24 = vrot.slane %v2631_v34, 4 }
 0x2dc   :  { %v7633_v59 = vrot.slane %v17070_v46, 4  ;;  %7907 = vst.msk [vmem:[#allocation3 + $0x38] sm:$0xf] %vm766_vm2, %v7632_v8  ;;  %v11057_v32 = vld [vmem:[#allocation3 + $0x10c] ss:$12 sps:$4 sm:$0xff]   ;;  %v17074_v53 = vrot.slane %v17073_v11, 9  ;;  %v10368_v9 = vcombine.low %v8011_v48, %v8013_v3 }
 0x2dd   :  { %v17075_v38 = vmov %v17072_v27  ;;  %v7641_v8 = vrot.slane %v14165_v12, 5  ;;  %v14255_v1 = vld [vmem:[#allocation2 + $0x10c] sm:$0xf]  ;;  %v14257_v11 = vld [vmem:[#allocation2 + $0x110] sm:$0x1]  ;;  %v17078_v12 = vsel %vm11625_vm15, %v14066_v55, %v14035_v6  ;;  %8943 = vmatprep.mubr.bf16.mxu1 %v11057_v32  ;;  %v10289_v55 = vrot.slane %v14219_v52, 9 }
 0x2de   :  { %v7639_v44 = vsel %vm11586_vm12, %v17074_v53, %v17072_v27  ;;  %v7640_v46 = vrot.slane %v17075_v38, 4  ;;  %v17077_v53 = vrot.slane %v17076_v20, 5  ;;  %7237 = vrot.lane.b32.xlu1 %v17078_v12, %s11179_s24  ;;  %v14279_v27 = vrot.slane %v2634_v14, 5  ;;  %v4305_v5 = vld [vmem:[#allocation2 + $0xf0] sm:$0xf]  ;;  %v17079_v34 = vld [vmem:[#allocation15_spill] sm:$0xff]  ;;  %v5719_v38 = vpop.permute.xlu0 %5718  ;;  %8944 = vmatmul.mubr.bf16.gmra.mxu1 %v10368_v9 }
 0x2df   :  { %7909 = vst.msk [vmem:[#allocation3 + $0x50] sm:$0xf] %vm766_vm2, %v7639_v44  ;;  %v11059_v18 = vld [vmem:[#allocation3 + $0x124] ss:$12 sps:$4 sm:$0xff]   ;;  %v17080_v14 = vrot.slane %v17079_v34, 5  ;;  %v14314_v9 = vrot.slane %v2644_v50, 5  ;;  %v17087_v50 = vsel %vm11625_vm15, %v14092_v16, %v14090_v37 }
 0x2e0   :  { %v7635_v30 = vsel %vm11586_vm12, %v7633_v59, %v17077_v53  ;;  %v7642_v59 = vsel %vm11586_vm12, %v7640_v46, %v7641_v8  ;;  %v17081_v33 = vld [vmem:[#allocation12_spill] sm:$0xff]  ;;  %v4306_v44 = vld [vmem:[#allocation2 + $0xf4] sm:$0xf]  ;;  %v7222_v46 = vpop.permute.xlu1 %7221  ;;  %v14302_v8 = vrot.slane %v2638_v4, 4  ;;  %v5573_v53 = vrot.slane %v14255_v1, 5  ;;  %8951 = vmatprep.mubr.bf16.mxu1 %v11059_v18 }
 0x2e1   :  { %7908 = vst.msk [vmem:[#allocation3 + $0x44] sm:$0xf] %vm766_vm2, %v7635_v30  ;;  %7910 = vst.msk [vmem:[#allocation3 + $0x5c] sm:$0xf] %vm766_vm2, %v7642_v59  ;;  %v17082_v41 = vrot.slane %v17081_v33, 9  ;;  %v17083_v3 = vmov %v17080_v14  ;;  %v5576_v4 = vrot.slane %v14257_v11, 5 }
 0x2e2   :  { %v7647_v32 = vrot.slane %v17083_v3, 4  ;;  %v14309_v30 = vld [vmem:[%s16919_s2] ss:$0 sm:$0xff]  ;;  %v4307_v59 = vld [vmem:[#allocation2 + $0xf8] sm:$0x1]  ;;  %v17084_v34 = vld [vmem:[#allocation16_spill] sm:$0xff]  ;;  %3010 = vrot.lane.b32.xlu1 %v17087_v50, %s11181_s26  ;;  %v3669_v16 = vpop.permute.xlu0 %3668 }
 0x2e3   :  { %v7646_v48 = vsel %vm11586_vm12, %v17082_v41, %v17080_v14  ;;  %v648_v12 = vadd.f32 %v14309_v30, %v10858_v40  ;;  %5882 = vst.msk [vmem:[#allocation3 + $0x154] sm:$0xf] %vm3128_vm0, %v5719_v38  ;;  %v14317_v1 = vld [vmem:[#allocation2 + $0xfc] sm:$0xe]  ;;  %v17085_v14 = vrot.slane %v17084_v34, 5  ;;  %v4759_v41 = vshrl.u32 %v4305_v5, 16 }
 0x2e4   :  { %7911 = vst.msk [vmem:[#allocation3 + $0x68] sm:$0xf] %vm766_vm2, %v7646_v48  ;;  %v17086_v40 = vsel %vm11625_vm15, %v14082_v31, %v14037_v22  ;;  %v4762_v48 = vshll.u32 %v4305_v5, 16  ;;  %v4768_v3 = vshll.u32 %v4306_v44, 16  ;;  %v8017_v22 = vld [vmem:[#allocation3 + $0x12c] sm:$0xff]  ;;  %v4778_v34 = vshll.u32 %v4307_v59, 16 }
 0x2e5   :  { %7386 = vst.msk [vmem:[#allocation3 + $0x148] sm:$0xf] %vm4189_vm4, %v7222_v46  ;;  %v7649_v33 = vsel %vm11586_vm12, %v7647_v32, %v17085_v14  ;;  %3008 = vrot.lane.b32.xlu0 %v17086_v40, %s11181_s26  ;;  %v752_v18 = vmax.f32 %v648_v12, 0.0  ;;  %v639_v32 = vpop.f32.mrf.mxu0  ;;  %v14340_v31 = vld [vmem:[#allocation2 + $0x100] sm:$0xf]  ;;  %v4761_v38 = vrot.slane %v4759_v41, 4  ;;  %v3671_v14 = vpop.permute.xlu1 %3670  ;;  %v14345_v40 = vsel %vm11586_vm12, %v10289_v55, %v5573_v53 }
 0x2e6   :  { %7912 = vst.msk [vmem:[#allocation3 + $0x74] sm:$0xf] %vm766_vm2, %v7649_v33  ;;  %v4772_v46 = vshrl.u32 %v4306_v44, 16  ;;  %v640_v37 = vadd.f32 %v14309_v30, %v639_v32  ;;  %v14347_v50 = vld [vmem:[#allocation2 + $0x104] sm:$0x1]  ;;  %v4764_v5 = vrot.slane %v4762_v48, 5  ;;  %v2641_v44 = vor.u32 %v14302_v8, %v14279_v27  ;;  %5736 = vrot.lane.b32.xlu1 %v14201_v63, %s11181_s26  ;;  %v6104_v11 = vpop.permute.xlu0 %6103 }
 0x2e7   :  { %v10615_v12 = vpack.c.bf16 %v752_v18, %v752_v18  ;;  %v4770_v33 = vrot.slane %v4768_v3, 5  ;;  %v8015_v36 = vld [vmem:[#allocation3 + $0x120] sm:$0xff]  ;;  %3833 = vst.msk [vmem:[#allocation3 + $0x150] sm:$0xf] %vm3804_vm3, %v3669_v16  ;;  %3834 = vst.msk [vmem:[#allocation3 + $0x15c] sm:$0xf] %vm3804_vm3, %v3671_v14 }
 0x2e8   :  { %v5575_v59 = vrot.slane %v5573_v53, 4  ;;  %v4774_v32 = vrot.slane %v4772_v46, 4  ;;  %v10371_v55 = vcombine.low %v8015_v36, %v8017_v22  ;;  %v14358_v18 = vld [vmem:[#allocation2 + $0x114] sm:$0xf]  ;;  %v4765_v16 = vor.u32 %v4764_v5, %v4761_v38  ;;  %v14361_v20 = vld [vmem:[#allocation2 + $0x118] sm:$0xf]  ;;  %v10859_v46 = vpop.f32.mrf.mxu0 }
 0x2e9   :  { %5734 = vrot.lane.b32.xlu0 %v14179_v15, %s11181_s26  ;;  %v1497_v48 = vshrl.u32 %v10615_v12, 16  ;;  %v1500_v3 = vshll.u32 %v10615_v12, 16  ;;  %v4780_v53 = vrot.slane %v4778_v34, 5  ;;  %v750_v41 = vmax.f32 %v640_v37, 0.0  ;;  %v6106_v52 = vpop.permute.xlu1 %6105  ;;  %v17088_v6 = vld [vmem:[#allocation22_spill] sm:$0xff]  ;;  %v17090_v38 = vld [vmem:[#allocation19_spill] sm:$0xff] }
 0x2ea   :  { %v4775_v8 = vor.u32 %v4774_v32, %v4770_v33  ;;  %8952 = vmatmul.mubr.bf16.gmra.mxu1 %v10371_v55  ;;  %v4766_v22 = vrot.slane %v4765_v16, 4  ;;  %v17089_v12 = vrot.slane %v17088_v6, 5  ;;  %v17091_v5 = vrot.slane %v17090_v38, 9  ;;  %6267 = vst.msk [vmem:[#allocation3 + $0x154] sm:$0xf] %vm3804_vm3, %v6104_v11  ;;  %3686 = vrot.lane.b32.xlu1 %v14240_v43, %s11180_s25  ;;  %v4054_v63 = vpop.permute.xlu0 %4053 }
 0x2eb   :  { %v14364_v36 = vrot.slane %v1497_v48, 7  ;;  %6268 = vst.msk [vmem:[#allocation3 + $0x160] sm:$0xf] %vm3804_vm3, %v6106_v52  ;;  %v14376_v34 = vsel %vm11586_vm12, %v5575_v59, %v5576_v4  ;;  %v1892_v37 = vld [vmem:[#allocation2 + $0x150] sm:$0xf]  ;;  %v10613_v55 = vpack.c.bf16 %v750_v41, %v750_v41  ;;  %v651_v48 = vadd.f32 %v14309_v30, %v10859_v46 }
 0x2ec   :  { %v11061_v15 = vld [vmem:[#allocation3 + $0x13c] ss:$12 sps:$4 sm:$0xff]   ;;  %v7653_v14 = vsel %vm11586_vm12, %v17091_v5, %v17089_v12  ;;  %v4776_v32 = vrot.slane %v4775_v8, 4  ;;  %v7440_v16 = vld [vmem:[#allocation2 + $0x5c] sm:$0x1]  ;;  %v14384_v11 = vrot.slane %v2641_v44, 4  ;;  %v4771_v41 = vsel %vm11625_vm15, %v4766_v22, %v4770_v33  ;;  %v642_v5 = vpop.f32.mrf.mxu0 }
 0x2ed   :  { %7913 = vst.msk [vmem:[#allocation3 + $0x80] sm:$0xf] %vm766_vm2, %v7653_v14  ;;  %3684 = vrot.lane.b32.xlu0 %v14205_v54, %s11180_s25  ;;  %v6856_v52 = vshrl.u32 %v14358_v18, 16  ;;  %v14387_v4 = vld [vmem:[#allocation2 + $0x11c] sm:$0x1]  ;;  %v1502_v59 = vor.u32 %v1500_v3, %v14364_v36  ;;  %v8021_v8 = vld [vmem:[#allocation3 + $0x144] sm:$0xff]  ;;  %8959 = vmatprep.mubr.bf16.mxu1 %v11061_v15  ;;  %v4056_v49 = vpop.permute.xlu1 %4055 }
 0x2ee   :  { %v5955_v14 = vld [vmem:[#allocation2 + $0x108] sm:$0xf]  ;;  %v5956_v46 = vld [vmem:[#allocation2 + $0x10c] sm:$0xf]  ;;  %v17092_v54 = vrot.slane %v14340_v31, 5  ;;  %v4781_v43 = vsel %vm11625_vm15, %v4776_v32, %v4780_v53  ;;  %v1480_v44 = vshrl.u32 %v10613_v55, 16 }
 0x2ef   :  { %5216 = vst.msk [vmem:[#allocation3 + $0x19c] sm:$0xf] %vm766_vm2, %v4771_v41  ;;  %v1483_v38 = vshll.u32 %v10613_v55, 16  ;;  %v1977_v3 = vld [vmem:[#allocation2 + $0xf0] sm:$0xf]  ;;  %v6859_v33 = vshll.u32 %v14358_v18, 16  ;;  %6121 = vrot.lane.b32.xlu1 %v5956_v46, %s11180_s25  ;;  %v7224_v46 = vpop.permute.xlu0 %7223 }
 0x2f0   :  { %v14394_v12 = vrot.slane %v17092_v54, 4  ;;  %v6865_v15 = vshll.u32 %v14361_v20, 16  ;;  %v6869_v22 = vshrl.u32 %v14361_v20, 16  ;;  %v1893_v54 = vsel %vm11538_vm6, %v1502_v59, %v1892_v37  ;;  %5217 = vst.msk [vmem:[#allocation3 + $0x1a8] sm:$0xf] %vm766_vm2, %v4781_v43  ;;  %v8019_v32 = vld [vmem:[#allocation3 + $0x138] sm:$0xff] }
 0x2f1   :  { %2041 = vst.msk [vmem:[#allocation3 + $0x1b0] sm:$0xf] %vm766_vm2, %v1977_v3  ;;  %v1978_v53 = vld [vmem:[#allocation2 + $0xf4] sm:$0xf]  ;;  %1894 = vst [vmem:[#allocation2 + $0x150] sm:$0xf] %v1893_v54  ;;  %6119 = vrot.lane.b32.xlu0 %v5955_v14, %s11180_s25  ;;  %v10374_v37 = vcombine.low %v8019_v32, %v8021_v8  ;;  %v7226_v54 = vpop.permute.xlu1 %7225 }
 0x2f2   :  { %4218 = vst.msk [vmem:[#allocation3 + $0x150] sm:$0xf] %vm4189_vm4, %v4054_v63  ;;  %4219 = vst.msk [vmem:[#allocation3 + $0x15c] sm:$0xf] %vm4189_vm4, %v4056_v49  ;;  %v14408_v55 = vrot.slane %v1480_v44, 7  ;;  %v753_v18 = vmax.f32 %v651_v48, 0.0 }
 0x2f3   :  { %v17093_v41 = vrot.slane %v17088_v6, 5  ;;  %v7655_v17 = vrot.slane %v7440_v16, 5  ;;  %2042 = vst.msk [vmem:[#allocation3 + $0x1bc] sm:$0xf] %vm766_vm2, %v1978_v53  ;;  %v14419_v63 = vrot.slane %v6856_v52, 4  ;;  %v643_v6 = vadd.f32 %v14309_v30, %v642_v5  ;;  %8960 = vmatmul.mubr.bf16.gmra.mxu1 %v10374_v37  ;;  %v17095_v37 = vld [vmem:[#allocation20_spill] sm:$0xff] }
 0x2f4   :  { %v2129_v59 = vld [vmem:[#allocation2 + $0x108] sm:$0xf]  ;;  %v1885_v48 = vld [vmem:[#allocation2 + $0x144] sm:$0xf]  ;;  %v3905_v43 = vld [vmem:[#allocation2 + $0xfc] sm:$0xf]  ;;  %v1485_v14 = vor.u32 %v1483_v38, %v14408_v55  ;;  %v10616_v3 = vpack.c.bf16 %v753_v18, %v753_v18 }
 0x2f5   :  { %v7654_v20 = vrot.slane %v17093_v41, 4  ;;  %v6875_v16 = vshll.u32 %v14387_v4, 16  ;;  %v2130_v44 = vld [vmem:[#allocation2 + $0x10c] sm:$0xf]  ;;  %v14426_v53 = vrot.slane %v6859_v33, 5  ;;  %v14428_v52 = vrot.slane %v6865_v15, 5  ;;  %v14435_v4 = vpop.f32.mrf.mxu1  ;;  %4069 = vrot.lane.b32.xlu0 %v3905_v43, %s11179_s24 }
 0x2f6   :  { %v14430_v32 = vrot.slane %v6869_v22, 4  ;;  %v751_v5 = vmax.f32 %v643_v6, 0.0  ;;  %7387 = vst.msk [vmem:[#allocation3 + $0x154] sm:$0xf] %vm4189_vm4, %v7224_v46  ;;  %7388 = vst.msk [vmem:[#allocation3 + $0x160] sm:$0xf] %vm4189_vm4, %v7226_v54  ;;  %v1886_v18 = vsel %vm11538_vm6, %v1485_v14, %v1885_v48 }
 0x2f7   :  { %v7656_v8 = vsel %vm11586_vm12, %v7654_v20, %v7655_v17  ;;  %17094 = vst [vmem:[#allocation8_spill] sm:$0xff] %v14435_v4  ;;  %v3906_v38 = vld [vmem:[#allocation2 + $0x100] sm:$0xf]  ;;  %v2649_v17 = vshrl.u32 %v2129_v59, 16  ;;  %v1505_v33 = vshrl.u32 %v10616_v3, 16  ;;  %v1508_v41 = vshll.u32 %v10616_v3, 16  ;;  %v8883_v49 = vpop.f32.mrf.mxu1 }
 0x2f8   :  { %7914 = vst.msk [vmem:[#allocation3 + $0x8c] sm:$0xf] %vm766_vm2, %v7656_v8  ;;  %4071 = vrot.lane.b32.xlu1 %v3906_v38, %s11179_s24  ;;  %v2652_v15 = vshll.u32 %v2129_v59, 16  ;;  %v2658_v22 = vshll.u32 %v2130_v44, 16  ;;  %1887 = vst [vmem:[#allocation2 + $0x144] sm:$0xf] %v1886_v18  ;;  %v10614_v20 = vpack.c.bf16 %v751_v5, %v751_v5  ;;  %v2997_v59 = vpop.permute.xlu0 %2996  ;;  %v2999_v38 = vpop.permute.xlu1 %2998  ;;  %v6862_v5 = vor.u32 %v14426_v53, %v14419_v63 }
 0x2f9   :  { %v17096_v6 = vrot.slane %v17095_v37, 5  ;;  %v17097_v8 = vld [vmem:[#allocation18_spill] sm:$0xff]  ;;  %v2662_v4 = vshrl.u32 %v2130_v44, 16  ;;  %v1503_v48 = vrot.slane %v14364_v36, 4  ;;  %v1507_v14 = vrot.slane %v1505_v33, 7  ;;  %v14457_v36 = vpop.f32.mrf.mxu1 }
 0x2fa   :  { %v17098_v46 = vrot.slane %v17097_v8, 9  ;;  %v14453_v18 = vrot.slane %v6875_v16, 5  ;;  %v1896_v8 = vld [vmem:[#allocation2 + $0x158] sm:$0x1]  ;;  %v1488_v57 = vshrl.u32 %v10614_v20, 16  ;;  %17100 = vst [vmem:[#allocation11_spill] sm:$0xff] %v14457_v36  ;;  %v6872_v44 = vor.u32 %v14430_v32, %v14428_v52 }
 0x2fb   :  { %v17099_v43 = vmov %v17096_v6  ;;  %v7446_v49 = vld [vmem:[#allocation2 + $0x74] sm:$0x1]  ;;  %3159 = vst.msk [vmem:[#allocation3 + $0x168] sm:$0xf] %vm3128_vm0, %v2997_v59  ;;  %3160 = vst.msk [vmem:[#allocation3 + $0x174] sm:$0xf] %vm3128_vm0, %v2999_v38  ;;  %v1510_v33 = vor.u32 %v1508_v41, %v1507_v14  ;;  %v17103_v16 = vsel %vm11625_vm15, %v14214_v25, %v14127_v28  ;;  %v17104_v53 = vsel %vm11625_vm15, %v14232_v21, %v14207_v23  ;;  %v8886_v25 = vpop.f32.mrf.mxu1 }
 0x2fc   :  { %v7660_v54 = vsel %vm11586_vm12, %v17098_v46, %v17096_v6  ;;  %v7661_v3 = vrot.slane %v17099_v43, 4  ;;  %v1491_v6 = vshll.u32 %v10614_v20, 16  ;;  %v1512_v37 = vrot.slane %v1507_v14, 4  ;;  %v17101_v46 = vld [vmem:[#allocation21_spill] sm:$0xff]  ;;  %7239 = vrot.lane.b32.xlu0 %v17103_v16, %s11179_s24  ;;  %7241 = vrot.lane.b32.xlu1 %v17104_v53, %s11179_s24  ;;  %v5725_v38 = vpop.permute.xlu1 %5724  ;;  %v17107_v16 = vld [vmem:[#allocation24_spill] sm:$0xff] }
 0x2fd   :  { %7915 = vst.msk [vmem:[#allocation3 + $0x98] sm:$0xf] %vm766_vm2, %v7660_v54  ;;  %v17102_v54 = vrot.slane %v17101_v46, 5  ;;  %v14477_v32 = vrot.slane %v2649_v17, 4  ;;  %v14479_v41 = vrot.slane %v2652_v15, 5  ;;  %v1486_v14 = vrot.slane %v14408_v55, 4  ;;  %v5723_v15 = vpop.permute.xlu0 %5722 }
 0x2fe   :  { %v14481_v20 = vld [vmem:[#allocation2 + $0x110] sm:$0x1]  ;;  %v1490_v43 = vrot.slane %v1488_v57, 7  ;;  %v14485_v28 = vld [vmem:[#allocation2 + $0x8c] sm:$0x1]  ;;  %v14489_v59 = vrot.slane %v2662_v4, 4  ;;  %v1511_v23 = vsel %vm11548_vm8, %v1503_v48, %v1510_v33  ;;  %v1897_v21 = vsel %vm11554_vm9, %v1512_v37, %v1896_v8  ;;  %v14506_v37 = vpop.f32.mrf.mxu1 }
 0x2ff   :  { %v7663_v63 = vsel %vm11586_vm12, %v7661_v3, %v17102_v54  ;;  %v14487_v3 = vrot.slane %v2658_v22, 5  ;;  %v1889_v17 = vld [vmem:[#allocation2 + $0x14c] sm:$0x1]  ;;  %v8023_v55 = vld [vmem:[#allocation3 + $0x150] sm:$0xff]  ;;  %1895 = vst.msk [vmem:[#allocation2 + $0x154] sm:$0xf] %vm766_vm2, %v1511_v23 }
 0x300   :  { %7916 = vst.msk [vmem:[#allocation3 + $0xa4] sm:$0xf] %vm766_vm2, %v7663_v63  ;;  %v8025_v57 = vld [vmem:[#allocation3 + $0x15c] sm:$0xff]  ;;  %1898 = vst [vmem:[#allocation2 + $0x158] sm:$0x1] %v1897_v21  ;;  %v1493_v54 = vor.u32 %v1491_v6, %v1490_v43  ;;  %v1495_v22 = vrot.slane %v1490_v43, 4 }
 0x301   :  { %v11063_v46 = vld [vmem:[#allocation3 + $0x154] ss:$12 sps:$4 sm:$0xff]   ;;  %v17105_v63 = vld [vmem:[#allocation27_spill] sm:$0xff]  ;;  %v17108_v53 = vrot.slane %v17107_v16, 9  ;;  %5884 = vst.msk [vmem:[#allocation3 + $0x16c] sm:$0xf] %vm3128_vm0, %v5723_v15  ;;  %v10377_v25 = vcombine.low %v8023_v55, %v8025_v57  ;;  %v17111_v15 = vsel %vm11625_vm15, %v14277_v24, %v14279_v27  ;;  %v8891_v27 = vpop.f32.mrf.mxu1  ;;  %v2665_v57 = vor.u32 %v14489_v59, %v14487_v3 }
 0x302   :  { %v17106_v4 = vrot.slane %v17105_v63, 5  ;;  %5885 = vst.msk [vmem:[#allocation3 + $0x178] sm:$0xf] %vm3128_vm0, %v5725_v38  ;;  %17110 = vst [vmem:[#allocation13_spill] sm:$0xff] %v14506_v37  ;;  %v14508_v23 = vrot.slane %v6862_v5, 4  ;;  %v14510_v6 = vrot.slane %v6872_v44, 4  ;;  %3012 = vrot.lane.b32.xlu0 %v17111_v15, %s11181_s26  ;;  %v17112_v5 = vsel %vm11625_vm15, %v14384_v11, %v14314_v9  ;;  %8967 = vmatprep.mubr.bf16.mxu1 %v11063_v46  ;;  %v3675_v63 = vpop.permute.xlu1 %3674 }
 0x303   :  { %v14512_v43 = vld [vmem:[#allocation2 + $0x118] sm:$0xf]  ;;  %v7669_v21 = vrot.slane %v7446_v49, 5  ;;  %3014 = vrot.lane.b32.xlu1 %v17112_v5, %s11181_s26  ;;  %v2655_v44 = vor.u32 %v14479_v41, %v14477_v32  ;;  %v2668_v49 = vshll.u32 %v14481_v20, 16  ;;  %v14530_v38 = vld [vmem:[#allocation2 + $0x120] sm:$0xf]  ;;  %v1494_v55 = vsel %vm11548_vm8, %v1486_v14, %v1493_v54  ;;  %8968 = vmatmul.mubr.bf16.gmra.mxu1 %v10377_v25 }
 0x304   :  { %v7667_v48 = vsel %vm11586_vm12, %v17108_v53, %v17106_v4  ;;  %v17109_v8 = vmov %v17106_v4  ;;  %v1890_v24 = vsel %vm11554_vm9, %v1495_v22, %v1889_v17  ;;  %v14538_v9 = vld [vmem:[#allocation2 + $0x114] sm:$0xe]  ;;  %v14540_v11 = vld [vmem:[#allocation2 + $0x11c] sm:$0x1]  ;;  %1888 = vst.msk [vmem:[#allocation2 + $0x148] sm:$0xf] %vm766_vm2, %v1494_v55  ;;  %v3673_v22 = vpop.permute.xlu0 %3672  ;;  %v14569_v55 = vpop.f32.mrf.mxu1 }
 0x305   :  { %v7668_v33 = vrot.slane %v17109_v8, 4  ;;  %7917 = vst.msk [vmem:[#allocation3 + $0xb0] sm:$0xf] %vm766_vm2, %v7667_v48  ;;  %1891 = vst [vmem:[#allocation2 + $0x14c] sm:$0x1] %v1890_v24  ;;  %v17113_v41 = vld [vmem:[#allocation25_spill] sm:$0xff] }
 0x306   :  { %v17114_v20 = vrot.slane %v17113_v41, 5  ;;  %v17115_v14 = vld [vmem:[#allocation23_spill] sm:$0xff]  ;;  %v5580_v4 = vrot.slane %v14512_v43, 5  ;;  %v14554_v16 = vld [vmem:[#allocation2 + $0x108] sm:$0xe]  ;;  %v17118_v53 = vld [vmem:[#allocation32_spill] sm:$0xff]  ;;  %5738 = vrot.lane.b32.xlu0 %v14345_v40, %s11181_s26 }
 0x307   :  { %v7670_v32 = vsel %vm11586_vm12, %v7668_v33, %v7669_v21  ;;  %v17116_v54 = vrot.slane %v17115_v14, 9  ;;  %v17119_v48 = vrot.slane %v17118_v53, 5  ;;  %v17120_v8 = vld [vmem:[#allocation29_spill] sm:$0xff]  ;;  %v7683_v25 = vrot.slane %v14485_v28, 5  ;;  %3835 = vst.msk [vmem:[#allocation3 + $0x168] sm:$0xf] %vm3804_vm3, %v3673_v22  ;;  %5740 = vrot.lane.b32.xlu1 %v14376_v34, %s11181_s26 }
 0x308   :  { %v17117_v46 = vmov %v17114_v20  ;;  %7918 = vst.msk [vmem:[#allocation3 + $0xbc] sm:$0xf] %vm766_vm2, %v7670_v32  ;;  %v17121_v33 = vrot.slane %v17120_v8, 9  ;;  %17123 = vst [vmem:[#allocation6_spill] sm:$0xff] %v14569_v55  ;;  %v14571_v24 = vld [vmem:[#allocation2 + $0x10c] sm:$0xf]  ;;  %v8894_v8 = vpop.f32.mrf.mxu1 }
 0x309   :  { %v7674_v17 = vsel %vm11586_vm12, %v17116_v54, %v17114_v20  ;;  %v7675_v59 = vrot.slane %v17117_v46, 4  ;;  %v17122_v15 = vmov %v17119_v48  ;;  %3836 = vst.msk [vmem:[#allocation3 + $0x174] sm:$0xf] %vm3804_vm3, %v3675_v63  ;;  %v6880_v27 = vshrl.u32 %v14530_v38, 16  ;;  %v17124_v41 = vld [vmem:[#allocation26_spill] sm:$0xff] }
 0x30a   :  { %7919 = vst.msk [vmem:[#allocation3 + $0xc8] sm:$0xf] %vm766_vm2, %v7674_v17  ;;  %v7681_v21 = vsel %vm11586_vm12, %v17121_v33, %v17119_v48  ;;  %v7682_v5 = vrot.slane %v17122_v15, 4  ;;  %v6883_v32 = vshll.u32 %v14530_v38, 16  ;;  %v17125_v20 = vrot.slane %v17124_v41, 5  ;;  %v17126_v28 = vld [vmem:[#allocation30_spill] sm:$0xff] }
 0x30b   :  { %7921 = vst.msk [vmem:[#allocation3 + $0xe0] sm:$0xf] %vm766_vm2, %v7681_v21  ;;  %v17127_v54 = vrot.slane %v17126_v28, 5  ;;  %v17128_v17 = vld [vmem:[#allocation28_spill] sm:$0xff]  ;;  %v14590_v38 = vrot.slane %v2655_v44, 4  ;;  %v14592_v63 = vrot.slane %v2668_v49, 5 }
 0x30c   :  { %v7677_v14 = vsel %vm11586_vm12, %v7675_v59, %v17125_v20  ;;  %v17129_v46 = vrot.slane %v17128_v17, 9  ;;  %v10290_v59 = vrot.slane %v14538_v9, 9  ;;  %v7684_v53 = vsel %vm11586_vm12, %v7682_v5, %v7683_v25  ;;  %v1979_v48 = vld [vmem:[#allocation2 + $0xfc] sm:$0xf]  ;;  %v14602_v34 = vld [vmem:[#allocation2 + $0x124] sm:$0xf]  ;;  %v6110_v17 = vpop.permute.xlu1 %6109 }
 0x30d   :  { %7920 = vst.msk [vmem:[#allocation3 + $0xd4] sm:$0xf] %vm766_vm2, %v7677_v14  ;;  %v14599_v33 = vrot.slane %v2665_v57, 4  ;;  %7922 = vst.msk [vmem:[#allocation3 + $0xec] sm:$0xf] %vm766_vm2, %v7684_v53  ;;  %v17130_v49 = vrot.slane %v13405_v19, 5 }
 0x30e   :  { %v7688_v22 = vsel %vm11586_vm12, %v17129_v46, %v17127_v54  ;;  %v14605_v44 = vld [vmem:[#allocation2 + $0xfc] sm:$0xf]  ;;  %v17131_v21 = vld [vmem:[#allocation34_spill] sm:$0xff]  ;;  %v17135_v20 = vld [vmem:[#allocation33_spill] sm:$0xff]  ;;  %2043 = vst.msk [vmem:[#allocation3 + $0x1c8] sm:$0xf] %vm766_vm2, %v1979_v48  ;;  %v6108_v54 = vpop.permute.xlu0 %6107 }
 0x30f   :  { %7923 = vst.msk [vmem:[#allocation3 + $0xf8] sm:$0xf] %vm766_vm2, %v7688_v22  ;;  %v17132_v15 = vrot.slane %v17131_v21, 9  ;;  %v17133_v25 = vld [vmem:[#allocation35_spill] sm:$0xff]  ;;  %v17136_v57 = vrot.slane %v17135_v20, 9  ;;  %v17137_v46 = vrot.slane %v14340_v31, 5 }
 0x310   :  { %v17134_v41 = vrot.slane %v17133_v25, 5  ;;  %v17138_v22 = vrot.slane %v14317_v1, 9  ;;  %v17139_v8 = vrot.slane %v14347_v50, 5  ;;  %v16978_v21 = vrot.slane %v14571_v24, 5  ;;  %6269 = vst.msk [vmem:[#allocation3 + $0x16c] sm:$0xf] %vm3804_vm3, %v6108_v54 }
 0x311   :  { %v7695_v5 = vsel %vm11586_vm12, %v17132_v15, %v17130_v49  ;;  %v17140_v15 = vrot.slane %v17126_v28, 5  ;;  %6270 = vst.msk [vmem:[#allocation3 + $0x178] sm:$0xf] %vm3804_vm3, %v6110_v17  ;;  %v14642_v1 = vrot.slane %v5580_v4, 4  ;;  %v6882_v50 = vrot.slane %v6880_v27, 4 }
 0x312   :  { %v7702_v14 = vsel %vm11586_vm12, %v17136_v57, %v17134_v41  ;;  %v3524_v53 = vsel %vm11586_vm12, %v17138_v22, %v17137_v46  ;;  %v3527_v49 = vsel %vm11586_vm12, %v14394_v12, %v17139_v8  ;;  %v14634_v41 = vld [vmem:[#allocation2 + $0x100] sm:$0xf]  ;;  %7925 = vst.msk [vmem:[#allocation3 + $0x110] sm:$0xf] %vm766_vm2, %v7695_v5  ;;  %v6885_v12 = vrot.slane %v6883_v32, 5 }
 0x313   :  { %v7689_v48 = vrot.slane %v17140_v15, 4  ;;  %7927 = vst.msk [vmem:[#allocation3 + $0x128] sm:$0xf] %vm766_vm2, %v7702_v14  ;;  %v1980_v28 = vld [vmem:[#allocation2 + $0x100] sm:$0xf]  ;;  %3688 = vrot.lane.b32.xlu0 %v3524_v53, %s11180_s25  ;;  %3690 = vrot.lane.b32.xlu1 %v3527_v49, %s11180_s25  ;;  %v6889_v20 = vshll.u32 %v14602_v34, 16 }
 0x314   :  { %v14647_v5 = vld [vmem:[#allocation2 + $0x110] sm:$0x1]  ;;  %v6893_v57 = vshrl.u32 %v14602_v34, 16  ;;  %v17141_v14 = vld [vmem:[#allocation31_spill] sm:$0xff]  ;;  %v4783_v46 = vshrl.u32 %v14605_v44, 16  ;;  %v4786_v53 = vshll.u32 %v14605_v44, 16 }
 0x315   :  { %v17142_v54 = vrot.slane %v17141_v14, 5  ;;  %2044 = vst.msk [vmem:[#allocation3 + $0x1d4] sm:$0xf] %vm766_vm2, %v1980_v28  ;;  %v5957_v27 = vld [vmem:[#allocation2 + $0x114] sm:$0xf]  ;;  %v4792_v8 = vshll.u32 %v14634_v41, 16 }
 0x316   :  { %v5958_v32 = vld [vmem:[#allocation2 + $0x118] sm:$0xf]  ;;  %v17143_v34 = vrot.slane %v13453_v39, 5  ;;  %v17144_v49 = vrot.slane %v13415_v29, 9  ;;  %v17146_v28 = vrot.slane %v13407_v47, 9  ;;  %v6886_v29 = vor.u32 %v6885_v12, %v6882_v50  ;;  %v10862_v50 = vpop.f32.mrf.mxu0 }
 0x317   :  { %v7691_v17 = vsel %vm11586_vm12, %v7689_v48, %v17142_v54  ;;  %v14657_v22 = vld [vmem:[#allocation2 + $0x138] sm:$0xe]  ;;  %v17145_v48 = vrot.slane %v13444_v60, 5  ;;  %v2937_v54 = vpop.permute.xlu0 %2936  ;;  %v14686_v47 = vld [vmem:[#allocation2 + $0x128] sm:$0x1]  ;;  %6123 = vrot.lane.b32.xlu0 %v5957_v27, %s11180_s25  ;;  %6125 = vrot.lane.b32.xlu1 %v5958_v32, %s11180_s25  ;;  %v14722_v12 = vrot.slane %v6889_v20, 5 }
 0x318   :  { %7924 = vst.msk [vmem:[#allocation3 + $0x104] sm:$0xf] %vm766_vm2, %v7691_v17  ;;  %v7709_v15 = vsel %vm11586_vm12, %v17144_v49, %v17143_v34  ;;  %v2939_v17 = vpop.permute.xlu1 %2938  ;;  %v14684_v34 = vrot.slane %v16978_v21, 4  ;;  %v14688_v49 = vld [vmem:[#allocation2 + $0x114] sm:$0xf]  ;;  %v17149_v27 = vrot.slane %v13780_v62, 5 }
 0x319   :  { %v7716_v14 = vsel %vm11586_vm12, %v17146_v28, %v17145_v48  ;;  %v4796_v48 = vshrl.u32 %v14634_v41, 16  ;;  %7929 = vst.msk [vmem:[#allocation3 + $0x140] sm:$0xf] %vm766_vm2, %v7709_v15  ;;  %v14695_v28 = vld [vmem:[#allocation2 + $0x12c] sm:$0xe]  ;;  %v14719_v41 = vsel %vm11586_vm12, %v10290_v59, %v5580_v4  ;;  %v6895_v40 = vrot.slane %v6893_v57, 4 }
 0x31a   :  { %7931 = vst.msk [vmem:[#allocation3 + $0x158] sm:$0xf] %vm766_vm2, %v7716_v14  ;;  %v4310_v15 = vld [vmem:[#allocation2 + $0x104] sm:$0x1]  ;;  %v17147_v14 = vrot.slane %v13643_v58, 5  ;;  %v4785_v4 = vrot.slane %v4783_v46, 4 }
 0x31b   :  { %3129 = vst.msk [vmem:[#allocation3] sm:$0xf] %vm3128_vm0, %v2937_v54  ;;  %3130 = vst.msk [vmem:[#allocation3 + $0xc] sm:$0xf] %vm3128_vm0, %v2939_v17  ;;  %v17148_v54 = vrot.slane %v13489_v10, 9  ;;  %v4788_v59 = vrot.slane %v4786_v53, 5  ;;  %v4058_v20 = vpop.permute.xlu0 %4057 }
 0x31c   :  { %v14724_v10 = vld [vmem:[#allocation2 + $0x118] sm:$0xf]  ;;  %v7458_v9 = vld [vmem:[#allocation2 + $0xa4] sm:$0x1]  ;;  %v4794_v44 = vrot.slane %v4792_v8, 5  ;;  %v4060_v31 = vpop.permute.xlu1 %4059  ;;  %v4798_v55 = vrot.slane %v4796_v48, 4 }
 0x31d   :  { %v7730_v17 = vsel %vm11586_vm12, %v17148_v54, %v17147_v14  ;;  %v17150_v14 = vld [vmem:[#allocation41_spill] sm:$0xff]  ;;  %4220 = vst.msk [vmem:[#allocation3 + $0x168] sm:$0xf] %vm4189_vm4, %v4058_v20  ;;  %4221 = vst.msk [vmem:[#allocation3 + $0x174] sm:$0xf] %vm4189_vm4, %v4060_v31  ;;  %v14738_v57 = vrot.slane %v6886_v29, 4  ;;  %v4789_v8 = vor.u32 %v4788_v59, %v4785_v4 }
 0x31e   :  { %7935 = vst.msk [vmem:[#allocation3 + $0x188] sm:$0xf] %vm766_vm2, %v7730_v17  ;;  %v17151_v32 = vrot.slane %v17150_v14, 9  ;;  %v3907_v54 = vld [vmem:[#allocation2 + $0x108] sm:$0xf]  ;;  %v4802_v14 = vshll.u32 %v4310_v15, 16  ;;  %v4799_v15 = vor.u32 %v4798_v55, %v4794_v44  ;;  %v6896_v55 = vor.u32 %v6895_v40, %v14722_v12 }
 0x31f   :  { %v6899_v46 = vshll.u32 %v14686_v47, 16  ;;  %v2673_v53 = vshrl.u32 %v14688_v49, 16  ;;  %4073 = vrot.lane.b32.xlu0 %v3907_v54, %s11179_s24  ;;  %v2676_v48 = vshll.u32 %v14688_v49, 16  ;;  %v17152_v20 = vld [vmem:[#allocation42_spill] sm:$0xff]  ;;  %v17154_v17 = vld [vmem:[#allocation40_spill] sm:$0xff]  ;;  %v17156_v4 = vrot.slane %v14571_v24, 5 }
 0x320   :  { %v7737_v43 = vsel %vm11586_vm12, %v17151_v32, %v17149_v27  ;;  %v3908_v27 = vld [vmem:[#allocation2 + $0x10c] sm:$0xf]  ;;  %v14744_v32 = vld [vmem:[#allocation2 + $0x13c] sm:$0xf]  ;;  %v17153_v31 = vrot.slane %v17152_v20, 5  ;;  %v17155_v29 = vrot.slane %v17154_v17, 9  ;;  %v5663_v17 = vpop.permute.xlu0 %5662 }
 0x321   :  { %7937 = vst.msk [vmem:[#allocation3 + $0x1a0] sm:$0xf] %vm766_vm2, %v7737_v43  ;;  %4075 = vrot.lane.b32.xlu1 %v3908_v27, %s11179_s24  ;;  %v4804_v43 = vrot.slane %v4802_v14, 5  ;;  %v14753_v21 = vld [vmem:[#allocation2 + $0x130] sm:$0xf]  ;;  %v17157_v54 = vrot.slane %v14554_v16, 9  ;;  %v655_v27 = vpop.f32.mrf.mxu0 }
 0x322   :  { %v7744_v47 = vsel %vm11586_vm12, %v17155_v29, %v17153_v31  ;;  %v2682_v49 = vshll.u32 %v14724_v10, 16  ;;  %v4790_v14 = vrot.slane %v4789_v8, 4  ;;  %v5665_v31 = vpop.permute.xlu1 %5664  ;;  %v2686_v29 = vshrl.u32 %v14724_v10, 16  ;;  %5854 = vst.msk [vmem:[#allocation3 + $0x4] sm:$0xf] %vm3128_vm0, %v5663_v17 }
 0x323   :  { %v14761_v59 = vsel %vm11586_vm12, %v17157_v54, %v17156_v4  ;;  %7939 = vst.msk [vmem:[#allocation3 + $0x1b8] sm:$0xf] %vm766_vm2, %v7744_v47  ;;  %v4800_v37 = vrot.slane %v4799_v15, 4  ;;  %v17158_v24 = vrot.slane %v13405_v19, 5  ;;  %v7697_v36 = vrot.slane %v7458_v9, 5 }
 0x324   :  { %5855 = vst.msk [vmem:[#allocation3 + $0x10] sm:$0xf] %vm3128_vm0, %v5665_v31  ;;  %v16979_v40 = vrot.slane %v14744_v32, 5  ;;  %v14772_v4 = vrot.slane %v6899_v46, 5  ;;  %v14774_v8 = vrot.slane %v2673_v53, 4  ;;  %v4795_v47 = vsel %vm11625_vm15, %v4790_v14, %v4794_v44 }
 0x325   :  { %v7696_v16 = vrot.slane %v17158_v24, 4  ;;  %v17159_v19 = vsel %vm11625_vm15, %v14508_v23, %v14428_v52  ;;  %v17160_v10 = vsel %vm11625_vm15, %v14510_v6, %v14453_v18  ;;  %v14790_v9 = vrot.slane %v2676_v48, 5  ;;  %v2134_v46 = vld [vmem:[#allocation2 + $0x11c] sm:$0x1]  ;;  %5218 = vst.msk [vmem:[#allocation3 + $0x1b4] sm:$0xf] %vm766_vm2, %v4795_v47 }
 0x326   :  { %7243 = vrot.lane.b32.xlu0 %v17159_v19, %s11179_s24  ;;  %7245 = vrot.lane.b32.xlu1 %v17160_v10, %s11179_s24  ;;  %v4805_v44 = vsel %vm11625_vm15, %v4800_v37, %v4804_v43  ;;  %v17161_v52 = vrot.slane %v17133_v25, 5  ;;  %v16980_v15 = vrot.slane %v14753_v21, 5  ;;  %v14800_v54 = vrot.slane %v6896_v55, 4  ;;  %v14802_v18 = vld [vmem:[#allocation2 + $0x120] sm:$0xe]  ;;  %v7228_v43 = vpop.permute.xlu0 %7227  ;;  %v7230_v25 = vpop.permute.xlu1 %7229 }
 0x327   :  { %v7698_v53 = vsel %vm11586_vm12, %v7696_v16, %v7697_v36  ;;  %v14804_v6 = vld [vmem:[#allocation2 + $0x124] sm:$0xf]  ;;  %5219 = vst.msk [vmem:[#allocation3 + $0x1c0] sm:$0xf] %vm766_vm2, %v4805_v44  ;;  %v664_v37 = vadd.f32 %v14309_v30, %v10862_v50  ;;  %v656_v48 = vadd.f32 %v14309_v30, %v655_v27  ;;  %v10863_v36 = vpop.f32.mrf.mxu0  ;;  %v17162_v14 = vrot.slane %v14540_v11, 5 }
 0x328   :  { %v7703_v23 = vrot.slane %v17161_v52, 4  ;;  %7926 = vst.msk [vmem:[#allocation3 + $0x11c] sm:$0xf] %vm766_vm2, %v7698_v53  ;;  %v14815_v17 = vrot.slane %v2682_v49, 5  ;;  %v14817_v31 = vrot.slane %v2686_v29, 4  ;;  %v17163_v24 = vld [vmem:[#allocation36_spill] sm:$0xff]  ;;  %v667_v44 = vadd.f32 %v14309_v30, %v10863_v36 }
 0x329   :  { %v5584_v55 = vsel %vm11586_vm12, %v14642_v1, %v17162_v14  ;;  %v17164_v16 = vrot.slane %v17163_v24, 5  ;;  %v7468_v47 = vld [vmem:[#allocation2 + $0xcc] sm:$0xe]  ;;  %7389 = vst.msk [vmem:[#allocation3 + $0x16c] sm:$0xf] %vm4189_vm4, %v7228_v43  ;;  %v17165_v11 = vrot.slane %v14647_v5, 5  ;;  %v17167_v5 = vsel %vm11625_vm15, %v14590_v38, %v14487_v3 }
 0x32a   :  { %7390 = vst.msk [vmem:[#allocation3 + $0x178] sm:$0xf] %vm4189_vm4, %v7230_v25  ;;  %v2692_v49 = vshll.u32 %v2134_v46, 16  ;;  %v17166_v27 = vrot.slane %v13453_v39, 5  ;;  %v7469_v19 = vld [vmem:[#allocation2 + $0xd0] sm:$0xf]  ;;  %3016 = vrot.lane.b32.xlu0 %v17167_v5, %s11181_s26  ;;  %v2679_v39 = vor.u32 %v14790_v9, %v14774_v8  ;;  %v3613_v14 = vpop.permute.xlu0 %3612  ;;  %v3615_v24 = vpop.permute.xlu1 %3614  ;;  %v2689_v8 = vor.u32 %v14817_v31, %v14815_v17 }
 0x32b   :  { %v7705_v50 = vsel %vm11586_vm12, %v7703_v23, %v17164_v16  ;;  %v14830_v1 = vsel %vm11586_vm12, %v14684_v34, %v17165_v11  ;;  %v7470_v10 = vld [vmem:[#allocation2 + $0xd4] sm:$0x1]  ;;  %v17168_v34 = vsel %vm11625_vm15, %v14599_v33, %v14592_v63  ;;  %v10291_v46 = vrot.slane %v14802_v18, 9  ;;  %v14854_v36 = vld [vmem:[#allocation2 + $0x128] sm:$0x1]  ;;  %v17172_v9 = vld [vmem:[#allocation37_spill] sm:$0xff] }
 0x32c   :  { %7928 = vst.msk [vmem:[#allocation3 + $0x134] sm:$0xf] %vm766_vm2, %v7705_v50  ;;  %v7710_v29 = vrot.slane %v17166_v27, 4  ;;  %3018 = vrot.lane.b32.xlu1 %v17168_v34, %s11181_s26  ;;  %v5587_v53 = vrot.slane %v14804_v6, 5  ;;  %v17169_v52 = vrot.slane %v13444_v60, 5  ;;  %v17170_v3 = vld [vmem:[#allocation38_spill] sm:$0xff] }
 0x32d   :  { %v17171_v38 = vrot.slane %v17170_v3, 5  ;;  %v756_v25 = vmax.f32 %v664_v37, 0.0  ;;  %v754_v63 = vmax.f32 %v656_v48, 0.0  ;;  %v10317_v33 = vrot.slane %v7468_v47, 9  ;;  %3805 = vst.msk [vmem:[#allocation3] sm:$0xf] %vm3804_vm3, %v3613_v14 }
 0x32e   :  { %v7717_v23 = vrot.slane %v17169_v52, 4  ;;  %v17173_v60 = vrot.slane %v17172_v9, 5  ;;  %v7722_v50 = vrot.slane %v7469_v19, 5  ;;  %v7725_v11 = vrot.slane %v7470_v10, 5  ;;  %3806 = vst.msk [vmem:[#allocation3 + $0xc] sm:$0xf] %vm3804_vm3, %v3615_v24  ;;  %5742 = vrot.lane.b32.xlu0 %v14719_v41, %s11181_s26  ;;  %v658_v41 = vpop.f32.mrf.mxu0  ;;  %v6050_v3 = vpop.permute.xlu1 %6049 }
 0x32f   :  { %v7712_v43 = vsel %vm11586_vm12, %v7710_v29, %v17171_v38  ;;  %v14869_v37 = vrot.slane %v2692_v49, 5  ;;  %v10619_v48 = vpack.c.bf16 %v756_v25, %v756_v25  ;;  %v10617_v47 = vpack.c.bf16 %v754_v63, %v754_v63  ;;  %6240 = vst.msk [vmem:[#allocation3 + $0x10] sm:$0xf] %vm3804_vm3, %v6050_v3  ;;  %v1981_v6 = vld [vmem:[#allocation2 + $0x108] sm:$0xf] }
 0x330   :  { %7930 = vst.msk [vmem:[#allocation3 + $0x14c] sm:$0xf] %vm766_vm2, %v7712_v43  ;;  %v7719_v16 = vsel %vm11586_vm12, %v7717_v23, %v17173_v60  ;;  %v757_v31 = vmax.f32 %v667_v44, 0.0  ;;  %5744 = vrot.lane.b32.xlu1 %v5584_v55, %s11181_s26  ;;  %v7723_v29 = vsel %vm11586_vm12, %v10317_v33, %v7722_v50  ;;  %v7724_v19 = vrot.slane %v7722_v50, 4  ;;  %v6048_v55 = vpop.permute.xlu0 %6047  ;;  %v8027_v38 = vld [vmem:[#allocation3 + $0x168] sm:$0xff] }
 0x331   :  { %7932 = vst.msk [vmem:[#allocation3 + $0x164] sm:$0xf] %vm766_vm2, %v7719_v16  ;;  %v17174_v10 = vrot.slane %v14230_v35, 5  ;;  %v17175_v49 = vrot.slane %v14153_v61, 9  ;;  %v1531_v34 = vshrl.u32 %v10619_v48, 16  ;;  %v1534_v44 = vshll.u32 %v10619_v48, 16 }
 0x332   :  { %v1514_v52 = vshrl.u32 %v10617_v47, 16  ;;  %v1517_v23 = vshll.u32 %v10617_v47, 16  ;;  %7933 = vst.msk [vmem:[#allocation3 + $0x170] sm:$0xf] %vm766_vm2, %v7723_v29  ;;  %v8029_v43 = vld [vmem:[#allocation3 + $0x174] sm:$0xff]  ;;  %v14886_v63 = vrot.slane %v2679_v39, 4  ;;  %v7726_v14 = vsel %vm11586_vm12, %v7724_v19, %v7725_v11  ;;  %3692 = vrot.lane.b32.xlu0 %v14761_v59, %s11180_s25 }
 0x333   :  { %v7751_v5 = vsel %vm11586_vm12, %v17175_v49, %v17174_v10  ;;  %v11067_v25 = vld [vmem:[#allocation3 + $0x16c] ss:$12 sps:$4 sm:$0xff]   ;;  %v14890_v61 = vrot.slane %v5587_v53, 4  ;;  %v14892_v33 = vld [vmem:[#allocation2 + $0x118] sm:$0xf]  ;;  %v10620_v24 = vpack.c.bf16 %v757_v31, %v757_v31  ;;  %v10380_v9 = vcombine.low %v8027_v38, %v8029_v43 }
 0x334   :  { %7941 = vst.msk [vmem:[#allocation3 + $0x1d0] sm:$0xf] %vm766_vm2, %v7751_v5  ;;  %v14898_v60 = vld [vmem:[#allocation2 + $0x12c] sm:$0xf]  ;;  %v1533_v16 = vrot.slane %v1531_v34, 7  ;;  %v14900_v39 = vrot.slane %v1514_v52, 7  ;;  %3694 = vrot.lane.b32.xlu1 %v14830_v1, %s11180_s25  ;;  %v6892_v47 = vsel %vm11625_vm15, %v14738_v57, %v14722_v12  ;;  %8975 = vmatprep.mubr.bf16.mxu1 %v11067_v25  ;;  %v659_v1 = vadd.f32 %v14309_v30, %v658_v41  ;;  %v3998_v52 = vpop.permute.xlu0 %3997 }
 0x335   :  { %6239 = vst.msk [vmem:[#allocation3 + $0x4] sm:$0xf] %vm3804_vm3, %v6048_v55  ;;  %v17176_v50 = vrot.slane %v14186_v42, 5  ;;  %v17177_v48 = vrot.slane %v14142_v51, 9  ;;  %v1906_v31 = vld [vmem:[#allocation2 + $0x168] sm:$0xf]  ;;  %v4000_v55 = vpop.permute.xlu1 %3999  ;;  %8976 = vmatmul.mubr.bf16.gmra.mxu1 %v10380_v9 }
 0x336   :  { %7934 = vst.msk [vmem:[#allocation3 + $0x17c] sm:$0xf] %vm766_vm2, %v7726_v14  ;;  %v1899_v29 = vld [vmem:[#allocation2 + $0x15c] sm:$0xf]  ;;  %v1539_v19 = vshrl.u32 %v10620_v24, 16  ;;  %v1542_v10 = vshll.u32 %v10620_v24, 16  ;;  %v1536_v59 = vor.u32 %v1534_v44, %v1533_v16  ;;  %v1519_v34 = vor.u32 %v1517_v23, %v14900_v39 }
 0x337   :  { %v7758_v11 = vsel %vm11586_vm12, %v17177_v48, %v17176_v50  ;;  %v5959_v51 = vld [vmem:[#allocation2 + $0x120] sm:$0xf]  ;;  %v5960_v49 = vld [vmem:[#allocation2 + $0x124] sm:$0xf]  ;;  %v14918_v5 = vrot.slane %v2689_v8, 4  ;;  %v1537_v3 = vrot.slane %v1533_v16, 4 }
 0x338   :  { %7943 = vst.msk [vmem:[#allocation3 + $0x1e8] sm:$0xf] %vm766_vm2, %v7758_v11  ;;  %v1541_v38 = vrot.slane %v1539_v19, 7  ;;  %v4311_v43 = vld [vmem:[#allocation2 + $0x108] sm:$0xf]  ;;  %v17178_v14 = vrot.slane %v14695_v28, 9  ;;  %v1907_v24 = vsel %vm11538_vm6, %v1536_v59, %v1906_v31  ;;  %6127 = vrot.lane.b32.xlu0 %v5959_v51, %s11180_s25  ;;  %6129 = vrot.lane.b32.xlu1 %v5960_v49, %s11180_s25  ;;  %v6902_v59 = vsel %vm11625_vm15, %v14800_v54, %v14772_v4 }
 0x339   :  { %v17179_v8 = vrot.slane %v14657_v22, 9  ;;  %4190 = vst.msk [vmem:[#allocation3] sm:$0xf] %vm4189_vm4, %v3998_v52  ;;  %4191 = vst.msk [vmem:[#allocation3 + $0xc] sm:$0xf] %vm4189_vm4, %v4000_v55  ;;  %v6904_v28 = vshrl.u32 %v14898_v60, 16  ;;  %v1900_v22 = vsel %vm11538_vm6, %v1519_v34, %v1899_v29  ;;  %v2685_v51 = vsel %vm11625_vm15, %v14886_v63, %v14815_v17  ;;  %v7168_v55 = vpop.permute.xlu0 %7167 }
 0x33a   :  { %v7765_v25 = vsel %vm11586_vm12, %v17178_v14, %v16980_v15  ;;  %v14937_v23 = vld [vmem:[#allocation2 + $0x130] sm:$0xf]  ;;  %v14940_v41 = vld [vmem:[#allocation2 + $0x148] sm:$0xf]  ;;  %1908 = vst [vmem:[#allocation2 + $0x168] sm:$0xf] %v1907_v24  ;;  %v1544_v50 = vor.u32 %v1542_v10, %v1541_v38  ;;  %v2695_v24 = vsel %vm11625_vm15, %v14918_v5, %v14869_v37  ;;  %v5588_v63 = vsel %vm11586_vm12, %v10291_v46, %v5587_v53 }
 0x33b   :  { %v7772_v30 = vsel %vm11586_vm12, %v17179_v8, %v16979_v40  ;;  %v1910_v9 = vld [vmem:[#allocation2 + $0x170] sm:$0x1]  ;;  %7945 = vst.msk [vmem:[#allocation3 + $0x200] sm:$0xf] %vm766_vm2, %v7765_v25  ;;  %1901 = vst [vmem:[#allocation2 + $0x15c] sm:$0xf] %v1900_v22 }
 0x33c   :  { %7947 = vst.msk [vmem:[#allocation3 + $0x218] sm:$0xf] %vm766_vm2, %v7772_v30  ;;  %v1546_v48 = vrot.slane %v1541_v38, 4  ;;  %v17180_v11 = vrot.slane %v13643_v58, 5  ;;  %v3909_v19 = vld [vmem:[#allocation2 + $0x114] sm:$0xf]  ;;  %v7170_v38 = vpop.permute.xlu1 %7169  ;;  %v1545_v25 = vsel %vm11548_vm8, %v1537_v3, %v1544_v50  ;;  %v14974_v30 = vpop.f32.mrf.mxu1 }
 0x33d   :  { %v3910_v29 = vld [vmem:[#allocation2 + $0x118] sm:$0xf]  ;;  %v755_v49 = vmax.f32 %v659_v1, 0.0  ;;  %v4312_v34 = vld [vmem:[#allocation2 + $0x10c] sm:$0xf]  ;;  %v4807_v52 = vshrl.u32 %v4311_v43, 16  ;;  %4077 = vrot.lane.b32.xlu0 %v3909_v19, %s11179_s24 }
 0x33e   :  { %v7731_v31 = vrot.slane %v17180_v11, 4  ;;  %v4313_v10 = vld [vmem:[#allocation2 + $0x110] sm:$0x1]  ;;  %v14961_v58 = vld [vmem:[#allocation2 + $0x144] sm:$0xe]  ;;  %v7778_v14 = vrot.slane %v14940_v41, 5  ;;  %v1911_v4 = vsel %vm11554_vm9, %v1546_v48, %v1910_v9  ;;  %4079 = vrot.lane.b32.xlu1 %v3910_v29, %s11179_s24 }
 0x33f   :  { %v17181_v54 = vld [vmem:[#allocation39_spill] sm:$0xff]  ;;  %7359 = vst.msk [vmem:[#allocation3 + $0x4] sm:$0xf] %vm4189_vm4, %v7168_v55  ;;  %7360 = vst.msk [vmem:[#allocation3 + $0x10] sm:$0xf] %vm4189_vm4, %v7170_v38  ;;  %v10618_v50 = vpack.c.bf16 %v755_v49, %v755_v49  ;;  %v4809_v48 = vrot.slane %v4807_v52, 4 }
 0x340   :  { %v17182_v8 = vrot.slane %v17181_v54, 5  ;;  %v14980_v3 = vld [vmem:[#allocation2 + $0x150] sm:$0xe]  ;;  %v14982_v22 = vld [vmem:[#allocation2 + $0x120] sm:$0xf]  ;;  %v4810_v11 = vshll.u32 %v4311_v43, 16  ;;  %v3003_v49 = vpop.permute.xlu1 %3002 }
 0x341   :  { %v7494_v9 = vld [vmem:[#allocation2 + $0x14c] sm:$0x1]  ;;  %1909 = vst.msk [vmem:[#allocation2 + $0x16c] sm:$0xf] %vm766_vm2, %v1545_v25  ;;  %1912 = vst [vmem:[#allocation2 + $0x170] sm:$0x1] %v1911_v4  ;;  %7247 = vrot.lane.b32.xlu0 %v6892_v47, %s11179_s24 }
 0x342   :  { %v7733_v1 = vsel %vm11586_vm12, %v7731_v31, %v17182_v8  ;;  %vm8726_vm1 = vcmask 261120   ;;  %v4816_v55 = vshll.u32 %v4312_v34, 16  ;;  %v4820_v38 = vshrl.u32 %v4312_v34, 16  ;;  %v8899_v8 = vpop.f32.mrf.mxu1  ;;  %v14990_v52 = vld [vmem:[#allocation2 + $0x154] sm:$0xf]  ;;  %7249 = vrot.lane.b32.xlu1 %v6902_v59, %s11179_s24 }
 0x343   :  { %7936 = vst.msk [vmem:[#allocation3 + $0x194] sm:$0xf] %vm766_vm2, %v7733_v1  ;;  %v4826_v54 = vshll.u32 %v4313_v10, 16  ;;  %v10325_v40 = vrot.slane %v14961_v58, 9  ;;  %v1522_v25 = vshrl.u32 %v10618_v50, 16  ;;  %v1525_v4 = vshll.u32 %v10618_v50, 16  ;;  %v3001_v1 = vpop.permute.xlu0 %3000 }
 0x344   :  { %v4812_v15 = vrot.slane %v4810_v11, 5  ;;  %v7780_v43 = vrot.slane %v7778_v14, 4  ;;  %v7781_v19 = vrot.slane %v7494_v9, 5  ;;  %v4818_v29 = vrot.slane %v4816_v55, 5  ;;  %3161 = vst.msk [vmem:[#allocation3 + $0x180] sm:$0xf] %vm3128_vm0, %v3001_v1  ;;  %v14996_v34 = vpop.f32.mrf.mxu1  ;;  %v5729_v12 = vpop.permute.xlu1 %5728 }
 0x345   :  { %v4822_v44 = vrot.slane %v4820_v38, 4  ;;  %3162 = vst.msk [vmem:[#allocation3 + $0x18c] sm:$0xf] %vm3128_vm0, %v3003_v49  ;;  %v14998_v10 = vld [vmem:[#allocation2 + $0x114] sm:$0xe]  ;;  %v10326_v50 = vrot.slane %v14980_v3, 9  ;;  %3020 = vrot.lane.b32.xlu0 %v2685_v51, %s11181_s26 }
 0x346   :  { %v15000_v58 = vld [vmem:[#allocation2 + $0x11c] sm:$0x1]  ;;  %v1520_v11 = vrot.slane %v14900_v39, 4  ;;  %v1524_v8 = vrot.slane %v1522_v25, 7  ;;  %v4813_v31 = vor.u32 %v4812_v15, %v4809_v48  ;;  %v6917_v9 = vshrl.u32 %v14937_v23, 16  ;;  %v8902_v49 = vpop.f32.mrf.mxu1  ;;  %3022 = vrot.lane.b32.xlu1 %v2695_v24, %s11181_s26 }
 0x347   :  { %v1903_v38 = vld [vmem:[#allocation2 + $0x164] sm:$0x1]  ;;  %v4823_v1 = vor.u32 %v4822_v44, %v4818_v29  ;;  %v4828_v3 = vrot.slane %v4826_v54, 5  ;;  %v15013_v39 = vld [vmem:[#allocation2 + $0x134] sm:$0x1]  ;;  %v7785_v15 = vrot.slane %v14990_v52, 5  ;;  %v5727_v27 = vpop.permute.xlu0 %5726  ;;  %v7779_v44 = vsel %vm11586_vm12, %v10325_v40, %v7778_v14 }
 0x348   :  { %v1527_v48 = vor.u32 %v1525_v4, %v1524_v8  ;;  %v1529_v25 = vrot.slane %v1524_v8, 4  ;;  %v4814_v16 = vrot.slane %v4813_v31, 4  ;;  %v11069_v57 = vld [vmem:[#allocation3] ss:$12 sps:$4 sm:$0xff]   ;;  %v2700_v47 = vshll.u32 %v14982_v22, 16  ;;  %v15029_v31 = vpop.f32.mrf.mxu1 }
 0x349   :  { %v4824_v59 = vrot.slane %v4823_v1, 4  ;;  %v7782_v54 = vsel %vm11586_vm12, %v7780_v43, %v7781_v19  ;;  %v15023_v49 = vld [vmem:[#allocation2 + $0x11c] sm:$0x1]  ;;  %v15025_v55 = vld [vmem:[#allocation2 + $0x140] sm:$0x1]  ;;  %v10259_v19 = vrot.slane %v14998_v10, 9  ;;  %5746 = vrot.lane.b32.xlu0 %v5588_v63, %s11181_s26 }
 0x34a   :  { %5886 = vst.msk [vmem:[#allocation3 + $0x184] sm:$0xf] %vm3128_vm0, %v5727_v27  ;;  %5887 = vst.msk [vmem:[#allocation3 + $0x190] sm:$0xf] %vm3128_vm0, %v5729_v12  ;;  %v11071_v4 = vld [vmem:[#allocation3 + $0x4] ss:$12 sps:$4 sm:$0xff]   ;;  %v1528_v41 = vsel %vm11548_vm8, %v1520_v11, %v1527_v48  ;;  %v1904_v40 = vsel %vm11554_vm9, %v1529_v25, %v1903_v38  ;;  %v4819_v14 = vsel %vm11625_vm15, %v4814_v16, %v4818_v29  ;;  %v8907_v37 = vpop.f32.mrf.mxu1  ;;  %v3679_v11 = vpop.permute.xlu1 %3678 }
 0x34b   :  { %v15031_v8 = vld [vmem:[#allocation2 + $0x124] sm:$0xf]  ;;  %7949 = vst.msk [vmem:[#allocation3 + $0x230] sm:$0xf] %vm766_vm2, %v7779_v44  ;;  %7950 = vst.msk [vmem:[#allocation3 + $0x23c] sm:$0xf] %vm766_vm2, %v7782_v54  ;;  %v7786_v27 = vsel %vm11586_vm12, %v10326_v50, %v7785_v15  ;;  %v4829_v17 = vsel %vm11625_vm15, %v4824_v59, %v4828_v3  ;;  %8855 = vmatprep.mubr.bf16.mxu0 %v11071_v4  ;;  %v3677_v18 = vpop.permute.xlu0 %3676 }
 0x34c   :  { %v15045_v43 = vld [vmem:[#allocation2 + $0x134] sm:$0x1]  ;;  %v11074_v16 = vld [vmem:[%s16920_s3 + $0x80] sm:$0xff]   ;;  %v3540_v29 = vrot.slane %v15000_v58, 5  ;;  %v15066_v50 = vrot.slane %v6904_v28, 4  ;;  %v17183_v28 = vrot.slane %v14854_v36, 5  ;;  %8856 = vmatmul.mubr.bf16.vlgmr.msra.gmra.mxu0 %v11069_v57 }
 0x34d   :  { %1902 = vst.msk [vmem:[#allocation2 + $0x160] sm:$0xf] %vm766_vm2, %v1528_v41  ;;  %1905 = vst [vmem:[#allocation2 + $0x164] sm:$0x1] %v1904_v40  ;;  %v11073_v5 = vld [vmem:[#allocation3 + $0x8] ss:$12 sps:$4 sm:$0xff]  }
 0x34e   :  { %5220 = vst.msk [vmem:[#allocation3 + $0x1cc] sm:$0xf] %vm766_vm2, %v4819_v14  ;;  %7951 = vst.msk [vmem:[#allocation3 + $0x248] sm:$0xf] %vm766_vm2, %v7786_v27  ;;  %v5591_v51 = vsel %vm11586_vm12, %v14890_v61, %v17183_v28  ;;  %v17184_v24 = vshll.u32 %v14898_v60, 16  ;;  %v6923_v58 = vshll.u32 %v15013_v39, 16  ;;  %v15103_v39 = vpop.f32.mrf.mxu1  ;;  %10876 = vmatprep.mubr.msk.bf16.mxu0 %vm8726_vm1, %v11073_v5  ;;  %v6114_v28 = vpop.permute.xlu1 %6113 }
 0x34f   :  { %5221 = vst.msk [vmem:[#allocation3 + $0x1d8] sm:$0xf] %vm766_vm2, %v4829_v17  ;;  %v17185_v46 = vshll.u32 %v14937_v23, 16  ;;  %v15094_v36 = vrot.slane %v6917_v9, 4  ;;  %v17186_v61 = vrot.slane %v13780_v62, 5  ;;  %v17187_v60 = vrot.slane %v17152_v20, 5  ;;  %5748 = vrot.lane.b32.xlu1 %v5591_v51, %s11181_s26  ;;  %v6112_v5 = vpop.permute.xlu0 %6111 }
 0x350   :  { %v15086_v10 = vrot.slane %v17184_v24, 5  ;;  %2045 = vst.msk [vmem:[#allocation3 + $0x1e0] sm:$0xf] %vm766_vm2, %v1981_v6  ;;  %v1982_v3 = vld [vmem:[#allocation2 + $0x10c] sm:$0xf]  ;;  %v17188_v62 = vrot.slane %v14892_v33, 5  ;;  %v8910_v14 = vpop.f32.mrf.mxu1 }
 0x351   :  { %v15092_v53 = vrot.slane %v17185_v46, 5  ;;  %v7738_v38 = vrot.slane %v17186_v61, 4  ;;  %v7745_v1 = vrot.slane %v17187_v60, 4  ;;  %3837 = vst.msk [vmem:[#allocation3 + $0x180] sm:$0xf] %vm3804_vm3, %v3677_v18  ;;  %v11175_v23 = vld [vmem:[%s16920_s3 + $0x88] sm:$0xff]  }
 0x352   :  { %3838 = vst.msk [vmem:[#allocation3 + $0x18c] sm:$0xf] %vm3804_vm3, %v3679_v11  ;;  %10873 = vmatpush3.bf16.msra.mxu0 %v11175_v23  ;;  %v3539_v20 = vrot.slane %v17188_v62, 4  ;;  %v17189_v9 = vshrl.u32 %v14982_v22, 16  ;;  %v15115_v25 = vrot.slane %v2700_v47, 5  ;;  %v2706_v12 = vshll.u32 %v15031_v8, 16 }
 0x353   :  { %2046 = vst.msk [vmem:[#allocation3 + $0x1ec] sm:$0xf] %vm766_vm2, %v1982_v3  ;;  %v7753_v57 = vrot.slane %v15023_v49, 5  ;;  %v7774_v59 = vrot.slane %v15025_v55, 5  ;;  %v17190_v44 = vld [vmem:[#allocation44_spill] sm:$0xff]  ;;  %v17192_v4 = vld [vmem:[#allocation43_spill] sm:$0xff]  ;;  %10874 = vmatprep.subr.bf16.mxu0 %v11074_v16  ;;  %v17194_v49 = vmov %v17188_v62  ;;  %v6920_v33 = vor.u32 %v15094_v36, %v15092_v53 }
 0x354   :  { %v15113_v48 = vrot.slane %v17189_v9, 4  ;;  %v17191_v54 = vrot.slane %v17190_v44, 5  ;;  %v17193_v47 = vrot.slane %v17192_v4, 5  ;;  %v7767_v40 = vrot.slane %v15045_v43, 5  ;;  %v15137_v37 = vld [vmem:[#allocation2 + $0x128] sm:$0x1] }
 0x355   :  { %v3538_v27 = vsel %vm11586_vm12, %v10259_v19, %v17194_v49  ;;  %v2710_v17 = vshrl.u32 %v15031_v8, 16  ;;  %v7498_v63 = vld [vmem:[#allocation2 + $0x15c] sm:$0xe]  ;;  %v6910_v43 = vor.u32 %v15086_v10, %v15066_v50  ;;  %v15145_v51 = vrot.slane %v6923_v58, 5  ;;  %6271 = vst.msk [vmem:[#allocation3 + $0x184] sm:$0xf] %vm3804_vm3, %v6112_v5 }
 0x356   :  { %v7740_v22 = vsel %vm11586_vm12, %v7738_v38, %v17191_v54  ;;  %v7747_v41 = vsel %vm11586_vm12, %v7745_v1, %v17193_v47  ;;  %v17195_v19 = vrot.slane %v14230_v35, 5  ;;  %6272 = vst.msk [vmem:[#allocation3 + $0x190] sm:$0xf] %vm3804_vm3, %v6114_v28  ;;  %10875 = vmatpush3.bf16.msra.mxu0 %v11074_v16  ;;  %v3541_v24 = vsel %vm11586_vm12, %v3539_v20, %v3540_v29  ;;  %v7499_v10 = vld [vmem:[#allocation2 + $0x160] sm:$0xf] }
 0x357   :  { %7938 = vst.msk [vmem:[#allocation3 + $0x1ac] sm:$0xf] %vm766_vm2, %v7740_v22  ;;  %7940 = vst.msk [vmem:[#allocation3 + $0x1c4] sm:$0xf] %vm766_vm2, %v7747_v41  ;;  %v2703_v6 = vor.u32 %v15115_v25, %v15113_v48  ;;  %v15155_v50 = vrot.slane %v2706_v12, 5  ;;  %v17196_v58 = vrot.slane %v14186_v42, 5  ;;  %3696 = vrot.lane.b32.xlu0 %v3538_v27, %s11180_s25  ;;  %3698 = vrot.lane.b32.xlu1 %v3541_v24, %s11180_s25  ;;  %v4062_v48 = vpop.permute.xlu0 %4061  ;;  %v4064_v25 = vpop.permute.xlu1 %4063 }
 0x358   :  { %v7752_v8 = vrot.slane %v17195_v19, 4  ;;  %v7500_v18 = vld [vmem:[#allocation2 + $0x164] sm:$0x1]  ;;  %v11075_v35 = vld [vmem:[#allocation3 + $0x20] ss:$12 sps:$4 sm:$0xff]   ;;  %v2716_v16 = vshll.u32 %v15137_v37, 16 }
 0x359   :  { %v7759_v11 = vrot.slane %v17196_v58, 4  ;;  %v10327_v46 = vrot.slane %v7498_v63, 9  ;;  %v7792_v36 = vrot.slane %v7499_v10, 5  ;;  %v7795_v29 = vrot.slane %v7500_v18, 5  ;;  %v5961_v61 = vld [vmem:[#allocation2 + $0x12c] sm:$0xf]  ;;  %10877 = vmatmul.mubr.msk.bf16.vlgmr.msra.gmra.mxu0 %vm8726_vm1, %v11075_v35 }
 0x35a   :  { %v11076_v38 = vld [vmem:[#allocation3 + $0x38] ss:$12 sps:$4 sm:$0xff]   ;;  %v5962_v60 = vld [vmem:[#allocation2 + $0x130] sm:$0xf]  ;;  %v15162_v1 = vrot.slane %v2710_v17, 4  ;;  %v7754_v42 = vsel %vm11586_vm12, %v7752_v8, %v7753_v57  ;;  %v17197_v23 = vrot.slane %v14197_v56, 5 }
 0x35b   :  { %v15164_v3 = vld [vmem:[#allocation2 + $0x12c] sm:$0xe]  ;;  %v17198_v20 = vrot.slane %v14753_v21, 5  ;;  %v15175_v12 = vrot.slane %v6910_v43, 4  ;;  %v15177_v44 = vrot.slane %v6920_v33, 4  ;;  %v7794_v57 = vrot.slane %v7792_v36, 4  ;;  %10880 = vmatprep.mubr.msk.bf16.mxu0 %vm8726_vm1, %v11076_v38  ;;  %6131 = vrot.lane.b32.xlu0 %v5961_v61, %s11180_s25  ;;  %v7232_v19 = vpop.permute.xlu0 %7231  ;;  %v7234_v8 = vpop.permute.xlu1 %7233 }
 0x35c   :  { %v7761_v62 = vsel %vm11586_vm12, %v7759_v11, %v17197_v23  ;;  %v15179_v54 = vld [vmem:[#allocation2 + $0x130] sm:$0xf]  ;;  %v7501_v22 = vld [vmem:[#allocation2 + $0x168] sm:$0xe]  ;;  %7942 = vst.msk [vmem:[#allocation3 + $0x1dc] sm:$0xf] %vm766_vm2, %v7754_v42  ;;  %6133 = vrot.lane.b32.xlu1 %v5962_v60, %s11180_s25  ;;  %v2713_v28 = vor.u32 %v15162_v1, %v15155_v50 }
 0x35d   :  { %v7766_v9 = vrot.slane %v17198_v20, 4  ;;  %7944 = vst.msk [vmem:[#allocation3 + $0x1f4] sm:$0xf] %vm766_vm2, %v7761_v62  ;;  %v17199_v56 = vrot.slane %v14744_v32, 5  ;;  %v15188_v4 = vld [vmem:[#allocation2 + $0x138] sm:$0xf]  ;;  %v7796_v17 = vsel %vm11586_vm12, %v7794_v57, %v7795_v29 }
 0x35e   :  { %4222 = vst.msk [vmem:[#allocation3 + $0x180] sm:$0xf] %vm4189_vm4, %v4062_v48  ;;  %4223 = vst.msk [vmem:[#allocation3 + $0x18c] sm:$0xf] %vm4189_vm4, %v4064_v25  ;;  %v4314_v41 = vld [vmem:[#allocation2 + $0x114] sm:$0xf] }
 0x35f   :  { %v7773_v21 = vrot.slane %v17199_v56, 4  ;;  %v7768_v47 = vsel %vm11586_vm12, %v7766_v9, %v7767_v40  ;;  %v4315_v14 = vld [vmem:[#allocation2 + $0x118] sm:$0xf]  ;;  %v15194_v49 = vld [vmem:[#allocation2 + $0x13c] sm:$0xf]  ;;  %v7793_v40 = vsel %vm11586_vm12, %v10327_v46, %v7792_v36  ;;  %v15207_v5 = vrot.slane %v2703_v6, 4  ;;  %v3005_v9 = vpop.permute.xlu0 %3004  ;;  %v3007_v48 = vpop.permute.xlu1 %3006 }
 0x360   :  { %v15196_v32 = vld [vmem:[#allocation2 + $0x16c] sm:$0xf]  ;;  %7946 = vst.msk [vmem:[#allocation3 + $0x20c] sm:$0xf] %vm766_vm2, %v7768_v47  ;;  %v3911_v37 = vld [vmem:[#allocation2 + $0x120] sm:$0xf]  ;;  %v6926_v56 = vsel %vm11625_vm15, %v15177_v44, %v15145_v51 }
 0x361   :  { %v7775_v27 = vsel %vm11586_vm12, %v7773_v21, %v7774_v59  ;;  %v3912_v63 = vld [vmem:[#allocation2 + $0x124] sm:$0xf]  ;;  %v15211_v43 = vrot.slane %v2716_v16, 5  ;;  %v10328_v33 = vrot.slane %v7501_v22, 9  ;;  %v4316_v55 = vld [vmem:[#allocation2 + $0x11c] sm:$0x1]  ;;  %v15216_v59 = vpop.f32.mrf.mxu0  ;;  %4081 = vrot.lane.b32.xlu0 %v3911_v37, %s11179_s24  ;;  %v2709_v21 = vsel %vm11625_vm15, %v15207_v5, %v15155_v50 }
 0x362   :  { %7948 = vst.msk [vmem:[#allocation3 + $0x224] sm:$0xf] %vm766_vm2, %v7775_v27  ;;  %7953 = vst.msk [vmem:[#allocation3 + $0x260] sm:$0xf] %vm766_vm2, %v7793_v40  ;;  %v11077_v24 = vld [vmem:[#allocation3 + $0x50] ss:$12 sps:$4 sm:$0xff]   ;;  %4083 = vrot.lane.b32.xlu1 %v3912_v63, %s11179_s24 }
 0x363   :  { %7954 = vst.msk [vmem:[#allocation3 + $0x26c] sm:$0xf] %vm766_vm2, %v7796_v17  ;;  %v10292_v6 = vrot.slane %v15164_v3, 9  ;;  %v15219_v10 = vld [vmem:[#allocation2 + $0x134] sm:$0x1]  ;;  %v4831_v18 = vshrl.u32 %v4314_v41, 16  ;;  %v6916_v3 = vsel %vm11625_vm15, %v15175_v12, %v15092_v53  ;;  %v15238_v20 = vpop.f32.mrf.mxu0  ;;  %10881 = vmatmul.mubr.msk.bf16.gmra.mxu0 %vm8726_vm1, %v11077_v24 }
 0x364   :  { %v4834_v58 = vshll.u32 %v4314_v41, 16  ;;  %v4840_v11 = vshll.u32 %v4315_v14, 16  ;;  %7391 = vst.msk [vmem:[#allocation3 + $0x184] sm:$0xf] %vm4189_vm4, %v7232_v19  ;;  %7392 = vst.msk [vmem:[#allocation3 + $0x190] sm:$0xf] %vm4189_vm4, %v7234_v8 }
 0x365   :  { %v11078_v35 = vld [vmem:[#allocation3 + $0x68] ss:$12 sps:$4 sm:$0xff]   ;;  %v5594_v16 = vrot.slane %v15179_v54, 5  ;;  %v6928_v46 = vshrl.u32 %v15188_v4, 16  ;;  %v7799_v36 = vrot.slane %v15196_v32, 5  ;;  %v4844_v29 = vshrl.u32 %v4315_v14, 16  ;;  %7251 = vrot.lane.b32.xlu0 %v6916_v3, %s11179_s24  ;;  %v10867_v5 = vpop.f32.mrf.mxu0 }
 0x366   :  { %v4833_v61 = vrot.slane %v4831_v18, 4  ;;  %v4836_v38 = vrot.slane %v4834_v58, 5  ;;  %v4842_v60 = vrot.slane %v4840_v11, 5  ;;  %v4850_v1 = vshll.u32 %v4316_v55, 16  ;;  %v15241_v54 = vld [vmem:[#allocation2 + $0x158] sm:$0x1]  ;;  %10884 = vmatprep.mubr.msk.bf16.mxu0 %vm8726_vm1, %v11078_v35  ;;  %7253 = vrot.lane.b32.xlu1 %v6926_v56, %s11179_s24 }
 0x367   :  { %v6931_v42 = vshll.u32 %v15188_v4, 16  ;;  %v6937_v23 = vshll.u32 %v15194_v49, 16  ;;  %v7800_v62 = vsel %vm11586_vm12, %v10328_v33, %v7799_v36  ;;  %v2714_v25 = vrot.slane %v2713_v28, 4  ;;  %v15243_v22 = vld [vmem:[#allocation2 + $0x120] sm:$0xe]  ;;  %v5731_v28 = vpop.permute.xlu0 %5730  ;;  %v5733_v33 = vpop.permute.xlu1 %5732 }
 0x368   :  { %v6941_v53 = vshrl.u32 %v15194_v49, 16  ;;  %v4837_v12 = vor.u32 %v4836_v38, %v4833_v61  ;;  %v4846_v57 = vrot.slane %v4844_v29, 4  ;;  %7955 = vst.msk [vmem:[#allocation3 + $0x278] sm:$0xf] %vm766_vm2, %v7800_v62  ;;  %v5596_v4 = vrot.slane %v5594_v16, 4  ;;  %v674_v52 = vpop.f32.mrf.mxu0 }
 0x369   :  { %3163 = vst.msk [vmem:[#allocation3 + $0x198] sm:$0xf] %vm3128_vm0, %v3005_v9  ;;  %3164 = vst.msk [vmem:[#allocation3 + $0x1a4] sm:$0xf] %vm3128_vm0, %v3007_v48  ;;  %v5597_v47 = vrot.slane %v15219_v10, 5  ;;  %v5595_v14 = vsel %vm11586_vm12, %v10292_v6, %v5594_v16  ;;  %v4852_v44 = vrot.slane %v4850_v1, 5  ;;  %v2719_v55 = vsel %vm11625_vm15, %v2714_v25, %v15211_v43  ;;  %3024 = vrot.lane.b32.xlu0 %v2709_v21, %s11181_s26 }
 0x36a   :  { %v3260_v41 = vld [vmem:[#allocation2 + $0x124] sm:$0xf]  ;;  %v15263_v49 = vld [vmem:[#allocation2 + $0x12c] sm:$0xf]  ;;  %v4838_v27 = vrot.slane %v4837_v12, 4  ;;  %v4847_v51 = vor.u32 %v4846_v57, %v4842_v60  ;;  %v7788_v40 = vrot.slane %v15241_v54, 5  ;;  %3026 = vrot.lane.b32.xlu1 %v2719_v55, %s11181_s26 }
 0x36b   :  { %v15266_v17 = vrot.slane %v6928_v46, 4  ;;  %v15268_v50 = vrot.slane %v6931_v42, 5  ;;  %v15270_v37 = vrot.slane %v6937_v23, 5  ;;  %v2139_v63 = vld [vmem:[#allocation2 + $0x130] sm:$0xf]  ;;  %v8033_v8 = vld [vmem:[#allocation3 + $0x18c] sm:$0xff]  ;;  %v5598_v11 = vsel %vm11586_vm12, %v5596_v4, %v5597_v47  ;;  %v3683_v54 = vpop.permute.xlu1 %3682 }
 0x36c   :  { %v8031_v19 = vld [vmem:[#allocation3 + $0x180] sm:$0xff]  ;;  %v6943_v6 = vrot.slane %v6941_v53, 4  ;;  %v4843_v10 = vsel %vm11625_vm15, %v4838_v27, %v4842_v60  ;;  %v4848_v18 = vrot.slane %v4847_v51, 4  ;;  %5888 = vst.msk [vmem:[#allocation3 + $0x19c] sm:$0xf] %vm3128_vm0, %v5731_v28  ;;  %v10260_v35 = vrot.slane %v15243_v22, 9 }
 0x36d   :  { %v11079_v24 = vld [vmem:[#allocation3 + $0x184] ss:$12 sps:$4 sm:$0xff]   ;;  %5889 = vst.msk [vmem:[#allocation3 + $0x1a8] sm:$0xf] %vm3128_vm0, %v5733_v33  ;;  %v10383_v58 = vcombine.low %v8031_v19, %v8033_v8  ;;  %v3544_v16 = vrot.slane %v3260_v41, 5  ;;  %v2721_v61 = vshrl.u32 %v15263_v49, 16  ;;  %v6934_v42 = vor.u32 %v15268_v50, %v15266_v17  ;;  %5750 = vrot.lane.b32.xlu0 %v5595_v14, %s11181_s26 }
 0x36e   :  { %v3261_v43 = vld [vmem:[#allocation2 + $0x128] sm:$0x1]  ;;  %v6371_v46 = vld [vmem:[#allocation2 + $0x140] sm:$0x1]  ;;  %5222 = vst.msk [vmem:[#allocation3 + $0x1e4] sm:$0xf] %vm766_vm2, %v4843_v10  ;;  %v4853_v60 = vsel %vm11625_vm15, %v4848_v18, %v4852_v44  ;;  %8983 = vmatprep.mubr.bf16.mxu1 %v11079_v24  ;;  %v6944_v22 = vor.u32 %v6943_v6, %v15270_v37  ;;  %5752 = vrot.lane.b32.xlu1 %v5598_v11, %s11181_s26 }
 0x36f   :  { %v11081_v29 = vld [vmem:[#allocation3 + $0x80] ss:$12 sps:$4 sm:$0xff]   ;;  %v2724_v38 = vshll.u32 %v15263_v49, 16  ;;  %v7787_v1 = vrot.slane %v7785_v15, 4  ;;  %v11082_v3 = vld [vmem:[#allocation3 + $0x98] ss:$12 sps:$4 sm:$0xff]   ;;  %v3681_v15 = vpop.permute.xlu0 %3680  ;;  %8984 = vmatmul.mubr.bf16.gmra.mxu1 %v10383_v58  ;;  %v6118_v50 = vpop.permute.xlu1 %6117 }
 0x370   :  { %v2730_v23 = vshll.u32 %v2139_v63, 16  ;;  %v2734_v62 = vshrl.u32 %v2139_v63, 16  ;;  %v7503_v9 = vld [vmem:[#allocation2 + $0x170] sm:$0x1]  ;;  %5223 = vst.msk [vmem:[#allocation3 + $0x1f0] sm:$0xf] %vm766_vm2, %v4853_v60  ;;  %10885 = vmatmul.mubr.msk.bf16.gmra.mxu0 %vm8726_vm1, %v11081_v29 }
 0x371   :  { %v15297_v48 = vld [vmem:[%s16919_s2] ss:$0 sm:$0xff]  ;;  %v7789_v53 = vsel %vm11586_vm12, %v7787_v1, %v7788_v40  ;;  %3839 = vst.msk [vmem:[#allocation3 + $0x198] sm:$0xf] %vm3804_vm3, %v3681_v15  ;;  %3840 = vst.msk [vmem:[#allocation3 + $0x1a4] sm:$0xf] %vm3804_vm3, %v3683_v54  ;;  %10888 = vmatprep.mubr.msk.bf16.mxu0 %vm8726_vm1, %v11082_v3 }
 0x372   :  { %v680_v25 = vadd.f32 %v15297_v48, %v15216_v59  ;;  %v672_v12 = vadd.f32 %v15297_v48, %v15238_v20  ;;  %v3545_v59 = vsel %vm11586_vm12, %v10260_v35, %v3544_v16  ;;  %v3546_v57 = vrot.slane %v3544_v16, 4  ;;  %7952 = vst.msk [vmem:[#allocation3 + $0x254] sm:$0xf] %vm766_vm2, %v7789_v53  ;;  %v2140_v47 = vld [vmem:[#allocation2 + $0x134] sm:$0x1]  ;;  %s11182_s2 = smov 1  }
 0x373   :  { %v3547_v56 = vrot.slane %v3261_v43, 5  ;;  %v6947_v21 = vshll.u32 %v6371_v46, 16  ;;  %v2723_v4 = vrot.slane %v2721_v61, 4  ;;  %v2726_v20 = vrot.slane %v2724_v38, 5  ;;  %v6116_v17 = vpop.permute.xlu0 %6115  ;;  %v15325_v28 = vld [vmem:[#allocation2 + $0x138] sm:$0xe]  ;;  %3700 = vrot.lane.b32.xlu0 %v3545_v59, %s11180_s25  ;;  %v4068_v3 = vpop.permute.xlu1 %4067 }
 0x374   :  { %v7802_v41 = vrot.slane %v7503_v9, 5  ;;  %v683_v49 = vadd.f32 %v15297_v48, %v10867_v5  ;;  %v15316_v27 = vrot.slane %v2730_v23, 5  ;;  %v2736_v51 = vrot.slane %v2734_v62, 4  ;;  %v15327_v33 = vld [vmem:[#allocation2 + $0x13c] sm:$0xf] }
 0x375   :  { %v760_v44 = vmax.f32 %v680_v25, 0.0  ;;  %v15319_v40 = vadd.f32 %v15297_v48, %v674_v52  ;;  %v15321_v63 = vrot.slane %v6934_v42, 4  ;;  %v15323_v14 = vrot.slane %v6944_v22, 4  ;;  %6273 = vst.msk [vmem:[#allocation3 + $0x19c] sm:$0xf] %vm3804_vm3, %v6116_v17 }
 0x376   :  { %v7801_v5 = vrot.slane %v7799_v36, 4  ;;  %v758_v55 = vmax.f32 %v672_v12, 0.0  ;;  %6274 = vst.msk [vmem:[#allocation3 + $0x1a8] sm:$0xf] %vm3804_vm3, %v6118_v50  ;;  %v3548_v19 = vsel %vm11586_vm12, %v3546_v57, %v3547_v56  ;;  %v15335_v8 = vrot.slane %v6947_v21, 5 }
 0x377   :  { %v2740_v24 = vshll.u32 %v2140_v47, 16  ;;  %v10623_v6 = vpack.c.bf16 %v760_v44, %v760_v44  ;;  %v1983_v10 = vld [vmem:[#allocation2 + $0x114] sm:$0xf]  ;;  %3702 = vrot.lane.b32.xlu1 %v3548_v19, %s11180_s25  ;;  %v11083_v18 = vld [vmem:[#allocation3 + $0xb0] ss:$12 sps:$4 sm:$0xff]   ;;  %v2727_v32 = vor.u32 %v2726_v20, %v2723_v4  ;;  %v761_v35 = vmax.f32 %v683_v49, 0.0  ;;  %v4066_v1 = vpop.permute.xlu0 %4065  ;;  %v7238_v50 = vpop.permute.xlu1 %7237 }
 0x378   :  { %v7803_v36 = vsel %vm11586_vm12, %v7801_v5, %v7802_v41  ;;  %v10621_v58 = vpack.c.bf16 %v758_v55, %v758_v55  ;;  %2047 = vst.msk [vmem:[#allocation3 + $0x1f8] sm:$0xf] %vm766_vm2, %v1983_v10  ;;  %v1984_v11 = vld [vmem:[#allocation2 + $0x118] sm:$0xf]  ;;  %v5964_v46 = vld [vmem:[#allocation2 + $0x13c] sm:$0xf]  ;;  %v2737_v29 = vor.u32 %v2736_v51, %v15316_v27  ;;  %10889 = vmatmul.mubr.msk.bf16.gmra.mxu0 %vm8726_vm1, %v11083_v18  ;;  %v15386_v10 = vpop.f32.mrf.mxu1 }
 0x379   :  { %v5963_v16 = vld [vmem:[#allocation2 + $0x138] sm:$0xf]  ;;  %v1565_v61 = vshrl.u32 %v10623_v6, 16  ;;  %v1568_v38 = vshll.u32 %v10623_v6, 16  ;;  %7956 = vst.msk [vmem:[#allocation3 + $0x284] sm:$0xf] %vm766_vm2, %v7803_v36  ;;  %v6940_v42 = vsel %vm11625_vm15, %v15321_v63, %v15270_v37  ;;  %v10624_v25 = vpack.c.bf16 %v761_v35, %v761_v35 }
 0x37a   :  { %v11084_v43 = vld [vmem:[#allocation3 + $0xc8] ss:$12 sps:$4 sm:$0xff]   ;;  %2048 = vst.msk [vmem:[#allocation3 + $0x204] sm:$0xf] %vm766_vm2, %v1984_v11  ;;  %v759_v60 = vmax.f32 %v15319_v40, 0.0  ;;  %v1548_v62 = vshrl.u32 %v10621_v58, 16  ;;  %6135 = vrot.lane.b32.xlu0 %v5963_v16, %s11180_s25 }
 0x37b   :  { %v15351_v23 = vld [vmem:[#allocation2 + $0x140] sm:$0x1]  ;;  %v1551_v9 = vshll.u32 %v10621_v58, 16  ;;  %4224 = vst.msk [vmem:[#allocation3 + $0x198] sm:$0xf] %vm4189_vm4, %v4066_v1  ;;  %10892 = vmatprep.mubr.msk.bf16.mxu0 %vm8726_vm1, %v11084_v43  ;;  %v15356_v52 = vrot.slane %v2740_v24, 5  ;;  %6137 = vrot.lane.b32.xlu1 %v5964_v46, %s11180_s25  ;;  %v7236_v17 = vpop.permute.xlu0 %7235 }
 0x37c   :  { %4225 = vst.msk [vmem:[#allocation3 + $0x1a4] sm:$0xf] %vm4189_vm4, %v4068_v3  ;;  %v10293_v15 = vrot.slane %v15325_v28, 9  ;;  %v5601_v54 = vrot.slane %v15327_v33, 5  ;;  %v15360_v22 = vld [vmem:[#allocation2 + $0x12c] sm:$0xe]  ;;  %v15373_v40 = vpack.c.bf16 %v759_v60, %v759_v60  ;;  %v6950_v33 = vsel %vm11625_vm15, %v15323_v14, %v15335_v8 }
 0x37d   :  { %v1567_v53 = vrot.slane %v1565_v61, 7  ;;  %v15364_v12 = vrot.slane %v2727_v32, 4  ;;  %v1920_v59 = vld [vmem:[#allocation2 + $0x180] sm:$0xf]  ;;  %v15366_v57 = vrot.slane %v1548_v62, 7  ;;  %v1573_v56 = vshrl.u32 %v10624_v25, 16  ;;  %v8915_v61 = vpop.f32.mrf.mxu1 }
 0x37e   :  { %v1576_v21 = vshll.u32 %v10624_v25, 16  ;;  %v3913_v4 = vld [vmem:[#allocation2 + $0x12c] sm:$0xf]  ;;  %v3914_v20 = vld [vmem:[#allocation2 + $0x130] sm:$0xf]  ;;  %v15368_v47 = vrot.slane %v2737_v29, 4  ;;  %v15390_v32 = vsel %vm11586_vm12, %v10293_v15, %v5601_v54  ;;  %v3011_v25 = vpop.permute.xlu1 %3010 }
 0x37f   :  { %v5604_v41 = vrot.slane %v15351_v23, 5  ;;  %v15371_v49 = vld [vmem:[#allocation2 + $0x130] sm:$0xf]  ;;  %v1570_v51 = vor.u32 %v1568_v38, %v1567_v53  ;;  %v1913_v44 = vld [vmem:[#allocation2 + $0x174] sm:$0xf]  ;;  %v1571_v19 = vrot.slane %v1567_v53, 4  ;;  %v1553_v24 = vor.u32 %v1551_v9, %v15366_v57  ;;  %4085 = vrot.lane.b32.xlu0 %v3913_v4, %s11179_s24  ;;  %4087 = vrot.lane.b32.xlu1 %v3914_v20, %s11179_s24  ;;  %v3009_v9 = vpop.permute.xlu0 %3008 }
 0x380   :  { %v11085_v28 = vld [vmem:[#allocation3 + $0xe0] ss:$12 sps:$4 sm:$0xff]   ;;  %v15379_v5 = vld [vmem:[#allocation2 + $0x144] sm:$0xf]  ;;  %v15381_v55 = vld [vmem:[#allocation2 + $0x148] sm:$0xf]  ;;  %v2733_v63 = vsel %vm11625_vm15, %v15364_v12, %v15316_v27 }
 0x381   :  { %v1575_v6 = vrot.slane %v1573_v56, 7  ;;  %7393 = vst.msk [vmem:[#allocation3 + $0x19c] sm:$0xf] %vm4189_vm4, %v7236_v17  ;;  %7394 = vst.msk [vmem:[#allocation3 + $0x1a8] sm:$0xf] %vm4189_vm4, %v7238_v50  ;;  %v15392_v14 = vrot.slane %v5601_v54, 4  ;;  %v1921_v36 = vsel %vm11538_vm6, %v1570_v51, %v1920_v59  ;;  %v1914_v43 = vsel %vm11538_vm6, %v1553_v24, %v1913_v44  ;;  %10893 = vmatmul.mubr.msk.bf16.gmra.mxu0 %vm8726_vm1, %v11085_v28  ;;  %v15416_v56 = vpop.f32.mrf.mxu1 }
 0x382   :  { %v11086_v18 = vld [vmem:[#allocation3 + $0xf8] ss:$12 sps:$4 sm:$0xff]   ;;  %v10261_v8 = vrot.slane %v15360_v22, 9  ;;  %v4317_v11 = vld [vmem:[#allocation2 + $0x120] sm:$0xf]  ;;  %v3551_v35 = vrot.slane %v15371_v49, 5  ;;  %v5737_v37 = vpop.permute.xlu1 %5736 }
 0x383   :  { %v1924_v58 = vld [vmem:[#allocation2 + $0x188] sm:$0x1]  ;;  %v15400_v16 = vld [vmem:[#allocation2 + $0x138] sm:$0xf]  ;;  %1922 = vst [vmem:[#allocation2 + $0x180] sm:$0xf] %v1921_v36  ;;  %v1578_v46 = vor.u32 %v1576_v21, %v1575_v6  ;;  %10896 = vmatprep.mubr.msk.bf16.mxu0 %vm8726_vm1, %v11086_v18  ;;  %7255 = vrot.lane.b32.xlu0 %v6940_v42, %s11179_s24  ;;  %v2743_v42 = vsel %vm11625_vm15, %v15368_v47, %v15356_v52 }
 0x384   :  { %v1580_v29 = vrot.slane %v1575_v6, 4  ;;  %v6952_v38 = vshrl.u32 %v15379_v5, 16  ;;  %v6955_v60 = vshll.u32 %v15379_v5, 16  ;;  %v6961_v1 = vshll.u32 %v15381_v55, 16  ;;  %1915 = vst [vmem:[#allocation2 + $0x174] sm:$0xf] %v1914_v43  ;;  %7257 = vrot.lane.b32.xlu1 %v6950_v33, %s11179_s24  ;;  %v8918_v5 = vpop.f32.mrf.mxu1 }
 0x385   :  { %v1556_v3 = vshrl.u32 %v15373_v40, 16  ;;  %v4318_v62 = vld [vmem:[#allocation2 + $0x124] sm:$0xf]  ;;  %v1579_v15 = vsel %vm11548_vm8, %v1571_v19, %v1578_v46  ;;  %v1559_v53 = vshll.u32 %v15373_v40, 16  ;;  %v4855_v59 = vshrl.u32 %v4317_v11, 16 }
 0x386   :  { %v1925_v54 = vsel %vm11554_vm9, %v1580_v29, %v1924_v58  ;;  %3165 = vst.msk [vmem:[#allocation3 + $0x1b0] sm:$0xf] %vm3128_vm0, %v3009_v9  ;;  %3166 = vst.msk [vmem:[#allocation3 + $0x1bc] sm:$0xf] %vm3128_vm0, %v3011_v25  ;;  %v6965_v21 = vshrl.u32 %v15381_v55, 16  ;;  %v1554_v4 = vrot.slane %v15366_v57, 4  ;;  %v5735_v58 = vpop.permute.xlu0 %5734  ;;  %v15443_v29 = vpop.f32.mrf.mxu1 }
 0x387   :  { %1923 = vst.msk [vmem:[#allocation2 + $0x184] sm:$0xf] %vm766_vm2, %v1579_v15  ;;  %1926 = vst [vmem:[#allocation2 + $0x188] sm:$0x1] %v1925_v54  ;;  %v1558_v20 = vrot.slane %v1556_v3, 7  ;;  %v4858_v51 = vshll.u32 %v4317_v11, 16  ;;  %3028 = vrot.lane.b32.xlu0 %v2733_v63, %s11181_s26 }
 0x388   :  { %v15429_v44 = vld [vmem:[#allocation2 + $0x134] sm:$0x1]  ;;  %v2745_v40 = vshrl.u32 %v15400_v16, 16  ;;  %v1917_v17 = vld [vmem:[#allocation2 + $0x17c] sm:$0x1]  ;;  %v4857_v57 = vrot.slane %v4855_v59, 4  ;;  %3030 = vrot.lane.b32.xlu1 %v2743_v42, %s11181_s26 }
 0x389   :  { %v4864_v50 = vshll.u32 %v4318_v62, 16  ;;  %v4868_v28 = vshrl.u32 %v4318_v62, 16  ;;  %v2748_v19 = vshll.u32 %v15400_v16, 16  ;;  %v1561_v24 = vor.u32 %v1559_v53, %v1558_v20  ;;  %v4319_v36 = vld [vmem:[#allocation2 + $0x128] sm:$0x1]  ;;  %v8037_v11 = vld [vmem:[#allocation3 + $0x1a4] sm:$0xff]  ;;  %v8923_v53 = vpop.f32.mrf.mxu1 }
 0x38a   :  { %v1563_v6 = vrot.slane %v1558_v20, 4  ;;  %v4860_v18 = vrot.slane %v4858_v51, 5  ;;  %v8035_v33 = vld [vmem:[#allocation3 + $0x198] sm:$0xff]  ;;  %5890 = vst.msk [vmem:[#allocation3 + $0x1b4] sm:$0xf] %vm3128_vm0, %v5735_v58  ;;  %v6954_v47 = vrot.slane %v6952_v38, 4  ;;  %v3687_v38 = vpop.permute.xlu1 %3686 }
 0x38b   :  { %v11087_v43 = vld [vmem:[#allocation3 + $0x19c] ss:$12 sps:$4 sm:$0xff]   ;;  %v4866_v16 = vrot.slane %v4864_v50, 5  ;;  %v4870_v46 = vrot.slane %v4868_v28, 4  ;;  %5891 = vst.msk [vmem:[#allocation3 + $0x1c0] sm:$0xf] %vm3128_vm0, %v5737_v37  ;;  %v10386_v61 = vcombine.low %v8035_v33, %v8037_v11  ;;  %v1562_v27 = vsel %vm11548_vm8, %v1554_v4, %v1561_v24  ;;  %v15464_v55 = vpop.f32.mrf.mxu1  ;;  %5754 = vrot.lane.b32.xlu0 %v15390_v32, %s11181_s26 }
 0x38c   :  { %v11089_v3 = vld [vmem:[#allocation3 + $0x110] ss:$12 sps:$4 sm:$0xff]   ;;  %v15445_v62 = vld [vmem:[#allocation2 + $0x13c] sm:$0xf]  ;;  %v1918_v52 = vsel %vm11554_vm9, %v1563_v6, %v1917_v17  ;;  %v4861_v12 = vor.u32 %v4860_v18, %v4857_v57  ;;  %v6957_v9 = vrot.slane %v6955_v60, 5  ;;  %v4874_v54 = vshll.u32 %v4319_v36, 16  ;;  %8991 = vmatprep.mubr.bf16.mxu1 %v11087_v43  ;;  %v3685_v57 = vpop.permute.xlu0 %3684 }
 0x38d   :  { %v7507_v25 = vld [vmem:[#allocation2 + $0x180] sm:$0xe]  ;;  %1916 = vst.msk [vmem:[#allocation2 + $0x178] sm:$0xf] %vm766_vm2, %v1562_v27  ;;  %1919 = vst [vmem:[#allocation2 + $0x17c] sm:$0x1] %v1918_v52  ;;  %v4871_v15 = vor.u32 %v4870_v46, %v4866_v16  ;;  %8992 = vmatmul.mubr.bf16.gmra.mxu1 %v10386_v61  ;;  %10897 = vmatmul.mubr.msk.bf16.gmra.mxu0 %vm8726_vm1, %v11089_v3  ;;  %v8926_v58 = vpop.f32.mrf.mxu1 }
 0x38e   :  { %v11090_v59 = vld [vmem:[#allocation3 + $0x128] ss:$12 sps:$4 sm:$0xff]   ;;  %v3554_v4 = vrot.slane %v15429_v44, 5  ;;  %v15457_v20 = vrot.slane %v6961_v1, 5  ;;  %v6967_v51 = vrot.slane %v6965_v21, 4  ;;  %v4862_v17 = vrot.slane %v4861_v12, 4  ;;  %v6122_v63 = vpop.permute.xlu1 %6121 }
 0x38f   :  { %v2747_v60 = vrot.slane %v2745_v40, 4  ;;  %v2750_v50 = vrot.slane %v2748_v19, 5  ;;  %v15460_v28 = vld [vmem:[#allocation2 + $0x184] sm:$0xf]  ;;  %v4872_v5 = vrot.slane %v4871_v15, 4  ;;  %v4876_v24 = vrot.slane %v4874_v54, 5  ;;  %10900 = vmatprep.mubr.msk.bf16.mxu0 %vm8726_vm1, %v11090_v59  ;;  %v15707_v45 = vpop.f32.mrf.mxu1 }
 0x390   :  { %3841 = vst.msk [vmem:[#allocation3 + $0x1b0] sm:$0xf] %vm3804_vm3, %v3685_v57  ;;  %3842 = vst.msk [vmem:[#allocation3 + $0x1bc] sm:$0xf] %vm3804_vm3, %v3687_v38  ;;  %v5605_v1 = vsel %vm11586_vm12, %v15392_v14, %v5604_v41  ;;  %v3553_v21 = vrot.slane %v3551_v35, 4  ;;  %v10330_v40 = vrot.slane %v7507_v25, 9  ;;  %v4867_v19 = vsel %vm11625_vm15, %v4862_v17, %v4866_v16  ;;  %v6120_v32 = vpop.permute.xlu0 %6119 }
 0x391   :  { %v6374_v44 = vld [vmem:[#allocation2 + $0x14c] sm:$0x1]  ;;  %5756 = vrot.lane.b32.xlu1 %v5605_v1, %s11181_s26  ;;  %v6958_v6 = vor.u32 %v6957_v9, %v6954_v47  ;;  %v2754_v23 = vshll.u32 %v15445_v62, 16  ;;  %v2758_v18 = vshrl.u32 %v15445_v62, 16  ;;  %5224 = vst.msk [vmem:[#allocation3 + $0x1fc] sm:$0xf] %vm766_vm2, %v4867_v19  ;;  %v4877_v41 = vsel %vm11625_vm15, %v4872_v5, %v4876_v24 }
 0x392   :  { %v1985_v14 = vld [vmem:[#allocation2 + $0x120] sm:$0xf]  ;;  %v1986_v36 = vld [vmem:[#allocation2 + $0x124] sm:$0xf]  ;;  %v7813_v37 = vrot.slane %v15460_v28, 5  ;;  %v6968_v42 = vor.u32 %v6967_v51, %v15457_v20  ;;  %v6971_v33 = vshll.u32 %v6374_v44, 16  ;;  %v2751_v11 = vor.u32 %v2750_v50, %v2747_v60  ;;  %v4072_v9 = vpop.permute.xlu1 %4071 }
 0x393   :  { %5225 = vst.msk [vmem:[#allocation3 + $0x208] sm:$0xf] %vm766_vm2, %v4877_v41  ;;  %2049 = vst.msk [vmem:[#allocation3 + $0x210] sm:$0xf] %vm766_vm2, %v1985_v14  ;;  %v2143_v43 = vld [vmem:[#allocation2 + $0x140] sm:$0x1]  ;;  %v3552_v16 = vsel %vm11586_vm12, %v10261_v8, %v3551_v35  ;;  %v3555_v46 = vsel %vm11586_vm12, %v3553_v21, %v3554_v4 }
 0x394   :  { %2050 = vst.msk [vmem:[#allocation3 + $0x21c] sm:$0xf] %vm766_vm2, %v1986_v36  ;;  %v15499_v61 = vld [vmem:[#allocation2 + $0x148] sm:$0xf]  ;;  %v7814_v3 = vsel %vm11586_vm12, %v10330_v40, %v7813_v37  ;;  %3704 = vrot.lane.b32.xlu0 %v3552_v16, %s11180_s25  ;;  %v11091_v49 = vld [vmem:[#allocation3 + $0x140] ss:$12 sps:$4 sm:$0xff]   ;;  %v4070_v47 = vpop.permute.xlu0 %4069 }
 0x395   :  { %6275 = vst.msk [vmem:[#allocation3 + $0x1b4] sm:$0xf] %vm3804_vm3, %v6120_v32  ;;  %6276 = vst.msk [vmem:[#allocation3 + $0x1c0] sm:$0xf] %vm3804_vm3, %v6122_v63  ;;  %3706 = vrot.lane.b32.xlu1 %v3555_v46, %s11180_s25  ;;  %v15507_v62 = vrot.slane %v6958_v6, 4  ;;  %v15509_v22 = vrot.slane %v2754_v23, 5  ;;  %10901 = vmatmul.mubr.msk.bf16.gmra.mxu0 %vm8726_vm1, %v11091_v49  ;;  %v15541_v23 = vpop.f32.mrf.mxu0 }
 0x396   :  { %v2760_v8 = vrot.slane %v2758_v18, 4  ;;  %7959 = vst.msk [vmem:[#allocation3 + $0x2a8] sm:$0xf] %vm766_vm2, %v7814_v3  ;;  %v5965_v35 = vld [vmem:[#allocation2 + $0x144] sm:$0xf]  ;;  %v2764_v52 = vshll.u32 %v2143_v43, 16  ;;  %v7242_v41 = vpop.permute.xlu1 %7241 }
 0x397   :  { %v11092_v27 = vld [vmem:[#allocation3 + $0x158] ss:$12 sps:$4 sm:$0xff]   ;;  %v15512_v12 = vld [vmem:[#allocation2 + $0x144] sm:$0xe]  ;;  %v15515_v25 = vrot.slane %v6968_v42, 4  ;;  %v15517_v15 = vrot.slane %v6971_v33, 5  ;;  %v6964_v38 = vsel %vm11625_vm15, %v15507_v62, %v15457_v20 }
 0x398   :  { %v15519_v54 = vrot.slane %v2751_v11, 4  ;;  %v5608_v53 = vrot.slane %v15499_v61, 5  ;;  %v4320_v59 = vld [vmem:[#allocation2 + $0x12c] sm:$0xf]  ;;  %4226 = vst.msk [vmem:[#allocation3 + $0x1b0] sm:$0xf] %vm4189_vm4, %v4070_v47  ;;  %10904 = vmatprep.mubr.msk.bf16.mxu0 %vm8726_vm1, %v11092_v27  ;;  %6139 = vrot.lane.b32.xlu0 %v5965_v35, %s11180_s25  ;;  %v2761_v60 = vor.u32 %v2760_v8, %v15509_v22  ;;  %v7240_v18 = vpop.permute.xlu0 %7239 }
 0x399   :  { %4227 = vst.msk [vmem:[#allocation3 + $0x1bc] sm:$0xf] %vm4189_vm4, %v4072_v9  ;;  %v5966_v4 = vld [vmem:[#allocation2 + $0x148] sm:$0xf]  ;;  %v15525_v51 = vld [vmem:[#allocation2 + $0x14c] sm:$0x1]  ;;  %v6974_v20 = vsel %vm11625_vm15, %v15515_v25, %v15517_v15 }
 0x39a   :  { %v15527_v17 = vld [vmem:[#allocation2 + $0x178] sm:$0xf]  ;;  %6141 = vrot.lane.b32.xlu1 %v5966_v4, %s11180_s25  ;;  %v11093_v57 = vld [vmem:[#allocation3 + $0x170] ss:$12 sps:$4 sm:$0xff]   ;;  %v15536_v50 = vld [vmem:[#allocation2 + $0x13c] sm:$0xf]  ;;  %v2757_v14 = vsel %vm11625_vm15, %v15519_v54, %v15509_v22 }
 0x39b   :  { %v4321_v5 = vld [vmem:[#allocation2 + $0x130] sm:$0xf]  ;;  %v3915_v24 = vld [vmem:[#allocation2 + $0x138] sm:$0xf]  ;;  %v3916_v1 = vld [vmem:[#allocation2 + $0x13c] sm:$0xf] }
 0x39c   :  { %v15538_v21 = vrot.slane %v2764_v52, 5  ;;  %v10294_v44 = vrot.slane %v15512_v12, 9  ;;  %v4879_v40 = vshrl.u32 %v4320_v59, 16  ;;  %v4882_v19 = vshll.u32 %v4320_v59, 16  ;;  %v4322_v6 = vld [vmem:[#allocation2 + $0x134] sm:$0x1]  ;;  %4089 = vrot.lane.b32.xlu0 %v3915_v24, %s11179_s24  ;;  %v687_v59 = vpop.f32.mrf.mxu0  ;;  %v3013_v4 = vpop.permute.xlu0 %3012 }
 0x39d   :  { %v15553_v36 = vrot.slane %v5608_v53, 4  ;;  %v15555_v58 = vld [vmem:[#allocation2 + $0x138] sm:$0xe]  ;;  %v6375_v32 = vld [vmem:[#allocation2 + $0x150] sm:$0xf]  ;;  %v7806_v42 = vrot.slane %v15527_v17, 5  ;;  %v3015_v17 = vpop.permute.xlu1 %3014  ;;  %10905 = vmatmul.mubr.msk.bf16.gmra.mxu0 %vm8726_vm1, %v11093_v57 }
 0x39e   :  { %v7504_v63 = vld [vmem:[#allocation2 + $0x174] sm:$0xe]  ;;  %7395 = vst.msk [vmem:[#allocation3 + $0x1b4] sm:$0xf] %vm4189_vm4, %v7240_v18  ;;  %7396 = vst.msk [vmem:[#allocation3 + $0x1c0] sm:$0xf] %vm4189_vm4, %v7242_v41  ;;  %4091 = vrot.lane.b32.xlu1 %v3916_v1, %s11179_s24 }
 0x39f   :  { %v15560_v33 = vld [vmem:[#allocation2 + $0x140] sm:$0x1]  ;;  %v7506_v11 = vld [vmem:[#allocation2 + $0x17c] sm:$0x1]  ;;  %v4881_v43 = vrot.slane %v4879_v40, 4  ;;  %v4884_v16 = vrot.slane %v4882_v19, 5 }
 0x3a0   :  { %v4888_v46 = vshll.u32 %v4321_v5, 16  ;;  %v4892_v3 = vshrl.u32 %v4321_v5, 16  ;;  %v11094_v49 = vld [vmem:[#allocation3 + $0x188] ss:$12 sps:$4 sm:$0xff]   ;;  %v2762_v62 = vrot.slane %v2761_v60, 4  ;;  %v5611_v8 = vrot.slane %v15525_v51, 5  ;;  %7259 = vrot.lane.b32.xlu0 %v6964_v38, %s11179_s24 }
 0x3a1   :  { %v3558_v35 = vrot.slane %v15536_v50, 5  ;;  %v4898_v27 = vshll.u32 %v4322_v6, 16  ;;  %v15566_v52 = vld [vmem:[#allocation2 + $0x154] sm:$0xf]  ;;  %v6976_v47 = vshrl.u32 %v6375_v32, 16  ;;  %v4885_v9 = vor.u32 %v4884_v16, %v4881_v43  ;;  %10908 = vmatprep.mubr.msk.bf16.mxu0 %vm8726_vm1, %v11094_v49 }
 0x3a2   :  { %v4890_v25 = vrot.slane %v4888_v46, 5  ;;  %v4894_v15 = vrot.slane %v4892_v3, 4  ;;  %v6979_v5 = vshll.u32 %v6375_v32, 16  ;;  %v10329_v24 = vrot.slane %v7504_v63, 9  ;;  %3167 = vst.msk [vmem:[#allocation3 + $0x1c8] sm:$0xf] %vm3128_vm0, %v3013_v4  ;;  %7261 = vrot.lane.b32.xlu1 %v6974_v20, %s11179_s24  ;;  %v10871_v46 = vpop.f32.mrf.mxu0  ;;  %v5741_v3 = vpop.permute.xlu1 %5740 }
 0x3a3   :  { %v7808_v1 = vrot.slane %v7806_v42, 4  ;;  %v7809_v60 = vrot.slane %v7506_v11, 5  ;;  %3168 = vst.msk [vmem:[#allocation3 + $0x1d4] sm:$0xf] %vm3128_vm0, %v3015_v17  ;;  %v10262_v40 = vrot.slane %v15555_v58, 9  ;;  %v4886_v19 = vrot.slane %v4885_v9, 4 }
 0x3a4   :  { %v4895_v6 = vor.u32 %v4894_v15, %v4890_v25  ;;  %v4900_v18 = vrot.slane %v4898_v27, 5  ;;  %v2767_v57 = vsel %vm11625_vm15, %v2762_v62, %v15538_v21  ;;  %v3560_v41 = vrot.slane %v3558_v35, 4  ;;  %v6377_v11 = vld [vmem:[#allocation2 + $0x158] sm:$0x1]  ;;  %v15585_v16 = vld [vmem:[#allocation2 + $0x188] sm:$0x1]  ;;  %v5739_v21 = vpop.permute.xlu0 %5738  ;;  %3032 = vrot.lane.b32.xlu0 %v2757_v14, %s11181_s26 }
 0x3a5   :  { %v3561_v32 = vrot.slane %v15560_v33, 5  ;;  %v6985_v63 = vshll.u32 %v15566_v52, 16  ;;  %v15582_v58 = vrot.slane %v6976_v47, 4  ;;  %v6989_v43 = vshrl.u32 %v15566_v52, 16  ;;  %v8039_v49 = vld [vmem:[#allocation3 + $0x1b0] sm:$0xff]  ;;  %v8041_v62 = vld [vmem:[#allocation3 + $0x1bc] sm:$0xff] }
 0x3a6   :  { %v4891_v38 = vsel %vm11625_vm15, %v4886_v19, %v4890_v25  ;;  %v4896_v20 = vrot.slane %v4895_v6, 4  ;;  %v11095_v27 = vld [vmem:[#allocation3 + $0x1b4] ss:$12 sps:$4 sm:$0xff]   ;;  %v6981_v33 = vrot.slane %v6979_v5, 5  ;;  %v7807_v47 = vsel %vm11586_vm12, %v10329_v24, %v7806_v42  ;;  %5892 = vst.msk [vmem:[#allocation3 + $0x1cc] sm:$0xf] %vm3128_vm0, %v5739_v21  ;;  %3034 = vrot.lane.b32.xlu1 %v2767_v57, %s11181_s26 }
 0x3a7   :  { %5226 = vst.msk [vmem:[#allocation3 + $0x214] sm:$0xf] %vm766_vm2, %v4891_v38  ;;  %v7810_v52 = vsel %vm11586_vm12, %v7808_v1, %v7809_v60  ;;  %v696_v9 = vadd.f32 %v15297_v48, %v15541_v23  ;;  %v10389_v25 = vcombine.low %v8039_v49, %v8041_v62  ;;  %v15598_v15 = vld [vmem:[#allocation2 + $0x144] sm:$0xf]  ;;  %v15600_v4 = vld [vmem:[#allocation2 + $0x148] sm:$0xf]  ;;  %v688_v42 = vadd.f32 %v15297_v48, %v687_v59  ;;  %v3691_v60 = vpop.permute.xlu1 %3690 }
 0x3a8   :  { %5893 = vst.msk [vmem:[#allocation3 + $0x1d8] sm:$0xf] %vm3128_vm0, %v5741_v3  ;;  %v4901_v17 = vsel %vm11625_vm15, %v4896_v20, %v4900_v18  ;;  %v699_v23 = vadd.f32 %v15297_v48, %v10871_v46  ;;  %v11097_v5 = vld [vmem:[#allocation3 + $0x1a0] ss:$12 sps:$4 sm:$0xff]   ;;  %v11098_v24 = vld [vmem:[#allocation3 + $0x1b8] ss:$12 sps:$4 sm:$0xff]   ;;  %v5609_v59 = vsel %vm11586_vm12, %v10294_v44, %v5608_v53  ;;  %8999 = vmatprep.mubr.bf16.mxu1 %v11095_v27  ;;  %v3689_v14 = vpop.permute.xlu0 %3688  ;;  %v690_v18 = vpop.f32.mrf.mxu0 }
 0x3a9   :  { %7957 = vst.msk [vmem:[#allocation3 + $0x290] sm:$0xf] %vm766_vm2, %v7807_v47  ;;  %7958 = vst.msk [vmem:[#allocation3 + $0x29c] sm:$0xf] %vm766_vm2, %v7810_v52  ;;  %v6995_v1 = vshll.u32 %v6377_v11, 16  ;;  %v5612_v22 = vsel %vm11586_vm12, %v15553_v36, %v5611_v8  ;;  %v3559_v61 = vsel %vm11586_vm12, %v10262_v40, %v3558_v35  ;;  %v15631_v54 = vrot.slane %v6985_v63, 5  ;;  %9000 = vmatmul.mubr.bf16.gmra.mxu1 %v10389_v25 }
 0x3aa   :  { %5227 = vst.msk [vmem:[#allocation3 + $0x220] sm:$0xf] %vm766_vm2, %v4901_v17  ;;  %v7816_v12 = vrot.slane %v15585_v16, 5  ;;  %v1987_v53 = vld [vmem:[#allocation2 + $0x12c] sm:$0xf]  ;;  %10909 = vmatmul.mubr.msk.bf16.gmra.mxu0 %vm8726_vm1, %v11097_v5  ;;  %v6982_v51 = vor.u32 %v6981_v33, %v15582_v58  ;;  %v15636_v19 = vrot.slane %v6989_v43, 4  ;;  %v3562_v8 = vsel %vm11586_vm12, %v3560_v41, %v3561_v32  ;;  %5758 = vrot.lane.b32.xlu0 %v5609_v59, %s11181_s26 }
 0x3ab   :  { %v1988_v44 = vld [vmem:[#allocation2 + $0x130] sm:$0xf]  ;;  %v2769_v50 = vshrl.u32 %v15598_v15, 16  ;;  %v764_v36 = vmax.f32 %v696_v9, 0.0  ;;  %2051 = vst.msk [vmem:[#allocation3 + $0x228] sm:$0xf] %vm766_vm2, %v1987_v53  ;;  %10912 = vmatprep.mubr.msk.bf16.mxu0 %vm8726_vm1, %v11098_v24  ;;  %5760 = vrot.lane.b32.xlu1 %v5612_v22, %s11181_s26  ;;  %v6126_v38 = vpop.permute.xlu1 %6125  ;;  %v691_v49 = vadd.f32 %v15297_v48, %v690_v18 }
 0x3ac   :  { %2052 = vst.msk [vmem:[#allocation3 + $0x234] sm:$0xf] %vm766_vm2, %v1988_v44  ;;  %v7815_v35 = vrot.slane %v7813_v37, 4  ;;  %v762_v40 = vmax.f32 %v688_v42, 0.0  ;;  %v765_v6 = vmax.f32 %v699_v23, 0.0  ;;  %v15650_v57 = vrot.slane %v6995_v1, 5  ;;  %v6124_v16 = vpop.permute.xlu0 %6123 }
 0x3ad   :  { %3843 = vst.msk [vmem:[#allocation3 + $0x1c8] sm:$0xf] %vm3804_vm3, %v3689_v14  ;;  %3844 = vst.msk [vmem:[#allocation3 + $0x1d4] sm:$0xf] %vm3804_vm3, %v3691_v60  ;;  %v2772_v63 = vshll.u32 %v15598_v15, 16  ;;  %v2778_v11 = vshll.u32 %v15600_v4, 16  ;;  %v10627_v58 = vpack.c.bf16 %v764_v36, %v764_v36  ;;  %v6992_v21 = vor.u32 %v15636_v19, %v15631_v54 }
 0x3ae   :  { %v2782_v43 = vshrl.u32 %v15600_v4, 16  ;;  %v2146_v41 = vld [vmem:[#allocation2 + $0x14c] sm:$0x1]  ;;  %v7817_v28 = vsel %vm11586_vm12, %v7815_v35, %v7816_v12  ;;  %v10625_v37 = vpack.c.bf16 %v762_v40, %v762_v40  ;;  %v10628_v32 = vpack.c.bf16 %v765_v6, %v765_v6  ;;  %6277 = vst.msk [vmem:[#allocation3 + $0x1cc] sm:$0xf] %vm3804_vm3, %v6124_v16  ;;  %3708 = vrot.lane.b32.xlu0 %v3559_v61, %s11180_s25 }
 0x3af   :  { %v11099_v20 = vld [vmem:[#allocation3 + $0x1d0] ss:$12 sps:$4 sm:$0xff]   ;;  %v15657_v46 = vrot.slane %v6982_v51, 4  ;;  %v15661_v3 = vrot.slane %v2769_v50, 4  ;;  %7960 = vst.msk [vmem:[#allocation3 + $0x2b4] sm:$0xf] %vm766_vm2, %v7817_v28  ;;  %3710 = vrot.lane.b32.xlu1 %v3562_v8, %s11180_s25  ;;  %v4076_v61 = vpop.permute.xlu1 %4075 }
 0x3b0   :  { %6278 = vst.msk [vmem:[#allocation3 + $0x1d8] sm:$0xf] %vm3804_vm3, %v6126_v38  ;;  %v11100_v62 = vld [vmem:[#allocation3 + $0x1e8] ss:$12 sps:$4 sm:$0xff]   ;;  %v1599_v27 = vshrl.u32 %v10627_v58, 16  ;;  %v1602_v33 = vshll.u32 %v10627_v58, 16  ;;  %v4074_v22 = vpop.permute.xlu0 %4073 }
 0x3b1   :  { %v1582_v47 = vshrl.u32 %v10625_v37, 16  ;;  %v1585_v52 = vshll.u32 %v10625_v37, 16  ;;  %v15669_v9 = vrot.slane %v2772_v63, 5  ;;  %v2788_v25 = vshll.u32 %v2146_v41, 16  ;;  %v15671_v15 = vld [vmem:[#allocation2 + $0x150] sm:$0xe] }
 0x3b2   :  { %v1607_v4 = vshrl.u32 %v10628_v32, 16  ;;  %v1610_v48 = vshll.u32 %v10628_v32, 16  ;;  %v5967_v17 = vld [vmem:[#allocation2 + $0x150] sm:$0xf]  ;;  %v5968_v42 = vld [vmem:[#allocation2 + $0x154] sm:$0xf]  ;;  %10913 = vmatmul.mubr.msk.bf16.gmra.mxu0 %vm8726_vm1, %v11099_v20 }
 0x3b3   :  { %v15673_v23 = vrot.slane %v2778_v11, 5  ;;  %v2784_v5 = vrot.slane %v2782_v43, 4  ;;  %v15675_v24 = vld [vmem:[#allocation2 + $0x154] sm:$0xf]  ;;  %v1601_v59 = vrot.slane %v1599_v27, 7  ;;  %v15677_v1 = vrot.slane %v1582_v47, 7  ;;  %10916 = vmatprep.mubr.msk.bf16.mxu0 %vm8726_vm1, %v11100_v62  ;;  %6143 = vrot.lane.b32.xlu0 %v5967_v17, %s11180_s25  ;;  %v7246_v16 = vpop.permute.xlu1 %7245 }
 0x3b4   :  { %v1934_v12 = vld [vmem:[#allocation2 + $0x198] sm:$0xf]  ;;  %v1927_v53 = vld [vmem:[#allocation2 + $0x18c] sm:$0xf]  ;;  %v1609_v44 = vrot.slane %v1607_v4, 7  ;;  %v763_v14 = vmax.f32 %v691_v49, 0.0  ;;  %6145 = vrot.lane.b32.xlu1 %v5968_v42, %s11180_s25  ;;  %v2775_v35 = vor.u32 %v15669_v9, %v15661_v3  ;;  %v7244_v32 = vpop.permute.xlu0 %7243 }
 0x3b5   :  { %4228 = vst.msk [vmem:[#allocation3 + $0x1c8] sm:$0xf] %vm4189_vm4, %v4074_v22  ;;  %4229 = vst.msk [vmem:[#allocation3 + $0x1d4] sm:$0xf] %vm4189_vm4, %v4076_v61  ;;  %v15683_v60 = vrot.slane %v6992_v21, 4  ;;  %v1604_v19 = vor.u32 %v1602_v33, %v1601_v59  ;;  %v1605_v50 = vrot.slane %v1601_v59, 4  ;;  %v1587_v36 = vor.u32 %v1585_v52, %v15677_v1 }
 0x3b6   :  { %v15685_v51 = vld [vmem:[#allocation2 + $0x158] sm:$0x1]  ;;  %v1938_v8 = vld [vmem:[#allocation2 + $0x1a0] sm:$0x1]  ;;  %v15692_v40 = vrot.slane %v2788_v25, 5  ;;  %v1612_v6 = vor.u32 %v1610_v48, %v1609_v44  ;;  %v1614_v18 = vrot.slane %v1609_v44, 4  ;;  %v2785_v43 = vor.u32 %v2784_v5, %v15673_v23  ;;  %v8931_v5 = vpop.f32.mrf.mxu1 }
 0x3b7   :  { %v4323_v63 = vld [vmem:[#allocation2 + $0x138] sm:$0xf]  ;;  %v4324_v11 = vld [vmem:[#allocation2 + $0x13c] sm:$0xf]  ;;  %v3917_v58 = vld [vmem:[#allocation2 + $0x144] sm:$0xf]  ;;  %v1935_v28 = vsel %vm11538_vm6, %v1604_v19, %v1934_v12  ;;  %v1928_v37 = vsel %vm11538_vm6, %v1587_v36, %v1927_v53  ;;  %v10626_v62 = vpack.c.bf16 %v763_v14, %v763_v14  ;;  %v3019_v14 = vpop.permute.xlu1 %3018 }
 0x3b8   :  { %v10295_v41 = vrot.slane %v15671_v15, 9  ;;  %v3918_v38 = vld [vmem:[#allocation2 + $0x148] sm:$0xf]  ;;  %v11101_v20 = vld [vmem:[#allocation3 + $0x200] ss:$12 sps:$4 sm:$0xff]   ;;  %v5615_v21 = vrot.slane %v15675_v24, 5  ;;  %v1613_v3 = vsel %vm11548_vm8, %v1605_v50, %v1612_v6  ;;  %v1939_v49 = vsel %vm11554_vm9, %v1614_v18, %v1938_v8  ;;  %4093 = vrot.lane.b32.xlu0 %v3917_v58, %s11179_s24  ;;  %v3017_v44 = vpop.permute.xlu0 %3016 }
 0x3b9   :  { %1936 = vst [vmem:[#allocation2 + $0x198] sm:$0xf] %v1935_v28  ;;  %1929 = vst [vmem:[#allocation2 + $0x18c] sm:$0xf] %v1928_v37  ;;  %v5618_v27 = vrot.slane %v15685_v51, 5  ;;  %v4903_v33 = vshrl.u32 %v4323_v63, 16  ;;  %4095 = vrot.lane.b32.xlu1 %v3918_v38, %s11179_s24  ;;  %v6988_v6 = vsel %vm11625_vm15, %v15657_v46, %v15631_v54 }
 0x3ba   :  { %7397 = vst.msk [vmem:[#allocation3 + $0x1cc] sm:$0xf] %vm4189_vm4, %v7244_v32  ;;  %7398 = vst.msk [vmem:[#allocation3 + $0x1d8] sm:$0xf] %vm4189_vm4, %v7246_v16  ;;  %v4906_v47 = vshll.u32 %v4323_v63, 16  ;;  %v4912_v52 = vshll.u32 %v4324_v11, 16  ;;  %10917 = vmatmul.mubr.msk.bf16.gmra.mxu0 %vm8726_vm1, %v11101_v20 }
 0x3bb   :  { %1937 = vst.msk [vmem:[#allocation2 + $0x19c] sm:$0xf] %vm766_vm2, %v1613_v3  ;;  %1940 = vst [vmem:[#allocation2 + $0x1a0] sm:$0x1] %v1939_v49  ;;  %v4325_v9 = vld [vmem:[#allocation2 + $0x140] sm:$0x1]  ;;  %v5745_v49 = vpop.permute.xlu1 %5744 }
 0x3bc   :  { %v11102_v25 = vld [vmem:[#allocation3 + $0x218] ss:$12 sps:$4 sm:$0xff]   ;;  %v2776_v4 = vrot.slane %v2775_v35, 4  ;;  %v1590_v48 = vshrl.u32 %v10626_v62, 16  ;;  %v1593_v17 = vshll.u32 %v10626_v62, 16  ;;  %v4916_v42 = vshrl.u32 %v4324_v11, 16  ;;  %v15719_v35 = vpop.f32.mrf.mxu1  ;;  %7263 = vrot.lane.b32.xlu0 %v6988_v6, %s11179_s24  ;;  %v5743_v3 = vpop.permute.xlu0 %5742 }
 0x3bd   :  { %v2786_v59 = vrot.slane %v2785_v43, 4  ;;  %v15713_v22 = vld [vmem:[#allocation2 + $0x148] sm:$0xf]  ;;  %v4905_v61 = vrot.slane %v4903_v33, 4  ;;  %v4908_v12 = vrot.slane %v4906_v47, 5  ;;  %v4914_v53 = vrot.slane %v4912_v52, 5  ;;  %10920 = vmatprep.mubr.msk.bf16.mxu0 %vm8726_vm1, %v11102_v25 }
 0x3be   :  { %v1588_v19 = vrot.slane %v15677_v1, 4  ;;  %v1592_v50 = vrot.slane %v1590_v48, 7  ;;  %v4918_v36 = vrot.slane %v4916_v42, 4  ;;  %v4922_v8 = vshll.u32 %v4325_v9, 16  ;;  %3169 = vst.msk [vmem:[#allocation3 + $0x1e0] sm:$0xf] %vm3128_vm0, %v3017_v44  ;;  %v8934_v46 = vpop.f32.mrf.mxu1 }
 0x3bf   :  { %3170 = vst.msk [vmem:[#allocation3 + $0x1ec] sm:$0xf] %vm3128_vm0, %v3019_v14  ;;  %v6998_v1 = vsel %vm11625_vm15, %v15683_v60, %v15650_v57  ;;  %v15730_v18 = vld [vmem:[#allocation2 + $0x15c] sm:$0xf]  ;;  %v1931_v63 = vld [vmem:[#allocation2 + $0x194] sm:$0x1]  ;;  %v4909_v11 = vor.u32 %v4908_v12, %v4905_v61  ;;  %v2781_v57 = vsel %vm11625_vm15, %v2776_v4, %v15673_v23  ;;  %v2791_v62 = vsel %vm11625_vm15, %v2786_v59, %v15692_v40 }
 0x3c0   :  { %v1989_v58 = vld [vmem:[#allocation2 + $0x138] sm:$0xf]  ;;  %7265 = vrot.lane.b32.xlu1 %v6998_v1, %s11179_s24  ;;  %v3565_v43 = vrot.slane %v15713_v22, 5  ;;  %v1595_v28 = vor.u32 %v1593_v17, %v1592_v50  ;;  %v1597_v37 = vrot.slane %v1592_v50, 4  ;;  %v4919_v32 = vor.u32 %v4918_v36, %v4914_v53  ;;  %v1990_v54 = vld [vmem:[#allocation2 + $0x13c] sm:$0xf]  ;;  %v15752_v4 = vpop.f32.mrf.mxu1  ;;  %3036 = vrot.lane.b32.xlu0 %v2781_v57, %s11181_s26  ;;  %v3695_v50 = vpop.permute.xlu1 %3694 }
 0x3c1   :  { %2053 = vst.msk [vmem:[#allocation3 + $0x240] sm:$0xf] %vm766_vm2, %v1989_v58  ;;  %v5617_v60 = vrot.slane %v5615_v21, 4  ;;  %v6379_v16 = vld [vmem:[#allocation2 + $0x160] sm:$0xf]  ;;  %v4910_v38 = vrot.slane %v4909_v11, 4 }
 0x3c2   :  { %v4924_v20 = vrot.slane %v4922_v8, 5  ;;  %2054 = vst.msk [vmem:[#allocation3 + $0x24c] sm:$0xf] %vm766_vm2, %v1990_v54  ;;  %v8043_v33 = vld [vmem:[#allocation3 + $0x1c8] sm:$0xff]  ;;  %v8045_v47 = vld [vmem:[#allocation3 + $0x1d4] sm:$0xff]  ;;  %v7000_v9 = vshrl.u32 %v15730_v18, 16  ;;  %v1596_v23 = vsel %vm11548_vm8, %v1588_v19, %v1595_v28  ;;  %v1932_v25 = vsel %vm11554_vm9, %v1597_v37, %v1931_v63  ;;  %v8939_v12 = vpop.f32.mrf.mxu1  ;;  %v3693_v19 = vpop.permute.xlu0 %3692 }
 0x3c3   :  { %v11103_v52 = vld [vmem:[#allocation3 + $0x1cc] ss:$12 sps:$4 sm:$0xff]   ;;  %5894 = vst.msk [vmem:[#allocation3 + $0x1e4] sm:$0xf] %vm3128_vm0, %v5743_v3  ;;  %5895 = vst.msk [vmem:[#allocation3 + $0x1f0] sm:$0xf] %vm3128_vm0, %v5745_v49  ;;  %v10392_v48 = vcombine.low %v8043_v33, %v8045_v47  ;;  %v4915_v0 = vsel %vm11625_vm15, %v4910_v38, %v4914_v53  ;;  %v5616_v53 = vsel %vm11586_vm12, %v10295_v41, %v5615_v21 }
 0x3c4   :  { %v3268_v17 = vld [vmem:[#allocation2 + $0x144] sm:$0xe]  ;;  %v7003_v40 = vshll.u32 %v15730_v18, 16  ;;  %1930 = vst.msk [vmem:[#allocation2 + $0x190] sm:$0xf] %vm766_vm2, %v1596_v23  ;;  %v4920_v42 = vrot.slane %v4919_v32, 4  ;;  %3038 = vrot.lane.b32.xlu1 %v2791_v62, %s11181_s26  ;;  %9007 = vmatprep.mubr.bf16.mxu1 %v11103_v52  ;;  %v15775_v1 = vpop.f32.mrf.mxu1  ;;  %v5619_v15 = vsel %vm11586_vm12, %v5617_v60, %v5618_v27  ;;  %v6130_v51 = vpop.permute.xlu1 %6129 }
 0x3c5   :  { %1933 = vst [vmem:[#allocation2 + $0x194] sm:$0x1] %v1932_v25  ;;  %v11105_v2 = vld [vmem:[#allocation3 + $0x230] ss:$12 sps:$4 sm:$0xff]   ;;  %v7009_v59 = vshll.u32 %v6379_v16, 16  ;;  %v7013_v61 = vshrl.u32 %v6379_v16, 16  ;;  %9008 = vmatmul.mubr.bf16.gmra.mxu1 %v10392_v48  ;;  %5762 = vrot.lane.b32.xlu0 %v5616_v53, %s11181_s26 }
 0x3c6   :  { %v3270_v5 = vld [vmem:[#allocation2 + $0x14c] sm:$0x1]  ;;  %5228 = vst.msk [vmem:[#allocation3 + $0x22c] sm:$0xf] %vm766_vm2, %v4915_v0  ;;  %v11106_v44 = vld [vmem:[#allocation3 + $0x248] ss:$12 sps:$4 sm:$0xff]   ;;  %v4925_v14 = vsel %vm11625_vm15, %v4920_v42, %v4924_v20  ;;  %10921 = vmatmul.mubr.msk.bf16.gmra.mxu0 %vm8726_vm1, %v11105_v2  ;;  %v8942_v58 = vpop.f32.mrf.mxu1  ;;  %v6128_v54 = vpop.permute.xlu0 %6127 }
 0x3c7   :  { %v10263_v36 = vrot.slane %v3268_v17, 9  ;;  %v3567_v8 = vrot.slane %v3565_v43, 4  ;;  %v2147_v6 = vld [vmem:[#allocation2 + $0x150] sm:$0xf]  ;;  %5229 = vst.msk [vmem:[#allocation3 + $0x238] sm:$0xf] %vm766_vm2, %v4925_v14  ;;  %10924 = vmatprep.mubr.msk.bf16.mxu0 %vm8726_vm1, %v11106_v44 }
 0x3c8   :  { %3845 = vst.msk [vmem:[#allocation3 + $0x1e0] sm:$0xf] %vm3804_vm3, %v3693_v19  ;;  %3846 = vst.msk [vmem:[#allocation3 + $0x1ec] sm:$0xf] %vm3804_vm3, %v3695_v50  ;;  %v3568_v24 = vrot.slane %v3270_v5, 5  ;;  %v7002_v41 = vrot.slane %v7000_v9, 4  ;;  %5764 = vrot.lane.b32.xlu1 %v5619_v15, %s11181_s26 }
 0x3c9   :  { %v7005_v21 = vrot.slane %v7003_v40, 5  ;;  %v2148_v18 = vld [vmem:[#allocation2 + $0x154] sm:$0xf]  ;;  %v15784_v63 = vrot.slane %v7009_v59, 5  ;;  %v7015_v11 = vrot.slane %v7013_v61, 4  ;;  %v2793_v32 = vshrl.u32 %v2147_v6, 16 }
 0x3ca   :  { %v11107_v28 = vld [vmem:[#allocation3 + $0x260] ss:$12 sps:$4 sm:$0xff]   ;;  %v6380_v37 = vld [vmem:[#allocation2 + $0x164] sm:$0x1]  ;;  %v2796_v46 = vshll.u32 %v2147_v6, 16  ;;  %v2802_v57 = vshll.u32 %v2148_v18, 16  ;;  %v3566_v16 = vsel %vm11586_vm12, %v10263_v36, %v3565_v43  ;;  %v3569_v38 = vsel %vm11586_vm12, %v3567_v8, %v3568_v24  ;;  %v4078_v23 = vpop.permute.xlu0 %4077  ;;  %v4080_v43 = vpop.permute.xlu1 %4079 }
 0x3cb   :  { %v2806_v27 = vshrl.u32 %v2148_v18, 16  ;;  %v4326_v60 = vld [vmem:[#allocation2 + $0x144] sm:$0xf]  ;;  %6279 = vst.msk [vmem:[#allocation3 + $0x1e4] sm:$0xf] %vm3804_vm3, %v6128_v54  ;;  %v7006_v3 = vor.u32 %v7005_v21, %v7002_v41  ;;  %3712 = vrot.lane.b32.xlu0 %v3566_v16, %s11180_s25  ;;  %v7016_v49 = vor.u32 %v7015_v11, %v15784_v63  ;;  %v7019_v62 = vshll.u32 %v6380_v37, 16 }
 0x3cc   :  { %6280 = vst.msk [vmem:[#allocation3 + $0x1f0] sm:$0xf] %vm3804_vm3, %v6130_v51  ;;  %v11108_v20 = vld [vmem:[#allocation3 + $0x278] ss:$12 sps:$4 sm:$0xff]   ;;  %3714 = vrot.lane.b32.xlu1 %v3569_v38, %s11180_s25  ;;  %v5969_v47 = vld [vmem:[#allocation2 + $0x15c] sm:$0xf] }
 0x3cd   :  { %v4327_v33 = vld [vmem:[#allocation2 + $0x148] sm:$0xf]  ;;  %v15797_v52 = vrot.slane %v2793_v32, 4  ;;  %v4927_v22 = vshrl.u32 %v4326_v60, 16  ;;  %v4328_v9 = vld [vmem:[#allocation2 + $0x14c] sm:$0x1] }
 0x3ce   :  { %10925 = vmatmul.mubr.msk.bf16.gmra.mxu0 %vm8726_vm1, %v11107_v28  ;;  %v2798_v25 = vrot.slane %v2796_v46, 5  ;;  %v15800_v48 = vrot.slane %v2802_v57, 5  ;;  %v2149_v17 = vld [vmem:[#allocation2 + $0x158] sm:$0x1]  ;;  %v2808_v40 = vrot.slane %v2806_v27, 4  ;;  %v4930_v0 = vshll.u32 %v4326_v60, 16  ;;  %v7248_v41 = vpop.permute.xlu0 %7247  ;;  %v7250_v21 = vpop.permute.xlu1 %7249 }
 0x3cf   :  { %4230 = vst.msk [vmem:[#allocation3 + $0x1e0] sm:$0xf] %vm4189_vm4, %v4078_v23  ;;  %4231 = vst.msk [vmem:[#allocation3 + $0x1ec] sm:$0xf] %vm4189_vm4, %v4080_v43  ;;  %v5970_v42 = vld [vmem:[#allocation2 + $0x160] sm:$0xf]  ;;  %10928 = vmatprep.mubr.msk.bf16.mxu0 %vm8726_vm1, %v11108_v20  ;;  %6147 = vrot.lane.b32.xlu0 %v5969_v47, %s11180_s25 }
 0x3d0   :  { %v15805_v2 = vrot.slane %v7006_v3, 4  ;;  %v4929_v5 = vrot.slane %v4927_v22, 4  ;;  %v4936_v59 = vshll.u32 %v4327_v33, 16  ;;  %v4940_v61 = vshrl.u32 %v4327_v33, 16  ;;  %6149 = vrot.lane.b32.xlu1 %v5970_v42, %s11180_s25  ;;  %v15809_v14 = vld [vmem:[#allocation2 + $0x190] sm:$0xf] }
 0x3d1   :  { %v7017_v12 = vrot.slane %v7016_v49, 4  ;;  %v7021_v44 = vrot.slane %v7019_v62, 5  ;;  %v4932_v19 = vrot.slane %v4930_v0, 5  ;;  %v4946_v50 = vshll.u32 %v4328_v9, 16  ;;  %v3919_v53 = vld [vmem:[#allocation2 + $0x150] sm:$0xf] }
 0x3d2   :  { %v3920_v36 = vld [vmem:[#allocation2 + $0x154] sm:$0xf]  ;;  %v2812_v8 = vshll.u32 %v2149_v17, 16  ;;  %v15811_v6 = vld [vmem:[#allocation2 + $0x160] sm:$0xf]  ;;  %v4938_v15 = vrot.slane %v4936_v59, 5  ;;  %v2799_v18 = vor.u32 %v2798_v25, %v15797_v52  ;;  %v2809_v11 = vor.u32 %v2808_v40, %v15800_v48  ;;  %v3021_v43 = vpop.permute.xlu0 %3020  ;;  %v3023_v25 = vpop.permute.xlu1 %3022 }
 0x3d3   :  { %v4942_v24 = vrot.slane %v4940_v61, 4  ;;  %v11113_v58 = vld [vmem:[#allocation3 + $0x290] ss:$12 sps:$4 sm:$0xff]   ;;  %v11114_v28 = vld [vmem:[#allocation3 + $0x2a8] ss:$12 sps:$4 sm:$0xff]   ;;  %v4933_v32 = vor.u32 %v4932_v19, %v4929_v5  ;;  %v7820_v27 = vrot.slane %v15809_v14, 5  ;;  %4097 = vrot.lane.b32.xlu0 %v3919_v53, %s11179_s24  ;;  %v7012_v38 = vsel %vm11625_vm15, %v15805_v2, %v15784_v63 }
 0x3d4   :  { %v7510_v37 = vld [vmem:[#allocation2 + $0x18c] sm:$0xe]  ;;  %7399 = vst.msk [vmem:[#allocation3 + $0x1e4] sm:$0xf] %vm4189_vm4, %v7248_v41  ;;  %7400 = vst.msk [vmem:[#allocation3 + $0x1f0] sm:$0xf] %vm4189_vm4, %v7250_v21  ;;  %4099 = vrot.lane.b32.xlu1 %v3920_v36, %s11179_s24  ;;  %v7022_v20 = vsel %vm11625_vm15, %v7017_v12, %v7021_v44 }
 0x3d5   :  { %v15817_v54 = vld [vmem:[#allocation2 + $0x15c] sm:$0xe]  ;;  %v15819_v51 = vld [vmem:[#allocation2 + $0x164] sm:$0x1]  ;;  %v15821_v46 = vld [vmem:[#allocation2 + $0x198] sm:$0xe]  ;;  %v4943_v60 = vor.u32 %v4942_v24, %v4938_v15 }
 0x3d6   :  { %v15823_v57 = vld [vmem:[#allocation2 + $0x19c] sm:$0xf]  ;;  %v4948_v16 = vrot.slane %v4946_v50, 5  ;;  %v15834_v3 = vld [vmem:[#allocation2 + $0x154] sm:$0xf]  ;;  %v4934_v62 = vrot.slane %v4933_v32, 4  ;;  %10929 = vmatmul.mubr.msk.bf16.gmra.mxu0 %vm8726_vm1, %v11113_v58  ;;  %v5747_v41 = vpop.permute.xlu0 %5746  ;;  %v5749_v21 = vpop.permute.xlu1 %5748 }
 0x3d7   :  { %v7512_v49 = vld [vmem:[#allocation2 + $0x194] sm:$0x1]  ;;  %v1991_v33 = vld [vmem:[#allocation2 + $0x144] sm:$0xf]  ;;  %v2814_v47 = vrot.slane %v2812_v8, 5  ;;  %v5622_v52 = vrot.slane %v15811_v6, 5  ;;  %10932 = vmatprep.mubr.msk.bf16.mxu0 %vm8726_vm1, %v11114_v28  ;;  %7267 = vrot.lane.b32.xlu0 %v7012_v38, %s11179_s24 }
 0x3d8   :  { %v10331_v22 = vrot.slane %v7510_v37, 9  ;;  %v4944_v9 = vrot.slane %v4943_v60, 4  ;;  %2055 = vst.msk [vmem:[#allocation3 + $0x258] sm:$0xf] %vm766_vm2, %v1991_v33  ;;  %v1992_v23 = vld [vmem:[#allocation2 + $0x148] sm:$0xf]  ;;  %v4939_v42 = vsel %vm11625_vm15, %v4934_v62, %v4938_v15  ;;  %7269 = vrot.lane.b32.xlu1 %v7022_v20, %s11179_s24 }
 0x3d9   :  { %v2800_v17 = vrot.slane %v2799_v18, 4  ;;  %v2810_v63 = vrot.slane %v2809_v11, 4  ;;  %v10332_v40 = vrot.slane %v15821_v46, 9  ;;  %v7515_v0 = vld [vmem:[#allocation2 + $0x1a0] sm:$0x1]  ;;  %v7827_v5 = vrot.slane %v15823_v57, 5 }
 0x3da   :  { %2056 = vst.msk [vmem:[#allocation3 + $0x264] sm:$0xf] %vm766_vm2, %v1992_v23  ;;  %v15845_v2 = vld [vmem:[#allocation2 + $0x168] sm:$0xf]  ;;  %v7822_v59 = vrot.slane %v7820_v27, 4  ;;  %v7823_v61 = vrot.slane %v7512_v49, 5  ;;  %v4949_v12 = vsel %vm11625_vm15, %v4944_v9, %v4948_v16  ;;  %v7821_v24 = vsel %vm11586_vm12, %v10331_v22, %v7820_v27  ;;  %v3697_v22 = vpop.permute.xlu0 %3696  ;;  %v3699_v9 = vpop.permute.xlu1 %3698 }
 0x3db   :  { %3171 = vst.msk [vmem:[#allocation3 + $0x1f8] sm:$0xf] %vm3128_vm0, %v3021_v43  ;;  %3172 = vst.msk [vmem:[#allocation3 + $0x204] sm:$0xf] %vm3128_vm0, %v3023_v25  ;;  %v10296_v44 = vrot.slane %v15817_v54, 9  ;;  %v5625_v14 = vrot.slane %v15819_v51, 5  ;;  %v2805_v18 = vsel %vm11625_vm15, %v2800_v17, %v15800_v48  ;;  %v2815_v11 = vsel %vm11625_vm15, %v2810_v63, %v2814_v47  ;;  %v15876_v51 = vpop.f32.mrf.mxu1 }
 0x3dc   :  { %5230 = vst.msk [vmem:[#allocation3 + $0x244] sm:$0xf] %vm766_vm2, %v4939_v42  ;;  %v15856_v19 = vld [vmem:[#allocation2 + $0x150] sm:$0xe]  ;;  %v15858_v50 = vld [vmem:[#allocation2 + $0x158] sm:$0x1]  ;;  %v7824_v48 = vsel %vm11586_vm12, %v7822_v59, %v7823_v61  ;;  %v7828_v57 = vsel %vm11586_vm12, %v10332_v40, %v7827_v5  ;;  %3040 = vrot.lane.b32.xlu0 %v2805_v18, %s11181_s26  ;;  %3042 = vrot.lane.b32.xlu1 %v2815_v11, %s11181_s26 }
 0x3dd   :  { %5231 = vst.msk [vmem:[#allocation3 + $0x250] sm:$0xf] %vm766_vm2, %v4949_v12  ;;  %v5624_v53 = vrot.slane %v5622_v52, 4  ;;  %v3572_v36 = vrot.slane %v15834_v3, 5  ;;  %v6382_v8 = vld [vmem:[#allocation2 + $0x16c] sm:$0xf]  ;;  %v8947_v49 = vpop.f32.mrf.mxu1  ;;  %v5623_v23 = vsel %vm11586_vm12, %v10296_v44, %v5622_v52 }
 0x3de   :  { %v7830_v15 = vrot.slane %v7515_v0, 5  ;;  %v8047_v58 = vld [vmem:[#allocation3 + $0x1e0] sm:$0xff]  ;;  %v8049_v28 = vld [vmem:[#allocation3 + $0x1ec] sm:$0xff]  ;;  %v7024_v32 = vshrl.u32 %v15845_v2, 16  ;;  %v7027_v54 = vshll.u32 %v15845_v2, 16  ;;  %v7829_v27 = vrot.slane %v7827_v5, 4 }
 0x3df   :  { %v11109_v37 = vld [vmem:[#allocation3 + $0x1e4] ss:$12 sps:$4 sm:$0xff]   ;;  %7961 = vst.msk [vmem:[#allocation3 + $0x2c0] sm:$0xf] %vm766_vm2, %v7821_v24  ;;  %v10395_v46 = vcombine.low %v8047_v58, %v8049_v28  ;;  %v4329_v60 = vld [vmem:[#allocation2 + $0x150] sm:$0xf]  ;;  %v5626_v43 = vsel %vm11586_vm12, %v5624_v53, %v5625_v14  ;;  %v15899_v0 = vpop.f32.mrf.mxu1  ;;  %v6132_v24 = vpop.permute.xlu0 %6131 }
 0x3e0   :  { %5896 = vst.msk [vmem:[#allocation3 + $0x1fc] sm:$0xf] %vm3128_vm0, %v5747_v41  ;;  %5897 = vst.msk [vmem:[#allocation3 + $0x208] sm:$0xf] %vm3128_vm0, %v5749_v21  ;;  %v7033_v16 = vshll.u32 %v6382_v8, 16  ;;  %v7037_v38 = vshrl.u32 %v6382_v8, 16  ;;  %9015 = vmatprep.mubr.bf16.mxu1 %v11109_v37  ;;  %v7831_v47 = vsel %vm11586_vm12, %v7829_v27, %v7830_v15  ;;  %5766 = vrot.lane.b32.xlu0 %v5623_v23, %s11181_s26  ;;  %v6134_v41 = vpop.permute.xlu1 %6133 }
 0x3e1   :  { %7962 = vst.msk [vmem:[#allocation3 + $0x2cc] sm:$0xf] %vm766_vm2, %v7824_v48  ;;  %7963 = vst.msk [vmem:[#allocation3 + $0x2d8] sm:$0xf] %vm766_vm2, %v7828_v57  ;;  %v4330_v20 = vld [vmem:[#allocation2 + $0x154] sm:$0xf]  ;;  %9016 = vmatmul.mubr.bf16.gmra.mxu1 %v10395_v46  ;;  %5768 = vrot.lane.b32.xlu1 %v5626_v43, %s11181_s26 }
 0x3e2   :  { %v10264_v62 = vrot.slane %v15856_v19, 9  ;;  %v3575_v33 = vrot.slane %v15858_v50, 5  ;;  %v2150_v25 = vld [vmem:[#allocation2 + $0x15c] sm:$0xf]  ;;  %v2151_v17 = vld [vmem:[#allocation2 + $0x160] sm:$0xf]  ;;  %v8950_v19 = vpop.f32.mrf.mxu1 }
 0x3e3   :  { %7964 = vst.msk [vmem:[#allocation3 + $0x2e4] sm:$0xf] %vm766_vm2, %v7831_v47  ;;  %v4951_v63 = vshrl.u32 %v4329_v60, 16  ;;  %v4954_v40 = vshll.u32 %v4329_v60, 16  ;;  %v3574_v6 = vrot.slane %v3572_v36, 4  ;;  %v15903_v42 = vrot.slane %v7024_v32, 4 }
 0x3e4   :  { %3847 = vst.msk [vmem:[#allocation3 + $0x1f8] sm:$0xf] %vm3804_vm3, %v3697_v22  ;;  %3848 = vst.msk [vmem:[#allocation3 + $0x204] sm:$0xf] %vm3804_vm3, %v3699_v9  ;;  %v15905_v52 = vrot.slane %v7027_v54, 5  ;;  %v4960_v2 = vshll.u32 %v4330_v20, 16  ;;  %v15917_v28 = vpop.f32.mrf.mxu1  ;;  %v3573_v37 = vsel %vm11586_vm12, %v10264_v62, %v3572_v36  ;;  %v4084_v36 = vpop.permute.xlu1 %4083 }
 0x3e5   :  { %v4331_v5 = vld [vmem:[#allocation2 + $0x158] sm:$0x1]  ;;  %v15909_v59 = vrot.slane %v7033_v16, 5  ;;  %v15911_v61 = vld [vmem:[#allocation2 + $0x170] sm:$0x1]  ;;  %v15913_v12 = vrot.slane %v7037_v38, 4  ;;  %v3576_v32 = vsel %vm11586_vm12, %v3574_v6, %v3575_v33  ;;  %3716 = vrot.lane.b32.xlu0 %v3573_v37, %s11180_s25  ;;  %v4082_v38 = vpop.permute.xlu0 %4081 }
 0x3e6   :  { %v4953_v44 = vrot.slane %v4951_v63, 4  ;;  %v4956_v14 = vrot.slane %v4954_v40, 5  ;;  %v2817_v50 = vshrl.u32 %v2150_v25, 16  ;;  %v2820_v53 = vshll.u32 %v2150_v25, 16  ;;  %6281 = vst.msk [vmem:[#allocation3 + $0x1fc] sm:$0xf] %vm3804_vm3, %v6132_v24  ;;  %3718 = vrot.lane.b32.xlu1 %v3576_v32, %s11180_s25  ;;  %v8955_v57 = vpop.f32.mrf.mxu1 }
 0x3e7   :  { %v2826_v8 = vshll.u32 %v2151_v17, 16  ;;  %v4964_v15 = vshrl.u32 %v4330_v20, 16  ;;  %v2830_v21 = vshrl.u32 %v2151_v17, 16  ;;  %v4962_v11 = vrot.slane %v4960_v2, 5  ;;  %6282 = vst.msk [vmem:[#allocation3 + $0x208] sm:$0xf] %vm3804_vm3, %v6134_v41 }
 0x3e8   :  { %v4957_v18 = vor.u32 %v4956_v14, %v4953_v44  ;;  %v4970_v58 = vshll.u32 %v4331_v5, 16  ;;  %v11119_v54 = vld [vmem:[#allocation3 + $0x2c0] ss:$12 sps:$4 sm:$0xff]   ;;  %v7043_v46 = vshll.u32 %v15911_v61, 16  ;;  %v5971_v27 = vld [vmem:[#allocation2 + $0x168] sm:$0xf]  ;;  %v15935_v22 = vpop.f32.mrf.mxu1  ;;  %v7030_v23 = vor.u32 %v15905_v52, %v15903_v42  ;;  %v7254_v61 = vpop.permute.xlu1 %7253 }
 0x3e9   :  { %v2819_v60 = vrot.slane %v2817_v50, 4  ;;  %10933 = vmatmul.mubr.msk.bf16.gmra.mxu0 %vm8726_vm1, %v11119_v54  ;;  %v4966_v16 = vrot.slane %v4964_v15, 4  ;;  %v2822_v20 = vrot.slane %v2820_v53, 5  ;;  %v15929_v49 = vrot.slane %v2826_v8, 5  ;;  %v2152_v62 = vld [vmem:[#allocation2 + $0x164] sm:$0x1]  ;;  %6151 = vrot.lane.b32.xlu0 %v5971_v27, %s11180_s25  ;;  %v7252_v5 = vpop.permute.xlu0 %7251 }
 0x3ea   :  { %v4958_v48 = vrot.slane %v4957_v18, 4  ;;  %v11120_v3 = vld [vmem:[#allocation3 + $0x2d8] ss:$12 sps:$4 sm:$0xff]   ;;  %v2832_v33 = vrot.slane %v2830_v21, 4  ;;  %4232 = vst.msk [vmem:[#allocation3 + $0x1f8] sm:$0xf] %vm4189_vm4, %v4082_v38  ;;  %v7040_v43 = vor.u32 %v15913_v12, %v15909_v59  ;;  %v8958_v6 = vpop.f32.mrf.mxu1 }
 0x3eb   :  { %4233 = vst.msk [vmem:[#allocation3 + $0x204] sm:$0xf] %vm4189_vm4, %v4084_v36  ;;  %v5972_v9 = vld [vmem:[#allocation2 + $0x16c] sm:$0xf]  ;;  %10936 = vmatprep.mubr.msk.bf16.mxu0 %vm8726_vm1, %v11120_v3  ;;  %v4967_v25 = vor.u32 %v4966_v16, %v4962_v11  ;;  %v4972_v17 = vrot.slane %v4970_v58, 5  ;;  %v2836_v2 = vshll.u32 %v2152_v62, 16  ;;  %v2823_v44 = vor.u32 %v2822_v20, %v2819_v60 }
 0x3ec   :  { %v4963_v47 = vsel %vm11625_vm15, %v4958_v48, %v4962_v11  ;;  %v1993_v63 = vld [vmem:[#allocation2 + $0x150] sm:$0xf]  ;;  %6153 = vrot.lane.b32.xlu1 %v5972_v9, %s11180_s25  ;;  %v1994_v40 = vld [vmem:[#allocation2 + $0x154] sm:$0xf]  ;;  %v15946_v42 = vld [vmem:[#allocation2 + $0x16c] sm:$0xf]  ;;  %v2833_v14 = vor.u32 %v2832_v33, %v15929_v49  ;;  %v15954_v50 = vpop.f32.mrf.mxu1  ;;  %v3027_v48 = vpop.permute.xlu1 %3026 }
 0x3ed   :  { %5232 = vst.msk [vmem:[#allocation3 + $0x25c] sm:$0xf] %vm766_vm2, %v4963_v47  ;;  %2057 = vst.msk [vmem:[#allocation3 + $0x270] sm:$0xf] %vm766_vm2, %v1993_v63  ;;  %v4968_v52 = vrot.slane %v4967_v25, 4  ;;  %v7031_v8 = vrot.slane %v7030_v23, 4 }
 0x3ee   :  { %2058 = vst.msk [vmem:[#allocation3 + $0x27c] sm:$0xf] %vm766_vm2, %v1994_v40  ;;  %v3921_v12 = vld [vmem:[#allocation2 + $0x15c] sm:$0xf]  ;;  %v15950_v19 = vld [vmem:[#allocation2 + $0x174] sm:$0xf]  ;;  %v8963_v11 = vpop.f32.mrf.mxu1 }
 0x3ef   :  { %7401 = vst.msk [vmem:[#allocation3 + $0x1fc] sm:$0xf] %vm4189_vm4, %v7252_v5  ;;  %7402 = vst.msk [vmem:[#allocation3 + $0x208] sm:$0xf] %vm4189_vm4, %v7254_v61  ;;  %v3922_v53 = vld [vmem:[#allocation2 + $0x160] sm:$0xf]  ;;  %v4973_v41 = vsel %vm11625_vm15, %v4968_v52, %v4972_v17  ;;  %4101 = vrot.lane.b32.xlu0 %v3921_v12, %s11179_s24  ;;  %v7036_v38 = vsel %vm11625_vm15, %v7031_v8, %v15909_v59 }
 0x3f0   :  { %v7041_v15 = vrot.slane %v7040_v43, 4  ;;  %v7045_v24 = vrot.slane %v7043_v46, 5  ;;  %4103 = vrot.lane.b32.xlu1 %v3922_v53, %s11179_s24  ;;  %v5327_v21 = vld [vmem:[#allocation2 + $0x168] sm:$0xe]  ;;  %v5629_v18 = vrot.slane %v15946_v42, 5  ;;  %v2838_v58 = vrot.slane %v2836_v2, 5  ;;  %v3025_v46 = vpop.permute.xlu0 %3024  ;;  %v15969_v16 = vpop.f32.mrf.mxu1 }
 0x3f1   :  { %5233 = vst.msk [vmem:[#allocation3 + $0x268] sm:$0xf] %vm766_vm2, %v4973_v41  ;;  %v15962_v37 = vld [vmem:[#allocation2 + $0x170] sm:$0x1]  ;;  %v15964_v32 = vld [vmem:[#allocation2 + $0x160] sm:$0xf]  ;;  %v5753_v42 = vpop.permute.xlu1 %5752 }
 0x3f2   :  { %v7048_v54 = vshrl.u32 %v15950_v19, 16  ;;  %v2824_v57 = vrot.slane %v2823_v44, 4  ;;  %v2834_v27 = vrot.slane %v2833_v14, 4  ;;  %v6385_v60 = vld [vmem:[#allocation2 + $0x178] sm:$0xf]  ;;  %v7046_v36 = vsel %vm11625_vm15, %v7041_v15, %v7045_v24  ;;  %v8966_v25 = vpop.f32.mrf.mxu1 }
 0x3f3   :  { %v4332_v3 = vld [vmem:[#allocation2 + $0x15c] sm:$0xf]  ;;  %3173 = vst.msk [vmem:[#allocation3 + $0x210] sm:$0xf] %vm3128_vm0, %v3025_v46  ;;  %3174 = vst.msk [vmem:[#allocation3 + $0x21c] sm:$0xf] %vm3128_vm0, %v3027_v48  ;;  %7271 = vrot.lane.b32.xlu0 %v7036_v38, %s11179_s24 }
 0x3f4   :  { %v10297_v20 = vrot.slane %v5327_v21, 9  ;;  %v4333_v62 = vld [vmem:[#allocation2 + $0x160] sm:$0xf]  ;;  %7273 = vrot.lane.b32.xlu1 %v7046_v36, %s11179_s24  ;;  %v5631_v33 = vrot.slane %v5629_v18, 4  ;;  %v5632_v47 = vrot.slane %v15962_v37, 5  ;;  %v3579_v23 = vrot.slane %v15964_v32, 5  ;;  %v5751_v2 = vpop.permute.xlu0 %5750 }
 0x3f5   :  { %v15979_v9 = vld [vmem:[#allocation2 + $0x15c] sm:$0xe]  ;;  %v7051_v43 = vshll.u32 %v15950_v19, 16  ;;  %v15983_v59 = vrot.slane %v7048_v54, 4  ;;  %v7057_v17 = vshll.u32 %v6385_v60, 16  ;;  %v4975_v63 = vshrl.u32 %v4332_v3, 16 }
 0x3f6   :  { %v4978_v40 = vshll.u32 %v4332_v3, 16  ;;  %v4334_v6 = vld [vmem:[#allocation2 + $0x164] sm:$0x1]  ;;  %v2829_v52 = vsel %vm11625_vm15, %v2824_v57, %v15929_v49  ;;  %v2839_v5 = vsel %vm11625_vm15, %v2834_v27, %v2838_v58  ;;  %v8051_v61 = vld [vmem:[#allocation3 + $0x1f8] sm:$0xff]  ;;  %v8053_v12 = vld [vmem:[#allocation3 + $0x204] sm:$0xff]  ;;  %v4984_v14 = vshll.u32 %v4333_v62, 16  ;;  %v3703_v57 = vpop.permute.xlu1 %3702 }
 0x3f7   :  { %v11111_v44 = vld [vmem:[#allocation3 + $0x1fc] ss:$12 sps:$4 sm:$0xff]   ;;  %v4988_v19 = vshrl.u32 %v4333_v62, 16  ;;  %5898 = vst.msk [vmem:[#allocation3 + $0x214] sm:$0xf] %vm3128_vm0, %v5751_v2  ;;  %v10398_v53 = vcombine.low %v8051_v61, %v8053_v12  ;;  %v7061_v15 = vshrl.u32 %v6385_v60, 16  ;;  %3044 = vrot.lane.b32.xlu0 %v2829_v52, %s11181_s26  ;;  %v5630_v37 = vsel %vm11586_vm12, %v10297_v20, %v5629_v18  ;;  %v16001_v62 = vpop.f32.mrf.mxu1 }
 0x3f8   :  { %5899 = vst.msk [vmem:[#allocation3 + $0x220] sm:$0xf] %vm3128_vm0, %v5753_v42  ;;  %v3276_v8 = vld [vmem:[#allocation2 + $0x164] sm:$0x1]  ;;  %v4977_v24 = vrot.slane %v4975_v63, 4  ;;  %v4980_v41 = vrot.slane %v4978_v40, 5  ;;  %3046 = vrot.lane.b32.xlu1 %v2839_v5, %s11181_s26  ;;  %9023 = vmatprep.mubr.bf16.mxu1 %v11111_v44  ;;  %v3701_v48 = vpop.permute.xlu0 %3700  ;;  %v5633_v18 = vsel %vm11586_vm12, %v5631_v33, %v5632_v47 }
 0x3f9   :  { %v7053_v49 = vrot.slane %v7051_v43, 5  ;;  %v4986_v21 = vrot.slane %v4984_v14, 5  ;;  %v4990_v11 = vrot.slane %v4988_v19, 4  ;;  %v4994_v58 = vshll.u32 %v4334_v6, 16  ;;  %9024 = vmatmul.mubr.bf16.gmra.mxu1 %v10398_v53  ;;  %v2153_v3 = vld [vmem:[#allocation2 + $0x168] sm:$0xf]  ;;  %v8971_v42 = vpop.f32.mrf.mxu1 }
 0x3fa   :  { %v10265_v54 = vrot.slane %v15979_v9, 9  ;;  %v4981_v46 = vor.u32 %v4980_v41, %v4977_v24  ;;  %v3581_v27 = vrot.slane %v3579_v23, 4  ;;  %v3582_v60 = vrot.slane %v3276_v8, 5  ;;  %3849 = vst.msk [vmem:[#allocation3 + $0x210] sm:$0xf] %vm3804_vm3, %v3701_v48  ;;  %17200 = vst [vmem:[#allocation9_spill] sm:$0xff] %v16001_v62  ;;  %v6138_v61 = vpop.permute.xlu1 %6137 }
 0x3fb   :  { %v4991_v38 = vor.u32 %v4990_v11, %v4986_v21  ;;  %v4996_v36 = vrot.slane %v4994_v58, 5  ;;  %3850 = vst.msk [vmem:[#allocation3 + $0x21c] sm:$0xf] %vm3804_vm3, %v3703_v57  ;;  %v16005_v20 = vrot.slane %v7057_v17, 5  ;;  %v6386_v9 = vld [vmem:[#allocation2 + $0x17c] sm:$0x1]  ;;  %5770 = vrot.lane.b32.xlu0 %v5630_v37, %s11181_s26  ;;  %v7054_v63 = vor.u32 %v7053_v49, %v15983_v59  ;;  %v16025_v14 = vpop.f32.mrf.mxu1 }
 0x3fc   :  { %v7063_v43 = vrot.slane %v7061_v15, 4  ;;  %v4982_v25 = vrot.slane %v4981_v46, 4  ;;  %5772 = vrot.lane.b32.xlu1 %v5633_v18, %s11181_s26  ;;  %v2154_v40 = vld [vmem:[#allocation2 + $0x16c] sm:$0xf]  ;;  %v1995_v2 = vld [vmem:[#allocation2 + $0x15c] sm:$0xf]  ;;  %v6136_v17 = vpop.permute.xlu0 %6135  ;;  %v3580_v12 = vsel %vm11586_vm12, %v10265_v54, %v3579_v23  ;;  %v3583_v59 = vsel %vm11586_vm12, %v3581_v27, %v3582_v60 }
 0x3fd   :  { %v4992_v6 = vrot.slane %v4991_v38, 4  ;;  %v2841_v52 = vshrl.u32 %v2153_v3, 16  ;;  %v2844_v5 = vshll.u32 %v2153_v3, 16  ;;  %2059 = vst.msk [vmem:[#allocation3 + $0x288] sm:$0xf] %vm766_vm2, %v1995_v2  ;;  %17201 = vst [vmem:[#allocation7_spill] sm:$0xff] %v16025_v14  ;;  %v8974_v15 = vpop.f32.mrf.mxu1 }
 0x3fe   :  { %v4987_v33 = vsel %vm11625_vm15, %v4982_v25, %v4986_v21  ;;  %v1996_v47 = vld [vmem:[#allocation2 + $0x160] sm:$0xf]  ;;  %6283 = vst.msk [vmem:[#allocation3 + $0x214] sm:$0xf] %vm3804_vm3, %v6136_v17  ;;  %6284 = vst.msk [vmem:[#allocation3 + $0x220] sm:$0xf] %vm3804_vm3, %v6138_v61  ;;  %v7064_v32 = vor.u32 %v7063_v43, %v16005_v20  ;;  %v4088_v54 = vpop.permute.xlu1 %4087 }
 0x3ff   :  { %5234 = vst.msk [vmem:[#allocation3 + $0x274] sm:$0xf] %vm766_vm2, %v4987_v33  ;;  %v4997_v44 = vsel %vm11625_vm15, %v4992_v6, %v4996_v36  ;;  %2060 = vst.msk [vmem:[#allocation3 + $0x294] sm:$0xf] %vm766_vm2, %v1996_v47  ;;  %v7067_v19 = vshll.u32 %v6386_v9, 16  ;;  %v2850_v23 = vshll.u32 %v2154_v40, 16  ;;  %3720 = vrot.lane.b32.xlu0 %v3580_v12, %s11180_s25 }
 0x400   :  { %v2854_v53 = vshrl.u32 %v2154_v40, 16  ;;  %5235 = vst.msk [vmem:[#allocation3 + $0x280] sm:$0xf] %vm766_vm2, %v4997_v44  ;;  %3722 = vrot.lane.b32.xlu1 %v3583_v59, %s11180_s25  ;;  %v16031_v8 = vrot.slane %v7054_v63, 4  ;;  %v5973_v24 = vld [vmem:[#allocation2 + $0x174] sm:$0xf]  ;;  %v4086_v37 = vpop.permute.xlu0 %4085 }
 0x401   :  { %v5974_v41 = vld [vmem:[#allocation2 + $0x178] sm:$0xf]  ;;  %v2843_v49 = vrot.slane %v2841_v52, 4  ;;  %v2846_v21 = vrot.slane %v2844_v5, 5  ;;  %v2155_v11 = vld [vmem:[#allocation2 + $0x170] sm:$0x1] }
 0x402   :  { %v4335_v58 = vld [vmem:[#allocation2 + $0x168] sm:$0xf]  ;;  %v16033_v46 = vld [vmem:[#allocation2 + $0x174] sm:$0xe]  ;;  %v16035_v48 = vld [vmem:[#allocation2 + $0x178] sm:$0xf]  ;;  %v7060_v18 = vsel %vm11625_vm15, %v16031_v8, %v16005_v20  ;;  %v7258_v33 = vpop.permute.xlu1 %7257 }
 0x403   :  { %v4336_v57 = vld [vmem:[#allocation2 + $0x16c] sm:$0xf]  ;;  %4234 = vst.msk [vmem:[#allocation3 + $0x210] sm:$0xf] %vm4189_vm4, %v4086_v37  ;;  %4235 = vst.msk [vmem:[#allocation3 + $0x21c] sm:$0xf] %vm4189_vm4, %v4088_v54  ;;  %6155 = vrot.lane.b32.xlu0 %v5973_v24, %s11180_s25  ;;  %v2847_v40 = vor.u32 %v2846_v21, %v2843_v49 }
 0x404   :  { %v7065_v27 = vrot.slane %v7064_v32, 4  ;;  %v7069_v60 = vrot.slane %v7067_v19, 5  ;;  %v16039_v3 = vrot.slane %v2850_v23, 5  ;;  %v2856_v38 = vrot.slane %v2854_v53, 4  ;;  %v4337_v36 = vld [vmem:[#allocation2 + $0x170] sm:$0x1]  ;;  %6157 = vrot.lane.b32.xlu1 %v5974_v41, %s11180_s25  ;;  %v7256_v5 = vpop.permute.xlu0 %7255 }
 0x405   :  { %v2860_v9 = vshll.u32 %v2155_v11, 16  ;;  %v4999_v43 = vshrl.u32 %v4335_v58, 16  ;;  %v3923_v25 = vld [vmem:[#allocation2 + $0x168] sm:$0xf]  ;;  %v3924_v63 = vld [vmem:[#allocation2 + $0x16c] sm:$0xf] }
 0x406   :  { %v10298_v6 = vrot.slane %v16033_v46, 9  ;;  %v16048_v2 = vld [vmem:[#allocation2 + $0x17c] sm:$0x1]  ;;  %v5002_v42 = vshll.u32 %v4335_v58, 16  ;;  %v5008_v52 = vshll.u32 %v4336_v57, 16  ;;  %v5636_v47 = vrot.slane %v16035_v48, 5 }
 0x407   :  { %v5001_v17 = vrot.slane %v4999_v43, 4  ;;  %v5012_v61 = vshrl.u32 %v4336_v57, 16  ;;  %v5018_v12 = vshll.u32 %v4337_v36, 16  ;;  %v1997_v59 = vld [vmem:[#allocation2 + $0x168] sm:$0xf]  ;;  %v7070_v20 = vsel %vm11625_vm15, %v7065_v27, %v7069_v60  ;;  %4105 = vrot.lane.b32.xlu0 %v3923_v25, %s11179_s24  ;;  %v3031_v60 = vpop.permute.xlu1 %3030 }
 0x408   :  { %7403 = vst.msk [vmem:[#allocation3 + $0x214] sm:$0xf] %vm4189_vm4, %v7256_v5  ;;  %7404 = vst.msk [vmem:[#allocation3 + $0x220] sm:$0xf] %vm4189_vm4, %v7258_v33  ;;  %v2857_v44 = vor.u32 %v2856_v38, %v16039_v3  ;;  %v16056_v32 = vld [vmem:[#allocation2 + $0x16c] sm:$0xf]  ;;  %4107 = vrot.lane.b32.xlu1 %v3924_v63, %s11179_s24  ;;  %v3029_v27 = vpop.permute.xlu0 %3028 }
 0x409   :  { %v5004_v19 = vrot.slane %v5002_v42, 5  ;;  %v5010_v23 = vrot.slane %v5008_v52, 5  ;;  %2061 = vst.msk [vmem:[#allocation3 + $0x2a0] sm:$0xf] %vm766_vm2, %v1997_v59  ;;  %v1998_v53 = vld [vmem:[#allocation2 + $0x16c] sm:$0xf] }
 0x40a   :  { %v4338_v8 = vld [vmem:[#allocation2 + $0x174] sm:$0xf]  ;;  %v2862_v15 = vrot.slane %v2860_v9, 5  ;;  %v5639_v24 = vrot.slane %v16048_v2, 5  ;;  %v5014_v41 = vrot.slane %v5012_v61, 4  ;;  %v2848_v11 = vrot.slane %v2847_v40, 4 }
 0x40b   :  { %2062 = vst.msk [vmem:[#allocation3 + $0x2ac] sm:$0xf] %vm766_vm2, %v1998_v53  ;;  %v4339_v49 = vld [vmem:[#allocation2 + $0x178] sm:$0xf]  ;;  %v5023_v21 = vshrl.u32 %v4338_v8, 16  ;;  %v5005_v58 = vor.u32 %v5004_v19, %v5001_v17  ;;  %v5026_v37 = vshll.u32 %v4338_v8, 16  ;;  %7275 = vrot.lane.b32.xlu0 %v7060_v18, %s11179_s24 }
 0x40c   :  { %v5032_v54 = vshll.u32 %v4339_v49, 16  ;;  %v4340_v57 = vld [vmem:[#allocation2 + $0x17c] sm:$0x1]  ;;  %v6387_v38 = vld [vmem:[#allocation2 + $0x180] sm:$0xf]  ;;  %v5015_v36 = vor.u32 %v5014_v41, %v5010_v23  ;;  %v5020_v43 = vrot.slane %v5018_v12, 5  ;;  %7277 = vrot.lane.b32.xlu1 %v7070_v20, %s11179_s24  ;;  %v5755_v8 = vpop.permute.xlu0 %5754  ;;  %v5757_v41 = vpop.permute.xlu1 %5756 }
 0x40d   :  { %v5025_v25 = vrot.slane %v5023_v21, 4  ;;  %v5036_v63 = vshrl.u32 %v4339_v49, 16  ;;  %3175 = vst.msk [vmem:[#allocation3 + $0x228] sm:$0xf] %vm3128_vm0, %v3029_v27  ;;  %3176 = vst.msk [vmem:[#allocation3 + $0x234] sm:$0xf] %vm3128_vm0, %v3031_v60 }
 0x40e   :  { %v2858_v9 = vrot.slane %v2857_v44, 4  ;;  %v5006_v42 = vrot.slane %v5005_v58, 4  ;;  %v5028_v52 = vrot.slane %v5026_v37, 5  ;;  %v5034_v5 = vrot.slane %v5032_v54, 5  ;;  %v6388_v59 = vld [vmem:[#allocation2 + $0x184] sm:$0xf] }
 0x40f   :  { %v3586_v40 = vrot.slane %v16056_v32, 5  ;;  %v5016_v33 = vrot.slane %v5015_v36, 4  ;;  %v5038_v17 = vrot.slane %v5036_v63, 4  ;;  %v5042_v61 = vshll.u32 %v4340_v57, 16  ;;  %v8055_v49 = vld [vmem:[#allocation3 + $0x210] sm:$0xff]  ;;  %v8057_v18 = vld [vmem:[#allocation3 + $0x21c] sm:$0xff] }
 0x410   :  { %v5638_v12 = vrot.slane %v5636_v47, 4  ;;  %v7072_v19 = vshrl.u32 %v6387_v38, 16  ;;  %v5011_v44 = vsel %vm11625_vm15, %v5006_v42, %v5010_v23  ;;  %v5029_v53 = vor.u32 %v5028_v52, %v5025_v25  ;;  %v11115_v21 = vld [vmem:[#allocation3 + $0x214] ss:$12 sps:$4 sm:$0xff]   ;;  %5900 = vst.msk [vmem:[#allocation3 + $0x22c] sm:$0xf] %vm3128_vm0, %v5755_v8  ;;  %v3707_v42 = vpop.permute.xlu1 %3706 }
 0x411   :  { %v7075_v20 = vshll.u32 %v6387_v38, 16  ;;  %5236 = vst.msk [vmem:[#allocation3 + $0x28c] sm:$0xf] %vm766_vm2, %v5011_v44  ;;  %v5021_v58 = vsel %vm11625_vm15, %v5016_v33, %v5020_v43  ;;  %v5039_v37 = vor.u32 %v5038_v17, %v5034_v5  ;;  %v5044_v54 = vrot.slane %v5042_v61, 5  ;;  %v3277_v60 = vld [vmem:[#allocation2 + $0x168] sm:$0xe]  ;;  %9031 = vmatprep.mubr.bf16.mxu1 %v11115_v21 }
 0x412   :  { %5901 = vst.msk [vmem:[#allocation3 + $0x238] sm:$0xf] %vm3128_vm0, %v5757_v41  ;;  %v2853_v23 = vsel %vm11625_vm15, %v2848_v11, %v16039_v3  ;;  %v2863_v57 = vsel %vm11625_vm15, %v2858_v9, %v2862_v15  ;;  %v10401_v27 = vcombine.low %v8055_v49, %v8057_v18  ;;  %v5030_v38 = vrot.slane %v5029_v53, 4  ;;  %v3279_v36 = vld [vmem:[#allocation2 + $0x170] sm:$0x1]  ;;  %v3705_v11 = vpop.permute.xlu0 %3704 }
 0x413   :  { %5237 = vst.msk [vmem:[#allocation3 + $0x298] sm:$0xf] %vm766_vm2, %v5021_v58  ;;  %3048 = vrot.lane.b32.xlu0 %v2853_v23, %s11181_s26  ;;  %3050 = vrot.lane.b32.xlu1 %v2863_v57, %s11181_s26  ;;  %v7081_v43 = vshll.u32 %v6388_v59, 16  ;;  %v7085_v25 = vshrl.u32 %v6388_v59, 16  ;;  %v5040_v63 = vrot.slane %v5039_v37, 4  ;;  %v10266_v15 = vrot.slane %v3277_v60, 9 }
 0x414   :  { %v5035_v3 = vsel %vm11625_vm15, %v5030_v38, %v5034_v5  ;;  %9032 = vmatmul.mubr.bf16.gmra.mxu1 %v10401_v27  ;;  %v7074_v9 = vrot.slane %v7072_v19, 4  ;;  %v7077_v52 = vrot.slane %v7075_v20, 5  ;;  %v2156_v33 = vld [vmem:[#allocation2 + $0x174] sm:$0xf]  ;;  %3851 = vst.msk [vmem:[#allocation3 + $0x228] sm:$0xf] %vm3804_vm3, %v3705_v11  ;;  %v5637_v5 = vsel %vm11586_vm12, %v10298_v6, %v5636_v47  ;;  %v6142_v8 = vpop.permute.xlu1 %6141 }
 0x415   :  { %5238 = vst.msk [vmem:[#allocation3 + $0x2a4] sm:$0xf] %vm766_vm2, %v5035_v3  ;;  %v5045_v17 = vsel %vm11625_vm15, %v5040_v63, %v5044_v54  ;;  %v5640_v61 = vsel %vm11586_vm12, %v5638_v12, %v5639_v24  ;;  %v3588_v59 = vrot.slane %v3586_v40, 4  ;;  %v3589_v19 = vrot.slane %v3279_v36, 5  ;;  %v6389_v44 = vld [vmem:[#allocation2 + $0x188] sm:$0x1] }
 0x416   :  { %3852 = vst.msk [vmem:[#allocation3 + $0x234] sm:$0xf] %vm3804_vm3, %v3707_v42  ;;  %v2157_v53 = vld [vmem:[#allocation2 + $0x178] sm:$0xf]  ;;  %v16107_v46 = vrot.slane %v7081_v43, 5  ;;  %v7087_v48 = vrot.slane %v7085_v25, 4  ;;  %v6140_v47 = vpop.permute.xlu0 %6139  ;;  %v7078_v24 = vor.u32 %v7077_v52, %v7074_v9  ;;  %v3587_v18 = vsel %vm11586_vm12, %v10266_v15, %v3586_v40  ;;  %v16129_v25 = vpop.f32.mrf.mxu1 }
 0x417   :  { %5239 = vst.msk [vmem:[#allocation3 + $0x2b0] sm:$0xf] %vm766_vm2, %v5045_v17  ;;  %5774 = vrot.lane.b32.xlu0 %v5637_v5, %s11181_s26  ;;  %5776 = vrot.lane.b32.xlu1 %v5640_v61, %s11181_s26  ;;  %v2865_v6 = vshrl.u32 %v2156_v33, 16  ;;  %v2868_v2 = vshll.u32 %v2156_v33, 16  ;;  %v7091_v12 = vshll.u32 %v6389_v44, 16  ;;  %v2874_v41 = vshll.u32 %v2157_v53, 16 }
 0x418   :  { %v2878_v49 = vshrl.u32 %v2157_v53, 16  ;;  %6285 = vst.msk [vmem:[#allocation3 + $0x22c] sm:$0xf] %vm3804_vm3, %v6140_v47  ;;  %6286 = vst.msk [vmem:[#allocation3 + $0x238] sm:$0xf] %vm3804_vm3, %v6142_v8  ;;  %v3590_v21 = vsel %vm11586_vm12, %v3588_v59, %v3589_v19  ;;  %v7088_v20 = vor.u32 %v7087_v48, %v16107_v46  ;;  %v4092_v60 = vpop.permute.xlu1 %4091  ;;  %v16120_v32 = vrot.slane %v7078_v24, 4  ;;  %v8979_v33 = vpop.f32.mrf.mxu1 }
 0x419   :  { %v5975_v58 = vld [vmem:[#allocation2 + $0x180] sm:$0xf]  ;;  %v5976_v37 = vld [vmem:[#allocation2 + $0x184] sm:$0xf]  ;;  %v2867_v54 = vrot.slane %v2865_v6, 4  ;;  %v2870_v23 = vrot.slane %v2868_v2, 5 }
 0x41a   :  { %v1999_v57 = vld [vmem:[#allocation2 + $0x174] sm:$0xf]  ;;  %v4090_v27 = vpop.permute.xlu0 %4089  ;;  %v16122_v38 = vrot.slane %v7091_v12, 5  ;;  %v16124_v40 = vrot.slane %v2874_v41, 5  ;;  %v2158_v36 = vld [vmem:[#allocation2 + $0x17c] sm:$0x1]  ;;  %v16139_v24 = vpop.f32.mrf.mxu1 }
 0x41b   :  { %3724 = vrot.lane.b32.xlu0 %v3587_v18, %s11180_s25  ;;  %3726 = vrot.lane.b32.xlu1 %v3590_v21, %s11180_s25  ;;  %v2880_v43 = vrot.slane %v2878_v49, 4  ;;  %2063 = vst.msk [vmem:[#allocation3 + $0x2b8] sm:$0xf] %vm766_vm2, %v1999_v57  ;;  %17202 = vst [vmem:[#allocation17_spill] sm:$0xff] %v16129_v25  ;;  %v2000_v63 = vld [vmem:[#allocation2 + $0x178] sm:$0xf]  ;;  %v2871_v61 = vor.u32 %v2870_v23, %v2867_v54  ;;  %v7084_v21 = vsel %vm11625_vm15, %v16120_v32, %v16107_v46 }
 0x41c   :  { %4236 = vst.msk [vmem:[#allocation3 + $0x228] sm:$0xf] %vm4189_vm4, %v4090_v27  ;;  %4237 = vst.msk [vmem:[#allocation3 + $0x234] sm:$0xf] %vm4189_vm4, %v4092_v60  ;;  %v4341_v3 = vld [vmem:[#allocation2 + $0x180] sm:$0xf]  ;;  %v7262_v53 = vpop.permute.xlu1 %7261  ;;  %v8982_v23 = vpop.f32.mrf.mxu1 }
 0x41d   :  { %v4342_v11 = vld [vmem:[#allocation2 + $0x184] sm:$0xf]  ;;  %v7089_v42 = vrot.slane %v7088_v20, 4  ;;  %2064 = vst.msk [vmem:[#allocation3 + $0x2c4] sm:$0xf] %vm766_vm2, %v2000_v63  ;;  %v5047_v15 = vshrl.u32 %v4341_v3, 16  ;;  %v2881_v48 = vor.u32 %v2880_v43, %v16124_v40 }
 0x41e   :  { %v5050_v9 = vshll.u32 %v4341_v3, 16  ;;  %v5056_v52 = vshll.u32 %v4342_v11, 16  ;;  %v3925_v17 = vld [vmem:[#allocation2 + $0x174] sm:$0xf]  ;;  %v3926_v5 = vld [vmem:[#allocation2 + $0x178] sm:$0xf]  ;;  %v7260_v44 = vpop.permute.xlu0 %7259 }
 0x41f   :  { %6159 = vrot.lane.b32.xlu0 %v5975_v58, %s11180_s25  ;;  %6161 = vrot.lane.b32.xlu1 %v5976_v37, %s11180_s25  ;;  %v2884_v59 = vshll.u32 %v2158_v36, 16  ;;  %v5060_v19 = vshrl.u32 %v4342_v11, 16  ;;  %v16135_v6 = vld [vmem:[#allocation2 + $0x184] sm:$0xf]  ;;  %v5049_v2 = vrot.slane %v5047_v15, 4  ;;  %17203 = vst [vmem:[#allocation14_spill] sm:$0xff] %v16139_v24  ;;  %v7094_v20 = vsel %vm11625_vm15, %v7089_v42, %v16122_v38 }
 0x420   :  { %v5052_v47 = vrot.slane %v5050_v9, 5  ;;  %v5058_v8 = vrot.slane %v5056_v52, 5  ;;  %7405 = vst.msk [vmem:[#allocation3 + $0x22c] sm:$0xf] %vm4189_vm4, %v7260_v44  ;;  %7406 = vst.msk [vmem:[#allocation3 + $0x238] sm:$0xf] %vm4189_vm4, %v7262_v53  ;;  %v3035_v3 = vpop.permute.xlu1 %3034 }
 0x421   :  { %v6390_v12 = vld [vmem:[#allocation2 + $0x18c] sm:$0xf]  ;;  %v4343_v41 = vld [vmem:[#allocation2 + $0x188] sm:$0x1]  ;;  %v5062_v49 = vrot.slane %v5060_v19, 4  ;;  %v2872_v57 = vrot.slane %v2871_v61, 4 }
 0x422   :  { %v16141_v18 = vld [vmem:[#allocation5] ss:$0 sm:$0xff]  ;;  %v5053_v37 = vor.u32 %v5052_v47, %v5049_v2  ;;  %v5066_v54 = vshll.u32 %v4343_v41, 16  ;;  %v2886_v27 = vrot.slane %v2884_v59, 5  ;;  %v5333_v60 = vld [vmem:[#allocation2 + $0x180] sm:$0xe]  ;;  %v3033_v63 = vpop.permute.xlu0 %3032 }
 0x423   :  { %4109 = vrot.lane.b32.xlu0 %v3925_v17, %s11179_s24  ;;  %4111 = vrot.lane.b32.xlu1 %v3926_v5, %s11179_s24  ;;  %v6391_v58 = vld [vmem:[#allocation2 + $0x190] sm:$0xf]  ;;  %v5643_v36 = vrot.slane %v16135_v6, 5  ;;  %v5063_v43 = vor.u32 %v5062_v49, %v5058_v8  ;;  %v2882_v11 = vrot.slane %v2881_v48, 4  ;;  %v5335_v15 = vld [vmem:[#allocation2 + $0x188] sm:$0x1]  ;;  %v16159_v5 = vadd.f32 %v16141_v18, %v13972_v26 }
 0x424   :  { %v7096_v9 = vshrl.u32 %v6390_v12, 16  ;;  %v5054_v46 = vrot.slane %v5053_v37, 4  ;;  %v5068_v32 = vrot.slane %v5066_v54, 5  ;;  %3177 = vst.msk [vmem:[#allocation3 + $0x240] sm:$0xf] %vm3128_vm0, %v3033_v63  ;;  %v7099_v42 = vshll.u32 %v6390_v12, 16  ;;  %v5761_v41 = vpop.permute.xlu1 %5760 }
 0x425   :  { %3178 = vst.msk [vmem:[#allocation3 + $0x24c] sm:$0xf] %vm3128_vm0, %v3035_v3  ;;  %v16155_v38 = vld [vmem:[#allocation2 + $0x178] sm:$0xf]  ;;  %v7105_v52 = vshll.u32 %v6391_v58, 16  ;;  %v7109_v33 = vshrl.u32 %v6391_v58, 16  ;;  %v2877_v49 = vsel %vm11625_vm15, %v2872_v57, %v16124_v40 }
 0x426   :  { %v5064_v17 = vrot.slane %v5063_v43, 4  ;;  %v17204_v61 = vld [vmem:[#allocation45_spill] sm:$0xff]  ;;  %v16167_v19 = vld [vmem:[#allocation2 + $0x174] sm:$0xe]  ;;  %v5059_v44 = vsel %vm11625_vm15, %v5054_v46, %v5058_v8  ;;  %v10299_v53 = vrot.slane %v5333_v60, 9  ;;  %v5645_v48 = vrot.slane %v5643_v36, 4  ;;  %v5759_v12 = vpop.permute.xlu0 %5758 }
 0x427   :  { %v16163_v59 = vadd.f32 %v16141_v18, %v17204_v61  ;;  %7279 = vrot.lane.b32.xlu0 %v7084_v21, %s11179_s24  ;;  %7281 = vrot.lane.b32.xlu1 %v7094_v20, %s11179_s24  ;;  %v5646_v6 = vrot.slane %v5335_v15, 5  ;;  %v3282_v2 = vld [vmem:[#allocation2 + $0x17c] sm:$0x1]  ;;  %v2159_v47 = vld [vmem:[#allocation2 + $0x180] sm:$0xf]  ;;  %v2887_v21 = vsel %vm11625_vm15, %v2882_v11, %v2886_v27  ;;  %v8061_v20 = vld [vmem:[#allocation3 + $0x234] sm:$0xff] }
 0x428   :  { %5240 = vst.msk [vmem:[#allocation3 + $0x2bc] sm:$0xf] %vm766_vm2, %v5059_v44  ;;  %v5069_v26 = vsel %vm11625_vm15, %v5064_v17, %v5068_v32  ;;  %v8059_v8 = vld [vmem:[#allocation3 + $0x228] sm:$0xff]  ;;  %v3593_v37 = vrot.slane %v16155_v38, 5  ;;  %v7098_v54 = vrot.slane %v7096_v9, 4  ;;  %v7101_v60 = vrot.slane %v7099_v42, 5  ;;  %v3711_v17 = vpop.permute.xlu1 %3710 }
 0x429   :  { %v11117_v58 = vld [vmem:[#allocation3 + $0x22c] ss:$12 sps:$4 sm:$0xff]   ;;  %5241 = vst.msk [vmem:[#allocation3 + $0x2c8] sm:$0xf] %vm766_vm2, %v5069_v26  ;;  %v10404_v23 = vcombine.low %v8059_v8, %v8061_v20  ;;  %v16183_v43 = vrot.slane %v7105_v52, 5  ;;  %v7111_v57 = vrot.slane %v7109_v33, 4  ;;  %v5644_v32 = vsel %vm11586_vm12, %v10299_v53, %v5643_v36 }
 0x42a   :  { %5902 = vst.msk [vmem:[#allocation3 + $0x244] sm:$0xf] %vm3128_vm0, %v5759_v12  ;;  %5903 = vst.msk [vmem:[#allocation3 + $0x250] sm:$0xf] %vm3128_vm0, %v5761_v41  ;;  %v6392_v40 = vld [vmem:[#allocation2 + $0x194] sm:$0x1]  ;;  %9039 = vmatprep.mubr.bf16.mxu1 %v11117_v58  ;;  %v3709_v33 = vpop.permute.xlu0 %3708  ;;  %v5647_v61 = vsel %vm11586_vm12, %v5645_v48, %v5646_v6  ;;  %v8857_v41 = vpop.f32.mrf.mxu0  ;;  %v16223_v58 = vadd.f32 %v16141_v18, %v14974_v30 }
 0x42b   :  { %v17205_v63 = vld [vmem:[#allocation46_spill] sm:$0xff]  ;;  %v17206_v3 = vld [vmem:[#allocation47_spill] sm:$0xff]  ;;  %v17207_v15 = vld [vmem:[#allocation8_spill] sm:$0xff]  ;;  %3052 = vrot.lane.b32.xlu0 %v2877_v49, %s11181_s26  ;;  %3054 = vrot.lane.b32.xlu1 %v2887_v21, %s11181_s26  ;;  %v10267_v38 = vrot.slane %v16167_v19, 9  ;;  %v2889_v42 = vshrl.u32 %v2159_v47, 16  ;;  %v2892_v52 = vshll.u32 %v2159_v47, 16  ;;  %v7102_v49 = vor.u32 %v7101_v60, %v7098_v54 }
 0x42c   :  { %v16187_v27 = vadd.f32 %v16141_v18, %v17205_v63  ;;  %v16191_v11 = vadd.f32 %v16141_v18, %v17206_v3  ;;  %v16195_v9 = vadd.f32 %v16141_v18, %v17207_v15  ;;  %v2160_v46 = vld [vmem:[#allocation2 + $0x184] sm:$0xf]  ;;  %9040 = vmatmul.mubr.bf16.gmra.mxu1 %v10404_v23  ;;  %v3595_v44 = vrot.slane %v3593_v37, 4  ;;  %3853 = vst.msk [vmem:[#allocation3 + $0x240] sm:$0xf] %vm3804_vm3, %v3709_v33  ;;  %v17208_v21 = vld [vmem:[#allocation11_spill] sm:$0xff]  ;;  %v8859_v23 = vpop.f32.mrf.mxu0  ;;  %v6146_v63 = vpop.permute.xlu1 %6145 }
 0x42d   :  { %v3596_v26 = vrot.slane %v3282_v2, 5  ;;  %v7115_v12 = vshll.u32 %v6392_v40, 16  ;;  %3854 = vst.msk [vmem:[#allocation3 + $0x24c] sm:$0xf] %vm3804_vm3, %v3711_v17  ;;  %v7112_v36 = vor.u32 %v7111_v57, %v16183_v43  ;;  %v2898_v19 = vshll.u32 %v2160_v46, 16  ;;  %v17209_v20 = vld [vmem:[#allocation13_spill] sm:$0xff] }
 0x42e   :  { %v2902_v53 = vshrl.u32 %v2160_v46, 16  ;;  %v2161_v47 = vld [vmem:[#allocation2 + $0x188] sm:$0x1]  ;;  %v16209_v8 = vadd.f32 %v16141_v18, %v17208_v21  ;;  %v16213_v48 = vadd.f32 %v16141_v18, %v17209_v20  ;;  %v17210_v6 = vld [vmem:[#allocation6_spill] sm:$0xff]  ;;  %v16227_v54 = vadd.f32 %v16141_v18, %v14996_v34  ;;  %v6144_v57 = vpop.permute.xlu0 %6143  ;;  %v16235_v30 = vld [vmem:[#allocation2 + $0x18c] sm:$0xe]  ;;  %v8860_v34 = vpop.f32.mrf.mxu0 }
 0x42f   :  { %v16217_v2 = vadd.f32 %v16141_v18, %v17210_v6  ;;  %5778 = vrot.lane.b32.xlu0 %v5644_v32, %s11181_s26  ;;  %5780 = vrot.lane.b32.xlu1 %v5647_v61, %s11181_s26  ;;  %v2891_v60 = vrot.slane %v2889_v42, 4  ;;  %v2894_v40 = vrot.slane %v2892_v52, 5  ;;  %v3594_v3 = vsel %vm11586_vm12, %v10267_v38, %v3593_v37  ;;  %v16237_v33 = vld [vmem:[#allocation2 + $0x190] sm:$0xf]  ;;  %6287 = vst.msk [vmem:[#allocation3 + $0x244] sm:$0xf] %vm3804_vm3, %v6144_v57 }
 0x430   :  { %v3597_v15 = vsel %vm11586_vm12, %v3595_v44, %v3596_v26  ;;  %v16233_v46 = vrot.slane %v7115_v12, 5  ;;  %v2908_v32 = vshll.u32 %v2161_v47, 16  ;;  %6288 = vst.msk [vmem:[#allocation3 + $0x250] sm:$0xf] %vm3804_vm3, %v6146_v63  ;;  %v16241_v42 = vrot.slane %v7102_v49, 4  ;;  %v4096_v21 = vpop.permute.xlu1 %4095 }
 0x431   :  { %v16243_v52 = vrot.slane %v7112_v36, 4  ;;  %v16245_v37 = vrot.slane %v2898_v19, 5  ;;  %v2904_v38 = vrot.slane %v2902_v53, 4  ;;  %v2001_v17 = vld [vmem:[#allocation2 + $0x180] sm:$0xf]  ;;  %v16249_v61 = vadd.f32 %v16141_v18, %v15029_v31 }
 0x432   :  { %v16253_v44 = vadd.f32 %v16141_v18, %v15103_v39  ;;  %v16257_v26 = vadd.f32 %v16141_v18, %v15386_v10  ;;  %2065 = vst.msk [vmem:[#allocation3 + $0x2d0] sm:$0xf] %vm766_vm2, %v2001_v17  ;;  %v16264_v12 = vadd.f32 %v16141_v18, %v15416_v56  ;;  %v16268_v31 = vadd.f32 %v16141_v18, %v15443_v29  ;;  %v8862_v39 = vpop.f32.mrf.mxu0  ;;  %v5977_v49 = vld [vmem:[#allocation2 + $0x18c] sm:$0xf]  ;;  %v5978_v36 = vld [vmem:[#allocation2 + $0x190] sm:$0xf]  ;;  %v4094_v47 = vpop.permute.xlu0 %4093 }
 0x433   :  { %3728 = vrot.lane.b32.xlu0 %v3594_v3, %s11180_s25  ;;  %3730 = vrot.lane.b32.xlu1 %v3597_v15, %s11180_s25  ;;  %v2895_v19 = vor.u32 %v2894_v40, %v2891_v60  ;;  %v16981_v10 = vrot.slane %v16237_v33, 5  ;;  %v16273_v53 = vadd.f32 %v16141_v18, %v15464_v55  ;;  %v16275_v20 = vrot.slane %v2908_v32, 5  ;;  %v16278_v6 = vld [vmem:[#allocation2 + $0x194] sm:$0x1]  ;;  %4238 = vst.msk [vmem:[#allocation3 + $0x240] sm:$0xf] %vm4189_vm4, %v4094_v47 }
 0x434   :  { %v8858_v29 = vadd.f32 %v16141_v18, %v8857_v41  ;;  %4239 = vst.msk [vmem:[#allocation3 + $0x24c] sm:$0xf] %vm4189_vm4, %v4096_v21  ;;  %v10878_v23 = vpop.f32.mrf.mxu0  ;;  %v2905_v40 = vor.u32 %v2904_v38, %v16245_v37  ;;  %v2002_v57 = vld [vmem:[#allocation2 + $0x184] sm:$0xf]  ;;  %v4344_v63 = vld [vmem:[#allocation2 + $0x18c] sm:$0xf]  ;;  %v7266_v55 = vpop.permute.xlu1 %7265  ;;  %v8861_v24 = vadd.f32 %v16141_v18, %v8860_v34 }
 0x435   :  { %v4345_v41 = vld [vmem:[#allocation2 + $0x190] sm:$0xf]  ;;  %v9155_v3 = vadd.f32 %v10878_v23, %v16159_v5  ;;  %2066 = vst.msk [vmem:[#allocation3 + $0x2dc] sm:$0xf] %vm766_vm2, %v2002_v57  ;;  %v5071_v15 = vshrl.u32 %v4344_v63, 16  ;;  %v5074_v32 = vshll.u32 %v4344_v63, 16 }
 0x436   :  { %v5080_v17 = vshll.u32 %v4345_v41, 16  ;;  %v9146_v39 = vpop.f32.mrf.mxu0  ;;  %v3927_v47 = vld [vmem:[#allocation2 + $0x180] sm:$0xf]  ;;  %v3928_v21 = vld [vmem:[#allocation2 + $0x184] sm:$0xf]  ;;  %v16296_v56 = vrot.slane %v2895_v19, 4 }
 0x437   :  { %6163 = vrot.lane.b32.xlu0 %v5977_v49, %s11180_s25  ;;  %6165 = vrot.lane.b32.xlu1 %v5978_v36, %s11180_s25  ;;  %v16300_v38 = vrot.slane %v16981_v10, 4  ;;  %v5084_v23 = vshrl.u32 %v4345_v41, 16  ;;  %v9403_v49 = vmax.f32 %v9155_v3, 0.0  ;;  %v9147_v60 = vadd.f32 %v9146_v39, %v8858_v29  ;;  %v7264_v36 = vpop.permute.xlu0 %7263  ;;  %v16303_v57 = vld [vmem:[#allocation2 + $0x198] sm:$0xf] }
 0x438   :  { %v5073_v63 = vrot.slane %v5071_v15, 4  ;;  %v5076_v14 = vrot.slane %v5074_v32, 5  ;;  %7407 = vst.msk [vmem:[#allocation3 + $0x244] sm:$0xf] %vm4189_vm4, %v7264_v36  ;;  %7408 = vst.msk [vmem:[#allocation3 + $0x250] sm:$0xf] %vm4189_vm4, %v7266_v55  ;;  %v10879_v19 = vpop.f32.mrf.mxu0 }
 0x439   :  { %v16308_v10 = vrot.slane %v2905_v40, 4  ;;  %v5082_v62 = vrot.slane %v5080_v17, 5  ;;  %v4346_v5 = vld [vmem:[#allocation2 + $0x194] sm:$0x1]  ;;  %v5086_v41 = vrot.slane %v5084_v23, 4  ;;  %v10631_v3 = vpack.c.bf16 %v9403_v49, %v9403_v49 }
 0x43a   :  { %v9401_v29 = vmax.f32 %v9147_v60, 0.0  ;;  %v9158_v39 = vadd.f32 %v10879_v19, %v16163_v59  ;;  %v6394_v15 = vld [vmem:[#allocation2 + $0x19c] sm:$0xf]  ;;  %v5077_v34 = vor.u32 %v5076_v14, %v5073_v63  ;;  %v9149_v32 = vpop.f32.mrf.mxu0  ;;  %v7120_v36 = vshrl.u32 %v16303_v57, 16  ;;  %v3039_v59 = vpop.permute.xlu1 %3038  ;;  %v16316_v19 = vld [vmem:[#allocation2 + $0x184] sm:$0xf] }
 0x43b   :  { %4113 = vrot.lane.b32.xlu0 %v3927_v47, %s11179_s24  ;;  %4115 = vrot.lane.b32.xlu1 %v3928_v21, %s11179_s24  ;;  %v7123_v55 = vshll.u32 %v16303_v57, 16  ;;  %v5087_v40 = vor.u32 %v5086_v41, %v5082_v62  ;;  %v5090_v25 = vshll.u32 %v4346_v5, 16  ;;  %9612 = vst.msk [vmem:[#allocation4 + $0x8] sm:$0xf] %vm9609_vm5, %v10631_v3  ;;  %v9150_v60 = vadd.f32 %v9149_v32, %v8861_v24  ;;  %v3037_v49 = vpop.permute.xlu0 %3036 }
 0x43c   :  { %v10629_v17 = vpack.c.bf16 %v9401_v29, %v9401_v29  ;;  %v9404_v23 = vmax.f32 %v9158_v39, 0.0  ;;  %v5078_v47 = vrot.slane %v5077_v34, 4  ;;  %3179 = vst.msk [vmem:[#allocation3 + $0x258] sm:$0xf] %vm3128_vm0, %v3037_v49  ;;  %3180 = vst.msk [vmem:[#allocation3 + $0x264] sm:$0xf] %vm3128_vm0, %v3039_v59  ;;  %v10882_v14 = vpop.f32.mrf.mxu0  ;;  %v17211_v29 = vsel %vm11625_vm15, %v16241_v42, %v16183_v43 }
 0x43d   :  { %v7129_v21 = vshll.u32 %v6394_v15, 16  ;;  %v7133_v63 = vshrl.u32 %v6394_v15, 16  ;;  %v5088_v57 = vrot.slane %v5087_v40, 4  ;;  %v5092_v41 = vrot.slane %v5090_v25, 5  ;;  %v16344_v42 = vld [vmem:[#allocation2 + $0x180] sm:$0xe] }
 0x43e   :  { %9610 = vst.msk [vmem:[#allocation4] sm:$0xf] %vm9609_vm5, %v10629_v17  ;;  %v10632_v5 = vpack.c.bf16 %v9404_v23, %v9404_v23  ;;  %v9402_v3 = vmax.f32 %v9150_v60, 0.0  ;;  %v9171_v24 = vadd.f32 %v10882_v14, %v16195_v9  ;;  %v17212_v39 = vsel %vm11625_vm15, %v16243_v52, %v16233_v46  ;;  %v9162_v15 = vpop.f32.mrf.mxu0  ;;  %v16347_v46 = vld [vmem:[#allocation2 + $0x188] sm:$0x1]  ;;  %v5765_v40 = vpop.permute.xlu1 %5764 }
 0x43f   :  { %7283 = vrot.lane.b32.xlu0 %v17211_v29, %s11179_s24  ;;  %7285 = vrot.lane.b32.xlu1 %v17212_v39, %s11179_s24  ;;  %v5083_v25 = vsel %vm11625_vm15, %v5078_v47, %v5082_v62  ;;  %v2901_v9 = vsel %vm11625_vm15, %v16296_v56, %v16245_v37  ;;  %v2911_v43 = vsel %vm11625_vm15, %v16308_v10, %v16275_v20  ;;  %v3600_v34 = vrot.slane %v16316_v19, 5  ;;  %v5763_v32 = vpop.permute.xlu0 %5762  ;;  %v8063_v10 = vld [vmem:[#allocation3 + $0x240] sm:$0xff]  ;;  %v8065_v20 = vld [vmem:[#allocation3 + $0x24c] sm:$0xff]  ;;  %v16406_v19 = vld [vmem:[#allocation2 + $0x198] sm:$0xe] }
 0x440   :  { %5242 = vst.msk [vmem:[#allocation3 + $0x2d4] sm:$0xf] %vm766_vm2, %v5083_v25  ;;  %v5093_v62 = vsel %vm11625_vm15, %v5088_v57, %v5092_v41  ;;  %v10630_v52 = vpack.c.bf16 %v9402_v3, %v9402_v3  ;;  %v9407_v37 = vmax.f32 %v9171_v24, 0.0  ;;  %v9163_v56 = vadd.f32 %v9162_v15, %v16187_v27  ;;  %v11121_v17 = vld [vmem:[#allocation3 + $0x244] ss:$12 sps:$4 sm:$0xff]   ;;  %v10883_v60 = vpop.f32.mrf.mxu0 }
 0x441   :  { %9613 = vst.msk [vmem:[#allocation4 + $0xc] sm:$0xf] %vm9609_vm5, %v10632_v5  ;;  %v16354_v23 = vrot.slane %v7120_v36, 4  ;;  %v10407_v49 = vcombine.low %v8063_v10, %v8065_v20  ;;  %v7125_v59 = vrot.slane %v7123_v55, 5  ;;  %v16359_v47 = vrot.slane %v7129_v21, 5  ;;  %9047 = vmatprep.mubr.bf16.mxu1 %v11121_v17 }
 0x442   :  { %5243 = vst.msk [vmem:[#allocation3 + $0x2e0] sm:$0xf] %vm766_vm2, %v5093_v62  ;;  %v6395_v14 = vld [vmem:[#allocation2 + $0x1a0] sm:$0x1]  ;;  %v7135_v27 = vrot.slane %v7133_v63, 4  ;;  %v10635_v57 = vpack.c.bf16 %v9407_v37, %v9407_v37  ;;  %v9405_v41 = vmax.f32 %v9163_v56, 0.0  ;;  %v9174_v36 = vadd.f32 %v10883_v60, %v16209_v8  ;;  %v9165_v24 = vpop.f32.mrf.mxu0 }
 0x443   :  { %5904 = vst.msk [vmem:[#allocation3 + $0x25c] sm:$0xf] %vm3128_vm0, %v5763_v32  ;;  %5905 = vst.msk [vmem:[#allocation3 + $0x268] sm:$0xf] %vm3128_vm0, %v5765_v40  ;;  %3056 = vrot.lane.b32.xlu0 %v2901_v9, %s11181_s26  ;;  %3058 = vrot.lane.b32.xlu1 %v2911_v43, %s11181_s26  ;;  %v17213_v5 = vrot.slane %v16237_v33, 5  ;;  %v17214_v3 = vrot.slane %v16235_v30, 9  ;;  %v9166_v15 = vadd.f32 %v9165_v24, %v16191_v11  ;;  %v3713_v9 = vpop.permute.xlu0 %3712  ;;  %v3715_v43 = vpop.permute.xlu1 %3714 }
 0x444   :  { %9611 = vst.msk [vmem:[#allocation4 + $0x4] sm:$0xf] %vm9609_vm5, %v10630_v52  ;;  %v2162_v21 = vld [vmem:[#allocation2 + $0x18c] sm:$0xf]  ;;  %v17215_v63 = vrot.slane %v16278_v6, 5  ;;  %v10268_v29 = vrot.slane %v16344_v42, 9  ;;  %v10633_v30 = vpack.c.bf16 %v9405_v41, %v9405_v41  ;;  %9048 = vmatmul.mubr.bf16.gmra.mxu1 %v10407_v49  ;;  %v10886_v42 = vpop.f32.mrf.mxu0  ;;  %v7136_v52 = vor.u32 %v7135_v27, %v16359_v47 }
 0x445   :  { %v5651_v55 = vsel %vm11586_vm12, %v17214_v3, %v17213_v5  ;;  %v3602_v39 = vrot.slane %v3600_v34, 4  ;;  %v3603_v33 = vrot.slane %v16347_v46, 5  ;;  %9616 = vst.msk [vmem:[#allocation4 + $0x18] sm:$0xf] %vm9609_vm5, %v10635_v57  ;;  %v9408_v25 = vmax.f32 %v9174_v36, 0.0 }
 0x446   :  { %v5654_v8 = vsel %vm11586_vm12, %v16300_v38, %v17215_v63  ;;  %v7139_v6 = vshll.u32 %v6395_v14, 16  ;;  %v2163_v62 = vld [vmem:[#allocation2 + $0x190] sm:$0xf]  ;;  %3855 = vst.msk [vmem:[#allocation3 + $0x258] sm:$0xf] %vm3804_vm3, %v3713_v9  ;;  %v16384_v38 = vpop.f32.mrf.mxu1  ;;  %v7126_v46 = vor.u32 %v7125_v59, %v16354_v23  ;;  %v2913_v37 = vshrl.u32 %v2162_v21, 16  ;;  %v9178_v17 = vpop.f32.mrf.mxu0 }
 0x447   :  { %3856 = vst.msk [vmem:[#allocation3 + $0x264] sm:$0xf] %vm3804_vm3, %v3715_v43  ;;  %v2916_v56 = vshll.u32 %v2162_v21, 16  ;;  %v16390_v11 = vadd.f32 %v16141_v18, %v15707_v45  ;;  %v10636_v32 = vpack.c.bf16 %v9408_v25, %v9408_v25  ;;  %v9406_v40 = vmax.f32 %v9166_v15, 0.0  ;;  %5782 = vrot.lane.b32.xlu0 %v5651_v55, %s11181_s26  ;;  %5784 = vrot.lane.b32.xlu1 %v5654_v8, %s11181_s26  ;;  %v6148_v27 = vpop.permute.xlu0 %6147  ;;  %v6150_v57 = vpop.permute.xlu1 %6149  ;;  %v2164_v36 = vld [vmem:[#allocation2 + $0x194] sm:$0x1] }
 0x448   :  { %9614 = vst.msk [vmem:[#allocation4 + $0x10] sm:$0xf] %vm9609_vm5, %v10633_v30  ;;  %v9187_v10 = vadd.f32 %v10886_v42, %v16223_v58  ;;  %v8987_v20 = vpop.f32.mrf.mxu1  ;;  %v3601_v23 = vsel %vm11586_vm12, %v10268_v29, %v3600_v34  ;;  %v3604_v45 = vsel %vm11586_vm12, %v3602_v39, %v3603_v33  ;;  %v2922_v60 = vshll.u32 %v2163_v62, 16  ;;  %v10887_v5 = vpop.f32.mrf.mxu0  ;;  %v2003_v24 = vld [vmem:[#allocation2 + $0x18c] sm:$0xf] }
 0x449   :  { %v2926_v49 = vshrl.u32 %v2163_v62, 16  ;;  %9617 = vst.msk [vmem:[#allocation4 + $0x1c] sm:$0xf] %vm9609_vm5, %v10636_v32  ;;  %v10634_v59 = vpack.c.bf16 %v9406_v40, %v9406_v40  ;;  %v9179_v14 = vadd.f32 %v9178_v17, %v16213_v48  ;;  %v16404_v41 = vrot.slane %v7139_v6, 5  ;;  %v4348_v20 = vld [vmem:[#allocation2 + $0x19c] sm:$0xf] }
 0x44a   :  { %v9411_v58 = vmax.f32 %v9187_v10, 0.0  ;;  %6289 = vst.msk [vmem:[#allocation3 + $0x25c] sm:$0xf] %vm3804_vm3, %v6148_v27  ;;  %6290 = vst.msk [vmem:[#allocation3 + $0x268] sm:$0xf] %vm3804_vm3, %v6150_v57  ;;  %v16410_v34 = vpop.f32.mrf.mxu1  ;;  %v16412_v3 = vrot.slane %v7126_v46, 4  ;;  %v16422_v63 = vadd.f32 %v16141_v18, %v15719_v35  ;;  %v9190_v39 = vadd.f32 %v10887_v5, %v16227_v54  ;;  %v9181_v25 = vpop.f32.mrf.mxu0 }
 0x44b   :  { %v16414_v55 = vrot.slane %v7136_v52, 4  ;;  %v16416_v21 = vrot.slane %v2913_v37, 4  ;;  %v16418_v48 = vrot.slane %v2916_v56, 5  ;;  %9615 = vst.msk [vmem:[#allocation4 + $0x14] sm:$0xf] %vm9609_vm5, %v10634_v59  ;;  %v9409_v29 = vmax.f32 %v9179_v14, 0.0  ;;  %3732 = vrot.lane.b32.xlu0 %v3601_v23, %s11180_s25  ;;  %3734 = vrot.lane.b32.xlu1 %v3604_v45, %s11180_s25  ;;  %v4098_v62 = vpop.permute.xlu0 %4097  ;;  %v4100_v42 = vpop.permute.xlu1 %4099 }
 0x44c   :  { %v10639_v8 = vpack.c.bf16 %v9411_v58, %v9411_v58  ;;  %2067 = vst.msk [vmem:[#allocation3 + $0x2e8] sm:$0xf] %vm766_vm2, %v2003_v24  ;;  %v16431_v33 = vadd.f32 %v16141_v18, %v15752_v4  ;;  %v8990_v30 = vpop.f32.mrf.mxu1  ;;  %v16433_v35 = vrot.slane %v2922_v60, 5  ;;  %v16435_v15 = vrot.slane %v2926_v49, 4  ;;  %v5979_v46 = vld [vmem:[#allocation2 + $0x198] sm:$0xf]  ;;  %v10890_v56 = vpop.f32.mrf.mxu0 }
 0x44d   :  { %v2932_v9 = vshll.u32 %v2164_v36, 16  ;;  %v10637_v54 = vpack.c.bf16 %v9409_v29, %v9409_v29  ;;  %v9412_v43 = vmax.f32 %v9190_v39, 0.0  ;;  %v9182_v6 = vadd.f32 %v9181_v25, %v16217_v2  ;;  %v5980_v52 = vld [vmem:[#allocation2 + $0x19c] sm:$0xf]  ;;  %4240 = vst.msk [vmem:[#allocation3 + $0x258] sm:$0xf] %vm4189_vm4, %v4098_v62 }
 0x44e   :  { %9620 = vst.msk [vmem:[#allocation4 + $0x28] sm:$0xf] %vm9609_vm5, %v10639_v8  ;;  %v10301_v4 = vrot.slane %v16406_v19, 9  ;;  %v16442_v37 = vadd.f32 %v16141_v18, %v15876_v51  ;;  %v7132_v2 = vsel %vm11625_vm15, %v16412_v3, %v16359_v47  ;;  %v7142_v32 = vsel %vm11625_vm15, %v16414_v55, %v16404_v41  ;;  %v2004_v51 = vld [vmem:[#allocation2 + $0x190] sm:$0xf]  ;;  %v9194_v49 = vpop.f32.mrf.mxu0 }
 0x44f   :  { %4241 = vst.msk [vmem:[#allocation3 + $0x264] sm:$0xf] %vm4189_vm4, %v4100_v42  ;;  %v2919_v40 = vor.u32 %v16418_v48, %v16416_v21  ;;  %v4347_v10 = vld [vmem:[#allocation2 + $0x198] sm:$0xf]  ;;  %v10640_v17 = vpack.c.bf16 %v9412_v43, %v9412_v43  ;;  %v9410_v23 = vmax.f32 %v9182_v6, 0.0  ;;  %v9203_v45 = vadd.f32 %v10890_v56, %v16257_v26  ;;  %6167 = vrot.lane.b32.xlu0 %v5979_v46, %s11180_s25  ;;  %v7268_v21 = vpop.permute.xlu0 %7267  ;;  %v7270_v48 = vpop.permute.xlu1 %7269 }
 0x450   :  { %9618 = vst.msk [vmem:[#allocation4 + $0x20] sm:$0xf] %vm9609_vm5, %v10637_v54  ;;  %6169 = vrot.lane.b32.xlu1 %v5980_v52, %s11180_s25  ;;  %v5095_v60 = vshrl.u32 %v4347_v10, 16  ;;  %v3929_v59 = vld [vmem:[#allocation2 + $0x18c] sm:$0xf]  ;;  %v16461_v58 = vrot.slane %v2932_v9, 5  ;;  %v9195_v26 = vadd.f32 %v9194_v49, %v16249_v61  ;;  %v10891_v39 = vpop.f32.mrf.mxu0  ;;  %v2929_v30 = vor.u32 %v16435_v15, %v16433_v35 }
 0x451   :  { %2068 = vst.msk [vmem:[#allocation3 + $0x2f4] sm:$0xf] %vm766_vm2, %v2004_v51  ;;  %v5098_v14 = vshll.u32 %v4347_v10, 16  ;;  %v5104_v27 = vshll.u32 %v4348_v20, 16  ;;  %v5108_v57 = vshrl.u32 %v4348_v20, 16  ;;  %v10638_v36 = vpack.c.bf16 %v9410_v23, %v9410_v23 }
 0x452   :  { %9621 = vst.msk [vmem:[#allocation4 + $0x2c] sm:$0xf] %vm9609_vm5, %v10640_v17  ;;  %v9415_v5 = vmax.f32 %v9203_v45, 0.0  ;;  %v3930_v24 = vld [vmem:[#allocation2 + $0x190] sm:$0xf]  ;;  %v5097_v29 = vrot.slane %v5095_v60, 4  ;;  %v9206_v62 = vadd.f32 %v10891_v39, %v16264_v12  ;;  %v9197_v52 = vpop.f32.mrf.mxu0 }
 0x453   :  { %v16465_v8 = vld [vmem:[#allocation2 + $0x19c] sm:$0xf]  ;;  %7409 = vst.msk [vmem:[#allocation3 + $0x25c] sm:$0xf] %vm4189_vm4, %v7268_v21  ;;  %7410 = vst.msk [vmem:[#allocation3 + $0x268] sm:$0xf] %vm4189_vm4, %v7270_v48  ;;  %4117 = vrot.lane.b32.xlu0 %v3929_v59, %s11179_s24  ;;  %v9198_v12 = vadd.f32 %v9197_v52, %v16253_v44  ;;  %v3041_v45 = vpop.permute.xlu0 %3040  ;;  %v3043_v60 = vpop.permute.xlu1 %3042 }
 0x454   :  { %v5100_v25 = vrot.slane %v5098_v14, 5  ;;  %v5106_v9 = vrot.slane %v5104_v27, 5  ;;  %v4349_v54 = vld [vmem:[#allocation2 + $0x1a0] sm:$0x1]  ;;  %v5110_v43 = vrot.slane %v5108_v57, 4  ;;  %v10643_v61 = vpack.c.bf16 %v9415_v5, %v9415_v5  ;;  %4119 = vrot.lane.b32.xlu1 %v3930_v24, %s11179_s24 }
 0x455   :  { %9619 = vst.msk [vmem:[#allocation4 + $0x24] sm:$0xf] %vm9609_vm5, %v10638_v36  ;;  %v9413_v6 = vmax.f32 %v9195_v26, 0.0  ;;  %v16475_v42 = vld [vmem:[#allocation2 + $0x1a0] sm:$0x1]  ;;  %v5114_v46 = vshll.u32 %v4349_v54, 16 }
 0x456   :  { %v2920_v56 = vrot.slane %v2919_v40, 4  ;;  %v5657_v15 = vrot.slane %v16465_v8, 5  ;;  %v16478_v51 = vld [vmem:[#allocation2 + $0x18c] sm:$0xe]  ;;  %v5101_v10 = vor.u32 %v5100_v25, %v5097_v29  ;;  %v5111_v20 = vor.u32 %v5110_v43, %v5106_v9  ;;  %9624 = vst.msk [vmem:[#allocation4 + $0x38] sm:$0xf] %vm9609_vm5, %v10643_v61  ;;  %v10894_v40 = vpop.f32.mrf.mxu0 }
 0x457   :  { %v10641_v17 = vpack.c.bf16 %v9413_v6, %v9413_v6  ;;  %v9416_v23 = vmax.f32 %v9206_v62, 0.0  ;;  %v16482_v49 = vld [vmem:[#allocation2 + $0x190] sm:$0xf]  ;;  %v5116_v59 = vrot.slane %v5114_v46, 5  ;;  %3181 = vst.msk [vmem:[#allocation3 + $0x270] sm:$0xf] %vm3128_vm0, %v3041_v45  ;;  %v9219_v44 = vadd.f32 %v10894_v40, %v16390_v11  ;;  %7287 = vrot.lane.b32.xlu0 %v7132_v2, %s11179_s24  ;;  %v5769_v25 = vpop.permute.xlu1 %5768  ;;  %v16546_v40 = vpop.f32.mrf.mxu1 }
 0x458   :  { %3182 = vst.msk [vmem:[#allocation3 + $0x27c] sm:$0xf] %vm3128_vm0, %v3043_v60  ;;  %v2930_v14 = vrot.slane %v2929_v30, 4  ;;  %v5660_v27 = vrot.slane %v16475_v42, 5  ;;  %v5102_v57 = vrot.slane %v5101_v10, 4  ;;  %v5112_v36 = vrot.slane %v5111_v20, 4  ;;  %7289 = vrot.lane.b32.xlu1 %v7142_v32, %s11179_s24  ;;  %v9210_v24 = vpop.f32.mrf.mxu0  ;;  %v5767_v30 = vpop.permute.xlu0 %5766 }
 0x459   :  { %9622 = vst.msk [vmem:[#allocation4 + $0x30] sm:$0xf] %vm9609_vm5, %v10641_v17  ;;  %v10644_v5 = vpack.c.bf16 %v9416_v23, %v9416_v23  ;;  %v9414_v26 = vmax.f32 %v9198_v12, 0.0  ;;  %v10269_v21 = vrot.slane %v16478_v51, 9  ;;  %v6396_v48 = vld [vmem:[#allocation2 + $0x1a4] sm:$0xf]  ;;  %v9211_v32 = vadd.f32 %v9210_v24, %v16268_v31 }
 0x45a   :  { %v5659_v11 = vrot.slane %v5657_v15, 4  ;;  %v3607_v29 = vrot.slane %v16482_v49, 5  ;;  %v16505_v39 = vld [vmem:[#allocation2 + $0x194] sm:$0x1]  ;;  %v16507_v47 = vld [vmem:[#allocation2 + $0x1a8] sm:$0xf]  ;;  %v5107_v3 = vsel %vm11625_vm15, %v5102_v57, %v5106_v9  ;;  %v5117_v41 = vsel %vm11625_vm15, %v5112_v36, %v5116_v59  ;;  %v10895_v9 = vpop.f32.mrf.mxu0 }
 0x45b   :  { %9625 = vst.msk [vmem:[#allocation4 + $0x3c] sm:$0xf] %vm9609_vm5, %v10644_v5  ;;  %v10642_v55 = vpack.c.bf16 %v9414_v26, %v9414_v26  ;;  %v9419_v2 = vmax.f32 %v9219_v44, 0.0  ;;  %v2925_v54 = vsel %vm11625_vm15, %v2920_v56, %v16433_v35  ;;  %v8067_v43 = vld [vmem:[#allocation3 + $0x258] sm:$0xff]  ;;  %v8069_v61 = vld [vmem:[#allocation3 + $0x264] sm:$0xff]  ;;  %v2935_v31 = vsel %vm11625_vm15, %v2930_v14, %v16461_v58  ;;  %v3719_v8 = vpop.permute.xlu1 %3718 }
 0x45c   :  { %v11123_v6 = vld [vmem:[#allocation3 + $0x25c] ss:$12 sps:$4 sm:$0xff]   ;;  %5244 = vst.msk [vmem:[#allocation3 + $0x2ec] sm:$0xf] %vm766_vm2, %v5107_v3  ;;  %5245 = vst.msk [vmem:[#allocation3 + $0x2f8] sm:$0xf] %vm766_vm2, %v5117_v41  ;;  %v10410_v62 = vcombine.low %v8067_v43, %v8069_v61  ;;  %v9222_v56 = vadd.f32 %v10895_v9, %v16422_v63  ;;  %3060 = vrot.lane.b32.xlu0 %v2925_v54, %s11181_s26  ;;  %3062 = vrot.lane.b32.xlu1 %v2935_v31, %s11181_s26  ;;  %v9213_v20 = vpop.f32.mrf.mxu0  ;;  %v3717_v59 = vpop.permute.xlu0 %3716 }
 0x45d   :  { %5906 = vst.msk [vmem:[#allocation3 + $0x274] sm:$0xf] %vm3128_vm0, %v5767_v30  ;;  %5907 = vst.msk [vmem:[#allocation3 + $0x280] sm:$0xf] %vm3128_vm0, %v5769_v25  ;;  %v7144_v42 = vshrl.u32 %v6396_v48, 16  ;;  %v7147_v46 = vshll.u32 %v6396_v48, 16  ;;  %v10647_v35 = vpack.c.bf16 %v9419_v2, %v9419_v2  ;;  %9055 = vmatprep.mubr.bf16.mxu1 %v11123_v6  ;;  %v5658_v58 = vsel %vm11586_vm12, %v10301_v4, %v5657_v15 }
 0x45e   :  { %9623 = vst.msk [vmem:[#allocation4 + $0x34] sm:$0xf] %vm9609_vm5, %v10642_v55  ;;  %v9417_v52 = vmax.f32 %v9211_v32, 0.0  ;;  %v7153_v10 = vshll.u32 %v16507_v47, 16  ;;  %v3609_v17 = vrot.slane %v3607_v29, 4  ;;  %v3610_v63 = vrot.slane %v16505_v39, 5  ;;  %9056 = vmatmul.mubr.bf16.gmra.mxu1 %v10410_v62  ;;  %v10898_v14 = vpop.f32.mrf.mxu0 }
 0x45f   :  { %v7157_v23 = vshrl.u32 %v16507_v47, 16  ;;  %9628 = vst.msk [vmem:[#allocation4 + $0x48] sm:$0xf] %vm9609_vm5, %v10647_v35  ;;  %v9420_v45 = vmax.f32 %v9222_v56, 0.0  ;;  %v9214_v60 = vadd.f32 %v9213_v20, %v16273_v53  ;;  %v5661_v19 = vsel %vm11586_vm12, %v5659_v11, %v5660_v27  ;;  %v7516_v4 = vld [vmem:[#allocation2 + $0x1a4] sm:$0xe]  ;;  %v8995_v11 = vpop.f32.mrf.mxu1  ;;  %v6154_v54 = vpop.permute.xlu1 %6153 }
 0x460   :  { %v10645_v12 = vpack.c.bf16 %v9417_v52, %v9417_v52  ;;  %v7517_v15 = vld [vmem:[#allocation2 + $0x1a8] sm:$0xf]  ;;  %3857 = vst.msk [vmem:[#allocation3 + $0x270] sm:$0xf] %vm3804_vm3, %v3717_v59  ;;  %3858 = vst.msk [vmem:[#allocation3 + $0x27c] sm:$0xf] %vm3804_vm3, %v3719_v8  ;;  %v9235_v48 = vadd.f32 %v10898_v14, %v16442_v37  ;;  %5786 = vrot.lane.b32.xlu0 %v5658_v58, %s11181_s26  ;;  %5788 = vrot.lane.b32.xlu1 %v5661_v19, %s11181_s26  ;;  %v9226_v39 = vpop.f32.mrf.mxu0  ;;  %v6152_v25 = vpop.permute.xlu0 %6151 }
 0x461   :  { %v16548_v57 = vrot.slane %v7144_v42, 4  ;;  %v16550_v36 = vrot.slane %v7147_v46, 5  ;;  %v7518_v53 = vld [vmem:[#allocation2 + $0x1ac] sm:$0x1]  ;;  %v10333_v5 = vrot.slane %v7516_v4, 9  ;;  %v7834_v26 = vrot.slane %v7517_v15, 5  ;;  %v16567_v61 = vpop.f32.mrf.mxu1 }
 0x462   :  { %9626 = vst.msk [vmem:[#allocation4 + $0x40] sm:$0xf] %vm9609_vm5, %v10645_v12  ;;  %v10648_v44 = vpack.c.bf16 %v9420_v45, %v9420_v45  ;;  %v9418_v27 = vmax.f32 %v9214_v60, 0.0  ;;  %v16556_v24 = vrot.slane %v7153_v10, 5  ;;  %v7159_v47 = vrot.slane %v7157_v23, 4  ;;  %v10899_v6 = vpop.f32.mrf.mxu0 }
 0x463   :  { %v7835_v3 = vsel %vm11586_vm12, %v10333_v5, %v7834_v26  ;;  %v7836_v41 = vrot.slane %v7834_v26, 4  ;;  %v7837_v55 = vrot.slane %v7518_v53, 5  ;;  %v8949_v2 = vadd.f32 %v16141_v18, %v15899_v0  ;;  %v6398_v43 = vld [vmem:[#allocation2 + $0x1ac] sm:$0x1]  ;;  %6291 = vst.msk [vmem:[#allocation3 + $0x274] sm:$0xf] %vm3804_vm3, %v6152_v25  ;;  %v8998_v51 = vpop.f32.mrf.mxu1 }
 0x464   :  { %9629 = vst.msk [vmem:[#allocation4 + $0x4c] sm:$0xf] %vm9609_vm5, %v10648_v44  ;;  %v10646_v37 = vpack.c.bf16 %v9418_v27, %v9418_v27  ;;  %v9423_v32 = vmax.f32 %v9235_v48, 0.0  ;;  %v9227_v30 = vadd.f32 %v9226_v39, %v16431_v33  ;;  %v3608_v0 = vsel %vm11586_vm12, %v10269_v21, %v3607_v29  ;;  %v9229_v49 = vpop.f32.mrf.mxu0  ;;  %v5981_v21 = vld [vmem:[#allocation2 + $0x1a4] sm:$0xf]  ;;  %v4102_v58 = vpop.permute.xlu0 %4101  ;;  %v17217_v25 = vld [vmem:[#allocation9_spill] sm:$0xff] }
 0x465   :  { %7965 = vst.msk [vmem:[#allocation3 + $0x2f0] sm:$0xf] %vm766_vm2, %v7835_v3  ;;  %v3611_v33 = vsel %vm11586_vm12, %v3609_v17, %v3610_v63  ;;  %v7838_v9 = vsel %vm11586_vm12, %v7836_v41, %v7837_v55  ;;  %v8941_v31 = vadd.f32 %v16141_v18, %v15775_v1  ;;  %v9238_v46 = vadd.f32 %v10899_v6, %v8949_v2  ;;  %v5982_v29 = vld [vmem:[#allocation2 + $0x1a8] sm:$0xf]  ;;  %v4104_v17 = vpop.permute.xlu1 %4103  ;;  %v16598_v4 = vld [vmem:[#allocation5] ss:$0 sm:$0xff] }
 0x466   :  { %6292 = vst.msk [vmem:[#allocation3 + $0x280] sm:$0xf] %vm3804_vm3, %v6154_v54  ;;  %v10651_v62 = vpack.c.bf16 %v9423_v32, %v9423_v32  ;;  %v9421_v42 = vmax.f32 %v9227_v30, 0.0  ;;  %3736 = vrot.lane.b32.xlu0 %v3608_v0, %s11180_s25  ;;  %3738 = vrot.lane.b32.xlu1 %v3611_v33, %s11180_s25  ;;  %v7150_v7 = vor.u32 %v16550_v36, %v16548_v57  ;;  %v7163_v35 = vshll.u32 %v6398_v43, 16  ;;  %v10902_v63 = vpop.f32.mrf.mxu0  ;;  %v3931_v53 = vld [vmem:[#allocation2 + $0x198] sm:$0xf] }
 0x467   :  { %9627 = vst.msk [vmem:[#allocation4 + $0x44] sm:$0xf] %vm9609_vm5, %v10646_v37  ;;  %v7160_v1 = vor.u32 %v7159_v47, %v16556_v24  ;;  %v8962_v52 = vadd.f32 %v16141_v18, %v15954_v50  ;;  %v9424_v10 = vmax.f32 %v9238_v46, 0.0  ;;  %v9230_v20 = vadd.f32 %v9229_v49, %v8941_v31  ;;  %v3932_v26 = vld [vmem:[#allocation2 + $0x19c] sm:$0xf]  ;;  %v17218_v33 = vld [vmem:[#allocation14_spill] sm:$0xff] }
 0x468   :  { %7966 = vst.msk [vmem:[#allocation3 + $0x2fc] sm:$0xf] %vm766_vm2, %v7838_v9  ;;  %v10649_v56 = vpack.c.bf16 %v9421_v42, %v9421_v42  ;;  %v8954_v23 = vadd.f32 %v16141_v18, %v15917_v28  ;;  %v9242_v60 = vpop.f32.mrf.mxu0  ;;  %v7151_v59 = vrot.slane %v7150_v7, 4  ;;  %v7165_v19 = vrot.slane %v7163_v35, 5  ;;  %v7272_v57 = vpop.permute.xlu0 %7271  ;;  %v17219_v35 = vld [vmem:[#allocation7_spill] sm:$0xff] }
 0x469   :  { %9632 = vst.msk [vmem:[#allocation4 + $0x58] sm:$0xf] %vm9609_vm5, %v10651_v62  ;;  %v10652_v12 = vpack.c.bf16 %v9424_v10, %v9424_v10  ;;  %v9422_v45 = vmax.f32 %v9230_v20, 0.0  ;;  %v9251_v50 = vadd.f32 %v10902_v63, %v8962_v52  ;;  %v7161_v8 = vrot.slane %v7160_v1, 4  ;;  %v7274_v36 = vpop.permute.xlu1 %7273 }
 0x46a   :  { %4242 = vst.msk [vmem:[#allocation3 + $0x270] sm:$0xf] %vm4189_vm4, %v4102_v58  ;;  %4243 = vst.msk [vmem:[#allocation3 + $0x27c] sm:$0xf] %vm4189_vm4, %v4104_v17  ;;  %6171 = vrot.lane.b32.xlu0 %v5981_v21, %s11180_s25  ;;  %6173 = vrot.lane.b32.xlu1 %v5982_v29, %s11180_s25  ;;  %v8965_v15 = vadd.f32 %v16598_v4, %v15969_v16  ;;  %v9243_v14 = vadd.f32 %v9242_v60, %v8954_v23  ;;  %v10903_v5 = vpop.f32.mrf.mxu0  ;;  %v9001_v60 = vpop.f32.mrf.mxu1  ;;  %vm9818_vm2 = vcmask 11272   ;;  %vm10065_vm6 = vcmask 15360  }
 0x46b   :  { %9630 = vst.msk [vmem:[#allocation4 + $0x50] sm:$0xf] %vm9609_vm5, %v10649_v56  ;;  %9633 = vst.msk [vmem:[#allocation4 + $0x5c] sm:$0xf] %vm9609_vm5, %v10652_v12  ;;  %v10650_v28 = vpack.c.bf16 %v9422_v45, %v9422_v45  ;;  %v9427_v18 = vmax.f32 %v9251_v50, 0.0  ;;  %v8957_v27 = vadd.f32 %v16598_v4, %v15935_v22  ;;  %v7156_v47 = vsel %vm11625_vm15, %v7151_v59, %v16556_v24  ;;  %v17216_v22 = vld [vmem:[#allocation17_spill] sm:$0xff] }
 0x46c   :  { %7411 = vst.msk [vmem:[#allocation3 + $0x274] sm:$0xf] %vm4189_vm4, %v7272_v57  ;;  %7412 = vst.msk [vmem:[#allocation3 + $0x280] sm:$0xf] %vm4189_vm4, %v7274_v36  ;;  %v9425_v48 = vmax.f32 %v9243_v14, 0.0  ;;  %v9254_v11 = vadd.f32 %v10903_v5, %v8965_v15  ;;  %v9245_v39 = vpop.f32.mrf.mxu0  ;;  %v7166_v3 = vsel %vm11625_vm15, %v7161_v8, %v7165_v19  ;;  %v8978_v41 = vadd.f32 %v16598_v4, %v17216_v22  ;;  %v3045_v32 = vpop.permute.xlu0 %3044 }
 0x46d   :  { %9631 = vst.msk [vmem:[#allocation4 + $0x54] sm:$0xf] %vm9609_vm5, %v10650_v28  ;;  %v10655_v16 = vpack.c.bf16 %v9427_v18, %v9427_v18  ;;  %v9246_v37 = vadd.f32 %v9245_v39, %v8957_v27  ;;  %v3047_v30 = vpop.permute.xlu1 %3046  ;;  %v8970_v13 = vadd.f32 %v16598_v4, %v17217_v25  ;;  %v8981_v9 = vadd.f32 %v16598_v4, %v17218_v33  ;;  %v9003_v28 = vpop.f32.mrf.mxu1 }
 0x46e   :  { %4121 = vrot.lane.b32.xlu0 %v3931_v53, %s11179_s24  ;;  %4123 = vrot.lane.b32.xlu1 %v3932_v26, %s11179_s24  ;;  %v10653_v55 = vpack.c.bf16 %v9425_v48, %v9425_v48  ;;  %v9428_v2 = vmax.f32 %v9254_v11, 0.0  ;;  %3183 = vst.msk [vmem:[#allocation3 + $0x288] sm:$0xf] %vm3128_vm0, %v3045_v32  ;;  %3184 = vst.msk [vmem:[#allocation3 + $0x294] sm:$0xf] %vm3128_vm0, %v3047_v30  ;;  %v10906_v24 = vpop.f32.mrf.mxu0  ;;  %v8973_v52 = vadd.f32 %v16598_v4, %v17219_v35 }
 0x46f   :  { %v11137_v44 = vld [vmem:[#allocation3 + $0x2f0] ss:$12 sps:$4 sm:$0xff]   ;;  %9636 = vst.msk [vmem:[#allocation4 + $0x68] sm:$0xf] %vm9609_vm5, %v10655_v16  ;;  %v9426_v43 = vmax.f32 %v9246_v37, 0.0  ;;  %v9267_v6 = vadd.f32 %v10906_v24, %v8978_v41  ;;  %v8994_v17 = vadd.f32 %v16598_v4, %v16546_v40  ;;  %v8986_v8 = vadd.f32 %v16598_v4, %v16384_v38  ;;  %v9004_v38 = vpop.f32.mrf.mxu1 }
 0x470   :  { %10937 = vmatmul.mubr.msk.bf16.gmra.mxu0 %vm8726_vm1, %v11137_v44  ;;  %9634 = vst.msk [vmem:[#allocation4 + $0x60] sm:$0xf] %vm9609_vm5, %v10653_v55  ;;  %v10656_v54 = vpack.c.bf16 %v9428_v2, %v9428_v2  ;;  %v9258_v0 = vpop.f32.mrf.mxu0  ;;  %v5771_v46 = vpop.permute.xlu0 %5770  ;;  %v8997_v14 = vadd.f32 %v16598_v4, %v16567_v61  ;;  %v8989_v44 = vadd.f32 %v16598_v4, %v16410_v34 }
 0x471   :  { %v10654_v31 = vpack.c.bf16 %v9426_v43, %v9426_v43  ;;  %v9431_v62 = vmax.f32 %v9267_v6, 0.0  ;;  %v9259_v42 = vadd.f32 %v9258_v0, %v8970_v13  ;;  %v5773_v51 = vpop.permute.xlu1 %5772  ;;  %5908 = vst.msk [vmem:[#allocation3 + $0x28c] sm:$0xf] %vm3128_vm0, %v5771_v46  ;;  %v9006_v61 = vpop.f32.mrf.mxu1  ;;  %v9005_v37 = vadd.f32 %v16598_v4, %v9004_v38 }
 0x472   :  { %7291 = vrot.lane.b32.xlu0 %v7156_v47, %s11179_s24  ;;  %7293 = vrot.lane.b32.xlu1 %v7166_v3, %s11179_s24  ;;  %9637 = vst.msk [vmem:[#allocation4 + $0x6c] sm:$0xf] %vm9609_vm5, %v10656_v54  ;;  %v10907_v7 = vpop.f32.mrf.mxu0  ;;  %v9002_v3 = vadd.f32 %v16598_v4, %v9001_v60 }
 0x473   :  { %v8071_v49 = vld [vmem:[#allocation3 + $0x270] sm:$0xff]  ;;  %v8073_v21 = vld [vmem:[#allocation3 + $0x27c] sm:$0xff]  ;;  %5909 = vst.msk [vmem:[#allocation3 + $0x298] sm:$0xf] %vm3128_vm0, %v5773_v51  ;;  %v10659_v56 = vpack.c.bf16 %v9431_v62, %v9431_v62  ;;  %v9429_v10 = vmax.f32 %v9259_v42, 0.0  ;;  %v9270_v20 = vadd.f32 %v10907_v7, %v8981_v9 }
 0x474   :  { %v11125_v29 = vld [vmem:[#allocation3 + $0x274] ss:$12 sps:$4 sm:$0xff]   ;;  %v10413_v1 = vcombine.low %v8071_v49, %v8073_v21  ;;  %9635 = vst.msk [vmem:[#allocation4 + $0x64] sm:$0xf] %vm9609_vm5, %v10654_v31  ;;  %v9261_v58 = vpop.f32.mrf.mxu0  ;;  %v3721_v45 = vpop.permute.xlu0 %3720 }
 0x475   :  { %9063 = vmatprep.mubr.bf16.mxu1 %v11125_v29  ;;  %9640 = vst.msk [vmem:[#allocation4 + $0x78] sm:$0xf] %vm9609_vm5, %v10659_v56  ;;  %v10657_v63 = vpack.c.bf16 %v9429_v10, %v9429_v10  ;;  %v9432_v23 = vmax.f32 %v9270_v20, 0.0  ;;  %v9262_v12 = vadd.f32 %v9261_v58, %v8973_v52  ;;  %v3723_v50 = vpop.permute.xlu1 %3722 }
 0x476   :  { %9064 = vmatmul.mubr.bf16.gmra.mxu1 %v10413_v1  ;;  %3859 = vst.msk [vmem:[#allocation3 + $0x288] sm:$0xf] %vm3804_vm3, %v3721_v45  ;;  %3860 = vst.msk [vmem:[#allocation3 + $0x294] sm:$0xf] %vm3804_vm3, %v3723_v50  ;;  %v10910_v59 = vpop.f32.mrf.mxu0 }
 0x477   :  { %9638 = vst.msk [vmem:[#allocation4 + $0x70] sm:$0xf] %vm9609_vm5, %v10657_v63  ;;  %v10660_v19 = vpack.c.bf16 %v9432_v23, %v9432_v23  ;;  %v9430_v40 = vmax.f32 %v9262_v12, 0.0  ;;  %v16642_v15 = vadd.f32 %v10910_v59, %v8994_v17 }
 0x478   :  { %v9274_v18 = vpop.f32.mrf.mxu0  ;;  %v6156_v53 = vpop.permute.xlu0 %6155 }
 0x479   :  { %9641 = vst.msk [vmem:[#allocation4 + $0x7c] sm:$0xf] %vm9609_vm5, %v10660_v19  ;;  %v10658_v57 = vpack.c.bf16 %v9430_v40, %v9430_v40  ;;  %v16647_v36 = vadd.f32 %v9274_v18, %v8986_v8  ;;  %v6158_v5 = vpop.permute.xlu1 %6157 }
 0x47a   :  { %6293 = vst.msk [vmem:[#allocation3 + $0x28c] sm:$0xf] %vm3804_vm3, %v6156_v53  ;;  %6294 = vst.msk [vmem:[#allocation3 + $0x298] sm:$0xf] %vm3804_vm3, %v6158_v5  ;;  %v10911_v26 = vpop.f32.mrf.mxu0 }
 0x47b   :  { %9639 = vst.msk [vmem:[#allocation4 + $0x74] sm:$0xf] %vm9609_vm5, %v10658_v57  ;;  %v16654_v27 = vadd.f32 %v10911_v26, %v8997_v14 }
 0x47c   :  { %v9277_v16 = vpop.f32.mrf.mxu0  ;;  %v4106_v11 = vpop.permute.xlu0 %4105 }
 0x47d   :  { %v16656_v48 = vadd.f32 %v9277_v16, %v8989_v44  ;;  %v4108_v39 = vpop.permute.xlu1 %4107  ;;  %4244 = vst.msk [vmem:[#allocation3 + $0x288] sm:$0xf] %vm4189_vm4, %v4106_v11 }
 0x47e   :  { %4245 = vst.msk [vmem:[#allocation3 + $0x294] sm:$0xf] %vm4189_vm4, %v4108_v39  ;;  %v10914_v47 = vpop.f32.mrf.mxu0 }
 0x480   :  { %v9290_v22 = vpop.f32.mrf.mxu0  ;;  %v7276_v34 = vpop.permute.xlu0 %7275 }
 0x481   :  { %v16661_v41 = vadd.f32 %v9290_v22, %v9002_v3  ;;  %v7278_v55 = vpop.permute.xlu1 %7277  ;;  %7413 = vst.msk [vmem:[#allocation3 + $0x28c] sm:$0xf] %vm4189_vm4, %v7276_v34 }
 0x482   :  { %7414 = vst.msk [vmem:[#allocation3 + $0x298] sm:$0xf] %vm4189_vm4, %v7278_v55  ;;  %v10915_v2 = vpop.f32.mrf.mxu0 }
 0x484   :  { %v9293_v32 = vpop.f32.mrf.mxu0 }
 0x485   :  { %v16666_v30 = vadd.f32 %v9293_v32, %v9005_v37  ;;  %v3049_v24 = vpop.permute.xlu0 %3048  ;;  %v3051_v25 = vpop.permute.xlu1 %3050 }
 0x486   :  { %3185 = vst.msk [vmem:[#allocation3 + $0x2a0] sm:$0xf] %vm3128_vm0, %v3049_v24  ;;  %3186 = vst.msk [vmem:[#allocation3 + $0x2ac] sm:$0xf] %vm3128_vm0, %v3051_v25  ;;  %v9009_v62 = vpop.f32.mrf.mxu1  ;;  %v16710_v55 = vpop.f32.mrf.mxu0 }
 0x487   :  { %v9010_v42 = vadd.f32 %v16598_v4, %v9009_v62 }
 0x488   :  { %v8075_v43 = vld [vmem:[#allocation3 + $0x288] sm:$0xff]  ;;  %v9011_v46 = vpop.f32.mrf.mxu1  ;;  %v16714_v25 = vpop.f32.mrf.mxu0 }
 0x489   :  { %v5775_v13 = vpop.permute.xlu0 %5774  ;;  %v5777_v54 = vpop.permute.xlu1 %5776  ;;  %v8077_v6 = vld [vmem:[#allocation3 + $0x294] sm:$0xff]  ;;  %v16675_v51 = vadd.f32 %v10914_v47, %v9010_v42 }
 0x48a   :  { %v11127_v0 = vld [vmem:[#allocation3 + $0x28c] ss:$12 sps:$4 sm:$0xff]   ;;  %5910 = vst.msk [vmem:[#allocation3 + $0x2a4] sm:$0xf] %vm3128_vm0, %v5775_v13  ;;  %5911 = vst.msk [vmem:[#allocation3 + $0x2b0] sm:$0xf] %vm3128_vm0, %v5777_v54  ;;  %v10416_v33 = vcombine.low %v8075_v43, %v8077_v6  ;;  %v9012_v29 = vpop.f32.mrf.mxu1  ;;  %v10919_v6 = vpop.f32.mrf.mxu0 }
 0x48b   :  { %9071 = vmatprep.mubr.bf16.mxu1 %v11127_v0  ;;  %v9013_v7 = vadd.f32 %v16598_v4, %v9012_v29 }
 0x48c   :  { %9072 = vmatmul.mubr.bf16.gmra.mxu1 %v10416_v33  ;;  %v9014_v1 = vpop.f32.mrf.mxu1 }
 0x48d   :  { %v3725_v9 = vpop.permute.xlu0 %3724  ;;  %v3727_v31 = vpop.permute.xlu1 %3726  ;;  %v16680_v35 = vadd.f32 %v10915_v2, %v9013_v7 }
 0x48e   :  { %3861 = vst.msk [vmem:[#allocation3 + $0x2a0] sm:$0xf] %vm3804_vm3, %v3725_v9  ;;  %3862 = vst.msk [vmem:[#allocation3 + $0x2ac] sm:$0xf] %vm3804_vm3, %v3727_v31  ;;  %v16720_v9 = vpop.f32.mrf.mxu0 }
 0x490   :  { %v10922_v42 = vpop.f32.mrf.mxu0 }
 0x491   :  { %v6160_v49 = vpop.permute.xlu0 %6159  ;;  %v6162_v21 = vpop.permute.xlu1 %6161 }
 0x492   :  { %6295 = vst.msk [vmem:[#allocation3 + $0x2a4] sm:$0xf] %vm3804_vm3, %v6160_v49  ;;  %6296 = vst.msk [vmem:[#allocation3 + $0x2b0] sm:$0xf] %vm3804_vm3, %v6162_v21  ;;  %v9322_v7 = vpop.f32.mrf.mxu0 }
 0x495   :  { %v4110_v52 = vpop.permute.xlu0 %4109  ;;  %v4112_v56 = vpop.permute.xlu1 %4111 }
 0x496   :  { %4246 = vst.msk [vmem:[#allocation3 + $0x2a0] sm:$0xf] %vm4189_vm4, %v4110_v52  ;;  %4247 = vst.msk [vmem:[#allocation3 + $0x2ac] sm:$0xf] %vm4189_vm4, %v4112_v56 }
 0x499   :  { %v7280_v10 = vpop.permute.xlu0 %7279  ;;  %v7282_v20 = vpop.permute.xlu1 %7281 }
 0x49a   :  { %7415 = vst.msk [vmem:[#allocation3 + $0x2a4] sm:$0xf] %vm4189_vm4, %v7280_v10  ;;  %7416 = vst.msk [vmem:[#allocation3 + $0x2b0] sm:$0xf] %vm4189_vm4, %v7282_v20  ;;  %v10923_v20 = vpop.f32.mrf.mxu0 }
 0x49d   :  { %v3053_v58 = vpop.permute.xlu0 %3052  ;;  %v3055_v17 = vpop.permute.xlu1 %3054 }
 0x49e   :  { %3187 = vst.msk [vmem:[#allocation3 + $0x2b8] sm:$0xf] %vm3128_vm0, %v3053_v58  ;;  %3188 = vst.msk [vmem:[#allocation3 + $0x2c4] sm:$0xf] %vm3128_vm0, %v3055_v17 }
 0x4a1   :  { %v5779_v63 = vpop.permute.xlu0 %5778  ;;  %v5781_v23 = vpop.permute.xlu1 %5780  ;;  %v8079_v12 = vld [vmem:[#allocation3 + $0x2a0] sm:$0xff]  ;;  %v8081_v45 = vld [vmem:[#allocation3 + $0x2ac] sm:$0xff] }
 0x4a2   :  { %v11129_v50 = vld [vmem:[#allocation3 + $0x2a4] ss:$12 sps:$4 sm:$0xff]   ;;  %5912 = vst.msk [vmem:[#allocation3 + $0x2bc] sm:$0xf] %vm3128_vm0, %v5779_v63  ;;  %5913 = vst.msk [vmem:[#allocation3 + $0x2c8] sm:$0xf] %vm3128_vm0, %v5781_v23  ;;  %v10419_v60 = vcombine.low %v8079_v12, %v8081_v45  ;;  %v16692_v19 = vpop.f32.mrf.mxu1 }
 0x4a3   :  { %9079 = vmatprep.mubr.bf16.mxu1 %v11129_v50 }
 0x4a4   :  { %9080 = vmatmul.mubr.bf16.gmra.mxu1 %v10419_v60  ;;  %v9019_v40 = vpop.f32.mrf.mxu1 }
 0x4a5   :  { %v3729_v59 = vpop.permute.xlu0 %3728  ;;  %v3731_v8 = vpop.permute.xlu1 %3730 }
 0x4a6   :  { %3863 = vst.msk [vmem:[#allocation3 + $0x2b8] sm:$0xf] %vm3804_vm3, %v3729_v59  ;;  %3864 = vst.msk [vmem:[#allocation3 + $0x2c4] sm:$0xf] %vm3804_vm3, %v3731_v8  ;;  %v16696_v14 = vpop.f32.mrf.mxu1  ;;  %v9325_v59 = vpop.f32.mrf.mxu0 }
 0x4a8   :  { %v9022_v57 = vpop.f32.mrf.mxu1 }
 0x4a9   :  { %v6164_v28 = vpop.permute.xlu0 %6163  ;;  %v6166_v18 = vpop.permute.xlu1 %6165 }
 0x4aa   :  { %6297 = vst.msk [vmem:[#allocation3 + $0x2bc] sm:$0xf] %vm3804_vm3, %v6164_v28  ;;  %6298 = vst.msk [vmem:[#allocation3 + $0x2c8] sm:$0xf] %vm3804_vm3, %v6166_v18 }
 0x4ad   :  { %v4114_v53 = vpop.permute.xlu0 %4113  ;;  %v4116_v5 = vpop.permute.xlu1 %4115 }
 0x4ae   :  { %4248 = vst.msk [vmem:[#allocation3 + $0x2b8] sm:$0xf] %vm4189_vm4, %v4114_v53  ;;  %4249 = vst.msk [vmem:[#allocation3 + $0x2c4] sm:$0xf] %vm4189_vm4, %v4116_v5 }
 0x4b1   :  { %v7284_v38 = vpop.permute.xlu0 %7283  ;;  %v7286_v26 = vpop.permute.xlu1 %7285 }
 0x4b2   :  { %7417 = vst.msk [vmem:[#allocation3 + $0x2bc] sm:$0xf] %vm4189_vm4, %v7284_v38  ;;  %7418 = vst.msk [vmem:[#allocation3 + $0x2c8] sm:$0xf] %vm4189_vm4, %v7286_v26 }
 0x4b5   :  { %v3057_v44 = vpop.permute.xlu0 %3056  ;;  %v3059_v61 = vpop.permute.xlu1 %3058  ;;  %v11131_v39 = vld [vmem:[#allocation3 + $0x2b8] ss:$12 sps:$4 sm:$0xff]  }
 0x4b6   :  { %3189 = vst.msk [vmem:[#allocation3 + $0x2d0] sm:$0xf] %vm3128_vm0, %v3057_v44  ;;  %3190 = vst.msk [vmem:[#allocation3 + $0x2dc] sm:$0xf] %vm3128_vm0, %v3059_v61 }
 0x4b9   :  { %v5783_v16 = vpop.permute.xlu0 %5782  ;;  %v5785_v11 = vpop.permute.xlu1 %5784  ;;  %v11133_v47 = vld [vmem:[#allocation3 + $0x2bc] ss:$12 sps:$4 sm:$0xff]  }
 0x4ba   :  { %5914 = vst.msk [vmem:[#allocation3 + $0x2d4] sm:$0xf] %vm3128_vm0, %v5783_v16  ;;  %5915 = vst.msk [vmem:[#allocation3 + $0x2e0] sm:$0xf] %vm3128_vm0, %v5785_v11  ;;  %9087 = vmatprep.mubr.bf16.mxu1 %v11133_v47  ;;  %v16708_v34 = vpop.f32.mrf.mxu1 }
 0x4bb   :  { %9088 = vmatmul.mubr.bf16.gmra.mxu1 %v11131_v39  ;;  %v9026_v47 = vadd.f32 %v16598_v4, %v16708_v34 }
 0x4bc   :  { %v9027_v2 = vpop.f32.mrf.mxu1 }
 0x4bd   :  { %v3733_v3 = vpop.permute.xlu0 %3732  ;;  %v3735_v22 = vpop.permute.xlu1 %3734  ;;  %v9018_v2 = vadd.f32 %v16598_v4, %v16692_v19 }
 0x4be   :  { %3865 = vst.msk [vmem:[#allocation3 + $0x2d0] sm:$0xf] %vm3804_vm3, %v3733_v3  ;;  %3866 = vst.msk [vmem:[#allocation3 + $0x2dc] sm:$0xf] %vm3804_vm3, %v3735_v22  ;;  %v9028_v24 = vpop.f32.mrf.mxu1 }
 0x4bf   :  { %v9029_v17 = vadd.f32 %v16598_v4, %v9028_v24  ;;  %v9315_v24 = vadd.f32 %v16710_v55, %v9026_v47  ;;  %v9307_v34 = vadd.f32 %v16714_v25, %v9018_v2 }
 0x4c0   :  { %v9030_v13 = vpop.f32.mrf.mxu1 }
 0x4c1   :  { %v6168_v37 = vpop.permute.xlu0 %6167  ;;  %v9318_v40 = vadd.f32 %v10919_v6, %v9029_v17 }
 0x4c2   :  { %v6170_v32 = vpop.permute.xlu1 %6169  ;;  %6299 = vst.msk [vmem:[#allocation3 + $0x2d4] sm:$0xf] %vm3804_vm3, %v6168_v37 }
 0x4c3   :  { %6300 = vst.msk [vmem:[#allocation3 + $0x2e0] sm:$0xf] %vm3804_vm3, %v6170_v32  ;;  %v9444_v38 = vmax.f32 %v9318_v40, 0.0  ;;  %v9021_v32 = vadd.f32 %v16598_v4, %v16696_v14 }
 0x4c5   :  { %v4118_v54 = vpop.permute.xlu0 %4117  ;;  %v10672_v16 = vpack.c.bf16 %v9444_v38, %v9444_v38 }
 0x4c6   :  { %v4120_v43 = vpop.permute.xlu1 %4119  ;;  %4250 = vst.msk [vmem:[#allocation3 + $0x2d0] sm:$0xf] %vm4189_vm4, %v4118_v54 }
 0x4c7   :  { %4251 = vst.msk [vmem:[#allocation3 + $0x2dc] sm:$0xf] %vm4189_vm4, %v4120_v43 }
 0x4c9   :  { %v7288_v0 = vpop.permute.xlu0 %7287 }
 0x4ca   :  { %v7290_v33 = vpop.permute.xlu1 %7289  ;;  %7419 = vst.msk [vmem:[#allocation3 + $0x2d4] sm:$0xf] %vm4189_vm4, %v7288_v0 }
 0x4cb   :  { %7420 = vst.msk [vmem:[#allocation3 + $0x2e0] sm:$0xf] %vm4189_vm4, %v7290_v33  ;;  %v9310_v33 = vadd.f32 %v16720_v9, %v9021_v32 }
 0x4cd   :  { %v9442_v14 = vmax.f32 %v9310_v33, 0.0 }
 0x4ce   :  { %v3061_v31 = vpop.permute.xlu0 %3060  ;;  %v3063_v62 = vpop.permute.xlu1 %3062  ;;  %v11134_v21 = vld [vmem:[#allocation3 + $0x2d0] ss:$12 sps:$4 sm:$0xff]  }
 0x4cf   :  { %3191 = vst.msk [vmem:[#allocation3 + $0x2e8] sm:$0xf] %vm3128_vm0, %v3061_v31  ;;  %3192 = vst.msk [vmem:[#allocation3 + $0x2f4] sm:$0xf] %vm3128_vm0, %v3063_v62  ;;  %v9443_v31 = vmax.f32 %v9315_v24, 0.0 }
 0x4d2   :  { %v5787_v46 = vpop.permute.xlu0 %5786  ;;  %v5789_v49 = vpop.permute.xlu1 %5788  ;;  %v11136_v29 = vld [vmem:[#allocation3 + $0x2d4] ss:$12 sps:$4 sm:$0xff]  }
 0x4d3   :  { %5916 = vst.msk [vmem:[#allocation3 + $0x2ec] sm:$0xf] %vm3128_vm0, %v5787_v46  ;;  %5917 = vst.msk [vmem:[#allocation3 + $0x2f8] sm:$0xf] %vm3128_vm0, %v5789_v49  ;;  %9095 = vmatprep.mubr.bf16.mxu1 %v11136_v29  ;;  %v9441_v49 = vmax.f32 %v9307_v34, 0.0  ;;  %v10670_v29 = vpack.c.bf16 %v9442_v14, %v9442_v14 }
 0x4d4   :  { %9096 = vmatmul.mubr.bf16.gmra.mxu1 %v11134_v21  ;;  %v9033_v56 = vpop.f32.mrf.mxu1  ;;  %v10671_v21 = vpack.c.bf16 %v9443_v31, %v9443_v31 }
 0x4d5   :  { %v9034_v10 = vadd.f32 %v16598_v4, %v9033_v56 }
 0x4d6   :  { %v9035_v58 = vpop.f32.mrf.mxu1 }
 0x4d7   :  { %v9323_v63 = vadd.f32 %v9322_v7, %v9034_v10 }
 0x4d8   :  { %v3737_v1 = vpop.permute.xlu0 %3736  ;;  %v3739_v52 = vpop.permute.xlu1 %3738 }
 0x4d9   :  { %3867 = vst.msk [vmem:[#allocation3 + $0x2e8] sm:$0xf] %vm3804_vm3, %v3737_v1  ;;  %3868 = vst.msk [vmem:[#allocation3 + $0x2f4] sm:$0xf] %vm3804_vm3, %v3739_v52  ;;  %v9036_v45 = vpop.f32.mrf.mxu1  ;;  %v9445_v50 = vmax.f32 %v9323_v63, 0.0 }
 0x4da   :  { %v9037_v60 = vadd.f32 %v16598_v4, %v9036_v45 }
 0x4db   :  { %v9038_v8 = vpop.f32.mrf.mxu1  ;;  %v10673_v28 = vpack.c.bf16 %v9445_v50, %v9445_v50 }
 0x4dc   :  { %v6172_v23 = vpop.permute.xlu0 %6171  ;;  %v6174_v12 = vpop.permute.xlu1 %6173  ;;  %v9326_v18 = vadd.f32 %v9325_v59, %v9037_v60 }
 0x4dd   :  { %6301 = vst.msk [vmem:[#allocation3 + $0x2ec] sm:$0xf] %vm3804_vm3, %v6172_v23  ;;  %6302 = vst.msk [vmem:[#allocation3 + $0x2f8] sm:$0xf] %vm3804_vm3, %v6174_v12  ;;  %9746 = vrot.lane.b32.xlu0 %v10673_v28, %s11182_s2  ;;  %v16768_v12 = vpop.f32.mrf.mxu0 }
 0x4de   :  { %v9446_v5 = vmax.f32 %v9326_v18, 0.0 }
 0x4df   :  { %v16770_v45 = vpop.f32.mrf.mxu0 }
 0x4e0   :  { %v4122_v57 = vpop.permute.xlu0 %4121  ;;  %v4124_v53 = vpop.permute.xlu1 %4123  ;;  %v10674_v26 = vpack.c.bf16 %v9446_v5, %v9446_v5 }
 0x4e1   :  { %4252 = vst.msk [vmem:[#allocation3 + $0x2e8] sm:$0xf] %vm4189_vm4, %v4122_v57  ;;  %4253 = vst.msk [vmem:[#allocation3 + $0x2f4] sm:$0xf] %vm4189_vm4, %v4124_v53  ;;  %v16772_v50 = vpop.f32.mrf.mxu0 }
 0x4e2   :  { %9748 = vrot.lane.b32.xlu1 %v10674_v26, %s11182_s2 }
 0x4e3   :  { %v16776_v59 = vpop.f32.mrf.mxu0 }
 0x4e4   :  { %v7292_v44 = vpop.permute.xlu0 %7291  ;;  %v7294_v61 = vpop.permute.xlu1 %7293 }
 0x4e5   :  { %7421 = vst.msk [vmem:[#allocation3 + $0x2ec] sm:$0xf] %vm4189_vm4, %v7292_v44  ;;  %7422 = vst.msk [vmem:[#allocation3 + $0x2f8] sm:$0xf] %vm4189_vm4, %v7294_v61  ;;  %v16778_v40 = vpop.f32.mrf.mxu0 }
 0x4e6   :  { %9744 = vrot.lane.b32.xlu1 %v10672_v16, %s11182_s2 }
 0x4e7   :  { %v16783_v53 = vpop.f32.mrf.mxu0 }
 0x4e8   :  { %v11138_v11 = vld [vmem:[#allocation3 + $0x2e8] ss:$12 sps:$4 sm:$0xff]  }
 0x4e9   :  { %v16786_v38 = vpop.f32.mrf.mxu0 }
 0x4eb   :  { %v16789_v44 = vpop.f32.mrf.mxu0 }
 0x4ec   :  { %v11140_v39 = vld [vmem:[#allocation3 + $0x2ec] ss:$12 sps:$4 sm:$0xff]   ;;  %v9041_v3 = vpop.f32.mrf.mxu1 }
 0x4ed   :  { %9103 = vmatprep.mubr.bf16.mxu1 %v11140_v39  ;;  %v9042_v22 = vadd.f32 %v16598_v4, %v9041_v3  ;;  %v10934_v61 = vpop.f32.mrf.mxu0 }
 0x4ee   :  { %9104 = vmatmul.mubr.bf16.gmra.mxu1 %v11138_v11  ;;  %v9043_v37 = vpop.f32.mrf.mxu1 }
 0x4ef   :  { %v9331_v13 = vadd.f32 %v10922_v42, %v9042_v22  ;;  %v10669_v42 = vpack.c.bf16 %v9441_v49, %v9441_v49  ;;  %v9370_v16 = vpop.f32.mrf.mxu0 }
 0x4f0   :  { %v9044_v54 = vpop.f32.mrf.mxu1 }
 0x4f1   :  { %v9447_v43 = vmax.f32 %v9331_v13, 0.0  ;;  %v9045_v6 = vadd.f32 %v16598_v4, %v9044_v54  ;;  %v10935_v47 = vpop.f32.mrf.mxu0 }
 0x4f2   :  { %v9046_v0 = vpop.f32.mrf.mxu1 }
 0x4f3   :  { %v10675_v62 = vpack.c.bf16 %v9447_v43, %v9447_v43  ;;  %v9334_v46 = vadd.f32 %v10923_v20, %v9045_v6  ;;  %v9373_v13 = vpop.f32.mrf.mxu0 }
 0x4f5   :  { %v9448_v19 = vmax.f32 %v9334_v46, 0.0  ;;  %9750 = vrot.lane.b32.xlu0 %v10675_v62, %s11182_s2 }
 0x4f7   :  { %v10676_v55 = vpack.c.bf16 %v9448_v19, %v9448_v19 }
 0x4f9   :  { %9752 = vrot.lane.b32.xlu1 %v10676_v55, %s11182_s2  ;;  %9742 = vrot.lane.b32.xlu0 %v10671_v21, %s11182_s2 }
 0x4fd   :  { %9740 = vrot.lane.b32.xlu1 %v10670_v29, %s11182_s2  ;;  %9738 = vrot.lane.b32.xlu0 %v10669_v42, %s11182_s2 }
 0x504   :  { %v16756_v25 = vpop.f32.mrf.mxu1 }
 0x506   :  { %v9051_v9 = vpop.f32.mrf.mxu1 }
 0x508   :  { %v16758_v7 = vpop.f32.mrf.mxu1 }
 0x50a   :  { %v9054_v1 = vpop.f32.mrf.mxu1 }
 0x51e   :  { %v16760_v52 = vpop.f32.mrf.mxu1 }
 0x520   :  { %v9059_v56 = vpop.f32.mrf.mxu1 }
 0x522   :  { %v16762_v10 = vpop.f32.mrf.mxu1 }
 0x524   :  { %v9062_v20 = vpop.f32.mrf.mxu1 }
 0x536   :  { %v16764_v58 = vpop.f32.mrf.mxu1 }
 0x538   :  { %v9067_v17 = vpop.f32.mrf.mxu1 }
 0x53a   :  { %v16766_v63 = vpop.f32.mrf.mxu1 }
 0x53c   :  { %v9070_v23 = vpop.f32.mrf.mxu1 }
 0x53d   :  { %v10938_v23 = vpop.f32.mrf.mxu0 }
 0x54c   :  { %v16774_v60 = vpop.f32.mrf.mxu1 }
 0x54e   :  { %v9075_v8 = vpop.f32.mrf.mxu1 }
 0x54f   :  { %v9747_v18 = vpop.permute.xlu0 %9746  ;;  %v9386_v8 = vpop.f32.mrf.mxu0 }
 0x550   :  { %v16780_v28 = vpop.f32.mrf.mxu1  ;;  %9831 = vst.msk [vmem:[#allocation4 + $0x30] sm:$0xf] %vm9818_vm2, %v9747_v18 }
 0x552   :  { %v9078_v57 = vpop.f32.mrf.mxu1 }
 0x553   :  { %v10939_v57 = vpop.f32.mrf.mxu0 }
 0x554   :  { %v9749_v5 = vpop.permute.xlu1 %9748 }
 0x555   :  { %9832 = vst.msk [vmem:[#allocation4 + $0x34] sm:$0xf] %vm9818_vm2, %v9749_v5 }
 0x558   :  { %v9745_v26 = vpop.permute.xlu1 %9744 }
 0x559   :  { %9830 = vst.msk [vmem:[#allocation4 + $0x2c] sm:$0xf] %vm9818_vm2, %v9745_v26 }
 0x564   :  { %v9081_v11 = vpop.f32.mrf.mxu1 }
 0x565   :  { %v9082_v39 = vadd.f32 %v16598_v4, %v9081_v11  ;;  %v9389_v11 = vpop.f32.mrf.mxu0 }
 0x566   :  { %v9083_v3 = vpop.f32.mrf.mxu1 }
 0x567   :  { %v9371_v22 = vadd.f32 %v9370_v16, %v9082_v39  ;;  %v9751_v2 = vpop.permute.xlu0 %9750 }
 0x568   :  { %v9084_v37 = vpop.f32.mrf.mxu1  ;;  %9833 = vst.msk [vmem:[#allocation4 + $0x38] sm:$0xf] %vm9818_vm2, %v9751_v2 }
 0x569   :  { %v9457_v32 = vmax.f32 %v9371_v22, 0.0  ;;  %v9085_v24 = vadd.f32 %v16598_v4, %v9084_v37 }
 0x56a   :  { %v9086_v54 = vpop.f32.mrf.mxu1 }
 0x56b   :  { %v10685_v43 = vpack.c.bf16 %v9457_v32, %v9457_v32  ;;  %v9374_v6 = vadd.f32 %v9373_v13, %v9085_v24  ;;  %v9753_v34 = vpop.permute.xlu1 %9752  ;;  %v9743_v0 = vpop.permute.xlu0 %9742  ;;  %v9074_v24 = vadd.f32 %v16598_v4, %v16774_v60 }
 0x56c   :  { %9834 = vst.msk [vmem:[#allocation4 + $0x3c] sm:$0xf] %vm9818_vm2, %v9753_v34  ;;  %9829 = vst.msk [vmem:[#allocation4 + $0x28] sm:$0xf] %vm9818_vm2, %v9743_v0  ;;  %v9077_v34 = vadd.f32 %v16598_v4, %v16780_v28 }
 0x56d   :  { %v9458_v33 = vmax.f32 %v9374_v6, 0.0  ;;  %9770 = vrot.lane.b32.xlu0 %v10685_v43, %s11182_s2  ;;  %v9363_v6 = vadd.f32 %v16778_v40, %v9074_v24  ;;  %v9439_v40 = vmax.f32 %v16675_v51, 0.0 }
 0x56e   :  { %v9366_v60 = vadd.f32 %v16786_v38, %v9077_v34  ;;  %v9440_v38 = vmax.f32 %v16680_v35, 0.0 }
 0x56f   :  { %v10686_v31 = vpack.c.bf16 %v9458_v33, %v9458_v33  ;;  %v9741_v62 = vpop.permute.xlu1 %9740  ;;  %v9739_v46 = vpop.permute.xlu0 %9738 }
 0x570   :  { %9828 = vst.msk [vmem:[#allocation4 + $0x24] sm:$0xf] %vm9818_vm2, %v9741_v62  ;;  %9827 = vst.msk [vmem:[#allocation4 + $0x20] sm:$0xf] %vm9818_vm2, %v9739_v46  ;;  %v9066_v46 = vadd.f32 %v16598_v4, %v16764_v58  ;;  %v10667_v58 = vpack.c.bf16 %v9439_v40, %v9439_v40 }
 0x571   :  { %9772 = vrot.lane.b32.xlu1 %v10686_v31, %s11182_s2 }
 0x572   :  { %v9355_v28 = vadd.f32 %v16783_v53, %v9066_v46 }
 0x57b   :  { %v9089_v19 = vpop.f32.mrf.mxu1 }
 0x57c   :  { %v9090_v49 = vadd.f32 %v16598_v4, %v9089_v19 }
 0x57d   :  { %v9091_v14 = vpop.f32.mrf.mxu1 }
 0x57e   :  { %v9379_v21 = vadd.f32 %v10934_v61, %v9090_v49  ;;  %v9455_v49 = vmax.f32 %v9363_v6, 0.0 }
 0x57f   :  { %v9092_v55 = vpop.f32.mrf.mxu1 }
 0x580   :  { %v9459_v42 = vmax.f32 %v9379_v21, 0.0  ;;  %v9093_v29 = vadd.f32 %v16598_v4, %v9092_v55 }
 0x581   :  { %v9094_v9 = vpop.f32.mrf.mxu1 }
 0x582   :  { %v10687_v1 = vpack.c.bf16 %v9459_v42, %v9459_v42  ;;  %v9382_v56 = vadd.f32 %v10935_v47, %v9093_v29  ;;  %v9069_v42 = vadd.f32 %v16598_v4, %v16766_v63  ;;  %v10683_v29 = vpack.c.bf16 %v9455_v49, %v9455_v49 }
 0x583   :  { %v9456_v9 = vmax.f32 %v9366_v60, 0.0  ;;  %v9437_v63 = vmax.f32 %v16661_v41, 0.0 }
 0x584   :  { %v9460_v20 = vmax.f32 %v9382_v56, 0.0  ;;  %9774 = vrot.lane.b32.xlu0 %v10687_v1, %s11182_s2  ;;  %v9058_v56 = vadd.f32 %v16598_v4, %v16760_v52  ;;  %v9358_v51 = vadd.f32 %v16789_v44, %v9069_v42  ;;  %v9438_v44 = vmax.f32 %v16666_v30, 0.0 }
 0x585   :  { %v10684_v53 = vpack.c.bf16 %v9456_v9, %v9456_v9  ;;  %v10665_v52 = vpack.c.bf16 %v9437_v63, %v9437_v63 }
 0x586   :  { %v10688_v17 = vpack.c.bf16 %v9460_v20, %v9460_v20  ;;  %v9453_v20 = vmax.f32 %v9355_v28, 0.0  ;;  %v11144_v28 = vld [vmem:[#allocation4 + $0x30] sm:$0xff]  }
 0x588   :  { %9776 = vrot.lane.b32.xlu1 %v10688_v17, %s11182_s2  ;;  %v10668_v17 = vpack.c.bf16 %v9440_v38, %v9440_v38  ;;  %v10681_v35 = vpack.c.bf16 %v9453_v20, %v9453_v20  ;;  %v11148_v20 = vld [vmem:[#allocation4 + $0x20] sm:$0xff]  }
 0x594   :  { %v9097_v18 = vpop.f32.mrf.mxu1 }
 0x595   :  { %v9098_v5 = vadd.f32 %v16598_v4, %v9097_v18  ;;  %v9454_v18 = vmax.f32 %v9358_v51, 0.0 }
 0x596   :  { %v9099_v26 = vpop.f32.mrf.mxu1 }
 0x597   :  { %v9387_v61 = vadd.f32 %v9386_v8, %v9098_v5  ;;  %v9061_v8 = vadd.f32 %v16598_v4, %v16762_v10  ;;  %v10682_v26 = vpack.c.bf16 %v9454_v18, %v9454_v18  ;;  %v9435_v10 = vmax.f32 %v16642_v15, 0.0 }
 0x598   :  { %v9100_v16 = vpop.f32.mrf.mxu1  ;;  %v9433_v15 = vmax.f32 %v16647_v36, 0.0  ;;  %v11159_v36 = vld [vmem:[%s16922_s5 + $0x4] ss:$8 sps:$4 sm:$0xff]  }
 0x599   :  { %v9461_v39 = vmax.f32 %v9387_v61, 0.0  ;;  %v9101_v3 = vadd.f32 %v16598_v4, %v9100_v16  ;;  %v9350_v41 = vadd.f32 %v16772_v50, %v9061_v8  ;;  %v9053_v16 = vadd.f32 %v16598_v4, %v16758_v7  ;;  %10049 = vmatprep.mubr.bf16.mxu0 %v11159_v36 }
 0x59a   :  { %v9102_v47 = vpop.f32.mrf.mxu1  ;;  %v9436_v50 = vmax.f32 %v16654_v27, 0.0  ;;  %v9434_v27 = vmax.f32 %v16656_v48, 0.0  ;;  %v9887_v48 = vld [vmem:[%s16923_s6 + $0x8] sm:$0xff] }
 0x59b   :  { %v10689_v22 = vpack.c.bf16 %v9461_v39, %v9461_v39  ;;  %v9390_v2 = vadd.f32 %v9389_v11, %v9101_v3  ;;  %v9452_v11 = vmax.f32 %v9350_v41, 0.0  ;;  %v9342_v3 = vadd.f32 %v16776_v59, %v9053_v16  ;;  %v9853_v41 = vld [vmem:[%s16922_s5 + $0x10] sm:$0x11] }
 0x59c   :  { %v10662_v59 = vpack.c.bf16 %v9434_v27, %v9434_v27 }
 0x59d   :  { %v9462_v37 = vmax.f32 %v9390_v2, 0.0  ;;  %9778 = vrot.lane.b32.xlu0 %v10689_v22, %s11182_s2  ;;  %v10680_v47 = vpack.c.bf16 %v9452_v11, %v9452_v11  ;;  %v10661_v22 = vpack.c.bf16 %v9433_v15, %v9433_v15 }
 0x59f   :  { %v10690_v32 = vpack.c.bf16 %v9462_v37, %v9462_v37 }
 0x5a1   :  { %9780 = vrot.lane.b32.xlu1 %v10690_v32, %s11182_s2  ;;  %v9886_v32 = vld [vmem:[%s16923_s6] sm:$0xff] }
 0x5ae   :  { %v9105_v13 = vpop.f32.mrf.mxu1 }
 0x5af   :  { %v9106_v54 = vadd.f32 %v16598_v4, %v9105_v13  ;;  %v9888_v13 = vld [vmem:[%s16923_s6 + $0x10] sm:$0x1] }
 0x5b0   :  { %v9107_v43 = vpop.f32.mrf.mxu1 }
 0x5b1   :  { %v9395_v0 = vadd.f32 %v10938_v23, %v9106_v54  ;;  %v9347_v23 = vadd.f32 %v16768_v12, %v9058_v56  ;;  %v10666_v12 = vpack.c.bf16 %v9438_v44, %v9438_v44 }
 0x5b2   :  { %v9108_v33 = vpop.f32.mrf.mxu1 }
 0x5b3   :  { %v9463_v31 = vmax.f32 %v9395_v0, 0.0  ;;  %v9109_v62 = vadd.f32 %v16598_v4, %v9108_v33  ;;  %v9451_v5 = vmax.f32 %v9347_v23, 0.0 }
 0x5b4   :  { %v9110_v19 = vpop.f32.mrf.mxu1 }
 0x5b5   :  { %v10691_v14 = vpack.c.bf16 %v9463_v31, %v9463_v31  ;;  %v9398_v21 = vadd.f32 %v10939_v57, %v9109_v62  ;;  %v9050_v57 = vadd.f32 %v16598_v4, %v16756_v25  ;;  %v10679_v30 = vpack.c.bf16 %v9451_v5, %v9451_v5 }
 0x5b6   :  { %v10663_v25 = vpack.c.bf16 %v9435_v10, %v9435_v10  ;;  %v10664_v4 = vpack.c.bf16 %v9436_v50, %v9436_v50  ;;  %v11157_v10 = vld [vmem:[%s16922_s5] ss:$8 sps:$4 sm:$0xff]  }
 0x5b7   :  { %v9464_v55 = vmax.f32 %v9398_v21, 0.0  ;;  %9782 = vrot.lane.b32.xlu0 %v10691_v14, %s11182_s2  ;;  %v9339_v61 = vadd.f32 %v16770_v45, %v9050_v57  ;;  %v9450_v45 = vmax.f32 %v9342_v3, 0.0  ;;  %v11142_v14 = vld [vmem:[#allocation4 + $0x38] sm:$0xff]  }
 0x5b9   :  { %v10692_v1 = vpack.c.bf16 %v9464_v55, %v9464_v55  ;;  %v9449_v39 = vmax.f32 %v9339_v61, 0.0  ;;  %v10678_v2 = vpack.c.bf16 %v9450_v45, %v9450_v45  ;;  %v10547_v61 = vcombine.low %v9853_v41, %v9853_v41 }
 0x5bb   :  { %9784 = vrot.lane.b32.xlu1 %v10692_v1, %s11182_s2  ;;  %9766 = vrot.lane.b32.xlu0 %v10683_v29, %s11182_s2  ;;  %v10677_v7 = vpack.c.bf16 %v9449_v39, %v9449_v39  ;;  %v11146_v1 = vld [vmem:[#allocation4 + $0x28] sm:$0xff]  }
 0x5bf   :  { %9768 = vrot.lane.b32.xlu1 %v10684_v53, %s11182_s2  ;;  %9734 = vrot.lane.b32.xlu0 %v10667_v58, %s11182_s2 }
 0x5c3   :  { %9736 = vrot.lane.b32.xlu1 %v10668_v17, %s11182_s2  ;;  %9762 = vrot.lane.b32.xlu0 %v10681_v35, %s11182_s2 }
 0x5c7   :  { %9764 = vrot.lane.b32.xlu1 %v10682_v26, %s11182_s2  ;;  %9730 = vrot.lane.b32.xlu0 %v10665_v52, %s11182_s2 }
 0x5cb   :  { %9732 = vrot.lane.b32.xlu1 %v10666_v12, %s11182_s2  ;;  %9758 = vrot.lane.b32.xlu0 %v10679_v30, %s11182_s2  ;;  %v10548_v12 = vcombine.high %v9853_v41, %v9853_v41 }
 0x5cf   :  { %9760 = vrot.lane.b32.xlu1 %v10680_v47, %s11182_s2  ;;  %9726 = vrot.lane.b32.xlu0 %v10663_v25, %s11182_s2 }
 0x5d3   :  { %9728 = vrot.lane.b32.xlu1 %v10664_v4, %s11182_s2  ;;  %9754 = vrot.lane.b32.xlu0 %v10677_v7, %s11182_s2 }
 0x5d7   :  { %9756 = vrot.lane.b32.xlu1 %v10678_v2, %s11182_s2  ;;  %9722 = vrot.lane.b32.xlu0 %v10661_v22, %s11182_s2 }
 0x5db   :  { %9724 = vrot.lane.b32.xlu1 %v10662_v59, %s11182_s2  ;;  %9891 = vperm.xlu0 %10978, %v9886_v32  }
 0x5df   :  { %v9771_v37 = vpop.permute.xlu0 %9770  ;;  %9896 = vperm.xlu1 %10979, %v9887_v48  }
 0x5e0   :  { %9843 = vst.msk [vmem:[#allocation4 + $0x60] sm:$0xf] %vm9818_vm2, %v9771_v37 }
 0x5e3   :  { %v9773_v24 = vpop.permute.xlu1 %9772  ;;  %9901 = vperm.xlu1 %10979, %v9888_v13  }
 0x5e4   :  { %9844 = vst.msk [vmem:[#allocation4 + $0x64] sm:$0xf] %vm9818_vm2, %v9773_v24 }
 0x5eb   :  { %v11147_v58 = vld [vmem:[#allocation4 + $0x60] sm:$0xff]  }
 0x5f6   :  { %v9775_v54 = vpop.permute.xlu0 %9774 }
 0x5f7   :  { %9845 = vst.msk [vmem:[#allocation4 + $0x68] sm:$0xf] %vm9818_vm2, %v9775_v54 }
 0x5fa   :  { %v9777_v43 = vpop.permute.xlu1 %9776 }
 0x5fb   :  { %9846 = vst.msk [vmem:[#allocation4 + $0x6c] sm:$0xf] %vm9818_vm2, %v9777_v43 }
 0x602   :  { %v11145_v42 = vld [vmem:[#allocation4 + $0x68] sm:$0xff]  }
 0x60f   :  { %v9779_v6 = vpop.permute.xlu0 %9778 }
 0x610   :  { %9847 = vst.msk [vmem:[#allocation4 + $0x70] sm:$0xf] %vm9818_vm2, %v9779_v6 }
 0x613   :  { %v9781_v34 = vpop.permute.xlu1 %9780 }
 0x614   :  { %9848 = vst.msk [vmem:[#allocation4 + $0x74] sm:$0xf] %vm9818_vm2, %v9781_v34 }
 0x61b   :  { %v11143_v21 = vld [vmem:[#allocation4 + $0x70] sm:$0xff]  }
 0x629   :  { %v9783_v0 = vpop.permute.xlu0 %9782 }
 0x62a   :  { %9849 = vst.msk [vmem:[#allocation4 + $0x78] sm:$0xf] %vm9818_vm2, %v9783_v0 }
 0x62d   :  { %v9785_v33 = vpop.permute.xlu1 %9784  ;;  %v9767_v31 = vpop.permute.xlu0 %9766 }
 0x62e   :  { %9850 = vst.msk [vmem:[#allocation4 + $0x7c] sm:$0xf] %vm9818_vm2, %v9785_v33  ;;  %9841 = vst.msk [vmem:[#allocation4 + $0x58] sm:$0xf] %vm9818_vm2, %v9767_v31 }
 0x631   :  { %v9769_v62 = vpop.permute.xlu1 %9768  ;;  %v9735_v46 = vpop.permute.xlu0 %9734 }
 0x632   :  { %9842 = vst.msk [vmem:[#allocation4 + $0x5c] sm:$0xf] %vm9818_vm2, %v9769_v62  ;;  %9825 = vst.msk [vmem:[#allocation4 + $0x18] sm:$0xf] %vm9818_vm2, %v9735_v46 }
 0x635   :  { %v9737_v19 = vpop.permute.xlu1 %9736  ;;  %v9763_v49 = vpop.permute.xlu0 %9762  ;;  %v11141_v60 = vld [vmem:[#allocation4 + $0x78] sm:$0xff]  }
 0x636   :  { %9826 = vst.msk [vmem:[#allocation4 + $0x1c] sm:$0xf] %vm9818_vm2, %v9737_v19  ;;  %9839 = vst.msk [vmem:[#allocation4 + $0x50] sm:$0xf] %vm9818_vm2, %v9763_v49  ;;  %10766 = vmatprep.subr.bf16.mxu0 %v11141_v60 }
 0x637   :  { %10767 = vmatpush3.bf16.msra.mxu0 %v11142_v14 }
 0x638   :  { %10768 = vmatprep.subr.bf16.mxu0 %v11143_v21 }
 0x639   :  { %v9765_v55 = vpop.permute.xlu1 %9764  ;;  %v9731_v40 = vpop.permute.xlu0 %9730  ;;  %v11149_v51 = vld [vmem:[#allocation4 + $0x58] sm:$0xff]  }
 0x63a   :  { %9840 = vst.msk [vmem:[#allocation4 + $0x54] sm:$0xf] %vm9818_vm2, %v9765_v55  ;;  %9823 = vst.msk [vmem:[#allocation4 + $0x10] sm:$0xf] %vm9818_vm2, %v9731_v40 }
 0x63b   :  { %10769 = vmatpush3.bf16.msra.mxu0 %v11144_v28 }
 0x63c   :  { %10770 = vmatprep.subr.bf16.mxu0 %v11145_v42 }
 0x63d   :  { %v9733_v29 = vpop.permute.xlu1 %9732  ;;  %v9759_v9 = vpop.permute.xlu0 %9758  ;;  %v11150_v17 = vld [vmem:[#allocation4 + $0x18] sm:$0xff]  }
 0x63e   :  { %9824 = vst.msk [vmem:[#allocation4 + $0x14] sm:$0xf] %vm9818_vm2, %v9733_v29  ;;  %9837 = vst.msk [vmem:[#allocation4 + $0x48] sm:$0xf] %vm9818_vm2, %v9759_v9 }
 0x63f   :  { %10771 = vmatpush3.bf16.msra.mxu0 %v11146_v1 }
 0x640   :  { %10772 = vmatprep.subr.bf16.mxu0 %v11147_v58 }
 0x641   :  { %v9761_v38 = vpop.permute.xlu1 %9760  ;;  %v9727_v56 = vpop.permute.xlu0 %9726  ;;  %v11151_v23 = vld [vmem:[#allocation4 + $0x50] sm:$0xff]  }
 0x642   :  { %9838 = vst.msk [vmem:[#allocation4 + $0x4c] sm:$0xf] %vm9818_vm2, %v9761_v38  ;;  %9821 = vst.msk [vmem:[#allocation4 + $0x8] sm:$0xf] %vm9818_vm2, %v9727_v56 }
 0x643   :  { %10773 = vmatpush3.bf16.msra.mxu0 %v11148_v20 }
 0x644   :  { %10774 = vmatprep.subr.bf16.mxu0 %v11149_v51 }
 0x645   :  { %v9729_v53 = vpop.permute.xlu1 %9728  ;;  %v9755_v63 = vpop.permute.xlu0 %9754  ;;  %v11152_v18 = vld [vmem:[#allocation4 + $0x10] sm:$0xff]  }
 0x646   :  { %9822 = vst.msk [vmem:[#allocation4 + $0xc] sm:$0xf] %vm9818_vm2, %v9729_v53  ;;  %9835 = vst.msk [vmem:[#allocation4 + $0x40] sm:$0xf] %vm9818_vm2, %v9755_v63 }
 0x647   :  { %10775 = vmatpush3.bf16.msra.mxu0 %v11150_v17 }
 0x648   :  { %10776 = vmatprep.subr.bf16.mxu0 %v11151_v23 }
 0x649   :  { %v9757_v8 = vpop.permute.xlu1 %9756  ;;  %v9723_v35 = vpop.permute.xlu0 %9722  ;;  %v11153_v52 = vld [vmem:[#allocation4 + $0x48] sm:$0xff]  }
 0x64a   :  { %9836 = vst.msk [vmem:[#allocation4 + $0x44] sm:$0xf] %vm9818_vm2, %v9757_v8  ;;  %9819 = vst.msk [vmem:[#allocation4] sm:$0xf] %vm9818_vm2, %v9723_v35 }
 0x64b   :  { %10777 = vmatpush3.bf16.msra.mxu0 %v11152_v18 }
 0x64c   :  { %10778 = vmatprep.subr.bf16.mxu0 %v11153_v52 }
 0x64d   :  { %v9725_v44 = vpop.permute.xlu1 %9724  ;;  %v11154_v57 = vld [vmem:[#allocation4 + $0x8] sm:$0xff]  }
 0x64e   :  { %9820 = vst.msk [vmem:[#allocation4 + $0x4] sm:$0xf] %vm9818_vm2, %v9725_v44 }
 0x64f   :  { %10779 = vmatpush3.bf16.msra.mxu0 %v11154_v57 }
 0x651   :  { %v11155_v5 = vld [vmem:[#allocation4 + $0x40] sm:$0xff]  }
 0x652   :  { %10780 = vmatprep.subr.bf16.mxu0 %v11155_v5 }
 0x655   :  { %v11156_v26 = vld [vmem:[#allocation4] sm:$0xff]  }
 0x656   :  { %10781 = vmatpush3.bf16.msra.mxu0 %v11156_v26  ;;  %v9892_v50 = vpop.permute.xlu0 %9891 }
 0x659   :  { %10050 = vmatmul.mubr.bf16.vlgmr.msra.gmra.mxu0 %v11157_v10 }
 0x65a   :  { %10057 = vmatprep.mubr.bf16.mxu0 %v10548_v12  ;;  %v9897_v3 = vpop.permute.xlu1 %9896 }
 0x65e   :  { %v9902_v36 = vpop.permute.xlu1 %9901 }
 0x661   :  { %10058 = vmatmul.mubr.bf16.gmra.mxu0 %v10547_v61 }
 0x719   :  { %v10782_v16 = vpop.f32.mrf.mxu0 }
 0x71b   :  { %v10783_v30 = vpop.f32.mrf.mxu0 }
 0x71c   :  { %v10784_v11 = vadd.f32 %v10783_v30, %v10782_v16 }
 0x71d   :  { %v10785_v25 = vpop.f32.mrf.mxu0 }
 0x71e   :  { %v10052_v15 = vadd.f32 %v10784_v11, %v9892_v50 }
 0x71f   :  { %v10786_v39 = vpop.f32.mrf.mxu0 }
 0x720   :  { %v10787_v47 = vadd.f32 %v10786_v39, %v10785_v25  ;;  %v10066_v27 = vsel %vm10065_vm6, %v10052_v15, -inf }
 0x721   :  { %v10788_v4 = vpop.f32.mrf.mxu0 }
 0x722   :  { %v10055_v7 = vadd.f32 %v10787_v47, %v9897_v3 }
 0x723   :  { %v10789_v45 = vpop.f32.mrf.mxu0 }
 0x724   :  { %v10067_v22 = vsel %vm10065_vm6, %v10055_v7, -inf  ;;  %v10790_v2 = vadd.f32 %v10789_v45, %v10788_v4 }
 0x725   :  { %v10068_v59 = vmax.f32 %v10066_v27, %v10067_v22  ;;  %v10791_v37 = vpop.f32.mrf.mxu0 }
 0x726   :  { %v10060_v48 = vadd.f32 %v10790_v2, %v9902_v36 }
 0x727   :  { %v10069_v32 = vrot.slane %v10068_v59, 4  ;;  %v10792_v24 = vpop.f32.mrf.mxu0 }
 0x728   :  { %11162 = vtanh.f32 %v10060_v48 }
 0x729   :  { %v10070_v13 = vmax.f32 %v10068_v59, %v10069_v32 }
 0x72b   :  { %v10071_v54 = vrot.slane %v10070_v13, 2 }
 0x72d   :  { %v10072_v43 = vmax.f32 %v10070_v13, %v10071_v54 }
 0x72f   :  { %v10073_v6 = vrot.slane %v10072_v43, 1 }
 0x731   :  { %v10074_v34 = vmax.f32 %v10072_v43, %v10073_v6 }
 0x733   :  { %v10075_v0 = vsub.f32 %v10052_v15, %v10074_v34  ;;  %v10076_v33 = vsub.f32 %v10055_v7, %v10074_v34 }
 0x735   :  { %v11163_v31 = vpop.eup %11162  ;;  %v10077_v62 = vmul.f32 1.442695, %v10075_v0  ;;  %v10079_v46 = vmul.f32 1.442695, %v10076_v33 }
 0x736   :  { %10097 = vst.msk [vmem:[%s16924_s7 + $0x10] sm:$0x1] %vm10096_vm7, %v11163_v31 }
 0x737   :  { %11164 = vpow2.f32 %v10077_v62 }
 0x738   :  { %11166 = vpow2.f32 %v10079_v46 }
 0x744   :  { %v11165_v19 = vpop.eup %11164 }
 0x745   :  { %v11167_v49 = vpop.eup %11166  ;;  %v10081_v60 = vsel %vm10065_vm6, %v11165_v19, 0.0 }
 0x746   :  { %v10082_v14 = vsel %vm10065_vm6, %v11167_v49, 0.0 }
 0x747   :  { %v10083_v21 = vadd.f32 %v10082_v14, %v10081_v60 }
 0x749   :  { %v10084_v55 = vrot.slane %v10083_v21, 4 }
 0x74b   :  { %v10085_v40 = vadd.f32 %v10084_v55, %v10083_v21 }
 0x74d   :  { %v10086_v28 = vrot.slane %v10085_v40, 2 }
 0x74f   :  { %v10087_v42 = vadd.f32 %v10086_v28, %v10085_v40 }
 0x751   :  { %v10088_v29 = vrot.slane %v10087_v42, 1 }
 0x753   :  { %v10089_v9 = vadd.f32 %v10088_v29, %v10087_v42 }
 0x755   :  { %11168 = vrcp.f32 %v10089_v9 }
 0x762   :  { %v11169_v1 = vpop.eup %11168 }
 0x763   :  { %v10091_v58 = vmul.f32 %v11169_v1, %v11165_v19  ;;  %v10092_v38 = vmul.f32 %v11169_v1, %v11167_v49 }
 0x765   :  { %10093 = vst.msk [vmem:[%s16924_s7] sm:$0xff] %vm10065_vm6, %v10091_v58  ;;  %10094 = vst.msk [vmem:[%s16924_s7 + $0x8] sm:$0xff] %vm10065_vm6, %v10092_v38 }

</bundles_post_ra>
